<compile_context>
chip_gen: v7x
topology: tpu7x:2x2x1
jax: 0.10.0
libtpu: 0.0.40
codegen_flags: <defaults>
</compile_context>

<pallas_src>
import functools

import jax
import jax.numpy as jnp
from jax import lax
from jax.experimental import pallas as pl
from jax.experimental.pallas import tpu as pltpu

KH = 9            # conv kernel height (kernel width is 1)
STRIDE_H = 2
PAD_H = 4
CHANNELS = (1, 64, 128, 256, 512)
C0P = 128         # layer-0 output channels zero-padded 64 -> 128 (lane alignment)
BN_EPS = 1e-5


def _conv_out_h(h):
    return (h + 2 * PAD_H - KH) // STRIDE_H + 1


def _pick_tile_b(batch, width):
    """Smallest batch tile dividing `batch` whose column count (tile_b*W) is
    lane-aligned (%128) and sublane-aligned (%8); fall back to the whole batch
    (full-extent blocks are always legal).  For large problems tile_b can be
    raised toward the per-generation VMEM budget (64 MiB on v7x, 128 on v5e/v6e)."""
    for tb in range(8, batch, 8):
        if batch % tb == 0 and (tb * width) % 128 == 0:
            return tb
    return batch


def _cnn_kernel(x_ref,                       # [n_tile, H+8]      bf16 (col-major, pre-padded)
                w0_ref, b0_ref,              # [9, 128]   bf16 / [1, 128] f32
                w1_ref, b1_ref,              # [1152, 128]     / [1, 128]
                w2_ref, b2_ref,              # [1152, 256]     / [1, 256]
                w3_ref, b3_ref,              # [2304, 512]     / [1, 512]
                wfc_ref, bfc_ref,            # [512, W*cat] bf16 / [1, 1, cat] f32
                out_ref,                     # [tile_b, 1, cat] f32
                s1_ref, s2_ref, s3_ref,      # pre-padded bf16 activation scratch
                *, tile_b, W, H):
    n = tile_b * W                           # columns in this tile, ordered (b, w)
    H1 = _conv_out_h(H)
    H2 = _conv_out_h(H1)
    H3 = _conv_out_h(H2)
    H4 = _conv_out_h(H3)

    def parity_taps(ap, h_out):
        # ap: [h_in + 8, n, c] padded activation, height leading.  Tap kh of the
        # stride-2 conv reads padded row 2*h + kh -> parity kh % 2, offset kh // 2.
        hp = ap.shape[0]
        ar = ap.reshape((hp // 2, 2) + ap.shape[1:])
        even, odd = ar[:, 0], ar[:, 1]
        return [(even if kh % 2 == 0 else odd)[kh // 2: kh // 2 + h_out]
                for kh in range(KH)]

    def store_padded(s_ref, y, h_out, c):
        # Write the conv output into rows PAD_H..PAD_H+h_out of its pre-padded
        # scratch and (re)zero the edge rows (cheap: 8 rows), so the next layer
        # reads its zero padding for free instead of a full padded copy.
        s_ref[pl.ds(0, PAD_H)] = jnp.zeros((PAD_H, n, c), jnp.bfloat16)
        s_ref[pl.ds(PAD_H + h_out, PAD_H)] = jnp.zeros((PAD_H, n, c), jnp.bfloat16)
        s_ref[pl.ds(PAD_H, h_out)] = y.astype(jnp.bfloat16).reshape(h_out, n, c)

    # ---- layer 0 (C_in = 1): in-kernel im2col from lane slices of the
    #      column-major input, one MXU matmul (output channels padded to 128).
    xc = x_ref[...]                                          # [n, H + 8]
    col0 = jnp.concatenate(
        [xc[:, STRIDE_H * h1: STRIDE_H * h1 + KH] for h1 in range(H1)], axis=0)
    y = jnp.dot(col0, w0_ref[...], preferred_element_type=jnp.float32)  # [H1*n, 128]
    y = jnp.maximum(y + b0_ref[...], 0.0)
    store_padded(s1_ref, y, H1, C0P)

    # ---- layer 1: fused im2col (taps sit on 128-lane boundaries) -> one K=1152 matmul.
    col1 = jnp.concatenate(parity_taps(s1_ref[...], H2), axis=-1)   # [H2, n, 9*128]
    y = jnp.dot(col1.reshape(H2 * n, KH * C0P), w1_ref[...],
                preferred_element_type=jnp.float32)
    y = jnp.maximum(y + b1_ref[...], 0.0)
    store_padded(s2_ref, y, H2, CHANNELS[2])

    # ---- layers 2 & 3: per-tap accumulation (K = 128 / 256 fills the MXU depth,
    #      no 9x col materialization for the dominant layers).
    def conv_per_tap(ap, w_ref, h_out):
        c_in = ap.shape[-1]
        c_out = w_ref.shape[-1]
        acc = jnp.zeros((h_out * n, c_out), jnp.float32)
        for kh, tap in enumerate(parity_taps(ap, h_out)):
            acc += jnp.dot(tap.reshape(h_out * n, c_in),
                           w_ref[pl.ds(kh * c_in, c_in), :],
                           preferred_element_type=jnp.float32)
        return acc

    y = conv_per_tap(s2_ref[...], w2_ref, H3)
    y = jnp.maximum(y + b2_ref[...], 0.0)
    store_padded(s3_ref, y, H3, CHANNELS[3])

    y = conv_per_tap(s3_ref[...], w3_ref, H4)
    y = jnp.maximum(y + b3_ref[...], 0.0)                    # [H4*n, 512] f32

    # ---- AdaptiveAvgPool2d((1, W)): mean over the remaining height axis.
    pooled = jnp.mean(y.reshape(H4, n, CHANNELS[4]), axis=0)  # [n, 512] f32
    pooled = pooled.astype(jnp.bfloat16)

    # ---- fc: ONE [n, 512] x [512, W*cat] matmul against the pre-expanded fc
    #      weight, then pick the matching (w, w) diagonal blocks and reduce.
    cat = bfc_ref.shape[-1]
    p = jnp.dot(pooled, wfc_ref[...], preferred_element_type=jnp.float32)  # [n, W*cat]
    pr = p.reshape(tile_b, W, W * cat)
    acc = jnp.zeros((tile_b, 1, cat), jnp.float32)
    for w in range(W):
        acc = acc + pr[:, w:w + 1, w * cat:(w + 1) * cat]
    out_ref[...] = acc + bfc_ref[...]


def cnn_forward(x, kparams):
    """x: [B, 1, H, W] (NCHW, like the PyTorch module). Returns [B, category]."""
    B, C, H, W = x.shape
    assert C == 1, "Conv2d(1, 64, ...): input must have a single channel"
    assert H % 16 == 0, "height must stay even through the four stride-2 convs"
    H1, H2 = _conv_out_h(H), _conv_out_h(_conv_out_h(H))
    H3 = _conv_out_h(H2)
    cat = kparams["bfc"].shape[-1]

    tile_b = _pick_tile_b(B, W)
    n_tile = tile_b * W
    grid = (B // tile_b,)

    # Layout plumbing only: column-major [B*W, H+8] bf16 (columns ordered (b, w),
    # height pre-padded).  No gather, no 9x duplication of the input.
    x_cm = jnp.transpose(x[:, 0], (0, 2, 1)).reshape(B * W, H)
    x_cm = jnp.pad(x_cm, ((0, 0), (PAD_H, PAD_H))).astype(jnp.bfloat16)

    const2 = lambda i: (0, 0)
    kernel = pl.pallas_call(
        functools.partial(_cnn_kernel, tile_b=tile_b, W=W, H=H),
        out_shape=jax.ShapeDtypeStruct((B, 1, cat), jnp.float32),
        grid=grid,
        in_specs=[
            pl.BlockSpec((n_tile, H + 2 * PAD_H), lambda i: (i, 0)),
            pl.BlockSpec(kparams["w0"].shape, const2),
            pl.BlockSpec(kparams["b0"].shape, const2),
            pl.BlockSpec(kparams["w1"].shape, const2),
            pl.BlockSpec(kparams["b1"].shape, const2),
            pl.BlockSpec(kparams["w2"].shape, const2),
            pl.BlockSpec(kparams["b2"].shape, const2),
            pl.BlockSpec(kparams["w3"].shape, const2),
            pl.BlockSpec(kparams["b3"].shape, const2),
            pl.BlockSpec(kparams["wfc"].shape, const2),
            pl.BlockSpec(kparams["bfc"].shape, lambda i: (0, 0, 0)),
        ],
        out_specs=pl.BlockSpec((tile_b, 1, cat), lambda i: (i, 0, 0)),
        scratch_shapes=[
            pltpu.VMEM((H1 + 2 * PAD_H, n_tile, C0P), jnp.bfloat16),
            pltpu.VMEM((H2 + 2 * PAD_H, n_tile, CHANNELS[2]), jnp.bfloat16),
            pltpu.VMEM((H3 + 2 * PAD_H, n_tile, CHANNELS[3]), jnp.bfloat16),
        ],
        compiler_params=pltpu.CompilerParams(
            dimension_semantics=("parallel",),          # megacore split on v7x
            vmem_limit_bytes=32 * 1024 * 1024,          # tiles sized well below v7x's 64 MiB
        ),
    )
    out = kernel(x_cm,
                 kparams["w0"], kparams["b0"],
                 kparams["w1"], kparams["b1"],
                 kparams["w2"], kparams["b2"],
                 kparams["w3"], kparams["b3"],
                 kparams["wfc"], kparams["bfc"])
    return out.reshape(B, cat)


def init_params(key, category, w_dim):
    """Deterministic init with PyTorch-native layouts:
       conv: [C_out, C_in, 9, 1] + bias, BN: gamma/beta/running_mean/var,
       fc: [category, 512*w_dim] + bias."""
    params = {}
    keys = jax.random.split(key, 26)
    i = 0

    def u(shape, lo, hi):
        nonlocal i
        out = jax.random.uniform(keys[i], shape, jnp.float32, lo, hi)
        i += 1
        return out

    for l in range(4):
        cin, cout = CHANNELS[l], CHANNELS[l + 1]
        k = 1.0 / ((cin * KH) ** 0.5)
        params[f"conv{l}_w"] = u((cout, cin, KH, 1), -k, k)
        params[f"conv{l}_b"] = u((cout,), -k, k)
        params[f"bn{l}_g"] = u((cout,), 0.5, 1.5)
        params[f"bn{l}_b"] = u((cout,), -0.5, 0.5)
        params[f"bn{l}_m"] = u((cout,), -0.5, 0.5)
        params[f"bn{l}_v"] = u((cout,), 0.5, 1.5)
    k = 1.0 / ((CHANNELS[-1] * w_dim) ** 0.5)
    params["fc_w"] = u((category, CHANNELS[-1] * w_dim), -k, k)
    params["fc_b"] = u((category,), -k, k)
    return params


def prepare_kernel_params(params, w_dim):
    """Fold eval-mode BatchNorm into the conv weights/biases, transpose to the
    [K, N] matmul layout (row = kh*C_in + ci), zero-pad layer 0/1 channels to a
    128-lane boundary, expand the fc weight to [512, W*cat], cast weights bf16."""
    kp = {}
    for l in range(4):
        w = params[f"conv{l}_w"][:, :, :, 0]                 # [Cout, Cin, 9]
        cout, cin, _ = w.shape
        s = params[f"bn{l}_g"] / jnp.sqrt(params[f"bn{l}_v"] + BN_EPS)
        wf = w * s[:, None, None]
        bf = (params[f"conv{l}_b"] - params[f"bn{l}_m"]) * s + params[f"bn{l}_b"]
        wf = jnp.transpose(wf, (2, 1, 0))                    # [9, Cin, Cout]
        if l == 0:
            # Pad layer-0 output channels 64 -> 128 (padded channels: weight=0,
            # bias=0 -> ReLU keeps them at 0).
            wf = jnp.pad(wf, ((0, 0), (0, 0), (0, C0P - cout)))
            bf = jnp.pad(bf, (0, C0P - cout))
            cout = C0P
        if l == 1:
            # Matching zero rows for the padded layer-0 input channels.
            wf = jnp.pad(wf, ((0, 0), (0, C0P - cin), (0, 0)))
            cin = C0P
        kp[f"w{l}"] = wf.reshape(KH * cin, cout).astype(jnp.bfloat16)
        kp[f"b{l}"] = bf.reshape(1, cout).astype(jnp.float32)
    # PyTorch flattens pooled [B, 512, 1, W] as feature = c*W + w.  Expand the fc
    # weight to [512, W*cat] so the kernel does a single matmul and then picks
    # the (w, w) diagonal blocks.
    cat = params["fc_w"].shape[0]
    fcw = params["fc_w"].reshape(cat, CHANNELS[-1], w_dim)   # [cat, c, w]
    fcw = jnp.transpose(fcw, (1, 2, 0)).reshape(CHANNELS[-1], w_dim * cat)
    kp["wfc"] = fcw.astype(jnp.bfloat16)
    kp["bfc"] = params["fc_b"].reshape(1, 1, cat).astype(jnp.float32)
    return kp


def reference_forward(x, params):
    """Pure-JAX reference mirroring the PyTorch module (BN in eval mode)."""
    a = x
    for l in range(4):
        a = lax.conv_general_dilated(
            a, params[f"conv{l}_w"],
            window_strides=(STRIDE_H, 1), padding=((PAD_H, PAD_H), (0, 0)),
            dimension_numbers=("NCHW", "OIHW", "NCHW"),
            precision=lax.Precision.HIGHEST)
        a = a + params[f"conv{l}_b"][None, :, None, None]
        mean = params[f"bn{l}_m"][None, :, None, None]
        var = params[f"bn{l}_v"][None, :, None, None]
        g = params[f"bn{l}_g"][None, :, None, None]
        beta = params[f"bn{l}_b"][None, :, None, None]
        a = (a - mean) / jnp.sqrt(var + BN_EPS) * g + beta
        a = jnp.maximum(a, 0.0)
    a = jnp.mean(a, axis=2, keepdims=True)      # AdaptiveAvgPool2d((1, W)), W == train width
    flat = a.reshape(a.shape[0], -1)            # [B, 512*W], feature order (c, w)
    return jnp.dot(flat, params["fc_w"].T,
                   precision=lax.Precision.HIGHEST) + params["fc_b"]


if __name__ == "__main__":
    B, C, H, W = 16, 1, 16, 16     # x: [b, c, h, w]; train_shape[-1] == W == 16
    CATEGORY = 6

    root = jax.random.PRNGKey(0)
    kx, kp_key = jax.random.split(root)
    x = jax.random.normal(kx, (B, C, H, W), jnp.float32)
    params = init_params(kp_key, CATEGORY, W)
    kparams = prepare_kernel_params(params, W)

    out = jax.block_until_ready(cnn_forward(x, kparams))
    ref = reference_forward(x, params)

    assert out.shape == (B, CATEGORY)
    err = float(jnp.max(jnp.abs(out - ref)) / (jnp.max(jnp.abs(ref)) + 1e-6))
    assert err < 0.08, f"mismatch: rel-to-max err {err}"
    print("KERNEL_OK")
</pallas_src>

<mosaic_0001>
module attributes {stable_mosaic.version = 11 : i64} {
  func.func @_cnn_kernel(%arg0: i32, %arg1: memref<128x24xbf16, #tpu.memory_space<vmem>>, %arg2: memref<9x128xbf16, #tpu.memory_space<vmem>>, %arg3: memref<1x128xf32, #tpu.memory_space<vmem>>, %arg4: memref<1152x128xbf16, #tpu.memory_space<vmem>>, %arg5: memref<1x128xf32, #tpu.memory_space<vmem>>, %arg6: memref<1152x256xbf16, #tpu.memory_space<vmem>>, %arg7: memref<1x256xf32, #tpu.memory_space<vmem>>, %arg8: memref<2304x512xbf16, #tpu.memory_space<vmem>>, %arg9: memref<1x512xf32, #tpu.memory_space<vmem>>, %arg10: memref<512x96xbf16, #tpu.memory_space<vmem>>, %arg11: memref<1x1x6xf32, #tpu.memory_space<vmem>>, %arg12: memref<8x1x6xf32, #tpu.memory_space<vmem>>, %arg13: memref<16x128x128xbf16, #tpu.memory_space<vmem>>, %arg14: memref<12x128x128xbf16, #tpu.memory_space<vmem>>, %arg15: memref<10x128x256xbf16, #tpu.memory_space<vmem>>) attributes {dimension_semantics = [#tpu.dimension_semantics<parallel>], iteration_bounds = array<i64: 2>, scalar_prefetch = 0 : i64, scratch_operands = 3 : i64, tpu.core_type = #tpu.core_type<tc>, window_params = [{transform_indices = @transform_0, window_bounds = array<i64: 128, 24>}, {pipeline_mode = #tpu.pipeline_mode<synchronous>, transform_indices = @transform_1, window_bounds = array<i64: 9, 128>}, {pipeline_mode = #tpu.pipeline_mode<synchronous>, transform_indices = @transform_2, window_bounds = array<i64: 1, 128>}, {pipeline_mode = #tpu.pipeline_mode<synchronous>, transform_indices = @transform_3, window_bounds = array<i64: 1152, 128>}, {pipeline_mode = #tpu.pipeline_mode<synchronous>, transform_indices = @transform_4, window_bounds = array<i64: 1, 128>}, {pipeline_mode = #tpu.pipeline_mode<synchronous>, transform_indices = @transform_5, window_bounds = array<i64: 1152, 256>}, {pipeline_mode = #tpu.pipeline_mode<synchronous>, transform_indices = @transform_6, window_bounds = array<i64: 1, 256>}, {pipeline_mode = #tpu.pipeline_mode<synchronous>, transform_indices = @transform_7, window_bounds = array<i64: 2304, 512>}, {pipeline_mode = #tpu.pipeline_mode<synchronous>, transform_indices = @transform_8, window_bounds = array<i64: 1, 512>}, {pipeline_mode = #tpu.pipeline_mode<synchronous>, transform_indices = @transform_9, window_bounds = array<i64: 512, 96>}, {pipeline_mode = #tpu.pipeline_mode<synchronous>, transform_indices = @transform_10, window_bounds = array<i64: 1, 1, 6>}, {transform_indices = @transform_11, window_bounds = array<i64: 8, 1, 6>}]} {
    %c0 = arith.constant 0 : index
    %c0_0 = arith.constant 0 : index
    %0 = vector.load %arg1[%c0, %c0_0] : memref<128x24xbf16, #tpu.memory_space<vmem>>, vector<128x24xbf16>
    %1 = vector.extract_strided_slice %0 {offsets = [0, 0], sizes = [128, 9], strides = [1, 1]} : vector<128x24xbf16> to vector<128x9xbf16>
    %2 = vector.extract_strided_slice %0 {offsets = [0, 2], sizes = [128, 9], strides = [1, 1]} : vector<128x24xbf16> to vector<128x9xbf16>
    %3 = vector.extract_strided_slice %0 {offsets = [0, 4], sizes = [128, 9], strides = [1, 1]} : vector<128x24xbf16> to vector<128x9xbf16>
    %4 = vector.extract_strided_slice %0 {offsets = [0, 6], sizes = [128, 9], strides = [1, 1]} : vector<128x24xbf16> to vector<128x9xbf16>
    %5 = vector.extract_strided_slice %0 {offsets = [0, 8], sizes = [128, 9], strides = [1, 1]} : vector<128x24xbf16> to vector<128x9xbf16>
    %6 = vector.extract_strided_slice %0 {offsets = [0, 10], sizes = [128, 9], strides = [1, 1]} : vector<128x24xbf16> to vector<128x9xbf16>
    %7 = vector.extract_strided_slice %0 {offsets = [0, 12], sizes = [128, 9], strides = [1, 1]} : vector<128x24xbf16> to vector<128x9xbf16>
    %8 = vector.extract_strided_slice %0 {offsets = [0, 14], sizes = [128, 9], strides = [1, 1]} : vector<128x24xbf16> to vector<128x9xbf16>
    %9 = tpu.concatenate %1, %2, %3, %4, %5, %6, %7, %8 in 0 : vector<128x9xbf16>, vector<128x9xbf16>, vector<128x9xbf16>, vector<128x9xbf16>, vector<128x9xbf16>, vector<128x9xbf16>, vector<128x9xbf16>, vector<128x9xbf16> -> vector<1024x9xbf16>
    %c0_1 = arith.constant 0 : index
    %c0_2 = arith.constant 0 : index
    %10 = vector.load %arg2[%c0_1, %c0_2] : memref<9x128xbf16, #tpu.memory_space<vmem>>, vector<9x128xbf16>
    %cst = arith.constant dense<0.000000e+00> : vector<1024x128xf32>
    %11 = tpu.matmul %9, %10, %cst {dimension_numbers = #tpu.dot_dimension_numbers<[1], [0], [0], [1], [0, 0, 1, 1], [], []>} : vector<1024x9xbf16>, vector<9x128xbf16>, vector<1024x128xf32> -> vector<1024x128xf32>
    %c0_3 = arith.constant 0 : index
    %c0_4 = arith.constant 0 : index
    %12 = vector.load %arg3[%c0_3, %c0_4] : memref<1x128xf32, #tpu.memory_space<vmem>>, vector<1x128xf32>
    %13 = vector.broadcast %12 : vector<1x128xf32> to vector<1024x128xf32>
    %14 = arith.addf %11, %13 : vector<1024x128xf32>
    %cst_5 = arith.constant 0.000000e+00 : f32
    %15 = vector.broadcast %cst_5 : f32 to vector<1024x128xf32>
    %16 = arith.maximumf %14, %15 : vector<1024x128xf32>
    %cst_6 = arith.constant 0.000000e+00 : bf16
    %17 = vector.broadcast %cst_6 : bf16 to vector<4x128x128xbf16>
    %c0_7 = arith.constant 0 : index
    %c0_8 = arith.constant 0 : index
    %c0_9 = arith.constant 0 : index
    %18 = vector.load %arg13[%c0_7, %c0_8, %c0_9] : memref<16x128x128xbf16, #tpu.memory_space<vmem>>, vector<4x128x128xbf16>
    tpu.vector_store %arg13[%c0_7, %c0_8, %c0_9], %17 {strides = array<i32>} : memref<16x128x128xbf16, #tpu.memory_space<vmem>>, vector<4x128x128xbf16>,
    %cst_10 = arith.constant 0.000000e+00 : bf16
    %19 = vector.broadcast %cst_10 : bf16 to vector<4x128x128xbf16>
    %c12 = arith.constant 12 : index
    %c0_11 = arith.constant 0 : index
    %c0_12 = arith.constant 0 : index
    %20 = vector.load %arg13[%c12, %c0_11, %c0_12] : memref<16x128x128xbf16, #tpu.memory_space<vmem>>, vector<4x128x128xbf16>
    tpu.vector_store %arg13[%c12, %c0_11, %c0_12], %19 {strides = array<i32>} : memref<16x128x128xbf16, #tpu.memory_space<vmem>>, vector<4x128x128xbf16>,
    %21 = arith.truncf %16 : vector<1024x128xf32> to vector<1024x128xbf16>
    %22 = vector.shape_cast %21 : vector<1024x128xbf16> to vector<8x128x128xbf16>
    %c4 = arith.constant 4 : index
    %c0_13 = arith.constant 0 : index
    %c0_14 = arith.constant 0 : index
    %23 = vector.load %arg13[%c4, %c0_13, %c0_14] : memref<16x128x128xbf16, #tpu.memory_space<vmem>>, vector<8x128x128xbf16>
    tpu.vector_store %arg13[%c4, %c0_13, %c0_14], %22 {strides = array<i32>} : memref<16x128x128xbf16, #tpu.memory_space<vmem>>, vector<8x128x128xbf16>,
    %c0_15 = arith.constant 0 : index
    %c0_16 = arith.constant 0 : index
    %c0_17 = arith.constant 0 : index
    %24 = vector.load %arg13[%c0_15, %c0_16, %c0_17] : memref<16x128x128xbf16, #tpu.memory_space<vmem>>, vector<16x128x128xbf16>
    %25 = vector.shape_cast %24 : vector<16x128x128xbf16> to vector<8x2x128x128xbf16>
    %26 = vector.extract_strided_slice %25 {offsets = [0, 0, 0, 0], sizes = [8, 1, 128, 128], strides = [1, 1, 1, 1]} : vector<8x2x128x128xbf16> to vector<8x1x128x128xbf16>
    %27 = vector.shape_cast %26 : vector<8x1x128x128xbf16> to vector<8x128x128xbf16>
    %28 = vector.extract_strided_slice %25 {offsets = [0, 1, 0, 0], sizes = [8, 1, 128, 128], strides = [1, 1, 1, 1]} : vector<8x2x128x128xbf16> to vector<8x1x128x128xbf16>
    %29 = vector.shape_cast %28 : vector<8x1x128x128xbf16> to vector<8x128x128xbf16>
    %30 = vector.extract_strided_slice %27 {offsets = [0, 0, 0], sizes = [4, 128, 128], strides = [1, 1, 1]} : vector<8x128x128xbf16> to vector<4x128x128xbf16>
    %31 = vector.extract_strided_slice %29 {offsets = [0, 0, 0], sizes = [4, 128, 128], strides = [1, 1, 1]} : vector<8x128x128xbf16> to vector<4x128x128xbf16>
    %32 = vector.extract_strided_slice %27 {offsets = [1, 0, 0], sizes = [4, 128, 128], strides = [1, 1, 1]} : vector<8x128x128xbf16> to vector<4x128x128xbf16>
    %33 = vector.extract_strided_slice %29 {offsets = [1, 0, 0], sizes = [4, 128, 128], strides = [1, 1, 1]} : vector<8x128x128xbf16> to vector<4x128x128xbf16>
    %34 = vector.extract_strided_slice %27 {offsets = [2, 0, 0], sizes = [4, 128, 128], strides = [1, 1, 1]} : vector<8x128x128xbf16> to vector<4x128x128xbf16>
    %35 = vector.extract_strided_slice %29 {offsets = [2, 0, 0], sizes = [4, 128, 128], strides = [1, 1, 1]} : vector<8x128x128xbf16> to vector<4x128x128xbf16>
    %36 = vector.extract_strided_slice %27 {offsets = [3, 0, 0], sizes = [4, 128, 128], strides = [1, 1, 1]} : vector<8x128x128xbf16> to vector<4x128x128xbf16>
    %37 = vector.extract_strided_slice %29 {offsets = [3, 0, 0], sizes = [4, 128, 128], strides = [1, 1, 1]} : vector<8x128x128xbf16> to vector<4x128x128xbf16>
    %38 = vector.extract_strided_slice %27 {offsets = [4, 0, 0], sizes = [4, 128, 128], strides = [1, 1, 1]} : vector<8x128x128xbf16> to vector<4x128x128xbf16>
    %39 = tpu.concatenate %30, %31, %32, %33, %34, %35, %36, %37, %38 in 2 : vector<4x128x128xbf16>, vector<4x128x128xbf16>, vector<4x128x128xbf16>, vector<4x128x128xbf16>, vector<4x128x128xbf16>, vector<4x128x128xbf16>, vector<4x128x128xbf16>, vector<4x128x128xbf16>, vector<4x128x128xbf16> -> vector<4x128x1152xbf16>
    %40 = vector.shape_cast %39 : vector<4x128x1152xbf16> to vector<512x1152xbf16>
    %c0_18 = arith.constant 0 : index
    %c0_19 = arith.constant 0 : index
    %41 = vector.load %arg4[%c0_18, %c0_19] : memref<1152x128xbf16, #tpu.memory_space<vmem>>, vector<1152x128xbf16>
    %cst_20 = arith.constant dense<0.000000e+00> : vector<512x128xf32>
    %42 = tpu.matmul %40, %41, %cst_20 {dimension_numbers = #tpu.dot_dimension_numbers<[1], [0], [0], [1], [0, 0, 1, 1], [], []>} : vector<512x1152xbf16>, vector<1152x128xbf16>, vector<512x128xf32> -> vector<512x128xf32>
    %c0_21 = arith.constant 0 : index
    %c0_22 = arith.constant 0 : index
    %43 = vector.load %arg5[%c0_21, %c0_22] : memref<1x128xf32, #tpu.memory_space<vmem>>, vector<1x128xf32>
    %44 = vector.broadcast %43 : vector<1x128xf32> to vector<512x128xf32>
    %45 = arith.addf %42, %44 : vector<512x128xf32>
    %cst_23 = arith.constant 0.000000e+00 : f32
    %46 = vector.broadcast %cst_23 : f32 to vector<512x128xf32>
    %47 = arith.maximumf %45, %46 : vector<512x128xf32>
    %cst_24 = arith.constant 0.000000e+00 : bf16
    %48 = vector.broadcast %cst_24 : bf16 to vector<4x128x128xbf16>
    %c0_25 = arith.constant 0 : index
    %c0_26 = arith.constant 0 : index
    %c0_27 = arith.constant 0 : index
    %49 = vector.load %arg14[%c0_25, %c0_26, %c0_27] : memref<12x128x128xbf16, #tpu.memory_space<vmem>>, vector<4x128x128xbf16>
    tpu.vector_store %arg14[%c0_25, %c0_26, %c0_27], %48 {strides = array<i32>} : memref<12x128x128xbf16, #tpu.memory_space<vmem>>, vector<4x128x128xbf16>,
    %cst_28 = arith.constant 0.000000e+00 : bf16
    %50 = vector.broadcast %cst_28 : bf16 to vector<4x128x128xbf16>
    %c8 = arith.constant 8 : index
    %c0_29 = arith.constant 0 : index
    %c0_30 = arith.constant 0 : index
    %51 = vector.load %arg14[%c8, %c0_29, %c0_30] : memref<12x128x128xbf16, #tpu.memory_space<vmem>>, vector<4x128x128xbf16>
    tpu.vector_store %arg14[%c8, %c0_29, %c0_30], %50 {strides = array<i32>} : memref<12x128x128xbf16, #tpu.memory_space<vmem>>, vector<4x128x128xbf16>,
    %52 = arith.truncf %47 : vector<512x128xf32> to vector<512x128xbf16>
    %53 = vector.shape_cast %52 : vector<512x128xbf16> to vector<4x128x128xbf16>
    %c4_31 = arith.constant 4 : index
    %c0_32 = arith.constant 0 : index
    %c0_33 = arith.constant 0 : index
    %54 = vector.load %arg14[%c4_31, %c0_32, %c0_33] : memref<12x128x128xbf16, #tpu.memory_space<vmem>>, vector<4x128x128xbf16>
    tpu.vector_store %arg14[%c4_31, %c0_32, %c0_33], %53 {strides = array<i32>} : memref<12x128x128xbf16, #tpu.memory_space<vmem>>, vector<4x128x128xbf16>,
    %c0_34 = arith.constant 0 : index
    %c0_35 = arith.constant 0 : index
    %c0_36 = arith.constant 0 : index
    %55 = vector.load %arg14[%c0_34, %c0_35, %c0_36] : memref<12x128x128xbf16, #tpu.memory_space<vmem>>, vector<12x128x128xbf16>
    %cst_37 = arith.constant 0.000000e+00 : f32
    %56 = vector.broadcast %cst_37 : f32 to vector<256x256xf32>
    %57 = vector.shape_cast %55 : vector<12x128x128xbf16> to vector<6x2x128x128xbf16>
    %58 = vector.extract_strided_slice %57 {offsets = [0, 0, 0, 0], sizes = [6, 1, 128, 128], strides = [1, 1, 1, 1]} : vector<6x2x128x128xbf16> to vector<6x1x128x128xbf16>
    %59 = vector.shape_cast %58 : vector<6x1x128x128xbf16> to vector<6x128x128xbf16>
    %60 = vector.extract_strided_slice %57 {offsets = [0, 1, 0, 0], sizes = [6, 1, 128, 128], strides = [1, 1, 1, 1]} : vector<6x2x128x128xbf16> to vector<6x1x128x128xbf16>
    %61 = vector.shape_cast %60 : vector<6x1x128x128xbf16> to vector<6x128x128xbf16>
    %62 = vector.extract_strided_slice %59 {offsets = [0, 0, 0], sizes = [2, 128, 128], strides = [1, 1, 1]} : vector<6x128x128xbf16> to vector<2x128x128xbf16>
    %63 = vector.extract_strided_slice %61 {offsets = [0, 0, 0], sizes = [2, 128, 128], strides = [1, 1, 1]} : vector<6x128x128xbf16> to vector<2x128x128xbf16>
    %64 = vector.extract_strided_slice %59 {offsets = [1, 0, 0], sizes = [2, 128, 128], strides = [1, 1, 1]} : vector<6x128x128xbf16> to vector<2x128x128xbf16>
    %65 = vector.extract_strided_slice %61 {offsets = [1, 0, 0], sizes = [2, 128, 128], strides = [1, 1, 1]} : vector<6x128x128xbf16> to vector<2x128x128xbf16>
    %66 = vector.extract_strided_slice %59 {offsets = [2, 0, 0], sizes = [2, 128, 128], strides = [1, 1, 1]} : vector<6x128x128xbf16> to vector<2x128x128xbf16>
    %67 = vector.extract_strided_slice %61 {offsets = [2, 0, 0], sizes = [2, 128, 128], strides = [1, 1, 1]} : vector<6x128x128xbf16> to vector<2x128x128xbf16>
    %68 = vector.extract_strided_slice %59 {offsets = [3, 0, 0], sizes = [2, 128, 128], strides = [1, 1, 1]} : vector<6x128x128xbf16> to vector<2x128x128xbf16>
    %69 = vector.extract_strided_slice %61 {offsets = [3, 0, 0], sizes = [2, 128, 128], strides = [1, 1, 1]} : vector<6x128x128xbf16> to vector<2x128x128xbf16>
    %70 = vector.extract_strided_slice %59 {offsets = [4, 0, 0], sizes = [2, 128, 128], strides = [1, 1, 1]} : vector<6x128x128xbf16> to vector<2x128x128xbf16>
    %71 = vector.shape_cast %62 : vector<2x128x128xbf16> to vector<256x128xbf16>
    %c0_38 = arith.constant 0 : index
    %c0_39 = arith.constant 0 : index
    %72 = vector.load %arg6[%c0_38, %c0_39] : memref<1152x256xbf16, #tpu.memory_space<vmem>>, vector<128x256xbf16>
    %cst_40 = arith.constant dense<0.000000e+00> : vector<256x256xf32>
    %73 = tpu.matmul %71, %72, %cst_40 {dimension_numbers = #tpu.dot_dimension_numbers<[1], [0], [0], [1], [0, 0, 1, 1], [], []>} : vector<256x128xbf16>, vector<128x256xbf16>, vector<256x256xf32> -> vector<256x256xf32>
    %74 = arith.addf %56, %73 : vector<256x256xf32>
    %75 = vector.shape_cast %63 : vector<2x128x128xbf16> to vector<256x128xbf16>
    %c128 = arith.constant 128 : index
    %c0_41 = arith.constant 0 : index
    %76 = vector.load %arg6[%c128, %c0_41] : memref<1152x256xbf16, #tpu.memory_space<vmem>>, vector<128x256xbf16>
    %cst_42 = arith.constant dense<0.000000e+00> : vector<256x256xf32>
    %77 = tpu.matmul %75, %76, %cst_42 {dimension_numbers = #tpu.dot_dimension_numbers<[1], [0], [0], [1], [0, 0, 1, 1], [], []>} : vector<256x128xbf16>, vector<128x256xbf16>, vector<256x256xf32> -> vector<256x256xf32>
    %78 = arith.addf %74, %77 : vector<256x256xf32>
    %79 = vector.shape_cast %64 : vector<2x128x128xbf16> to vector<256x128xbf16>
    %c256 = arith.constant 256 : index
    %c0_43 = arith.constant 0 : index
    %80 = vector.load %arg6[%c256, %c0_43] : memref<1152x256xbf16, #tpu.memory_space<vmem>>, vector<128x256xbf16>
    %cst_44 = arith.constant dense<0.000000e+00> : vector<256x256xf32>
    %81 = tpu.matmul %79, %80, %cst_44 {dimension_numbers = #tpu.dot_dimension_numbers<[1], [0], [0], [1], [0, 0, 1, 1], [], []>} : vector<256x128xbf16>, vector<128x256xbf16>, vector<256x256xf32> -> vector<256x256xf32>
    %82 = arith.addf %78, %81 : vector<256x256xf32>
    %83 = vector.shape_cast %65 : vector<2x128x128xbf16> to vector<256x128xbf16>
    %c384 = arith.constant 384 : index
    %c0_45 = arith.constant 0 : index
    %84 = vector.load %arg6[%c384, %c0_45] : memref<1152x256xbf16, #tpu.memory_space<vmem>>, vector<128x256xbf16>
    %cst_46 = arith.constant dense<0.000000e+00> : vector<256x256xf32>
    %85 = tpu.matmul %83, %84, %cst_46 {dimension_numbers = #tpu.dot_dimension_numbers<[1], [0], [0], [1], [0, 0, 1, 1], [], []>} : vector<256x128xbf16>, vector<128x256xbf16>, vector<256x256xf32> -> vector<256x256xf32>
    %86 = arith.addf %82, %85 : vector<256x256xf32>
    %87 = vector.shape_cast %66 : vector<2x128x128xbf16> to vector<256x128xbf16>
    %c512 = arith.constant 512 : index
    %c0_47 = arith.constant 0 : index
    %88 = vector.load %arg6[%c512, %c0_47] : memref<1152x256xbf16, #tpu.memory_space<vmem>>, vector<128x256xbf16>
    %cst_48 = arith.constant dense<0.000000e+00> : vector<256x256xf32>
    %89 = tpu.matmul %87, %88, %cst_48 {dimension_numbers = #tpu.dot_dimension_numbers<[1], [0], [0], [1], [0, 0, 1, 1], [], []>} : vector<256x128xbf16>, vector<128x256xbf16>, vector<256x256xf32> -> vector<256x256xf32>
    %90 = arith.addf %86, %89 : vector<256x256xf32>
    %91 = vector.shape_cast %67 : vector<2x128x128xbf16> to vector<256x128xbf16>
    %c640 = arith.constant 640 : index
    %c0_49 = arith.constant 0 : index
    %92 = vector.load %arg6[%c640, %c0_49] : memref<1152x256xbf16, #tpu.memory_space<vmem>>, vector<128x256xbf16>
    %cst_50 = arith.constant dense<0.000000e+00> : vector<256x256xf32>
    %93 = tpu.matmul %91, %92, %cst_50 {dimension_numbers = #tpu.dot_dimension_numbers<[1], [0], [0], [1], [0, 0, 1, 1], [], []>} : vector<256x128xbf16>, vector<128x256xbf16>, vector<256x256xf32> -> vector<256x256xf32>
    %94 = arith.addf %90, %93 : vector<256x256xf32>
    %95 = vector.shape_cast %68 : vector<2x128x128xbf16> to vector<256x128xbf16>
    %c768 = arith.constant 768 : index
    %c0_51 = arith.constant 0 : index
    %96 = vector.load %arg6[%c768, %c0_51] : memref<1152x256xbf16, #tpu.memory_space<vmem>>, vector<128x256xbf16>
    %cst_52 = arith.constant dense<0.000000e+00> : vector<256x256xf32>
    %97 = tpu.matmul %95, %96, %cst_52 {dimension_numbers = #tpu.dot_dimension_numbers<[1], [0], [0], [1], [0, 0, 1, 1], [], []>} : vector<256x128xbf16>, vector<128x256xbf16>, vector<256x256xf32> -> vector<256x256xf32>
    %98 = arith.addf %94, %97 : vector<256x256xf32>
    %99 = vector.shape_cast %69 : vector<2x128x128xbf16> to vector<256x128xbf16>
    %c896 = arith.constant 896 : index
    %c0_53 = arith.constant 0 : index
    %100 = vector.load %arg6[%c896, %c0_53] : memref<1152x256xbf16, #tpu.memory_space<vmem>>, vector<128x256xbf16>
    %cst_54 = arith.constant dense<0.000000e+00> : vector<256x256xf32>
    %101 = tpu.matmul %99, %100, %cst_54 {dimension_numbers = #tpu.dot_dimension_numbers<[1], [0], [0], [1], [0, 0, 1, 1], [], []>} : vector<256x128xbf16>, vector<128x256xbf16>, vector<256x256xf32> -> vector<256x256xf32>
    %102 = arith.addf %98, %101 : vector<256x256xf32>
    %103 = vector.shape_cast %70 : vector<2x128x128xbf16> to vector<256x128xbf16>
    %c1024 = arith.constant 1024 : index
    %c0_55 = arith.constant 0 : index
    %104 = vector.load %arg6[%c1024, %c0_55] : memref<1152x256xbf16, #tpu.memory_space<vmem>>, vector<128x256xbf16>
    %cst_56 = arith.constant dense<0.000000e+00> : vector<256x256xf32>
    %105 = tpu.matmul %103, %104, %cst_56 {dimension_numbers = #tpu.dot_dimension_numbers<[1], [0], [0], [1], [0, 0, 1, 1], [], []>} : vector<256x128xbf16>, vector<128x256xbf16>, vector<256x256xf32> -> vector<256x256xf32>
    %106 = arith.addf %102, %105 : vector<256x256xf32>
    %c0_57 = arith.constant 0 : index
    %c0_58 = arith.constant 0 : index
    %107 = vector.load %arg7[%c0_57, %c0_58] : memref<1x256xf32, #tpu.memory_space<vmem>>, vector<1x256xf32>
    %108 = vector.broadcast %107 : vector<1x256xf32> to vector<256x256xf32>
    %109 = arith.addf %106, %108 : vector<256x256xf32>
    %cst_59 = arith.constant 0.000000e+00 : f32
    %110 = vector.broadcast %cst_59 : f32 to vector<256x256xf32>
    %111 = arith.maximumf %109, %110 : vector<256x256xf32>
    %cst_60 = arith.constant 0.000000e+00 : bf16
    %112 = vector.broadcast %cst_60 : bf16 to vector<4x128x256xbf16>
    %c0_61 = arith.constant 0 : index
    %c0_62 = arith.constant 0 : index
    %c0_63 = arith.constant 0 : index
    %113 = vector.load %arg15[%c0_61, %c0_62, %c0_63] : memref<10x128x256xbf16, #tpu.memory_space<vmem>>, vector<4x128x256xbf16>
    tpu.vector_store %arg15[%c0_61, %c0_62, %c0_63], %112 {strides = array<i32>} : memref<10x128x256xbf16, #tpu.memory_space<vmem>>, vector<4x128x256xbf16>,
    %cst_64 = arith.constant 0.000000e+00 : bf16
    %114 = vector.broadcast %cst_64 : bf16 to vector<4x128x256xbf16>
    %c6 = arith.constant 6 : index
    %c0_65 = arith.constant 0 : index
    %c0_66 = arith.constant 0 : index
    %115 = vector.load %arg15[%c6, %c0_65, %c0_66] : memref<10x128x256xbf16, #tpu.memory_space<vmem>>, vector<4x128x256xbf16>
    tpu.vector_store %arg15[%c6, %c0_65, %c0_66], %114 {strides = array<i32>} : memref<10x128x256xbf16, #tpu.memory_space<vmem>>, vector<4x128x256xbf16>,
    %116 = arith.truncf %111 : vector<256x256xf32> to vector<256x256xbf16>
    %117 = vector.shape_cast %116 : vector<256x256xbf16> to vector<2x128x256xbf16>
    %c4_67 = arith.constant 4 : index
    %c0_68 = arith.constant 0 : index
    %c0_69 = arith.constant 0 : index
    %118 = vector.load %arg15[%c4_67, %c0_68, %c0_69] : memref<10x128x256xbf16, #tpu.memory_space<vmem>>, vector<2x128x256xbf16>
    tpu.vector_store %arg15[%c4_67, %c0_68, %c0_69], %117 {strides = array<i32>} : memref<10x128x256xbf16, #tpu.memory_space<vmem>>, vector<2x128x256xbf16>,
    %c0_70 = arith.constant 0 : index
    %c0_71 = arith.constant 0 : index
    %c0_72 = arith.constant 0 : index
    %119 = vector.load %arg15[%c0_70, %c0_71, %c0_72] : memref<10x128x256xbf16, #tpu.memory_space<vmem>>, vector<10x128x256xbf16>
    %cst_73 = arith.constant 0.000000e+00 : f32
    %120 = vector.broadcast %cst_73 : f32 to vector<128x512xf32>
    %121 = vector.shape_cast %119 : vector<10x128x256xbf16> to vector<5x2x128x256xbf16>
    %122 = vector.extract_strided_slice %121 {offsets = [0, 0, 0, 0], sizes = [5, 1, 128, 256], strides = [1, 1, 1, 1]} : vector<5x2x128x256xbf16> to vector<5x1x128x256xbf16>
    %123 = vector.shape_cast %122 : vector<5x1x128x256xbf16> to vector<5x128x256xbf16>
    %124 = vector.extract_strided_slice %121 {offsets = [0, 1, 0, 0], sizes = [5, 1, 128, 256], strides = [1, 1, 1, 1]} : vector<5x2x128x256xbf16> to vector<5x1x128x256xbf16>
    %125 = vector.shape_cast %124 : vector<5x1x128x256xbf16> to vector<5x128x256xbf16>
    %126 = vector.extract_strided_slice %123 {offsets = [0, 0, 0], sizes = [1, 128, 256], strides = [1, 1, 1]} : vector<5x128x256xbf16> to vector<1x128x256xbf16>
    %127 = vector.extract_strided_slice %125 {offsets = [0, 0, 0], sizes = [1, 128, 256], strides = [1, 1, 1]} : vector<5x128x256xbf16> to vector<1x128x256xbf16>
    %128 = vector.extract_strided_slice %123 {offsets = [1, 0, 0], sizes = [1, 128, 256], strides = [1, 1, 1]} : vector<5x128x256xbf16> to vector<1x128x256xbf16>
    %129 = vector.extract_strided_slice %125 {offsets = [1, 0, 0], sizes = [1, 128, 256], strides = [1, 1, 1]} : vector<5x128x256xbf16> to vector<1x128x256xbf16>
    %130 = vector.extract_strided_slice %123 {offsets = [2, 0, 0], sizes = [1, 128, 256], strides = [1, 1, 1]} : vector<5x128x256xbf16> to vector<1x128x256xbf16>
    %131 = vector.extract_strided_slice %125 {offsets = [2, 0, 0], sizes = [1, 128, 256], strides = [1, 1, 1]} : vector<5x128x256xbf16> to vector<1x128x256xbf16>
    %132 = vector.extract_strided_slice %123 {offsets = [3, 0, 0], sizes = [1, 128, 256], strides = [1, 1, 1]} : vector<5x128x256xbf16> to vector<1x128x256xbf16>
    %133 = vector.extract_strided_slice %125 {offsets = [3, 0, 0], sizes = [1, 128, 256], strides = [1, 1, 1]} : vector<5x128x256xbf16> to vector<1x128x256xbf16>
    %134 = vector.extract_strided_slice %123 {offsets = [4, 0, 0], sizes = [1, 128, 256], strides = [1, 1, 1]} : vector<5x128x256xbf16> to vector<1x128x256xbf16>
    %135 = vector.shape_cast %126 : vector<1x128x256xbf16> to vector<128x256xbf16>
    %c0_74 = arith.constant 0 : index
    %c0_75 = arith.constant 0 : index
    %136 = vector.load %arg8[%c0_74, %c0_75] : memref<2304x512xbf16, #tpu.memory_space<vmem>>, vector<256x512xbf16>
    %cst_76 = arith.constant dense<0.000000e+00> : vector<128x512xf32>
    %137 = tpu.matmul %135, %136, %cst_76 {dimension_numbers = #tpu.dot_dimension_numbers<[1], [0], [0], [1], [0, 0, 1, 1], [], []>} : vector<128x256xbf16>, vector<256x512xbf16>, vector<128x512xf32> -> vector<128x512xf32>
    %138 = arith.addf %120, %137 : vector<128x512xf32>
    %139 = vector.shape_cast %127 : vector<1x128x256xbf16> to vector<128x256xbf16>
    %c256_77 = arith.constant 256 : index
    %c0_78 = arith.constant 0 : index
    %140 = vector.load %arg8[%c256_77, %c0_78] : memref<2304x512xbf16, #tpu.memory_space<vmem>>, vector<256x512xbf16>
    %cst_79 = arith.constant dense<0.000000e+00> : vector<128x512xf32>
    %141 = tpu.matmul %139, %140, %cst_79 {dimension_numbers = #tpu.dot_dimension_numbers<[1], [0], [0], [1], [0, 0, 1, 1], [], []>} : vector<128x256xbf16>, vector<256x512xbf16>, vector<128x512xf32> -> vector<128x512xf32>
    %142 = arith.addf %138, %141 : vector<128x512xf32>
    %143 = vector.shape_cast %128 : vector<1x128x256xbf16> to vector<128x256xbf16>
    %c512_80 = arith.constant 512 : index
    %c0_81 = arith.constant 0 : index
    %144 = vector.load %arg8[%c512_80, %c0_81] : memref<2304x512xbf16, #tpu.memory_space<vmem>>, vector<256x512xbf16>
    %cst_82 = arith.constant dense<0.000000e+00> : vector<128x512xf32>
    %145 = tpu.matmul %143, %144, %cst_82 {dimension_numbers = #tpu.dot_dimension_numbers<[1], [0], [0], [1], [0, 0, 1, 1], [], []>} : vector<128x256xbf16>, vector<256x512xbf16>, vector<128x512xf32> -> vector<128x512xf32>
    %146 = arith.addf %142, %145 : vector<128x512xf32>
    %147 = vector.shape_cast %129 : vector<1x128x256xbf16> to vector<128x256xbf16>
    %c768_83 = arith.constant 768 : index
    %c0_84 = arith.constant 0 : index
    %148 = vector.load %arg8[%c768_83, %c0_84] : memref<2304x512xbf16, #tpu.memory_space<vmem>>, vector<256x512xbf16>
    %cst_85 = arith.constant dense<0.000000e+00> : vector<128x512xf32>
    %149 = tpu.matmul %147, %148, %cst_85 {dimension_numbers = #tpu.dot_dimension_numbers<[1], [0], [0], [1], [0, 0, 1, 1], [], []>} : vector<128x256xbf16>, vector<256x512xbf16>, vector<128x512xf32> -> vector<128x512xf32>
    %150 = arith.addf %146, %149 : vector<128x512xf32>
    %151 = vector.shape_cast %130 : vector<1x128x256xbf16> to vector<128x256xbf16>
    %c1024_86 = arith.constant 1024 : index
    %c0_87 = arith.constant 0 : index
    %152 = vector.load %arg8[%c1024_86, %c0_87] : memref<2304x512xbf16, #tpu.memory_space<vmem>>, vector<256x512xbf16>
    %cst_88 = arith.constant dense<0.000000e+00> : vector<128x512xf32>
    %153 = tpu.matmul %151, %152, %cst_88 {dimension_numbers = #tpu.dot_dimension_numbers<[1], [0], [0], [1], [0, 0, 1, 1], [], []>} : vector<128x256xbf16>, vector<256x512xbf16>, vector<128x512xf32> -> vector<128x512xf32>
    %154 = arith.addf %150, %153 : vector<128x512xf32>
    %155 = vector.shape_cast %131 : vector<1x128x256xbf16> to vector<128x256xbf16>
    %c1280 = arith.constant 1280 : index
    %c0_89 = arith.constant 0 : index
    %156 = vector.load %arg8[%c1280, %c0_89] : memref<2304x512xbf16, #tpu.memory_space<vmem>>, vector<256x512xbf16>
    %cst_90 = arith.constant dense<0.000000e+00> : vector<128x512xf32>
    %157 = tpu.matmul %155, %156, %cst_90 {dimension_numbers = #tpu.dot_dimension_numbers<[1], [0], [0], [1], [0, 0, 1, 1], [], []>} : vector<128x256xbf16>, vector<256x512xbf16>, vector<128x512xf32> -> vector<128x512xf32>
    %158 = arith.addf %154, %157 : vector<128x512xf32>
    %159 = vector.shape_cast %132 : vector<1x128x256xbf16> to vector<128x256xbf16>
    %c1536 = arith.constant 1536 : index
    %c0_91 = arith.constant 0 : index
    %160 = vector.load %arg8[%c1536, %c0_91] : memref<2304x512xbf16, #tpu.memory_space<vmem>>, vector<256x512xbf16>
    %cst_92 = arith.constant dense<0.000000e+00> : vector<128x512xf32>
    %161 = tpu.matmul %159, %160, %cst_92 {dimension_numbers = #tpu.dot_dimension_numbers<[1], [0], [0], [1], [0, 0, 1, 1], [], []>} : vector<128x256xbf16>, vector<256x512xbf16>, vector<128x512xf32> -> vector<128x512xf32>
    %162 = arith.addf %158, %161 : vector<128x512xf32>
    %163 = vector.shape_cast %133 : vector<1x128x256xbf16> to vector<128x256xbf16>
    %c1792 = arith.constant 1792 : index
    %c0_93 = arith.constant 0 : index
    %164 = vector.load %arg8[%c1792, %c0_93] : memref<2304x512xbf16, #tpu.memory_space<vmem>>, vector<256x512xbf16>
    %cst_94 = arith.constant dense<0.000000e+00> : vector<128x512xf32>
    %165 = tpu.matmul %163, %164, %cst_94 {dimension_numbers = #tpu.dot_dimension_numbers<[1], [0], [0], [1], [0, 0, 1, 1], [], []>} : vector<128x256xbf16>, vector<256x512xbf16>, vector<128x512xf32> -> vector<128x512xf32>
    %166 = arith.addf %162, %165 : vector<128x512xf32>
    %167 = vector.shape_cast %134 : vector<1x128x256xbf16> to vector<128x256xbf16>
    %c2048 = arith.constant 2048 : index
    %c0_95 = arith.constant 0 : index
    %168 = vector.load %arg8[%c2048, %c0_95] : memref<2304x512xbf16, #tpu.memory_space<vmem>>, vector<256x512xbf16>
    %cst_96 = arith.constant dense<0.000000e+00> : vector<128x512xf32>
    %169 = tpu.matmul %167, %168, %cst_96 {dimension_numbers = #tpu.dot_dimension_numbers<[1], [0], [0], [1], [0, 0, 1, 1], [], []>} : vector<128x256xbf16>, vector<256x512xbf16>, vector<128x512xf32> -> vector<128x512xf32>
    %170 = arith.addf %166, %169 : vector<128x512xf32>
    %c0_97 = arith.constant 0 : index
    %c0_98 = arith.constant 0 : index
    %171 = vector.load %arg9[%c0_97, %c0_98] : memref<1x512xf32, #tpu.memory_space<vmem>>, vector<1x512xf32>
    %172 = vector.broadcast %171 : vector<1x512xf32> to vector<128x512xf32>
    %173 = arith.addf %170, %172 : vector<128x512xf32>
    %cst_99 = arith.constant 0.000000e+00 : f32
    %174 = vector.broadcast %cst_99 : f32 to vector<128x512xf32>
    %175 = arith.maximumf %173, %174 : vector<128x512xf32>
    %176 = vector.shape_cast %175 : vector<128x512xf32> to vector<1x128x512xf32>
    %cst_100 = arith.constant dense<0.000000e+00> : vector<128x512xf32>
    %177 = vector.multi_reduction <add>, %176, %cst_100 [0] : vector<1x128x512xf32> to vector<128x512xf32>
    %cst_101 = arith.constant 1.000000e+00 : f32
    %178 = vector.broadcast %cst_101 : f32 to vector<128x512xf32>
    %179 = arith.divf %177, %178 : vector<128x512xf32>
    %180 = arith.truncf %179 : vector<128x512xf32> to vector<128x512xbf16>
    %c0_102 = arith.constant 0 : index
    %c0_103 = arith.constant 0 : index
    %181 = vector.load %arg10[%c0_102, %c0_103] : memref<512x96xbf16, #tpu.memory_space<vmem>>, vector<512x96xbf16>
    %cst_104 = arith.constant dense<0.000000e+00> : vector<128x96xf32>
    %182 = tpu.matmul %180, %181, %cst_104 {dimension_numbers = #tpu.dot_dimension_numbers<[1], [0], [0], [1], [0, 0, 1, 1], [], []>} : vector<128x512xbf16>, vector<512x96xbf16>, vector<128x96xf32> -> vector<128x96xf32>
    %183 = vector.shape_cast %182 : vector<128x96xf32> to vector<8x16x96xf32>
    %cst_105 = arith.constant 0.000000e+00 : f32
    %184 = vector.broadcast %cst_105 : f32 to vector<8x1x6xf32>
    %185 = vector.extract_strided_slice %183 {offsets = [0, 0, 0], sizes = [8, 1, 6], strides = [1, 1, 1]} : vector<8x16x96xf32> to vector<8x1x6xf32>
    %186 = arith.addf %184, %185 : vector<8x1x6xf32>
    %187 = vector.extract_strided_slice %183 {offsets = [0, 1, 6], sizes = [8, 1, 6], strides = [1, 1, 1]} : vector<8x16x96xf32> to vector<8x1x6xf32>
    %188 = arith.addf %186, %187 : vector<8x1x6xf32>
    %189 = vector.extract_strided_slice %183 {offsets = [0, 2, 12], sizes = [8, 1, 6], strides = [1, 1, 1]} : vector<8x16x96xf32> to vector<8x1x6xf32>
    %190 = arith.addf %188, %189 : vector<8x1x6xf32>
    %191 = vector.extract_strided_slice %183 {offsets = [0, 3, 18], sizes = [8, 1, 6], strides = [1, 1, 1]} : vector<8x16x96xf32> to vector<8x1x6xf32>
    %192 = arith.addf %190, %191 : vector<8x1x6xf32>
    %193 = vector.extract_strided_slice %183 {offsets = [0, 4, 24], sizes = [8, 1, 6], strides = [1, 1, 1]} : vector<8x16x96xf32> to vector<8x1x6xf32>
    %194 = arith.addf %192, %193 : vector<8x1x6xf32>
    %195 = vector.extract_strided_slice %183 {offsets = [0, 5, 30], sizes = [8, 1, 6], strides = [1, 1, 1]} : vector<8x16x96xf32> to vector<8x1x6xf32>
    %196 = arith.addf %194, %195 : vector<8x1x6xf32>
    %197 = vector.extract_strided_slice %183 {offsets = [0, 6, 36], sizes = [8, 1, 6], strides = [1, 1, 1]} : vector<8x16x96xf32> to vector<8x1x6xf32>
    %198 = arith.addf %196, %197 : vector<8x1x6xf32>
    %199 = vector.extract_strided_slice %183 {offsets = [0, 7, 42], sizes = [8, 1, 6], strides = [1, 1, 1]} : vector<8x16x96xf32> to vector<8x1x6xf32>
    %200 = arith.addf %198, %199 : vector<8x1x6xf32>
    %201 = vector.extract_strided_slice %183 {offsets = [0, 8, 48], sizes = [8, 1, 6], strides = [1, 1, 1]} : vector<8x16x96xf32> to vector<8x1x6xf32>
    %202 = arith.addf %200, %201 : vector<8x1x6xf32>
    %203 = vector.extract_strided_slice %183 {offsets = [0, 9, 54], sizes = [8, 1, 6], strides = [1, 1, 1]} : vector<8x16x96xf32> to vector<8x1x6xf32>
    %204 = arith.addf %202, %203 : vector<8x1x6xf32>
    %205 = vector.extract_strided_slice %183 {offsets = [0, 10, 60], sizes = [8, 1, 6], strides = [1, 1, 1]} : vector<8x16x96xf32> to vector<8x1x6xf32>
    %206 = arith.addf %204, %205 : vector<8x1x6xf32>
    %207 = vector.extract_strided_slice %183 {offsets = [0, 11, 66], sizes = [8, 1, 6], strides = [1, 1, 1]} : vector<8x16x96xf32> to vector<8x1x6xf32>
    %208 = arith.addf %206, %207 : vector<8x1x6xf32>
    %209 = vector.extract_strided_slice %183 {offsets = [0, 12, 72], sizes = [8, 1, 6], strides = [1, 1, 1]} : vector<8x16x96xf32> to vector<8x1x6xf32>
    %210 = arith.addf %208, %209 : vector<8x1x6xf32>
    %211 = vector.extract_strided_slice %183 {offsets = [0, 13, 78], sizes = [8, 1, 6], strides = [1, 1, 1]} : vector<8x16x96xf32> to vector<8x1x6xf32>
    %212 = arith.addf %210, %211 : vector<8x1x6xf32>
    %213 = vector.extract_strided_slice %183 {offsets = [0, 14, 84], sizes = [8, 1, 6], strides = [1, 1, 1]} : vector<8x16x96xf32> to vector<8x1x6xf32>
    %214 = arith.addf %212, %213 : vector<8x1x6xf32>
    %215 = vector.extract_strided_slice %183 {offsets = [0, 15, 90], sizes = [8, 1, 6], strides = [1, 1, 1]} : vector<8x16x96xf32> to vector<8x1x6xf32>
    %216 = arith.addf %214, %215 : vector<8x1x6xf32>
    %c0_106 = arith.constant 0 : index
    %c0_107 = arith.constant 0 : index
    %c0_108 = arith.constant 0 : index
    %217 = vector.load %arg11[%c0_106, %c0_107, %c0_108] : memref<1x1x6xf32, #tpu.memory_space<vmem>>, vector<1x1x6xf32>
    %218 = vector.broadcast %217 : vector<1x1x6xf32> to vector<8x1x6xf32>
    %219 = arith.addf %216, %218 : vector<8x1x6xf32>
    %c0_109 = arith.constant 0 : index
    %c0_110 = arith.constant 0 : index
    %c0_111 = arith.constant 0 : index
    %220 = vector.load %arg12[%c0_109, %c0_110, %c0_111] : memref<8x1x6xf32, #tpu.memory_space<vmem>>, vector<8x1x6xf32>
    tpu.vector_store %arg12[%c0_109, %c0_110, %c0_111], %219 {strides = array<i32>} : memref<8x1x6xf32, #tpu.memory_space<vmem>>, vector<8x1x6xf32>,
    return
  }
  func.func @transform_0(%arg0: i32) -> (i32, i32) {
    %c0_i32 = arith.constant 0 : i32
    %c0_i32_0 = arith.constant 0 : i32
    return %arg0, %c0_i32 : i32, i32
  }
  func.func @transform_1(%arg0: i32) -> (i32, i32) {
    %c0_i32 = arith.constant 0 : i32
    %c0_i32_0 = arith.constant 0 : i32
    %c0_i32_1 = arith.constant 0 : i32
    return %c0_i32, %c0_i32_0 : i32, i32
  }
  func.func @transform_2(%arg0: i32) -> (i32, i32) {
    %c0_i32 = arith.constant 0 : i32
    %c0_i32_0 = arith.constant 0 : i32
    %c0_i32_1 = arith.constant 0 : i32
    return %c0_i32, %c0_i32_0 : i32, i32
  }
  func.func @transform_3(%arg0: i32) -> (i32, i32) {
    %c0_i32 = arith.constant 0 : i32
    %c0_i32_0 = arith.constant 0 : i32
    %c0_i32_1 = arith.constant 0 : i32
    return %c0_i32, %c0_i32_0 : i32, i32
  }
  func.func @transform_4(%arg0: i32) -> (i32, i32) {
    %c0_i32 = arith.constant 0 : i32
    %c0_i32_0 = arith.constant 0 : i32
    %c0_i32_1 = arith.constant 0 : i32
    return %c0_i32, %c0_i32_0 : i32, i32
  }
  func.func @transform_5(%arg0: i32) -> (i32, i32) {
    %c0_i32 = arith.constant 0 : i32
    %c0_i32_0 = arith.constant 0 : i32
    %c0_i32_1 = arith.constant 0 : i32
    return %c0_i32, %c0_i32_0 : i32, i32
  }
  func.func @transform_6(%arg0: i32) -> (i32, i32) {
    %c0_i32 = arith.constant 0 : i32
    %c0_i32_0 = arith.constant 0 : i32
    %c0_i32_1 = arith.constant 0 : i32
    return %c0_i32, %c0_i32_0 : i32, i32
  }
  func.func @transform_7(%arg0: i32) -> (i32, i32) {
    %c0_i32 = arith.constant 0 : i32
    %c0_i32_0 = arith.constant 0 : i32
    %c0_i32_1 = arith.constant 0 : i32
    return %c0_i32, %c0_i32_0 : i32, i32
  }
  func.func @transform_8(%arg0: i32) -> (i32, i32) {
    %c0_i32 = arith.constant 0 : i32
    %c0_i32_0 = arith.constant 0 : i32
    %c0_i32_1 = arith.constant 0 : i32
    return %c0_i32, %c0_i32_0 : i32, i32
  }
  func.func @transform_9(%arg0: i32) -> (i32, i32) {
    %c0_i32 = arith.constant 0 : i32
    %c0_i32_0 = arith.constant 0 : i32
    %c0_i32_1 = arith.constant 0 : i32
    return %c0_i32, %c0_i32_0 : i32, i32
  }
  func.func @transform_10(%arg0: i32) -> (i32, i32, i32) {
    %c0_i32 = arith.constant 0 : i32
    %c0_i32_0 = arith.constant 0 : i32
    %c0_i32_1 = arith.constant 0 : i32
    %c0_i32_2 = arith.constant 0 : i32
    return %c0_i32, %c0_i32_0, %c0_i32_1 : i32, i32, i32
  }
  func.func @transform_11(%arg0: i32) -> (i32, i32, i32) {
    %c0_i32 = arith.constant 0 : i32
    %c0_i32_0 = arith.constant 0 : i32
    %c0_i32_1 = arith.constant 0 : i32
    return %arg0, %c0_i32, %c0_i32_0 : i32, i32, i32
  }
}

</mosaic_0001>

<bundles_post_ra>
// kernel: tpu_custom_call.1
= control target key start
LH: loop header
LB: loop body
LE: loop exit
PB: predicated region body
PF: predicated region fallthrough
CT: control target
= control target key end

     0   :  { %16 = vsyncpa [#allocation6], 0  ;;  %s22624_s0 = inlined_call_operand.vmem [shape: bf16[256,24], index: 0, kind: input, shape index: {}]   ;;  %s22625_s1 = inlined_call_operand.hbm [shape: bf16[9,128], index: 1, kind: input, shape index: {}]   ;;  %s22626_s2 = inlined_call_operand.hbm [shape: f32[1,128], index: 2, kind: input, shape index: {}]   ;;  %s22627_s3 = inlined_call_operand.hbm [shape: bf16[1152,128], index: 3, kind: input, shape index: {}]   ;;  %s22628_s4 = inlined_call_operand.hbm [shape: f32[1,128], index: 4, kind: input, shape index: {}]   ;;  %s22629_s5 = inlined_call_operand.hbm [shape: bf16[1152,256], index: 5, kind: input, shape index: {}]   ;;  %s22630_s6 = inlined_call_operand.hbm [shape: f32[1,256], index: 6, kind: input, shape index: {}]   ;;  %s22631_s7 = inlined_call_operand.hbm [shape: bf16[2304,512], index: 7, kind: input, shape index: {}]   ;;  %s22632_s8 = inlined_call_operand.hbm [shape: f32[1,512], index: 8, kind: input, shape index: {}]   ;;  %s22633_s9 = inlined_call_operand.vmem [shape: bf16[512,96], index: 9, kind: input, shape index: {}]   ;;  %s22634_s10 = inlined_call_operand.hbm [shape: f32[1,1,6], index: 10, kind: input, shape index: {}]   ;;  %s22635_s11 = inlined_call_operand.vmem [shape: f32[16,1,6], index: 11, kind: output, shape index: {}]  }
   0x1   :  { %17 = vsyncpa [#allocation8], 0 }
   0x2   :  { %18 = vsyncpa [#allocation11], 0 }
   0x3   :  { %19 = vsyncpa [#allocation14], 0 }
   0x4   :  { %20 = vsyncpa [#allocation17], 0  ;;  %s19631_s17 = smov 0  }
   0x5 LB: > { %s19534_s18 = smov [#allocation7]   ;;  %s19637_s20 = sadd.s32 4294967295, %s19532_s17   ;;  %s19532_s17 = sphi %s19631_s17, %s26_s17  }
   0x6   : > { %s319_s19 = sshll.u32 %s19534_s18, 4  ;;  %p15124_p0 = scmp.ge.s32.totalorder %s19532_s17, 1  ;;  %s19642_s19 = int_to_ptr.vmem [resolvable:$true] %s319_s19 }
   0x7   : > { %p293_p1 = scmp.lt.s32.totalorder %s19532_s17, 3  ;;  %p22636_p2 = scmp.eq.s32.totalorder %s19637_s20, 0 }
   0x8   : > { %s19535_s22 = smov [#allocation10]   ;;  %s19536_s24 = smov [#allocation13]  }
   0x9   : > { %p19644_p3 = pnand %p15124_p0, %p293_p1  ;;  %s343_s23 = sshll.u32 %s19535_s22, 4  ;;  %s19650_s23 = int_to_ptr.vmem [resolvable:$true] %s343_s23 }
   0xa   : > { %s367_s25 = sshll.u32 %s19536_s24, 4  ;;  %s19537_s27 = smov [#allocation16]   ;;  %s19658_s25 = int_to_ptr.vmem [resolvable:$true] %s367_s25 }
   0xb   : > { %s22659_s21 = scalar_select %p19644_p3, 1, 0 }
   0xc   : > { %p17968_p4 = pneg %p19644_p3  ;;  %s391_s28 = sshll.u32 %s19537_s27, 4  ;;  %s19660_s28 = int_to_ptr.vmem [resolvable:$true] %s391_s28 }
   0xd   : > { %s19254_s12 = scalar_lea.hbm %s22626_s2, 16 }
   0xe   : > { %p19654_p5 = pnand %p22636_p2, %p17968_p4  ;;  %p19255_p6 = scmp.ne.s32.totalorder %s22626_s2, %s19254_s12 }
   0xf   : > { %p19261_p10 = scmp.lt.u32.totalorder %s19254_s12, %s22626_s2 }
  0x10   : > { %p19670_p7 = pneg %p19654_p5 }
  0x12   : > { %p19257_p8 = pnand %p19670_p7, %p19255_p6 }
  0x14   : > { %p19258_p9 = pneg %p19257_p8 }
  0x16   : > { %p19263_p11 = pnand %p19261_p10, %p19258_p9 }
  0x18   : > { %19266 = shalt.err (!%p19263_p11)
}
  0x19   : > { %s19267_s22 = scalar_lea.vmem %s19642_s19, 16  ;;  %s19274_s24 = scalar_lea.vmem %s19642_s19, 32 }
  0x1a   : > { %p19268_p12 = scmp.ne.s32.totalorder %s19642_s19, %s19267_s22  ;;  %p19275_p1 = scmp.lt.s32.totalorder %s19642_s19, %s19642_s19 }
  0x1b   : > { %p19276_p4 = scmp.lt.s32.totalorder %s19274_s24, %s19267_s22 }
  0x1c   : > { %p19270_p13 = pnand %p19268_p12, %p19670_p7 }
  0x1d   : > { %p19277_p6 = por %p19276_p4, %p19275_p1 }
  0x1e   : > { %p19271_p0 = pneg %p19270_p13 }
  0x20   : > { %p19278_p8 = pnand %p19277_p6, %p19271_p0 }
  0x22   : > { %19281 = shalt.err (!%p19278_p8)
}
  0x23   : > { %17974 = dma.hbm_to_vmem [thread:$0]  (!%p19654_p5), %s22626_s2, 16, %s19642_s19, [#allocation8]  }
  0x24   : > { %s19282_s13 = scalar_lea.hbm %s22628_s4, 16 }
  0x25   : > { %p19283_p9 = scmp.ne.s32.totalorder %s22628_s4, %s19282_s13  ;;  %p19289_p12 = scmp.lt.u32.totalorder %s19282_s13, %s22628_s4 }
  0x27   : > { %p19285_p10 = pnand %p19283_p9, %p19670_p7 }
  0x29   : > { %p19286_p11 = pneg %p19285_p10 }
  0x2b   : > { %p19291_p13 = pnand %p19289_p12, %p19286_p11 }
  0x2d   : > { %19294 = shalt.err (!%p19291_p13)
}
  0x2e   : > { %s19295_s19 = scalar_lea.vmem %s19650_s23, 16  ;;  %s19302_s24 = scalar_lea.vmem %s19650_s23, 32 }
  0x2f   : > { %p19296_p0 = scmp.ne.s32.totalorder %s19650_s23, %s19295_s19  ;;  %p19303_p6 = scmp.lt.s32.totalorder %s19650_s23, %s19650_s23 }
  0x30   : > { %p19304_p8 = scmp.lt.s32.totalorder %s19302_s24, %s19295_s19 }
  0x31   : > { %p19298_p1 = pnand %p19296_p0, %p19670_p7 }
  0x32   : > { %p19305_p9 = por %p19304_p8, %p19303_p6 }
  0x33   : > { %p19299_p4 = pneg %p19298_p1 }
  0x35   : > { %p19306_p10 = pnand %p19305_p9, %p19299_p4 }
  0x37   : > { %19309 = shalt.err (!%p19306_p10)
}
  0x38   : > { %17980 = dma.hbm_to_vmem [thread:$0]  (!%p19654_p5), %s22628_s4, 16, %s19650_s23, [#allocation11]  }
  0x39   : > { %s19310_s13 = scalar_lea.hbm %s22630_s6, 32 }
  0x3a   : > { %p19311_p11 = scmp.ne.s32.totalorder %s22630_s6, %s19310_s13  ;;  %p19317_p0 = scmp.lt.u32.totalorder %s19310_s13, %s22630_s6 }
  0x3c   : > { %p19313_p12 = pnand %p19311_p11, %p19670_p7 }
  0x3e   : > { %p19314_p13 = pneg %p19313_p12 }
  0x40   : > { %p19319_p1 = pnand %p19317_p0, %p19314_p13 }
  0x42   : > { %19322 = shalt.err (!%p19319_p1)
}
  0x43   : > { %s19323_s23 = scalar_lea.vmem %s19658_s25, 32  ;;  %p19331_p9 = scmp.lt.s32.totalorder %s19658_s25, %s19658_s25 }
  0x44   : > { %p19324_p4 = scmp.ne.s32.totalorder %s19658_s25, %s19323_s23  ;;  %p19332_p10 = scmp.lt.s32.totalorder %s19323_s23, %s19323_s23 }
  0x46   : > { %p19326_p6 = pnand %p19324_p4, %p19670_p7  ;;  %p19333_p11 = por %p19332_p10, %p19331_p9 }
  0x48   : > { %p19327_p8 = pneg %p19326_p6 }
  0x4a   : > { %p19334_p12 = pnand %p19333_p11, %p19327_p8 }
  0x4c   : > { %19337 = shalt.err (!%p19334_p12)
}
  0x4d   : > { %17986 = dma.hbm_to_vmem [thread:$0]  (!%p19654_p5), %s22630_s6, 32, %s19658_s25, [#allocation14]  }
  0x4e   : > { %s19338_s30 = scalar_lea.hbm %s22632_s8, 64 }
  0x4f   : > { %p19339_p13 = scmp.ne.s32.totalorder %s22632_s8, %s19338_s30  ;;  %p19345_p4 = scmp.lt.u32.totalorder %s19338_s30, %s22632_s8 }
  0x51   : > { %p19341_p0 = pnand %p19339_p13, %p19670_p7 }
  0x53   : > { %p19342_p1 = pneg %p19341_p0 }
  0x55   : > { %p19347_p6 = pnand %p19345_p4, %p19342_p1 }
  0x57   : > { %19350 = shalt.err (!%p19347_p6)
}
  0x58   : > { %s19351_s25 = scalar_lea.vmem %s19660_s28, 64  ;;  %p19359_p11 = scmp.lt.s32.totalorder %s19660_s28, %s19660_s28 }
  0x59   : > { %p19352_p8 = scmp.ne.s32.totalorder %s19660_s28, %s19351_s25  ;;  %p19360_p12 = scmp.lt.s32.totalorder %s19351_s25, %s19351_s25 }
  0x5b   : > { %p19354_p9 = pnand %p19352_p8, %p19670_p7  ;;  %p19361_p13 = por %p19360_p12, %p19359_p11 }
  0x5d   : > { %p19355_p10 = pneg %p19354_p9 }
  0x5f   : > { %p19362_p0 = pnand %p19361_p13, %p19355_p10 }
  0x61   : > { %19365 = shalt.err (!%p19362_p0)
}
  0x62   : > { %17992 = dma.hbm_to_vmem [thread:$0]  (!%p19654_p5), %s22632_s8, 64, %s19660_s28, [#allocation17]  }
  0x63   : > { %s19538_s23 = smov [#allocation5]   ;;  %s19366_s29 = scalar_lea.hbm %s22625_s1, 128 }
  0x64   : > { %s305_s19 = sshll.u32 %s19538_s23, 4  ;;  %p19367_p1 = scmp.ne.s32.totalorder %s22625_s1, %s19366_s29  ;;  %s306_s19 = int_to_ptr.vmem [resolvable:$true] %s305_s19 }
  0x65   : > { %p19373_p8 = scmp.lt.u32.totalorder %s19366_s29, %s22625_s1 }
  0x66   : > { %p19369_p4 = pnand %p19367_p1, %p19670_p7 }
  0x68   : > { %p19370_p6 = pneg %p19369_p4 }
  0x6a   : > { %p19375_p9 = pnand %p19373_p8, %p19370_p6 }
  0x6c   : > { %19378 = shalt.err (!%p19375_p9)
}
  0x6d   : > { %s19379_s28 = scalar_lea.vmem %s306_s19, 128  ;;  %p19387_p13 = scmp.lt.s32.totalorder %s306_s19, %s306_s19 }
  0x6e   : > { %p19380_p10 = scmp.ne.s32.totalorder %s306_s19, %s19379_s28  ;;  %p19388_p0 = scmp.lt.s32.totalorder %s19379_s28, %s19379_s28 }
  0x70   : > { %p19382_p11 = pnand %p19380_p10, %p19670_p7  ;;  %p19389_p2 = por %p19388_p0, %p19387_p13 }
  0x72   : > { %p19383_p12 = pneg %p19382_p11 }
  0x74   : > { %p19390_p3 = pnand %p19389_p2, %p19383_p12 }
  0x76   : > { %19393 = shalt.err (!%p19390_p3)
}
  0x77   : > { %s19539_s16 = smov 64   ;;  %s19540_s25 = smov 4  }
  0x78   : > { %17971 = dma.hbm_to_vmem [thread:$0]  (!%p19654_p5), %s22625_s1, 128, %s306_s19, [#allocation6], %s19539_s16, %s19539_s16, %s19540_s25  }
  0x79   : > { %s19541_s23 = smov [#allocation9]   ;;  %s19542_s27 = smov [#allocation12]  }
  0x7a   : > { %s329_s24 = sshll.u32 %s19541_s23, 4  ;;  %s353_s29 = sshll.u32 %s19542_s27, 4  ;;  %s330_s24 = int_to_ptr.vmem [resolvable:$true] %s329_s24  ;;  %s19780_s29 = int_to_ptr.vmem [resolvable:$true] %s353_s29 }
  0x7b   : > { %s19394_s13 = scalar_lea.hbm %s22627_s3, 9216 }
  0x7c   : > { %p19395_p2 = scmp.ne.s32.totalorder %s22627_s3, %s19394_s13  ;;  %p19401_p4 = scmp.lt.u32.totalorder %s19394_s13, %s22627_s3 }
  0x7e   : > { %p19397_p3 = pnand %p19395_p2, %p19670_p7 }
  0x80   : > { %p19398_p1 = pneg %p19397_p3 }
  0x82   : > { %p19403_p6 = pnand %p19401_p4, %p19398_p1 }
  0x84   : > { %19406 = shalt.err (!%p19403_p6)
}
  0x85   : > { %s19407_s22 = scalar_lea.vmem %s330_s24, 9216  ;;  %p19415_p11 = scmp.lt.s32.totalorder %s330_s24, %s330_s24 }
  0x86   : > { %p19408_p8 = scmp.ne.s32.totalorder %s330_s24, %s19407_s22  ;;  %p19416_p12 = scmp.lt.s32.totalorder %s19407_s22, %s19407_s22 }
  0x88   : > { %p19410_p9 = pnand %p19408_p8, %p19670_p7  ;;  %p19417_p13 = por %p19416_p12, %p19415_p11 }
  0x8a   : > { %p19411_p10 = pneg %p19410_p9 }
  0x8c   : > { %p19418_p0 = pnand %p19417_p13, %p19411_p10 }
  0x8e   : > { %19421 = shalt.err (!%p19418_p0)
}
  0x8f   : > { %17977 = dma.hbm_to_vmem [thread:$0]  (!%p19654_p5), %s22627_s3, 9216, %s330_s24, [#allocation8], %s19539_s16, %s19539_s16, %s19540_s25  }
  0x90   : > { %s19422_s13 = scalar_lea.hbm %s22629_s5, 18432 }
  0x91   : > { %p19423_p2 = scmp.ne.s32.totalorder %s22629_s5, %s19422_s13  ;;  %p19429_p4 = scmp.lt.u32.totalorder %s19422_s13, %s22629_s5 }
  0x93   : > { %p19425_p3 = pnand %p19423_p2, %p19670_p7 }
  0x95   : > { %p19426_p1 = pneg %p19425_p3 }
  0x97   : > { %p19431_p6 = pnand %p19429_p4, %p19426_p1 }
  0x99   : > { %19434 = shalt.err (!%p19431_p6)
}
  0x9a   : > { %s19435_s16 = scalar_lea.vmem %s19780_s29, 18432  ;;  %p19443_p11 = scmp.lt.s32.totalorder %s19780_s29, %s19780_s29 }
  0x9b   : > { %p19436_p8 = scmp.ne.s32.totalorder %s19780_s29, %s19435_s16  ;;  %p19444_p12 = scmp.lt.s32.totalorder %s19435_s16, %s19435_s16 }
  0x9d   : > { %p19438_p9 = pnand %p19436_p8, %p19670_p7  ;;  %p19445_p13 = por %p19444_p12, %p19443_p11 }
  0x9f   : > { %p19439_p10 = pneg %p19438_p9 }
  0xa1   : > { %p19446_p0 = pnand %p19445_p13, %p19439_p10 }
  0xa3   : > { %19449 = shalt.err (!%p19446_p0)
}
  0xa4   : > { %s19543_s25 = smov 128   ;;  %s19544_s24 = smov 8  }
  0xa5   : > { %17983 = dma.hbm_to_vmem [thread:$0]  (!%p19654_p5), %s22629_s5, 18432, %s19780_s29, [#allocation11], %s19543_s25, %s19543_s25, %s19544_s24  }
  0xa6   : > { %s19545_s27 = smov [#allocation15]   ;;  %s19450_s14 = scalar_lea.hbm %s22631_s7, 73728 }
  0xa7   : > { %s377_s30 = sshll.u32 %s19545_s27, 4  ;;  %p19451_p2 = scmp.ne.s32.totalorder %s22631_s7, %s19450_s14  ;;  %s378_s30 = int_to_ptr.vmem [resolvable:$true] %s377_s30 }
  0xa8   : > { %p19457_p4 = scmp.lt.u32.totalorder %s19450_s14, %s22631_s7 }
  0xa9   : > { %p19453_p3 = pnand %p19451_p2, %p19670_p7 }
  0xab   : > { %p19454_p1 = pneg %p19453_p3 }
  0xad   : > { %p19459_p6 = pnand %p19457_p4, %p19454_p1 }
  0xaf   : > { %19462 = shalt.err (!%p19459_p6)
}
  0xb0   : > { %s19463_s29 = scalar_lea.vmem %s378_s30, 73728  ;;  %p19471_p11 = scmp.lt.s32.totalorder %s378_s30, %s378_s30 }
  0xb1   : > { %p19464_p8 = scmp.ne.s32.totalorder %s378_s30, %s19463_s29  ;;  %p19472_p12 = scmp.lt.s32.totalorder %s19463_s29, %s19463_s29 }
  0xb3   : > { %p19466_p9 = pnand %p19464_p8, %p19670_p7  ;;  %p19473_p13 = por %p19472_p12, %p19471_p11 }
  0xb5   : > { %p19467_p10 = pneg %p19466_p9 }
  0xb7   : > { %p19474_p0 = pnand %p19473_p13, %p19467_p10 }
  0xb9   : > { %19477 = shalt.err (!%p19474_p0)
}
  0xba   : > { %s19546_s25 = smov 256   ;;  %s19547_s24 = smov 16  }
  0xbb   : > { %17989 = dma.hbm_to_vmem [thread:$0]  (!%p19654_p5), %s22631_s7, 73728, %s378_s30, [#allocation14], %s19546_s25, %s19546_s25, %s19547_s24  }
  0xbc   : > { %s19548_s27 = smov [#allocation18]   ;;  %s19478_s28 = scalar_lea.hbm %s22634_s10, 16 }
  0xbd   : > { %s405_s12 = sshll.u32 %s19548_s27, 4  ;;  %p19479_p2 = scmp.ne.s32.totalorder %s22634_s10, %s19478_s28  ;;  %s406_s12 = int_to_ptr.vmem [resolvable:$true] %s405_s12 }
  0xbe   : > { %p19485_p4 = scmp.lt.u32.totalorder %s19478_s28, %s22634_s10 }
  0xbf   : > { %p19481_p3 = pnand %p19479_p2, %p19670_p7 }
  0xc1   : > { %p19482_p1 = pneg %p19481_p3 }
  0xc3   : > { %p19487_p6 = pnand %p19485_p4, %p19482_p1 }
  0xc5   : > { %19490 = shalt.err (!%p19487_p6)
}
  0xc6   : > { %s19491_s30 = scalar_lea.vmem %s406_s12, 16  ;;  %s19498_s25 = scalar_lea.vmem %s406_s12, 32 }
  0xc7   : > { %p19492_p8 = scmp.ne.s32.totalorder %s406_s12, %s19491_s30  ;;  %p19499_p11 = scmp.lt.s32.totalorder %s406_s12, %s406_s12 }
  0xc8   : > { %p19500_p12 = scmp.lt.s32.totalorder %s19498_s25, %s19491_s30 }
  0xc9   : > { %p19494_p9 = pnand %p19492_p8, %p19670_p7 }
  0xca   : > { %p19501_p13 = por %p19500_p12, %p19499_p11 }
  0xcb   : > { %p19495_p10 = pneg %p19494_p9 }
  0xcd   : > { %p19502_p0 = pnand %p19501_p13, %p19495_p10 }
  0xcf   : > { %19505 = shalt.err (!%p19502_p0)
}
  0xd0   : > { %17995 = dma.hbm_to_vmem [thread:$0]  (!%p19654_p5), %s22634_s10, 16, %s406_s12, [#allocation17]  }
  0xd1   : > { %p22662_p2 = scmp.ne.s32.totalorder %s22659_s21, 0 }
  0xd3   : > { %427 = sbr.rel (%p22662_p2) target bundleno = 3594 (0xe0a), region = 64 }
  0xda   : > { %p22663_p3 = scmp.eq.s32.totalorder %s19637_s20, 0 }
  0xdc   : > { %19511 = dma.done.wait (%p22663_p3), [#allocation6], 128   ;;  %p22664_p7 = pmov %p22663_p3 }
  0xdd   : > { %p22665_p1 = pmov %p22663_p3 }
  0xde   : > { %19513 = vsyncadd (%p22664_p7), [#allocation6], 4294967168 }
  0xdf   : > { %19515 = dma.done.wait (%p22665_p1), [#allocation8], 9232   ;;  %p22666_p4 = pmov %p22665_p1 }
  0xe0   : > { %p22667_p6 = pmov %p22665_p1 }
  0xe1   : > { %19517 = vsyncadd (%p22666_p4), [#allocation8], 4294958064 }
  0xe2   : > { %19519 = dma.done.wait (%p22667_p6), [#allocation11], 18448   ;;  %p22668_p5 = pmov %p22665_p1 }
  0xe3   : > { %p22669_p8 = pmov %p22665_p1 }
  0xe4   : > { %19521 = vsyncadd (%p22668_p5), [#allocation11], 4294948848 }
  0xe5   : > { %19523 = dma.done.wait (%p22669_p8), [#allocation14], 73760   ;;  %p22670_p9 = pmov %p22665_p1 }
  0xe6   : > { %p22671_p10 = pmov %p22665_p1 }
  0xe7   : > { %19525 = vsyncadd (%p22670_p9), [#allocation14], 4294893536 }
  0xe8   : > { %19527 = dma.done.wait (%p22671_p10), [#allocation17], 80   ;;  %p22672_p11 = pmov %p22665_p1 }
  0xe9   : > { %s15145_s21 = sshll.u32 %s19637_s20, 4  ;;  %v22638_v0 = vmov 0   ;;  %vm692_vm0 = vcmask 72704   ;;  %vm885_vm1 = vcmask 1043456   ;;  %s19550_s12 = smov 126   ;;  %vm886_vm2 = vcmask 1044480  }
  0xea   : > { %19529 = vsyncadd (%p22672_p11), [#allocation17], 4294967216  ;;  %p499_p12 = scmp.lt.s32.totalorder %s15145_s21, 31  ;;  %2751 = vmatprep.subr.bf16.mxu1 %v22638_v0  ;;  %2783 = vmatprep.mubr.bf16.mxu1 %v22638_v0  ;;  %v19551_v5 = vmov 65535   ;;  %v18067_v10 = vld [vmem:[#allocation5] sm:$0x1f]  }
  0xeb   : > { %v887_v6 = vsel %vm885_vm1, 4294967295, %v19551_v5  ;;  %v18068_v14 = vld [vmem:[#allocation9] sm:$0xff]   ;;  %v18069_v15 = vld [vmem:[#allocation9 + $0x8] sm:$0xff]   ;;  %s19552_s13 = smov 124   ;;  %v18070_v16 = vld [vmem:[#allocation9 + $0x10] sm:$0xff]   ;;  %s19553_s14 = smov 122  }
  0xec   : > { %s22854_s21 = smov (!%p499_p12, %s15145_s21), 31  ;;  %v888_v9 = vsel %vm886_vm2, %v887_v6, 0  ;;  %v18071_v17 = vld [vmem:[#allocation9 + $0x18] sm:$0xff]   ;;  %v18072_v18 = vld [vmem:[#allocation9 + $0x20] sm:$0xff]   ;;  %v18073_v19 = vld [vmem:[#allocation9 + $0x28] sm:$0xff]   ;;  %s19554_s28 = smov 120  }
  0xed   : > { %s15146_s26 = sshll.u32 %s22854_s21, 2  ;;  %v890_v12 = vand.u32 %v18067_v10, %v888_v9  ;;  %v18074_v20 = vld [vmem:[#allocation9 + $0x30] sm:$0xff]   ;;  %s19555_s18 = smov 118   ;;  %v18075_v21 = vld [vmem:[#allocation9 + $0x38] sm:$0xff]   ;;  %v18076_v22 = vld [vmem:[#allocation9 + $0x80] sm:$0xff]   ;;  %vm14975_vm3 = vcmask 40960  }
  0xee   : > { %s502_s27 = scalar_lea.vmem %s22624_s0, %s15146_s26  ;;  %s19556_s19 = smov 116   ;;  %2752 = vmatpush1.bf16.msra.mxu1 %v18076_v22  ;;  %v18077_v23 = vld [vmem:[#allocation9 + $0x40] sm:$0xff]   ;;  %v18078_v24 = vld [vmem:[#allocation9 + $0x88] sm:$0xff]   ;;  %v18079_v25 = vld [vmem:[#allocation9 + $0x90] sm:$0xff]  }
  0xef   : > { %v19887_v1 = vld [vmem:[%s502_s27] sm:$0xff]   ;;  %v19889_v2 = vld [vmem:[%s502_s27 + $0x8] sm:$0xff]   ;;  %v19892_v3 = vld [vmem:[%s502_s27 + $0x10] sm:$0xff]   ;;  %16282 = vmatprep.subr.bf16.mxu0 %v890_v12  ;;  %2753 = vmatprep.subr.bf16.mxu1 %v22638_v0  ;;  %s19557_s16 = smov 114   ;;  %s19558_s22 = smov 110  }
  0xf0   : > { %566 = vrot.lane.b32.xlu0 %v19887_v1, %s19550_s12  ;;  %16284 = vmatprep.mubr.msk.bf16.mxu0 %vm692_vm0, %v19887_v1  ;;  %v19897_v4 = vld [vmem:[%s502_s27 + $0x18] sm:$0xff]   ;;  %v19900_v7 = vld [vmem:[%s502_s27 + $0x20] sm:$0xff]   ;;  %v19902_v8 = vld [vmem:[%s502_s27 + $0x28] sm:$0xff]   ;;  %s19559_s21 = smov 104   ;;  %s19560_s26 = smov 98  }
  0xf1   : > { %570 = vrot.lane.b32.xlu1 %v19892_v3, %s19550_s12  ;;  %v19906_v11 = vld [vmem:[%s502_s27 + $0x30] sm:$0xff]   ;;  %v19908_v13 = vld [vmem:[%s502_s27 + $0x38] sm:$0xff]   ;;  %16283 = vmatpush3.bf16.msra.mxu0 %v890_v12  ;;  %v18080_v26 = vld [vmem:[#allocation9 + $0x98] sm:$0xff]   ;;  %s19561_s15 = smov 92   ;;  %s19562_s23 = smov 86  }
  0xf2   : > { %2462 = vmatprep.subr.bf16.mxu0 %v22638_v0  ;;  %2754 = vmatpush1.bf16.msra.mxu1 %v18078_v24  ;;  %v18081_v27 = vld [vmem:[#allocation9 + $0xa0] sm:$0xff]   ;;  %v18082_v28 = vld [vmem:[#allocation9 + $0x48] sm:$0xff]   ;;  %v18084_v30 = vld [vmem:[#allocation9 + $0xb0] sm:$0xff]   ;;  %s19563_s27 = smov 80   ;;  %s19569_s29 = smov 44  }
  0xf3   : > { %2755 = vmatprep.subr.bf16.mxu1 %v22638_v0  ;;  %v18083_v29 = vld [vmem:[#allocation9 + $0xa8] sm:$0xff]   ;;  %v18085_v31 = vld [vmem:[#allocation9 + $0xb8] sm:$0xff]   ;;  %v18086_v32 = vld [vmem:[#allocation9 + $0xc0] sm:$0xff]   ;;  %s19570_s30 = smov 38   ;;  %s15147_s25 = sshll.u32 %s19637_s20, 3 }
  0xf4   : > { %568 = vrot.lane.b32.xlu0 %v19889_v2, %s19550_s12  ;;  %16285 = vmatmul.mubr.msk.bf16.vlgmr.msra.gmra.mrb[0].mxu0 %vm692_vm0, %v19889_v2  ;;  %v18087_v36 = vld [vmem:[#allocation9 + $0x50] sm:$0xff]   ;;  %v18088_v37 = vld [vmem:[#allocation9 + $0xc8] sm:$0xff]   ;;  %v18090_v41 = vld [vmem:[#allocation9 + $0xd8] sm:$0xff]   ;;  %p505_p13 = scmp.lt.s32.totalorder %s15147_s25, 15 }
  0xf5   : > { %572 = vrot.lane.b32.xlu1 %v19897_v4, %s19550_s12  ;;  %2463 = vmatpush1.bf16.msra.mxu0 %v18068_v14  ;;  %v18089_v38 = vld [vmem:[#allocation9 + $0xd0] sm:$0xff]   ;;  %v18091_v42 = vld [vmem:[#allocation9 + $0xe0] sm:$0xff]   ;;  %v18092_v45 = vld [vmem:[#allocation9 + $0x58] sm:$0xff]  }
  0xf6   : > { %16288 = vmatprep.mubr.msk.bf16.mxu0 %vm692_vm0, %v19892_v3  ;;  %2464 = vmatprep.subr.bf16.mxu0 %v22638_v0  ;;  %v18093_v46 = vld [vmem:[#allocation9 + $0xe8] sm:$0xff]   ;;  %v18094_v47 = vld [vmem:[#allocation9 + $0xf0] sm:$0xff]   ;;  %v18095_v50 = vld [vmem:[#allocation9 + $0xf8] sm:$0xff]   ;;  %s22856_s25 = smov (!%p505_p13, %s15147_s25), 15 }
  0xf7   : > { %2756 = vmatpush1.bf16.msra.mxu1 %v18079_v25  ;;  %v18096_v53 = vld [vmem:[#allocation9 + $0x60] sm:$0xff]   ;;  %v18097_v58 = vld [vmem:[#allocation9 + $0x68] sm:$0xff]   ;;  %v18098_v63 = vld [vmem:[#allocation9 + $0x70] sm:$0xff]  }
  0xf8   : > { %574 = vrot.lane.b32.xlu0 %v19900_v7, %s19550_s12  ;;  %2757 = vmatprep.subr.bf16.mxu1 %v22638_v0  ;;  %v18100_v6 = vld [vmem:[#allocation9 + $0x78] sm:$0xff]   ;;  %v20067_v12 = vld [vmem:[#allocation9 + $0x200] sm:$0xff]  }
  0xf9   : > { %576 = vrot.lane.b32.xlu1 %v19902_v8, %s19550_s12  ;;  %2465 = vmatpush1.bf16.msra.mxu0 %v18069_v15 }
  0xfa   : > { %2466 = vmatprep.subr.bf16.mxu0 %v22638_v0 }
  0xfb   : > { %2758 = vmatpush1.bf16.msra.mxu1 %v18080_v26 }
  0xfc   : > { %578 = vrot.lane.b32.xlu0 %v19906_v11, %s19550_s12  ;;  %16289 = vmatmul.mubr.msk.bf16.gmra.mrb[4].mxu0 %vm692_vm0, %v19897_v4 }
  0xfd   : > { %580 = vrot.lane.b32.xlu1 %v19908_v13, %s19550_s12  ;;  %16292 = vmatprep.mubr.msk.bf16.mxu0 %vm692_vm0, %v19900_v7  ;;  %s19564_s12 = smov 74  }
  0xfe   : > { %2467 = vmatpush1.bf16.msra.mxu0 %v18070_v16  ;;  %2759 = vmatprep.subr.bf16.mxu1 %v22638_v0  ;;  %v20071_v16 = vld [vmem:[#allocation7] ss:$0 sm:$0xff] }
  0xff   : > { %2468 = vmatprep.subr.bf16.mxu0 %v22638_v0  ;;  %2760 = vmatpush1.bf16.msra.mxu1 %v18081_v27 }
 0x100   : > { %582 = vrot.lane.b32.xlu0 %v19887_v1, %s19552_s13  ;;  %2761 = vmatprep.subr.bf16.mxu1 %v22638_v0 }
 0x101   : > { %584 = vrot.lane.b32.xlu1 %v19889_v2, %s19552_s13 }
 0x102   : > { %2469 = vmatpush1.bf16.msra.mxu0 %v18071_v17 }
 0x103   : > { %2470 = vmatprep.subr.bf16.mxu0 %v22638_v0  ;;  %2762 = vmatpush1.bf16.msra.mxu1 %v18083_v29 }
 0x104   : > { %586 = vrot.lane.b32.xlu0 %v19892_v3, %s19552_s13  ;;  %16293 = vmatmul.mubr.msk.bf16.gmra.mrb[8].mxu0 %vm692_vm0, %v19902_v8 }
 0x105   : > { %588 = vrot.lane.b32.xlu1 %v19897_v4, %s19552_s13  ;;  %16296 = vmatprep.mubr.msk.bf16.mxu0 %vm692_vm0, %v19906_v11 }
 0x106   : > { %2471 = vmatpush1.bf16.msra.mxu0 %v18072_v18  ;;  %2763 = vmatprep.subr.bf16.mxu1 %v22638_v0 }
 0x107   : > { %2472 = vmatprep.subr.bf16.mxu0 %v22638_v0  ;;  %2764 = vmatpush1.bf16.msra.mxu1 %v18084_v30 }
 0x108   : > { %590 = vrot.lane.b32.xlu0 %v19900_v7, %s19552_s13  ;;  %2765 = vmatprep.subr.bf16.mxu1 %v22638_v0 }
 0x109   : > { %592 = vrot.lane.b32.xlu1 %v19902_v8, %s19552_s13 }
 0x10a   : > { %2473 = vmatpush1.bf16.msra.mxu0 %v18073_v19 }
 0x10b   : > { %2474 = vmatprep.subr.bf16.mxu0 %v22638_v0  ;;  %2766 = vmatpush1.bf16.msra.mxu1 %v18085_v31 }
 0x10c   : > { %594 = vrot.lane.b32.xlu0 %v19906_v11, %s19552_s13  ;;  %16297 = vmatmul.mubr.msk.bf16.gmra.mrb[12].mxu0 %vm692_vm0, %v19908_v13 }
 0x10d   : > { %596 = vrot.lane.b32.xlu1 %v19908_v13, %s19552_s13  ;;  %2767 = vmatprep.subr.bf16.mxu1 %v22638_v0  ;;  %s22657_s13 = smov 68  }
 0x10e   : > { %2475 = vmatpush1.bf16.msra.mxu0 %v18074_v20 }
 0x10f   : > { %2476 = vmatprep.subr.bf16.mxu0 %v22638_v0  ;;  %2768 = vmatpush1.bf16.msra.mxu1 %v18086_v32  ;;  %v18104_v32 = vld [vmem:[#allocation9 + $0x118] sm:$0xff]  }
 0x110   : > { %598 = vrot.lane.b32.xlu0 %v19887_v1, %s19553_s14  ;;  %2769 = vmatprep.subr.bf16.mxu1 %v22638_v0 }
 0x111   : > { %600 = vrot.lane.b32.xlu1 %v19889_v2, %s19553_s14 }
 0x112   : > { %2477 = vmatpush1.bf16.msra.mxu0 %v18075_v21 }
 0x113   : > { %2478 = vmatprep.subr.bf16.mxu0 %v22638_v0  ;;  %2770 = vmatpush1.bf16.msra.mxu1 %v18088_v37 }
 0x114   : > { %602 = vrot.lane.b32.xlu0 %v19892_v3, %s19553_s14  ;;  %2771 = vmatprep.subr.bf16.mxu1 %v22638_v0 }
 0x115   : > { %604 = vrot.lane.b32.xlu1 %v19897_v4, %s19553_s14 }
 0x116   : > { %2479 = vmatpush1.bf16.msra.mxu0 %v18077_v23 }
 0x117   : > { %2480 = vmatprep.subr.bf16.mxu0 %v22638_v0  ;;  %2772 = vmatpush1.bf16.msra.mxu1 %v18089_v38 }
 0x118   : > { %606 = vrot.lane.b32.xlu0 %v19900_v7, %s19553_s14  ;;  %2773 = vmatprep.subr.bf16.mxu1 %v22638_v0 }
 0x119   : > { %608 = vrot.lane.b32.xlu1 %v19902_v8, %s19553_s14 }
 0x11a   : > { %2481 = vmatpush1.bf16.msra.mxu0 %v18082_v28 }
 0x11b   : > { %2482 = vmatprep.subr.bf16.mxu0 %v22638_v0  ;;  %2774 = vmatpush1.bf16.msra.mxu1 %v18090_v41 }
 0x11c   : > { %610 = vrot.lane.b32.xlu0 %v19906_v11, %s19553_s14  ;;  %2775 = vmatprep.subr.bf16.mxu1 %v22638_v0 }
 0x11d   : > { %612 = vrot.lane.b32.xlu1 %v19908_v13, %s19553_s14 }
 0x11e   : > { %2483 = vmatpush1.bf16.msra.mxu0 %v18087_v36 }
 0x11f   : > { %2484 = vmatprep.subr.bf16.mxu0 %v22638_v0  ;;  %2776 = vmatpush1.bf16.msra.mxu1 %v18091_v42 }
 0x120   : > { %614 = vrot.lane.b32.xlu0 %v19887_v1, %s19554_s28  ;;  %2777 = vmatprep.subr.bf16.mxu1 %v22638_v0 }
 0x121   : > { %616 = vrot.lane.b32.xlu1 %v19889_v2, %s19554_s28 }
 0x122   : > { %2485 = vmatpush1.bf16.msra.mxu0 %v18092_v45 }
 0x123   : > { %2778 = vmatpush1.bf16.msra.mxu1 %v18093_v46  ;;  %2486 = vmatprep.subr.bf16.mxu0 %v22638_v0 }
 0x124   : > { %618 = vrot.lane.b32.xlu0 %v19892_v3, %s19554_s28  ;;  %2779 = vmatprep.subr.bf16.mxu1 %v22638_v0 }
 0x125   : > { %620 = vrot.lane.b32.xlu1 %v19897_v4, %s19554_s28 }
 0x126   : > { %2487 = vmatpush1.bf16.msra.mxu0 %v18096_v53 }
 0x127   : > { %2780 = vmatpush1.bf16.msra.mxu1 %v18094_v47  ;;  %2488 = vmatprep.subr.bf16.mxu0 %v22638_v0 }
 0x128   : > { %622 = vrot.lane.b32.xlu0 %v19900_v7, %s19554_s28  ;;  %2781 = vmatprep.subr.bf16.mxu1 %v22638_v0 }
 0x129   : > { %624 = vrot.lane.b32.xlu1 %v19902_v8, %s19554_s28 }
 0x12a   : > { %2489 = vmatpush1.bf16.msra.mxu0 %v18097_v58 }
 0x12b   : > { %2782 = vmatpush1.bf16.msra.mxu1 %v18095_v50  ;;  %2490 = vmatprep.subr.bf16.mxu0 %v22638_v0 }
 0x12c   : > { %626 = vrot.lane.b32.xlu0 %v19906_v11, %s19554_s28  ;;  %3040 = vmatprep.subr.bf16.mxu1 %v22638_v0 }
 0x12d   : > { %628 = vrot.lane.b32.xlu1 %v19908_v13, %s19554_s28  ;;  %s19566_s28 = smov 62  }
 0x12e   : > { %2784 = vmatmul.mubr.bf16.vlgmr.msra.gmra.mrb[0].mxu1 %v22638_v0  ;;  %2491 = vmatpush1.bf16.msra.mxu0 %v18098_v63 }
 0x12f   : > { %2791 = vmatprep.mubr.bf16.mxu1 %v22638_v0  ;;  %2492 = vmatprep.subr.bf16.mxu0 %v22638_v0 }
 0x130   : > { %630 = vrot.lane.b32.xlu0 %v19887_v1, %s19555_s18 }
 0x131   : > { %632 = vrot.lane.b32.xlu1 %v19889_v2, %s19555_s18 }
 0x132   : > { %2493 = vmatpush1.bf16.msra.mxu0 %v18100_v6  ;;  %v18106_v6 = vld [vmem:[#allocation9 + $0x120] sm:$0xff]  }
 0x133   : > { %16412 = vmatprep.subr.bf16.mxu0 %v20067_v12 }
 0x134   : > { %634 = vrot.lane.b32.xlu0 %v19892_v3, %s19555_s18 }
 0x135   : > { %636 = vrot.lane.b32.xlu1 %v19897_v4, %s19555_s18 }
 0x136   : > { %2792 = vmatmul.mubr.bf16.gmra.mrb[4].mxu1 %v22638_v0 }
 0x137   : > { %2799 = vmatprep.mubr.bf16.mxu1 %v22638_v0 }
 0x138   : > { %638 = vrot.lane.b32.xlu0 %v19900_v7, %s19555_s18 }
 0x139   : > { %640 = vrot.lane.b32.xlu1 %v19902_v8, %s19555_s18 }
 0x13c   : > { %642 = vrot.lane.b32.xlu0 %v19906_v11, %s19555_s18 }
 0x13d   : > { %644 = vrot.lane.b32.xlu1 %v19908_v13, %s19555_s18  ;;  %s19567_s18 = smov 56  }
 0x13e   : > { %2800 = vmatmul.mubr.bf16.gmra.mrb[8].mxu1 %v22638_v0 }
 0x13f   : > { %2807 = vmatprep.mubr.bf16.mxu1 %v22638_v0 }
 0x140   : > { %646 = vrot.lane.b32.xlu0 %v19887_v1, %s19556_s19 }
 0x141   : > { %648 = vrot.lane.b32.xlu1 %v19889_v2, %s19556_s19 }
 0x144   : > { %650 = vrot.lane.b32.xlu0 %v19892_v3, %s19556_s19 }
 0x145   : > { %652 = vrot.lane.b32.xlu1 %v19897_v4, %s19556_s19 }
 0x146   : > { %2808 = vmatmul.mubr.bf16.gmra.mrb[12].mxu1 %v22638_v0 }
 0x147   : > { %2815 = vmatprep.mubr.bf16.mxu1 %v22638_v0 }
 0x148   : > { %654 = vrot.lane.b32.xlu0 %v19900_v7, %s19556_s19 }
 0x149   : > { %656 = vrot.lane.b32.xlu1 %v19902_v8, %s19556_s19 }
 0x14c   : > { %658 = vrot.lane.b32.xlu0 %v19906_v11, %s19556_s19 }
 0x14d   : > { %660 = vrot.lane.b32.xlu1 %v19908_v13, %s19556_s19 }
 0x14e   : > { %2816 = vmatmul.mubr.bf16.gmra.mrb[16].mxu1 %v22638_v0 }
 0x14f   : > { %2823 = vmatprep.mubr.bf16.mxu1 %v22638_v0 }
 0x150   : > { %662 = vrot.lane.b32.xlu0 %v19887_v1, %s19557_s16  ;;  %v18099_v1 = vld [vmem:[#allocation9 + $0x100] sm:$0xff]  }
 0x151   : > { %664 = vrot.lane.b32.xlu1 %v19889_v2, %s19557_s16  ;;  %3041 = vmatpush1.bf16.msra.mxu1 %v18099_v1 }
 0x152   : > { %3042 = vmatprep.subr.bf16.mxu1 %v22638_v0 }
 0x154   : > { %666 = vrot.lane.b32.xlu0 %v19892_v3, %s19557_s16 }
 0x155   : > { %668 = vrot.lane.b32.xlu1 %v19897_v4, %s19557_s16 }
 0x156   : > { %2824 = vmatmul.mubr.bf16.gmra.mrb[20].mxu1 %v22638_v0 }
 0x157   : > { %2831 = vmatprep.mubr.bf16.mxu1 %v22638_v0 }
 0x158   : > { %670 = vrot.lane.b32.xlu0 %v19900_v7, %s19557_s16  ;;  %v18101_v7 = vld [vmem:[#allocation9 + $0x108] sm:$0xff]  }
 0x159   : > { %672 = vrot.lane.b32.xlu1 %v19902_v8, %s19557_s16  ;;  %3043 = vmatpush1.bf16.msra.mxu1 %v18101_v7 }
 0x15a   : > { %3044 = vmatprep.subr.bf16.mxu1 %v22638_v0 }
 0x15c   : > { %674 = vrot.lane.b32.xlu0 %v19906_v11, %s19557_s16 }
 0x15d   : > { %676 = vrot.lane.b32.xlu1 %v19908_v13, %s19557_s16  ;;  %v18103_v13 = vld [vmem:[#allocation9 + $0x110] sm:$0xff]   ;;  %s19568_s16 = smov 50  }
 0x15e   : > { %2832 = vmatmul.mubr.bf16.gmra.mrb[24].mxu1 %v22638_v0 }
 0x15f   : > { %2839 = vmatprep.mubr.bf16.mxu1 %v22638_v0  ;;  %3045 = vmatpush1.bf16.msra.mxu1 %v18103_v13 }
 0x160   : > { %3046 = vmatprep.subr.bf16.mxu1 %v22638_v0 }
 0x162   : > { %v567_v33 = vpop.permute.xlu0 %566 }
 0x163   : > { %16300 = vmatprep.mubr.msk.bf16.mxu0 %vm692_vm0, %v567_v33  ;;  %v571_v34 = vpop.permute.xlu1 %570  ;;  %3047 = vmatpush1.bf16.msra.mxu1 %v18104_v32 }
 0x164   : > { %3048 = vmatprep.subr.bf16.mxu1 %v22638_v0 }
 0x166   : > { %v569_v35 = vpop.permute.xlu0 %568  ;;  %2840 = vmatmul.mubr.bf16.gmra.mrb[28].mxu1 %v22638_v0 }
 0x167   : > { %16301 = vmatmul.mubr.msk.bf16.gmra.mrb[16].mxu0 %vm692_vm0, %v569_v35  ;;  %v573_v39 = vpop.permute.xlu1 %572  ;;  %3049 = vmatpush1.bf16.msra.mxu1 %v18106_v6 }
 0x168   : > { %16304 = vmatprep.mubr.msk.bf16.mxu0 %vm692_vm0, %v571_v34  ;;  %3050 = vmatprep.subr.bf16.mxu1 %v22638_v0 }
 0x16a   : > { %v575_v40 = vpop.permute.xlu0 %574 }
 0x16b   : > { %v577_v43 = vpop.permute.xlu1 %576 }
 0x16e   : > { %v579_v44 = vpop.permute.xlu0 %578 }
 0x16f   : > { %16305 = vmatmul.mubr.msk.bf16.gmra.mrb[20].mxu0 %vm692_vm0, %v573_v39  ;;  %v581_v48 = vpop.permute.xlu1 %580 }
 0x170   : > { %16308 = vmatprep.mubr.msk.bf16.mxu0 %vm692_vm0, %v575_v40 }
 0x172   : > { %v583_v49 = vpop.permute.xlu0 %582 }
 0x173   : > { %v585_v51 = vpop.permute.xlu1 %584 }
 0x176   : > { %v587_v52 = vpop.permute.xlu0 %586 }
 0x177   : > { %16309 = vmatmul.mubr.msk.bf16.gmra.mrb[24].mxu0 %vm692_vm0, %v577_v43  ;;  %v589_v54 = vpop.permute.xlu1 %588 }
 0x178   : > { %16312 = vmatprep.mubr.msk.bf16.mxu0 %vm692_vm0, %v579_v44 }
 0x17a   : > { %v591_v55 = vpop.permute.xlu0 %590 }
 0x17b   : > { %v593_v56 = vpop.permute.xlu1 %592 }
 0x17e   : > { %v595_v57 = vpop.permute.xlu0 %594 }
 0x17f   : > { %16313 = vmatmul.mubr.msk.bf16.gmra.mrb[28].mxu0 %vm692_vm0, %v581_v48  ;;  %v597_v59 = vpop.permute.xlu1 %596 }
 0x180   : > { %16316 = vmatprep.mubr.msk.bf16.mxu0 %vm692_vm0, %v583_v49 }
 0x182   : > { %v599_v60 = vpop.permute.xlu0 %598 }
 0x183   : > { %v601_v61 = vpop.permute.xlu1 %600 }
 0x186   : > { %v603_v62 = vpop.permute.xlu0 %602 }
 0x187   : > { %16317 = vmatmul.mubr.msk.bf16.gmra.mrb[32].mxu0 %vm692_vm0, %v585_v51  ;;  %v605_v2 = vpop.permute.xlu1 %604 }
 0x188   : > { %16320 = vmatprep.mubr.msk.bf16.mxu0 %vm692_vm0, %v587_v52 }
 0x18a   : > { %v607_v3 = vpop.permute.xlu0 %606 }
 0x18b   : > { %v609_v4 = vpop.permute.xlu1 %608 }
 0x18e   : > { %v611_v5 = vpop.permute.xlu0 %610 }
 0x18f   : > { %16321 = vmatmul.mubr.msk.bf16.gmra.mrb[36].mxu0 %vm692_vm0, %v589_v54  ;;  %v613_v8 = vpop.permute.xlu1 %612 }
 0x190   : > { %16324 = vmatprep.mubr.msk.bf16.mxu0 %vm692_vm0, %v591_v55 }
 0x192   : > { %v615_v9 = vpop.permute.xlu0 %614 }
 0x193   : > { %v617_v10 = vpop.permute.xlu1 %616 }
 0x196   : > { %v619_v11 = vpop.permute.xlu0 %618 }
 0x197   : > { %16325 = vmatmul.mubr.msk.bf16.gmra.mrb[40].mxu0 %vm692_vm0, %v593_v56  ;;  %v621_v14 = vpop.permute.xlu1 %620 }
 0x198   : > { %16328 = vmatprep.mubr.msk.bf16.mxu0 %vm692_vm0, %v595_v57 }
 0x19a   : > { %v623_v15 = vpop.permute.xlu0 %622 }
 0x19b   : > { %v625_v22 = vpop.permute.xlu1 %624 }
 0x19e   : > { %v627_v26 = vpop.permute.xlu0 %626 }
 0x19f   : > { %16329 = vmatmul.mubr.msk.bf16.gmra.mrb[44].mxu0 %vm692_vm0, %v597_v59  ;;  %v629_v39 = vpop.permute.xlu1 %628 }
 0x1a0   : > { %16332 = vmatprep.mubr.msk.bf16.mxu0 %vm692_vm0, %v599_v60 }
 0x1a2   : > { %v631_v43 = vpop.permute.xlu0 %630 }
 0x1a3   : > { %v633_v55 = vpop.permute.xlu1 %632 }
 0x1a6   : > { %v635_v59 = vpop.permute.xlu0 %634 }
 0x1a7   : > { %16333 = vmatmul.mubr.msk.bf16.gmra.mrb[48].mxu0 %vm692_vm0, %v601_v61 }
 0x1a8   : > { %16336 = vmatprep.mubr.msk.bf16.mxu0 %vm692_vm0, %v603_v62 }
 0x1af   : > { %16337 = vmatmul.mubr.msk.bf16.gmra.mrb[52].mxu0 %vm692_vm0, %v605_v2 }
 0x1b0   : > { %16340 = vmatprep.mubr.msk.bf16.mxu0 %vm692_vm0, %v607_v3 }
 0x1b7   : > { %16341 = vmatmul.mubr.msk.bf16.gmra.mrb[56].mxu0 %vm692_vm0, %v609_v4 }
 0x1b8   : > { %16344 = vmatprep.mubr.msk.bf16.mxu0 %vm692_vm0, %v611_v5 }
 0x1bf   : > { %16345 = vmatmul.mubr.msk.bf16.gmra.mrb[60].mxu0 %vm692_vm0, %v613_v8 }
 0x1c0   : > { %16348 = vmatprep.mubr.msk.bf16.mxu0 %vm692_vm0, %v615_v9  ;;  %v637_v9 = vpop.permute.xlu1 %636 }
 0x1c7   : > { %16349 = vmatmul.mubr.msk.bf16.gmra.mrb[64].mxu0 %vm692_vm0, %v617_v10  ;;  %v16286_v17 = vpop.f32.mrb[0].mxu0 }
 0x1c8   : > { %16352 = vmatprep.mubr.msk.bf16.mxu0 %vm692_vm0, %v619_v11  ;;  %v935_v18 = vadd.f32 %v16286_v17, %v20071_v16  ;;  %v926_v19 = vpop.f32.mrb[1].mxu0 }
 0x1c9   : > { %v927_v20 = vadd.f32 %v20071_v16, %v926_v19  ;;  %v16287_v21 = vpop.f32.mrb[2].mxu0 }
 0x1ca   : > { %v1439_v23 = vmax.f32 %v935_v18, 0.0  ;;  %v938_v24 = vadd.f32 %v16287_v21, %v20071_v16  ;;  %v929_v25 = vpop.f32.mrb[3].mxu0 }
 0x1cb   : > { %v1437_v27 = vmax.f32 %v927_v20, 0.0  ;;  %v930_v28 = vadd.f32 %v20071_v16, %v929_v25 }
 0x1cc   : > { %v1440_v29 = vmax.f32 %v938_v24, 0.0  ;;  %v18107_v24 = vld [vmem:[#allocation9 + $0x128] sm:$0xff]  }
 0x1cd   : > { %v1438_v30 = vmax.f32 %v930_v28, 0.0  ;;  %3051 = vmatpush1.bf16.msra.mxu1 %v18107_v24 }
 0x1ce   : > { %v20081_v31 = vpack.c.bf16 %v1440_v29, %v1439_v23  ;;  %3052 = vmatprep.subr.bf16.mxu1 %v22638_v0  ;;  %v18109_v29 = vld [vmem:[#allocation9 + $0x130] sm:$0xff]  }
 0x1cf   : > { %16353 = vmatmul.mubr.msk.bf16.gmra.mrb[68].mxu0 %vm692_vm0, %v621_v14  ;;  %v16290_v33 = vpop.f32.mrb[4].mxu0  ;;  %v20083_v34 = vpack.c.bf16 %v1438_v30, %v1437_v27  ;;  %v639_v14 = vpop.permute.xlu0 %638 }
 0x1d0   : > { %16356 = vmatprep.mubr.msk.bf16.mxu0 %vm692_vm0, %v623_v15  ;;  %v951_v35 = vadd.f32 %v16290_v33, %v20071_v16  ;;  %v942_v36 = vpop.f32.mrb[5].mxu0 }
 0x1d1   : > { %v943_v37 = vadd.f32 %v20071_v16, %v942_v36  ;;  %v16291_v38 = vpop.f32.mrb[6].mxu0  ;;  %3053 = vmatpush1.bf16.msra.mxu1 %v18109_v29  ;;  %v18110_v36 = vld [vmem:[#allocation9 + $0x138] sm:$0xff]  }
 0x1d2   : > { %v1443_v40 = vmax.f32 %v951_v35, 0.0  ;;  %v954_v41 = vadd.f32 %v16291_v38, %v20071_v16  ;;  %v945_v42 = vpop.f32.mrb[7].mxu0  ;;  %3054 = vmatprep.subr.bf16.mxu1 %v22638_v0 }
 0x1d3   : > { %v1441_v44 = vmax.f32 %v943_v37, 0.0  ;;  %v946_v45 = vadd.f32 %v20071_v16, %v945_v42  ;;  %v643_v23 = vpop.permute.xlu0 %642 }
 0x1d4   : > { %v1444_v46 = vmax.f32 %v954_v41, 0.0  ;;  %v18112_v41 = vld [vmem:[#allocation9 + $0x140] sm:$0xff]  }
 0x1d5   : > { %v1442_v47 = vmax.f32 %v946_v45, 0.0  ;;  %3055 = vmatpush1.bf16.msra.mxu1 %v18110_v36 }
 0x1d6   : > { %v20092_v48 = vpack.c.bf16 %v1444_v46, %v1443_v40  ;;  %3056 = vmatprep.subr.bf16.mxu1 %v22638_v0  ;;  %v18113_v46 = vld [vmem:[#allocation9 + $0x148] sm:$0xff]  }
 0x1d7   : > { %16357 = vmatmul.mubr.msk.bf16.gmra.mrb[72].mxu0 %vm692_vm0, %v625_v22  ;;  %v16294_v49 = vpop.f32.mrb[8].mxu0  ;;  %v20094_v50 = vpack.c.bf16 %v1442_v47, %v1441_v44  ;;  %v641_v22 = vpop.permute.xlu1 %640 }
 0x1d8   : > { %16360 = vmatprep.mubr.msk.bf16.mxu0 %vm692_vm0, %v627_v26  ;;  %v967_v51 = vadd.f32 %v16294_v49, %v20071_v16  ;;  %v958_v52 = vpop.f32.mrb[9].mxu0  ;;  %v647_v26 = vpop.permute.xlu0 %646 }
 0x1d9   : > { %v959_v53 = vadd.f32 %v20071_v16, %v958_v52  ;;  %v16295_v54 = vpop.f32.mrb[10].mxu0  ;;  %3057 = vmatpush1.bf16.msra.mxu1 %v18112_v41 }
 0x1da   : > { %v1447_v56 = vmax.f32 %v967_v51, 0.0  ;;  %v970_v57 = vadd.f32 %v16295_v54, %v20071_v16  ;;  %v961_v58 = vpop.f32.mrb[11].mxu0  ;;  %3058 = vmatprep.subr.bf16.mxu1 %v22638_v0 }
 0x1db   : > { %v1445_v60 = vmax.f32 %v959_v53, 0.0  ;;  %v962_v61 = vadd.f32 %v20071_v16, %v961_v58  ;;  %v645_v25 = vpop.permute.xlu1 %644 }
 0x1dc   : > { %v1448_v62 = vmax.f32 %v970_v57, 0.0  ;;  %v651_v28 = vpop.permute.xlu0 %650 }
 0x1dd   : > { %v1446_v63 = vmax.f32 %v962_v61, 0.0  ;;  %3059 = vmatpush1.bf16.msra.mxu1 %v18113_v46 }
 0x1de   : > { %v20102_v1 = vpack.c.bf16 %v1448_v62, %v1447_v56  ;;  %3060 = vmatprep.subr.bf16.mxu1 %v22638_v0 }
 0x1df   : > { %16361 = vmatmul.mubr.msk.bf16.gmra.mrb[76].mxu0 %vm692_vm0, %v629_v39  ;;  %v16298_v2 = vpop.f32.mrb[12].mxu0  ;;  %v20104_v3 = vpack.c.bf16 %v1446_v63, %v1445_v60  ;;  %v649_v27 = vpop.permute.xlu1 %648 }
 0x1e0   : > { %16364 = vmatprep.mubr.msk.bf16.mxu0 %vm692_vm0, %v631_v43  ;;  %v983_v4 = vadd.f32 %v16298_v2, %v20071_v16  ;;  %v974_v5 = vpop.f32.mrb[13].mxu0  ;;  %v655_v32 = vpop.permute.xlu0 %654 }
 0x1e1   : > { %v975_v7 = vadd.f32 %v20071_v16, %v974_v5  ;;  %v16299_v8 = vpop.f32.mrb[14].mxu0 }
 0x1e2   : > { %v1451_v10 = vmax.f32 %v983_v4, 0.0  ;;  %v986_v11 = vadd.f32 %v16299_v8, %v20071_v16  ;;  %v977_v13 = vpop.f32.mrb[15].mxu0 }
 0x1e3   : > { %v1449_v15 = vmax.f32 %v975_v7, 0.0  ;;  %v978_v17 = vadd.f32 %v20071_v16, %v977_v13  ;;  %v653_v30 = vpop.permute.xlu1 %652 }
 0x1e4   : > { %v1452_v18 = vmax.f32 %v986_v11, 0.0  ;;  %v659_v35 = vpop.permute.xlu0 %658 }
 0x1e5   : > { %v1450_v19 = vmax.f32 %v978_v17, 0.0 }
 0x1e6   : > { %v20113_v20 = vpack.c.bf16 %v1452_v18, %v1451_v10  ;;  %v18105_v10 = vld [vmem:[#allocation9 + $0x208] sm:$0xff]   ;;  %v18115_v18 = vld [vmem:[#allocation9 + $0x150] sm:$0xff]  }
 0x1e7   : > { %16365 = vmatmul.mubr.msk.bf16.gmra.mrb[80].mxu0 %vm692_vm0, %v633_v55  ;;  %v20115_v21 = vpack.c.bf16 %v1450_v19, %v1449_v15  ;;  %v657_v33 = vpop.permute.xlu1 %656  ;;  %3061 = vmatpush1.bf16.msra.mxu1 %v18115_v18 }
 0x1e8   : > { %16368 = vmatprep.mubr.msk.bf16.mxu0 %vm692_vm0, %v635_v59  ;;  %v663_v38 = vpop.permute.xlu0 %662  ;;  %3062 = vmatprep.subr.bf16.mxu1 %v22638_v0 }
 0x1eb   : > { %v661_v37 = vpop.permute.xlu1 %660 }
 0x1ec   : > { %v667_v40 = vpop.permute.xlu0 %666 }
 0x1ef   : > { %16369 = vmatmul.mubr.msk.bf16.gmra.mrb[84].mxu0 %vm692_vm0, %v637_v9  ;;  %v665_v39 = vpop.permute.xlu1 %664 }
 0x1f0   : > { %16372 = vmatprep.mubr.msk.bf16.mxu0 %vm692_vm0, %v639_v14  ;;  %v671_v43 = vpop.permute.xlu0 %670 }
 0x1f3   : > { %v669_v42 = vpop.permute.xlu1 %668 }
 0x1f4   : > { %v675_v45 = vpop.permute.xlu0 %674 }
 0x1f7   : > { %16373 = vmatmul.mubr.msk.bf16.gmra.mrb[88].mxu0 %vm692_vm0, %v641_v22  ;;  %v673_v44 = vpop.permute.xlu1 %672  ;;  %v18108_v22 = vld [vmem:[#allocation9 + $0x210] sm:$0xff]  }
 0x1f8   : > { %16376 = vmatprep.mubr.msk.bf16.mxu0 %vm692_vm0, %v643_v23 }
 0x1fb   : > { %v677_v54 = vpop.permute.xlu1 %676 }
 0x1ff   : > { %16377 = vmatmul.mubr.msk.bf16.gmra.mrb[92].mxu0 %vm692_vm0, %v645_v25 }
 0x200   : > { %16380 = vmatprep.mubr.msk.bf16.mxu0 %vm692_vm0, %v647_v26 }
 0x207   : > { %16381 = vmatmul.mubr.msk.bf16.gmra.mrb[96].mxu0 %vm692_vm0, %v649_v27 }
 0x208   : > { %16384 = vmatprep.mubr.msk.bf16.mxu0 %vm692_vm0, %v651_v28 }
 0x20f   : > { %16385 = vmatmul.mubr.msk.bf16.gmra.mrb[100].mxu0 %vm692_vm0, %v653_v30  ;;  %v18111_v30 = vld [vmem:[#allocation9 + $0x218] sm:$0xff]  }
 0x210   : > { %16388 = vmatprep.mubr.msk.bf16.mxu0 %vm692_vm0, %v655_v32 }
 0x217   : > { %16389 = vmatmul.mubr.msk.bf16.gmra.mrb[104].mxu0 %vm692_vm0, %v657_v33 }
 0x218   : > { %16392 = vmatprep.mubr.msk.bf16.mxu0 %vm692_vm0, %v659_v35 }
 0x21f   : > { %16393 = vmatmul.mubr.msk.bf16.gmra.mrb[108].mxu0 %vm692_vm0, %v661_v37 }
 0x220   : > { %16396 = vmatprep.mubr.msk.bf16.mxu0 %vm692_vm0, %v663_v38 }
 0x227   : > { %16397 = vmatmul.mubr.msk.bf16.gmra.mrb[112].mxu0 %vm692_vm0, %v665_v39  ;;  %v18114_v39 = vld [vmem:[#allocation9 + $0x220] sm:$0xff]  }
 0x228   : > { %16400 = vmatprep.mubr.msk.bf16.mxu0 %vm692_vm0, %v667_v40 }
 0x22f   : > { %16401 = vmatmul.mubr.msk.bf16.gmra.mrb[116].mxu0 %vm692_vm0, %v669_v42  ;;  %v20177_v42 = vld [vmem:[#allocation7] ss:$0 sm:$0xff] }
 0x230   : > { %16404 = vmatprep.mubr.msk.bf16.mxu0 %vm692_vm0, %v671_v43 }
 0x237   : > { %16405 = vmatmul.mubr.msk.bf16.gmra.mrb[120].mxu0 %vm692_vm0, %v673_v44 }
 0x238   : > { %16408 = vmatprep.mubr.msk.bf16.mxu0 %vm692_vm0, %v675_v45 }
 0x23a   : > { %v16302_v47 = vpop.f32.mrb[16].mxu0 }
 0x23b   : > { %v999_v49 = vadd.f32 %v16302_v47, %v20071_v16  ;;  %v990_v51 = vpop.f32.mrb[17].mxu0 }
 0x23c   : > { %v991_v52 = vadd.f32 %v20071_v16, %v990_v51  ;;  %v16303_v53 = vpop.f32.mrb[18].mxu0 }
 0x23d   : > { %v1002_v55 = vadd.f32 %v16303_v53, %v20071_v16  ;;  %v993_v56 = vpop.f32.mrb[19].mxu0  ;;  %v1455_v58 = vmax.f32 %v999_v49, 0.0 }
 0x23e   : > { %v994_v57 = vadd.f32 %v20071_v16, %v993_v56  ;;  %v1453_v60 = vmax.f32 %v991_v52, 0.0 }
 0x23f   : > { %v1456_v59 = vmax.f32 %v1002_v55, 0.0  ;;  %16409 = vmatmul.mubr.msk.bf16.gmra.mrb[124].mxu0 %vm692_vm0, %v677_v54  ;;  %v18116_v55 = vld [vmem:[#allocation9 + $0x158] sm:$0xff]  }
 0x240   : > { %v1454_v61 = vmax.f32 %v994_v57, 0.0  ;;  %2494 = vmatprep.mubr.bf16.mxu0 %v22638_v0  ;;  %3063 = vmatpush1.bf16.msra.mxu1 %v18116_v55 }
 0x241   : > { %v20146_v62 = vpack.c.bf16 %v1456_v59, %v1455_v58  ;;  %3064 = vmatprep.subr.bf16.mxu1 %v22638_v0 }
 0x242   : > { %v16306_v63 = vpop.f32.mrb[20].mxu0  ;;  %v20148_v2 = vpack.c.bf16 %v1454_v61, %v1453_v60 }
 0x243   : > { %v1015_v4 = vadd.f32 %v16306_v63, %v20071_v16  ;;  %v1006_v5 = vpop.f32.mrb[21].mxu0 }
 0x244   : > { %v1007_v6 = vadd.f32 %v20071_v16, %v1006_v5  ;;  %v16307_v7 = vpop.f32.mrb[22].mxu0  ;;  %2847 = vmatprep.mubr.bf16.mxu1 %v20148_v2 }
 0x245   : > { %v1018_v8 = vadd.f32 %v16307_v7, %v20071_v16  ;;  %v1009_v9 = vpop.f32.mrb[23].mxu0  ;;  %2848 = vmatmul.mubr.bf16.gmra.mrb[32].mxu1 %v20083_v34  ;;  %v1459_v13 = vmax.f32 %v1015_v4, 0.0 }
 0x246   : > { %v1010_v11 = vadd.f32 %v20071_v16, %v1009_v9  ;;  %2855 = vmatprep.mubr.bf16.mxu1 %v20146_v62  ;;  %v1457_v15 = vmax.f32 %v1007_v6, 0.0 }
 0x247   : > { %v1460_v14 = vmax.f32 %v1018_v8, 0.0  ;;  %2495 = vmatmul.mubr.bf16.vlgmr.msra.gmra.mrb[128].mxu0 %v22638_v0 }
 0x248   : > { %v1458_v17 = vmax.f32 %v1010_v11, 0.0  ;;  %16413 = vmatpush3.bf16.msra.mxu0 %v20067_v12  ;;  %2502 = vmatprep.mubr.bf16.mxu0 %v22638_v0 }
 0x249   : > { %v20160_v19 = vpack.c.bf16 %v1460_v14, %v1459_v13  ;;  %16414 = vmatprep.subr.bf16.mxu0 %v18105_v10 }
 0x24a   : > { %v16310_v23 = vpop.f32.mrb[24].mxu0  ;;  %v20162_v24 = vpack.c.bf16 %v1458_v17, %v1457_v15 }
 0x24b   : > { %v1031_v25 = vadd.f32 %v16310_v23, %v20071_v16  ;;  %v1022_v26 = vpop.f32.mrb[25].mxu0 }
 0x24c   : > { %v1023_v27 = vadd.f32 %v20071_v16, %v1022_v26  ;;  %v16311_v28 = vpop.f32.mrb[26].mxu0  ;;  %16415 = vmatpush3.bf16.msra.mxu0 %v18105_v10 }
 0x24d   : > { %v1034_v12 = vadd.f32 %v16311_v28, %v20071_v16  ;;  %v1025_v29 = vpop.f32.mrb[27].mxu0  ;;  %2856 = vmatmul.mubr.bf16.gmra.mrb[36].mxu1 %v20081_v31  ;;  %16416 = vmatprep.subr.bf16.mxu0 %v18108_v22  ;;  %v1463_v33 = vmax.f32 %v1031_v25, 0.0 }
 0x24e   : > { %v1026_v32 = vadd.f32 %v20071_v16, %v1025_v29  ;;  %2863 = vmatprep.mubr.bf16.mxu1 %v20162_v24  ;;  %v1461_v36 = vmax.f32 %v1023_v27, 0.0  ;;  %v18117_v27 = vld [vmem:[#allocation9 + $0x228] sm:$0xff]  }
 0x24f   : > { %v1464_v35 = vmax.f32 %v1034_v12, 0.0  ;;  %2503 = vmatmul.mubr.bf16.gmra.mrb[132].mxu0 %v22638_v0 }
 0x250   : > { %v1462_v37 = vmax.f32 %v1026_v32, 0.0  ;;  %2510 = vmatprep.mubr.bf16.mxu0 %v22638_v0  ;;  %16417 = vmatpush3.bf16.msra.mxu0 %v18108_v22  ;;  %v18118_v32 = vld [vmem:[#allocation9 + $0x160] sm:$0xff]  }
 0x251   : > { %v20173_v38 = vpack.c.bf16 %v1464_v35, %v1463_v33  ;;  %16418 = vmatprep.subr.bf16.mxu0 %v18111_v30  ;;  %3065 = vmatpush1.bf16.msra.mxu1 %v18118_v32 }
 0x252   : > { %v16314_v40 = vpop.f32.mrb[28].mxu0  ;;  %v20175_v41 = vpack.c.bf16 %v1462_v37, %v1461_v36  ;;  %3066 = vmatprep.subr.bf16.mxu1 %v22638_v0 }
 0x253   : > { %v1047_v16 = vadd.f32 %v20177_v42, %v16314_v40  ;;  %v1038_v43 = vpop.f32.mrb[29].mxu0 }
 0x254   : > { %v1039_v44 = vadd.f32 %v20177_v42, %v1038_v43  ;;  %v16315_v45 = vpop.f32.mrb[30].mxu0  ;;  %16419 = vmatpush3.bf16.msra.mxu0 %v18111_v30 }
 0x255   : > { %v1050_v46 = vadd.f32 %v20177_v42, %v16315_v45  ;;  %v1041_v47 = vpop.f32.mrb[31].mxu0  ;;  %2864 = vmatmul.mubr.bf16.gmra.mrb[40].mxu1 %v20094_v50  ;;  %16420 = vmatprep.subr.bf16.mxu0 %v18114_v39  ;;  %v1467_v51 = vmax.f32 %v1047_v16, 0.0 }
 0x256   : > { %v1042_v49 = vadd.f32 %v20177_v42, %v1041_v47  ;;  %2871 = vmatprep.mubr.bf16.mxu1 %v20160_v19  ;;  %v1465_v53 = vmax.f32 %v1039_v44, 0.0 }
 0x257   : > { %v1468_v52 = vmax.f32 %v1050_v46, 0.0  ;;  %2511 = vmatmul.mubr.bf16.gmra.mrb[136].mxu0 %v22638_v0 }
 0x258   : > { %v1466_v54 = vmax.f32 %v1042_v49, 0.0  ;;  %2518 = vmatprep.mubr.bf16.mxu0 %v22638_v0  ;;  %16421 = vmatpush3.bf16.msra.mxu0 %v18114_v39 }
 0x259   : > { %v20187_v56 = vpack.c.bf16 %v1468_v52, %v1467_v51  ;;  %16422 = vmatprep.subr.bf16.mxu0 %v18117_v27 }
 0x25a   : > { %v16318_v57 = vpop.f32.mrb[32].mxu0  ;;  %v20189_v58 = vpack.c.bf16 %v1466_v54, %v1465_v53 }
 0x25b   : > { %v1063_v59 = vadd.f32 %v20177_v42, %v16318_v57  ;;  %v1054_v60 = vpop.f32.mrb[33].mxu0 }
 0x25c   : > { %v1055_v61 = vadd.f32 %v20177_v42, %v1054_v60  ;;  %v16319_v63 = vpop.f32.mrb[34].mxu0  ;;  %16423 = vmatpush3.bf16.msra.mxu0 %v18117_v27 }
 0x25d   : > { %v1066_v4 = vadd.f32 %v20177_v42, %v16319_v63  ;;  %v1057_v5 = vpop.f32.mrb[35].mxu0  ;;  %2872 = vmatmul.mubr.bf16.gmra.mrb[44].mxu1 %v20092_v48  ;;  %v1471_v7 = vmax.f32 %v1063_v59, 0.0 }
 0x25e   : > { %v1058_v6 = vadd.f32 %v20177_v42, %v1057_v5  ;;  %2879 = vmatprep.mubr.bf16.mxu1 %v20175_v41  ;;  %v1469_v9 = vmax.f32 %v1055_v61, 0.0 }
 0x25f   : > { %v1472_v8 = vmax.f32 %v1066_v4, 0.0  ;;  %2519 = vmatmul.mubr.bf16.gmra.mrb[140].mxu0 %v22638_v0 }
 0x260   : > { %v1470_v10 = vmax.f32 %v1058_v6, 0.0  ;;  %2526 = vmatprep.mubr.bf16.mxu0 %v22638_v0 }
 0x261   : > { %v20200_v11 = vpack.c.bf16 %v1472_v8, %v1471_v7 }
 0x262   : > { %v20202_v13 = vpack.c.bf16 %v1470_v10, %v1469_v9  ;;  %v16322_v14 = vpop.f32.mrb[36].mxu0  ;;  %v18119_v9 = vld [vmem:[#allocation9 + $0x168] sm:$0xff]  }
 0x263   : > { %v1079_v15 = vadd.f32 %v20177_v42, %v16322_v14  ;;  %v1070_v17 = vpop.f32.mrb[37].mxu0  ;;  %3067 = vmatpush1.bf16.msra.mxu1 %v18119_v9 }
 0x264   : > { %v1071_v18 = vadd.f32 %v20177_v42, %v1070_v17  ;;  %v16323_v22 = vpop.f32.mrb[38].mxu0  ;;  %3068 = vmatprep.subr.bf16.mxu1 %v22638_v0 }
 0x265   : > { %v1082_v23 = vadd.f32 %v20177_v42, %v16323_v22  ;;  %v1073_v25 = vpop.f32.mrb[39].mxu0  ;;  %2880 = vmatmul.mubr.bf16.gmra.mrb[48].mxu1 %v20104_v3  ;;  %v1475_v28 = vmax.f32 %v1079_v15, 0.0 }
 0x266   : > { %v1074_v26 = vadd.f32 %v20177_v42, %v1073_v25  ;;  %2887 = vmatprep.mubr.bf16.mxu1 %v20173_v38  ;;  %v1473_v29 = vmax.f32 %v1071_v18, 0.0  ;;  %v18120_v25 = vld [vmem:[#allocation9 + $0x170] sm:$0xff]  }
 0x267   : > { %v1476_v12 = vmax.f32 %v1082_v23, 0.0  ;;  %2527 = vmatmul.mubr.bf16.gmra.mrb[144].mxu0 %v22638_v0  ;;  %3069 = vmatpush1.bf16.msra.mxu1 %v18120_v25 }
 0x268   : > { %v1474_v30 = vmax.f32 %v1074_v26, 0.0  ;;  %2534 = vmatprep.mubr.bf16.mxu0 %v22638_v0  ;;  %3070 = vmatprep.subr.bf16.mxu1 %v22638_v0 }
 0x269   : > { %v20212_v33 = vpack.c.bf16 %v1476_v12, %v1475_v28 }
 0x26a   : > { %v20214_v35 = vpack.c.bf16 %v1474_v30, %v1473_v29  ;;  %v16326_v36 = vpop.f32.mrb[40].mxu0 }
 0x26b   : > { %v1095_v37 = vadd.f32 %v20177_v42, %v16326_v36  ;;  %v1086_v39 = vpop.f32.mrb[41].mxu0  ;;  %v18121_v36 = vld [vmem:[#allocation9 + $0x178] sm:$0xff]  }
 0x26c   : > { %v1087_v40 = vadd.f32 %v20177_v42, %v1086_v39  ;;  %v16327_v16 = vpop.f32.mrb[42].mxu0  ;;  %3071 = vmatpush1.bf16.msra.mxu1 %v18121_v36 }
 0x26d   : > { %v1098_v43 = vadd.f32 %v20177_v42, %v16327_v16  ;;  %v1089_v44 = vpop.f32.mrb[43].mxu0  ;;  %2888 = vmatmul.mubr.bf16.gmra.mrb[52].mxu1 %v20102_v1  ;;  %v1479_v46 = vmax.f32 %v1095_v37, 0.0  ;;  %3329 = vmatprep.subr.bf16.mxu1 %v22638_v0 }
 0x26e   : > { %v1090_v45 = vadd.f32 %v20177_v42, %v1089_v44  ;;  %2895 = vmatprep.mubr.bf16.mxu1 %v20189_v58  ;;  %v1477_v49 = vmax.f32 %v1087_v40, 0.0 }
 0x26f   : > { %v1480_v47 = vmax.f32 %v1098_v43, 0.0  ;;  %2535 = vmatmul.mubr.bf16.gmra.mrb[148].mxu0 %v22638_v0 }
 0x270   : > { %v1478_v51 = vmax.f32 %v1090_v45, 0.0  ;;  %2542 = vmatprep.mubr.bf16.mxu0 %v22638_v0 }
 0x271   : > { %v20225_v52 = vpack.c.bf16 %v1480_v47, %v1479_v46 }
 0x272   : > { %v20227_v53 = vpack.c.bf16 %v1478_v51, %v1477_v49  ;;  %v16330_v54 = vpop.f32.mrb[44].mxu0  ;;  %v18122_v51 = vld [vmem:[#allocation9 + $0x230] sm:$0xff]  }
 0x273   : > { %v1111_v55 = vadd.f32 %v20177_v42, %v16330_v54  ;;  %v1102_v57 = vpop.f32.mrb[45].mxu0  ;;  %16424 = vmatprep.subr.bf16.mxu0 %v18122_v51 }
 0x274   : > { %v1103_v59 = vadd.f32 %v20177_v42, %v1102_v57  ;;  %v16331_v60 = vpop.f32.mrb[46].mxu0  ;;  %16425 = vmatpush3.bf16.msra.mxu0 %v18122_v51 }
 0x275   : > { %v1114_v61 = vadd.f32 %v20177_v42, %v16331_v60  ;;  %v1105_v63 = vpop.f32.mrb[47].mxu0  ;;  %2896 = vmatmul.mubr.bf16.gmra.mrb[56].mxu1 %v20115_v21  ;;  %v1483_v5 = vmax.f32 %v1111_v55, 0.0 }
 0x276   : > { %v1106_v4 = vadd.f32 %v20177_v42, %v1105_v63  ;;  %2903 = vmatprep.mubr.bf16.mxu1 %v20187_v56  ;;  %v1481_v7 = vmax.f32 %v1103_v59, 0.0 }
 0x277   : > { %v1484_v6 = vmax.f32 %v1114_v61, 0.0  ;;  %2543 = vmatmul.mubr.bf16.gmra.mrb[152].mxu0 %v22638_v0 }
 0x278   : > { %v1482_v8 = vmax.f32 %v1106_v4, 0.0  ;;  %2550 = vmatprep.mubr.bf16.mxu0 %v22638_v0 }
 0x279   : > { %v20237_v10 = vpack.c.bf16 %v1484_v6, %v1483_v5 }
 0x27a   : > { %v20239_v14 = vpack.c.bf16 %v1482_v8, %v1481_v7  ;;  %v16334_v15 = vpop.f32.mrb[48].mxu0 }
 0x27b   : > { %v1127_v17 = vadd.f32 %v20177_v42, %v16334_v15  ;;  %v1118_v18 = vpop.f32.mrb[49].mxu0 }
 0x27c   : > { %v1119_v22 = vadd.f32 %v20177_v42, %v1118_v18  ;;  %v16335_v23 = vpop.f32.mrb[50].mxu0 }
 0x27d   : > { %v1130_v26 = vadd.f32 %v20177_v42, %v16335_v23  ;;  %v1121_v27 = vpop.f32.mrb[51].mxu0  ;;  %2904 = vmatmul.mubr.bf16.gmra.mrb[60].mxu1 %v20113_v20  ;;  %v1487_v12 = vmax.f32 %v1127_v17, 0.0 }
 0x27e   : > { %v1122_v28 = vadd.f32 %v20177_v42, %v1121_v27  ;;  %v1485_v30 = vmax.f32 %v1119_v22, 0.0 }
 0x27f   : > { %v1488_v29 = vmax.f32 %v1130_v26, 0.0  ;;  %2551 = vmatmul.mubr.bf16.gmra.mrb[156].mxu0 %v22638_v0 }
 0x280   : > { %v1486_v32 = vmax.f32 %v1122_v28, 0.0  ;;  %2558 = vmatprep.mubr.bf16.mxu0 %v22638_v0 }
 0x281   : > { %v20250_v37 = vpack.c.bf16 %v1488_v29, %v1487_v12 }
 0x282   : > { %v20252_v39 = vpack.c.bf16 %v1486_v32, %v1485_v30  ;;  %v16338_v40 = vpop.f32.mrb[52].mxu0 }
 0x283   : > { %v1143_v16 = vadd.f32 %v20177_v42, %v16338_v40  ;;  %v1134_v43 = vpop.f32.mrb[53].mxu0 }
 0x284   : > { %v1135_v44 = vadd.f32 %v20177_v42, %v1134_v43  ;;  %v16339_v45 = vpop.f32.mrb[54].mxu0  ;;  %2911 = vmatprep.mubr.bf16.mxu1 %v20252_v39 }
 0x285   : > { %v1146_v46 = vadd.f32 %v20177_v42, %v16339_v45  ;;  %v1137_v47 = vpop.f32.mrb[55].mxu0  ;;  %2912 = vmatmul.mubr.bf16.gmra.mrb[64].mxu1 %v20202_v13  ;;  %v1491_v54 = vmax.f32 %v1143_v16, 0.0 }
 0x286   : > { %v1138_v49 = vadd.f32 %v20177_v42, %v1137_v47  ;;  %2919 = vmatprep.mubr.bf16.mxu1 %v20250_v37  ;;  %v1489_v57 = vmax.f32 %v1135_v44, 0.0 }
 0x287   : > { %v1492_v55 = vmax.f32 %v1146_v46, 0.0  ;;  %2559 = vmatmul.mubr.bf16.gmra.mrb[160].mxu0 %v22638_v0 }
 0x288   : > { %v1490_v59 = vmax.f32 %v1138_v49, 0.0  ;;  %2566 = vmatprep.mubr.bf16.mxu0 %v22638_v0 }
 0x289   : > { %v20264_v60 = vpack.c.bf16 %v1492_v55, %v1491_v54 }
 0x28a   : > { %v20266_v61 = vpack.c.bf16 %v1490_v59, %v1489_v57  ;;  %v16342_v63 = vpop.f32.mrb[56].mxu0 }
 0x28b   : > { %v1159_v4 = vadd.f32 %v20177_v42, %v16342_v63  ;;  %v1150_v5 = vpop.f32.mrb[57].mxu0 }
 0x28c   : > { %v1151_v6 = vadd.f32 %v20177_v42, %v1150_v5  ;;  %v16343_v7 = vpop.f32.mrb[58].mxu0 }
 0x28d   : > { %v1162_v8 = vadd.f32 %v20177_v42, %v16343_v7  ;;  %v1153_v9 = vpop.f32.mrb[59].mxu0  ;;  %2920 = vmatmul.mubr.bf16.gmra.mrb[68].mxu1 %v20200_v11  ;;  %v1495_v17 = vmax.f32 %v1159_v4, 0.0 }
 0x28e   : > { %v1154_v15 = vadd.f32 %v20177_v42, %v1153_v9  ;;  %2927 = vmatprep.mubr.bf16.mxu1 %v20266_v61  ;;  %v1493_v22 = vmax.f32 %v1151_v6, 0.0 }
 0x28f   : > { %v1496_v18 = vmax.f32 %v1162_v8, 0.0  ;;  %2567 = vmatmul.mubr.bf16.gmra.mrb[164].mxu0 %v22638_v0 }
 0x290   : > { %v1494_v23 = vmax.f32 %v1154_v15, 0.0  ;;  %2574 = vmatprep.mubr.bf16.mxu0 %v22638_v0 }
 0x291   : > { %v20276_v25 = vpack.c.bf16 %v1496_v18, %v1495_v17 }
 0x292   : > { %v20278_v26 = vpack.c.bf16 %v1494_v23, %v1493_v22  ;;  %v16346_v27 = vpop.f32.mrb[60].mxu0 }
 0x293   : > { %v1175_v28 = vadd.f32 %v20177_v42, %v16346_v27  ;;  %v1166_v12 = vpop.f32.mrb[61].mxu0 }
 0x294   : > { %v1167_v29 = vadd.f32 %v20177_v42, %v1166_v12  ;;  %v16347_v30 = vpop.f32.mrb[62].mxu0 }
 0x295   : > { %v1178_v32 = vadd.f32 %v20177_v42, %v16347_v30  ;;  %v1169_v36 = vpop.f32.mrb[63].mxu0  ;;  %2928 = vmatmul.mubr.bf16.gmra.mrb[72].mxu1 %v20214_v35  ;;  %v1499_v16 = vmax.f32 %v1175_v28, 0.0  ;;  %v18123_v30 = vld [vmem:[#allocation9 + $0x238] sm:$0xff]  }
 0x296   : > { %v1170_v40 = vadd.f32 %v20177_v42, %v1169_v36  ;;  %2935 = vmatprep.mubr.bf16.mxu1 %v20264_v60  ;;  %v1497_v44 = vmax.f32 %v1167_v29, 0.0  ;;  %16426 = vmatprep.subr.bf16.mxu0 %v18123_v30 }
 0x297   : > { %v1500_v43 = vmax.f32 %v1178_v32, 0.0  ;;  %2575 = vmatmul.mubr.bf16.gmra.mrb[168].mxu0 %v22638_v0 }
 0x298   : > { %v1498_v45 = vmax.f32 %v1170_v40, 0.0  ;;  %2582 = vmatprep.mubr.bf16.mxu0 %v22638_v0  ;;  %16427 = vmatpush3.bf16.msra.mxu0 %v18123_v30 }
 0x299   : > { %v20288_v46 = vpack.c.bf16 %v1500_v43, %v1499_v16 }
 0x29a   : > { %v20290_v47 = vpack.c.bf16 %v1498_v45, %v1497_v44  ;;  %v16350_v49 = vpop.f32.mrb[64].mxu0 }
 0x29b   : > { %v1182_v51 = vpop.f32.mrb[65].mxu0  ;;  %v1191_v54 = vadd.f32 %v20177_v42, %v16350_v49 }
 0x29c   : > { %v16351_v55 = vpop.f32.mrb[66].mxu0  ;;  %v1183_v57 = vadd.f32 %v20177_v42, %v1182_v51 }
 0x29d   : > { %v1185_v59 = vpop.f32.mrb[67].mxu0  ;;  %2936 = vmatmul.mubr.bf16.gmra.mrb[76].mxu1 %v20212_v33  ;;  %v1194_v63 = vadd.f32 %v20177_v42, %v16351_v55  ;;  %v1503_v5 = vmax.f32 %v1191_v54, 0.0 }
 0x29e   : > { %2943 = vmatprep.mubr.bf16.mxu1 %v20278_v26  ;;  %v1186_v4 = vadd.f32 %v20177_v42, %v1185_v59  ;;  %v1501_v7 = vmax.f32 %v1183_v57, 0.0 }
 0x29f   : > { %2583 = vmatmul.mubr.bf16.gmra.mrb[172].mxu0 %v22638_v0  ;;  %v1504_v6 = vmax.f32 %v1194_v63, 0.0 }
 0x2a0   : > { %2590 = vmatprep.mubr.bf16.mxu0 %v22638_v0  ;;  %v1502_v8 = vmax.f32 %v1186_v4, 0.0 }
 0x2a1   : > { %v20300_v9 = vpack.c.bf16 %v1504_v6, %v1503_v5 }
 0x2a2   : > { %v16354_v15 = vpop.f32.mrb[68].mxu0  ;;  %v20302_v17 = vpack.c.bf16 %v1502_v8, %v1501_v7 }
 0x2a3   : > { %v1198_v18 = vpop.f32.mrb[69].mxu0  ;;  %v1207_v22 = vadd.f32 %v20177_v42, %v16354_v15 }
 0x2a4   : > { %v16355_v23 = vpop.f32.mrb[70].mxu0  ;;  %v1199_v27 = vadd.f32 %v20177_v42, %v1198_v18 }
 0x2a5   : > { %v1201_v28 = vpop.f32.mrb[71].mxu0  ;;  %2944 = vmatmul.mubr.bf16.gmra.mrb[80].mxu1 %v20227_v53  ;;  %v1210_v12 = vadd.f32 %v20177_v42, %v16355_v23  ;;  %v1507_v32 = vmax.f32 %v1207_v22, 0.0 }
 0x2a6   : > { %2951 = vmatprep.mubr.bf16.mxu1 %v20276_v25  ;;  %v1202_v29 = vadd.f32 %v20177_v42, %v1201_v28  ;;  %v1505_v40 = vmax.f32 %v1199_v27, 0.0 }
 0x2a7   : > { %2591 = vmatmul.mubr.bf16.gmra.mrb[176].mxu0 %v22638_v0  ;;  %v1508_v36 = vmax.f32 %v1210_v12, 0.0 }
 0x2a8   : > { %2598 = vmatprep.mubr.bf16.mxu0 %v22638_v0  ;;  %v1506_v16 = vmax.f32 %v1202_v29, 0.0 }
 0x2a9   : > { %v20312_v43 = vpack.c.bf16 %v1508_v36, %v1507_v32 }
 0x2aa   : > { %v16358_v44 = vpop.f32.mrb[72].mxu0  ;;  %v20314_v45 = vpack.c.bf16 %v1506_v16, %v1505_v40 }
 0x2ab   : > { %v1214_v49 = vpop.f32.mrb[73].mxu0  ;;  %v1223_v51 = vadd.f32 %v20177_v42, %v16358_v44 }
 0x2ac   : > { %v16359_v54 = vpop.f32.mrb[74].mxu0  ;;  %v1215_v55 = vadd.f32 %v20177_v42, %v1214_v49 }
 0x2ad   : > { %v1217_v57 = vpop.f32.mrb[75].mxu0  ;;  %2952 = vmatmul.mubr.bf16.gmra.mrb[84].mxu1 %v20225_v52  ;;  %v1226_v59 = vadd.f32 %v20177_v42, %v16359_v54  ;;  %v1511_v4 = vmax.f32 %v1223_v51, 0.0 }
 0x2ae   : > { %2959 = vmatprep.mubr.bf16.mxu1 %v20290_v47  ;;  %v1218_v63 = vadd.f32 %v20177_v42, %v1217_v57  ;;  %v1509_v6 = vmax.f32 %v1215_v55, 0.0 }
 0x2af   : > { %2599 = vmatmul.mubr.bf16.gmra.mrb[180].mxu0 %v22638_v0  ;;  %v1512_v5 = vmax.f32 %v1226_v59, 0.0 }
 0x2b0   : > { %2606 = vmatprep.mubr.bf16.mxu0 %v22638_v0  ;;  %v1510_v7 = vmax.f32 %v1218_v63, 0.0 }
 0x2b1   : > { %v20324_v8 = vpack.c.bf16 %v1512_v5, %v1511_v4 }
 0x2b2   : > { %v16362_v15 = vpop.f32.mrb[76].mxu0  ;;  %v20326_v18 = vpack.c.bf16 %v1510_v7, %v1509_v6 }
 0x2b3   : > { %v1230_v22 = vpop.f32.mrb[77].mxu0  ;;  %v1239_v23 = vadd.f32 %v20177_v42, %v16362_v15 }
 0x2b4   : > { %v16363_v27 = vpop.f32.mrb[78].mxu0  ;;  %v1231_v28 = vadd.f32 %v20177_v42, %v1230_v22 }
 0x2b5   : > { %v1233_v12 = vpop.f32.mrb[79].mxu0  ;;  %2960 = vmatmul.mubr.bf16.gmra.mrb[88].mxu1 %v20239_v14  ;;  %v1242_v29 = vadd.f32 %v20177_v42, %v16363_v27  ;;  %v1515_v32 = vmax.f32 %v1239_v23, 0.0 }
 0x2b6   : > { %2967 = vmatprep.mubr.bf16.mxu1 %v20288_v46  ;;  %v1234_v30 = vadd.f32 %v20177_v42, %v1233_v12  ;;  %v1513_v40 = vmax.f32 %v1231_v28, 0.0 }
 0x2b7   : > { %2607 = vmatmul.mubr.bf16.gmra.mrb[184].mxu0 %v22638_v0  ;;  %v1516_v36 = vmax.f32 %v1242_v29, 0.0 }
 0x2b8   : > { %2614 = vmatprep.mubr.bf16.mxu0 %v22638_v0  ;;  %v1514_v16 = vmax.f32 %v1234_v30, 0.0 }
 0x2b9   : > { %v20336_v44 = vpack.c.bf16 %v1516_v36, %v1515_v32 }
 0x2ba   : > { %v16366_v49 = vpop.f32.mrb[80].mxu0  ;;  %v20338_v51 = vpack.c.bf16 %v1514_v16, %v1513_v40 }
 0x2bb   : > { %v1246_v54 = vpop.f32.mrb[81].mxu0  ;;  %v1255_v55 = vadd.f32 %v20177_v42, %v16366_v49  ;;  %v18128_v49 = vld [vmem:[#allocation12 + $0x84] ss:$8 sps:$4 sm:$0xff]  }
 0x2bc   : > { %v16367_v57 = vpop.f32.mrb[82].mxu0  ;;  %v1247_v59 = vadd.f32 %v20177_v42, %v1246_v54  ;;  %4301 = vmatprep.subr.bf16.mxu0 %v18128_v49 }
 0x2bd   : > { %v1249_v63 = vpop.f32.mrb[83].mxu0  ;;  %2968 = vmatmul.mubr.bf16.gmra.mrb[92].mxu1 %v20237_v10  ;;  %v1258_v4 = vadd.f32 %v20177_v42, %v16367_v57  ;;  %v1519_v6 = vmax.f32 %v1255_v55, 0.0 }
 0x2be   : > { %v1250_v5 = vadd.f32 %v20177_v42, %v1249_v63  ;;  %v1517_v15 = vmax.f32 %v1247_v59, 0.0 }
 0x2bf   : > { %2615 = vmatmul.mubr.bf16.gmra.mrb[188].mxu0 %v22638_v0  ;;  %v1520_v7 = vmax.f32 %v1258_v4, 0.0 }
 0x2c0   : > { %2622 = vmatprep.mubr.bf16.mxu0 %v20148_v2  ;;  %v1518_v22 = vmax.f32 %v1250_v5, 0.0 }
 0x2c1   : > { %v20347_v23 = vpack.c.bf16 %v1520_v7, %v1519_v6 }
 0x2c2   : > { %v16370_v27 = vpop.f32.mrb[84].mxu0  ;;  %v20349_v28 = vpack.c.bf16 %v1518_v22, %v1517_v15 }
 0x2c3   : > { %22673 = vst [vmem:[#allocation24_spill] sm:$0xff] %v20347_v23  ;;  %v1262_v12 = vpop.f32.mrb[85].mxu0  ;;  %v1271_v29 = vadd.f32 %v20177_v42, %v16370_v27 }
 0x2c4   : > { %22674 = vst [vmem:[#allocation25_spill] sm:$0xff] %v20349_v28  ;;  %v16371_v30 = vpop.f32.mrb[86].mxu0  ;;  %2975 = vmatprep.mubr.bf16.mxu1 %v20349_v28  ;;  %v1263_v32 = vadd.f32 %v20177_v42, %v1262_v12 }
 0x2c5   : > { %v1265_v36 = vpop.f32.mrb[87].mxu0  ;;  %2976 = vmatmul.mubr.bf16.gmra.mrb[96].mxu1 %v20302_v17  ;;  %v1274_v40 = vadd.f32 %v20177_v42, %v16371_v30  ;;  %v1523_v54 = vmax.f32 %v1271_v29, 0.0 }
 0x2c6   : > { %2983 = vmatprep.mubr.bf16.mxu1 %v20347_v23  ;;  %v1266_v16 = vadd.f32 %v20177_v42, %v1265_v36  ;;  %v1521_v57 = vmax.f32 %v1263_v32, 0.0 }
 0x2c7   : > { %2623 = vmatmul.mubr.bf16.gmra.mrb[192].mxu0 %v20083_v34  ;;  %v1524_v55 = vmax.f32 %v1274_v40, 0.0 }
 0x2c8   : > { %2630 = vmatprep.mubr.bf16.mxu0 %v20146_v62  ;;  %v1522_v59 = vmax.f32 %v1266_v16, 0.0 }
 0x2c9   : > { %v20360_v63 = vpack.c.bf16 %v1524_v55, %v1523_v54 }
 0x2ca   : > { %v16374_v4 = vpop.f32.mrb[88].mxu0  ;;  %v20362_v5 = vpack.c.bf16 %v1522_v59, %v1521_v57 }
 0x2cb   : > { %22675 = vst [vmem:[#allocation26_spill] sm:$0xff] %v20360_v63  ;;  %v1278_v6 = vpop.f32.mrb[89].mxu0  ;;  %v1287_v7 = vadd.f32 %v20177_v42, %v16374_v4 }
 0x2cc   : > { %22676 = vst [vmem:[#allocation27_spill] sm:$0xff] %v20362_v5  ;;  %v16375_v15 = vpop.f32.mrb[90].mxu0  ;;  %v1279_v22 = vadd.f32 %v20177_v42, %v1278_v6 }
 0x2cd   : > { %v1281_v27 = vpop.f32.mrb[91].mxu0  ;;  %2984 = vmatmul.mubr.bf16.gmra.mrb[100].mxu1 %v20300_v9  ;;  %v1290_v12 = vadd.f32 %v20177_v42, %v16375_v15  ;;  %v1527_v30 = vmax.f32 %v1287_v7, 0.0 }
 0x2ce   : > { %2991 = vmatprep.mubr.bf16.mxu1 %v20362_v5  ;;  %v1282_v29 = vadd.f32 %v20177_v42, %v1281_v27  ;;  %v1525_v36 = vmax.f32 %v1279_v22, 0.0 }
 0x2cf   : > { %2631 = vmatmul.mubr.bf16.gmra.mrb[196].mxu0 %v20081_v31  ;;  %v1528_v32 = vmax.f32 %v1290_v12, 0.0 }
 0x2d0   : > { %2638 = vmatprep.mubr.bf16.mxu0 %v20162_v24  ;;  %v1526_v40 = vmax.f32 %v1282_v29, 0.0 }
 0x2d1   : > { %v20372_v16 = vpack.c.bf16 %v1528_v32, %v1527_v30 }
 0x2d2   : > { %v16378_v49 = vpop.f32.mrb[92].mxu0  ;;  %v20374_v54 = vpack.c.bf16 %v1526_v40, %v1525_v36 }
 0x2d3   : > { %22677 = vst [vmem:[#allocation28_spill] sm:$0xff] %v20372_v16  ;;  %v1294_v55 = vpop.f32.mrb[93].mxu0  ;;  %v1303_v57 = vadd.f32 %v20177_v42, %v16378_v49 }
 0x2d4   : > { %22678 = vst [vmem:[#allocation29_spill] sm:$0xff] %v20374_v54  ;;  %v16379_v59 = vpop.f32.mrb[94].mxu0  ;;  %v1295_v4 = vadd.f32 %v20177_v42, %v1294_v55 }
 0x2d5   : > { %v1297_v6 = vpop.f32.mrb[95].mxu0  ;;  %2992 = vmatmul.mubr.bf16.gmra.mrb[104].mxu1 %v20314_v45  ;;  %v1306_v7 = vadd.f32 %v20177_v42, %v16379_v59  ;;  %v1531_v22 = vmax.f32 %v1303_v57, 0.0 }
 0x2d6   : > { %2999 = vmatprep.mubr.bf16.mxu1 %v20360_v63  ;;  %v1298_v15 = vadd.f32 %v20177_v42, %v1297_v6  ;;  %v1529_v12 = vmax.f32 %v1295_v4, 0.0 }
 0x2d7   : > { %2639 = vmatmul.mubr.bf16.gmra.mrb[200].mxu0 %v20094_v50  ;;  %v1532_v27 = vmax.f32 %v1306_v7, 0.0 }
 0x2d8   : > { %2646 = vmatprep.mubr.bf16.mxu0 %v20160_v19  ;;  %v1530_v29 = vmax.f32 %v1298_v15, 0.0 }
 0x2d9   : > { %v20384_v30 = vpack.c.bf16 %v1532_v27, %v1531_v22 }
 0x2da   : > { %v16382_v32 = vpop.f32.mrb[96].mxu0  ;;  %v20386_v36 = vpack.c.bf16 %v1530_v29, %v1529_v12 }
 0x2db   : > { %22679 = vst [vmem:[#allocation30_spill] sm:$0xff] %v20384_v30  ;;  %v1310_v40 = vpop.f32.mrb[97].mxu0  ;;  %v1319_v49 = vadd.f32 %v20177_v42, %v16382_v32 }
 0x2dc   : > { %22680 = vst [vmem:[#allocation31_spill] sm:$0xff] %v20386_v36  ;;  %v16383_v55 = vpop.f32.mrb[98].mxu0  ;;  %v1311_v59 = vadd.f32 %v20177_v42, %v1310_v40 }
 0x2dd   : > { %v1313_v6 = vpop.f32.mrb[99].mxu0  ;;  %3000 = vmatmul.mubr.bf16.gmra.mrb[108].mxu1 %v20312_v43  ;;  %v1322_v57 = vadd.f32 %v20177_v42, %v16383_v55  ;;  %v1535_v7 = vmax.f32 %v1319_v49, 0.0 }
 0x2de   : > { %3007 = vmatprep.mubr.bf16.mxu1 %v20374_v54  ;;  %v1314_v4 = vadd.f32 %v20177_v42, %v1313_v6  ;;  %v1533_v22 = vmax.f32 %v1311_v59, 0.0 }
 0x2df   : > { %2647 = vmatmul.mubr.bf16.gmra.mrb[204].mxu0 %v20092_v48  ;;  %v1536_v15 = vmax.f32 %v1322_v57, 0.0 }
 0x2e0   : > { %2654 = vmatprep.mubr.bf16.mxu0 %v20175_v41  ;;  %v1534_v27 = vmax.f32 %v1314_v4, 0.0 }
 0x2e1   : > { %v20396_v12 = vpack.c.bf16 %v1536_v15, %v1535_v7 }
 0x2e2   : > { %v16386_v29 = vpop.f32.mrb[100].mxu0  ;;  %v20398_v32 = vpack.c.bf16 %v1534_v27, %v1533_v22 }
 0x2e3   : > { %v1326_v40 = vpop.f32.mrb[101].mxu0  ;;  %v1335_v55 = vadd.f32 %v20177_v42, %v16386_v29 }
 0x2e4   : > { %v16387_v0 = vpop.f32.mrb[102].mxu0  ;;  %v1327_v54 = vadd.f32 %v20177_v42, %v1326_v40 }
 0x2e5   : > { %v1329_v6 = vpop.f32.mrb[103].mxu0  ;;  %3008 = vmatmul.mubr.bf16.gmra.mrb[112].mxu1 %v20326_v18  ;;  %v1338_v49 = vadd.f32 %v20177_v42, %v16387_v0  ;;  %v1539_v57 = vmax.f32 %v1335_v55, 0.0 }
 0x2e6   : > { %3015 = vmatprep.mubr.bf16.mxu1 %v20372_v16  ;;  %v1330_v59 = vadd.f32 %v20177_v42, %v1329_v6  ;;  %v1537_v7 = vmax.f32 %v1327_v54, 0.0 }
 0x2e7   : > { %2655 = vmatmul.mubr.bf16.gmra.mrb[208].mxu0 %v20104_v3  ;;  %v1540_v4 = vmax.f32 %v1338_v49, 0.0 }
 0x2e8   : > { %2662 = vmatprep.mubr.bf16.mxu0 %v20173_v38  ;;  %v1538_v15 = vmax.f32 %v1330_v59, 0.0 }
 0x2e9   : > { %v20408_v22 = vpack.c.bf16 %v1540_v4, %v1539_v57 }
 0x2ea   : > { %v16390_v27 = vpop.f32.mrb[104].mxu0  ;;  %v20410_v29 = vpack.c.bf16 %v1538_v15, %v1537_v7 }
 0x2eb   : > { %v1342_v40 = vpop.f32.mrb[105].mxu0  ;;  %v1351_v0 = vadd.f32 %v20177_v42, %v16390_v27 }
 0x2ec   : > { %v16391_v63 = vpop.f32.mrb[106].mxu0  ;;  %v1343_v16 = vadd.f32 %v20177_v42, %v1342_v40 }
 0x2ed   : > { %v1345_v6 = vpop.f32.mrb[107].mxu0  ;;  %3016 = vmatmul.mubr.bf16.gmra.mrb[116].mxu1 %v20324_v8  ;;  %v1354_v55 = vadd.f32 %v20177_v42, %v16391_v63  ;;  %v1543_v49 = vmax.f32 %v1351_v0, 0.0 }
 0x2ee   : > { %3023 = vmatprep.mubr.bf16.mxu1 %v20386_v36  ;;  %v1346_v54 = vadd.f32 %v20177_v42, %v1345_v6  ;;  %v1541_v57 = vmax.f32 %v1343_v16, 0.0 }
 0x2ef   : > { %2663 = vmatmul.mubr.bf16.gmra.mrb[212].mxu0 %v20102_v1  ;;  %v1544_v59 = vmax.f32 %v1354_v55, 0.0 }
 0x2f0   : > { %2670 = vmatprep.mubr.bf16.mxu0 %v20189_v58  ;;  %v1542_v4 = vmax.f32 %v1346_v54, 0.0 }
 0x2f1   : > { %v20420_v7 = vpack.c.bf16 %v1544_v59, %v1543_v49 }
 0x2f2   : > { %v16394_v15 = vpop.f32.mrb[108].mxu0  ;;  %v20422_v27 = vpack.c.bf16 %v1542_v4, %v1541_v57 }
 0x2f3   : > { %v1358_v40 = vpop.f32.mrb[109].mxu0  ;;  %v1367_v63 = vadd.f32 %v20177_v42, %v16394_v15 }
 0x2f4   : > { %v16395_v5 = vpop.f32.mrb[110].mxu0  ;;  %v1359_v36 = vadd.f32 %v20177_v42, %v1358_v40 }
 0x2f5   : > { %v1361_v6 = vpop.f32.mrb[111].mxu0  ;;  %3024 = vmatmul.mubr.bf16.gmra.mrb[120].mxu1 %v20338_v51  ;;  %v1370_v0 = vadd.f32 %v20177_v42, %v16395_v5  ;;  %v1547_v55 = vmax.f32 %v1367_v63, 0.0 }
 0x2f6   : > { %3031 = vmatprep.mubr.bf16.mxu1 %v20384_v30  ;;  %v1362_v16 = vadd.f32 %v20177_v42, %v1361_v6  ;;  %v1545_v49 = vmax.f32 %v1359_v36, 0.0 }
 0x2f7   : > { %2671 = vmatmul.mubr.bf16.gmra.mrb[216].mxu0 %v20115_v21  ;;  %v1548_v54 = vmax.f32 %v1370_v0, 0.0 }
 0x2f8   : > { %2678 = vmatprep.mubr.bf16.mxu0 %v20187_v56  ;;  %v1546_v59 = vmax.f32 %v1362_v16, 0.0 }
 0x2f9   : > { %v20432_v57 = vpack.c.bf16 %v1548_v54, %v1547_v55 }
 0x2fa   : > { %v16398_v4 = vpop.f32.mrb[112].mxu0  ;;  %v20434_v15 = vpack.c.bf16 %v1546_v59, %v1545_v49 }
 0x2fb   : > { %22681 = vst [vmem:[#allocation32_spill] sm:$0xff] %v20432_v57  ;;  %v1374_v40 = vpop.f32.mrb[113].mxu0  ;;  %v1383_v5 = vadd.f32 %v20177_v42, %v16398_v4  ;;  %v18124_v4 = vld [vmem:[#allocation9 + $0x180] sm:$0xff]  }
 0x2fc   : > { %v16399_v23 = vpop.f32.mrb[114].mxu0  ;;  %v1375_v30 = vadd.f32 %v20177_v42, %v1374_v40 }
 0x2fd   : > { %v1377_v6 = vpop.f32.mrb[115].mxu0  ;;  %3032 = vmatmul.mubr.bf16.gmra.mrb[124].mxu1 %v20336_v44  ;;  %v1386_v63 = vadd.f32 %v20177_v42, %v16399_v23  ;;  %v1551_v0 = vmax.f32 %v1383_v5, 0.0 }
 0x2fe   : > { %3072 = vmatprep.mubr.bf16.mxu1 %v20148_v2  ;;  %v1378_v36 = vadd.f32 %v20177_v42, %v1377_v6  ;;  %v1549_v55 = vmax.f32 %v1375_v30, 0.0  ;;  %v18125_v30 = vld [vmem:[#allocation9 + $0x188] sm:$0xff]  }
 0x2ff   : > { %2679 = vmatmul.mubr.bf16.gmra.mrb[220].mxu0 %v20113_v20  ;;  %v1552_v16 = vmax.f32 %v1386_v63, 0.0 }
 0x300   : > { %2686 = vmatprep.mubr.bf16.mxu0 %v20252_v39  ;;  %v1550_v54 = vmax.f32 %v1378_v36, 0.0  ;;  %v22682_v36 = vmov 0  }
 0x301   : > { %v20444_v49 = vpack.c.bf16 %v1552_v16, %v1551_v0 }
 0x302   : > { %v16402_v59 = vpop.f32.mrb[116].mxu0  ;;  %v20446_v40 = vpack.c.bf16 %v1550_v54, %v1549_v55 }
 0x303   : > { %v1390_v57 = vpop.f32.mrb[117].mxu0  ;;  %v1399_v23 = vadd.f32 %v20177_v42, %v16402_v59  ;;  %v18129_v59 = vld [vmem:[#allocation9 + $0x190] sm:$0xff]  }
 0x304   : > { %v16403_v2 = vpop.f32.mrb[118].mxu0  ;;  %v1391_v6 = vadd.f32 %v20177_v42, %v1390_v57 }
 0x305   : > { %v1393_v28 = vpop.f32.mrb[119].mxu0  ;;  %3073 = vmatmul.mubr.bf16.vlgmr.msra.gmra.mrb[0].mxu1 %v20083_v34  ;;  %v1402_v5 = vadd.f32 %v20177_v42, %v16403_v2  ;;  %v1555_v0 = vmax.f32 %v1399_v23, 0.0 }
 0x306   : > { %3080 = vmatprep.mubr.bf16.mxu1 %v20146_v62  ;;  %3330 = vmatpush1.bf16.msra.mxu1 %v18124_v4  ;;  %v1394_v63 = vadd.f32 %v20177_v42, %v1393_v28  ;;  %v1553_v57 = vmax.f32 %v1391_v6, 0.0 }
 0x307   : > { %2687 = vmatmul.mubr.bf16.gmra.mrb[224].mxu0 %v20202_v13  ;;  %3331 = vmatprep.subr.bf16.mxu1 %v22682_v36  ;;  %v1556_v16 = vmax.f32 %v1402_v5, 0.0 }
 0x308   : > { %2694 = vmatprep.mubr.bf16.mxu0 %v20250_v37  ;;  %v1554_v55 = vmax.f32 %v1394_v63, 0.0 }
 0x309   : > { %v20457_v54 = vpack.c.bf16 %v1556_v16, %v1555_v0 }
 0x30a   : > { %v16406_v34 = vpop.f32.mrb[120].mxu0  ;;  %3332 = vmatpush1.bf16.msra.mxu1 %v18125_v30  ;;  %v20459_v62 = vpack.c.bf16 %v1554_v55, %v1553_v57  ;;  %v18133_v30 = vld [vmem:[#allocation9 + $0x198] sm:$0xff]  }
 0x30b   : > { %v1406_v4 = vpop.f32.mrb[121].mxu0  ;;  %3333 = vmatprep.subr.bf16.mxu1 %v22682_v36  ;;  %v1415_v28 = vadd.f32 %v20177_v42, %v16406_v34 }
 0x30c   : > { %v16407_v2 = vpop.f32.mrb[122].mxu0  ;;  %v1407_v23 = vadd.f32 %v20177_v42, %v1406_v4  ;;  %v18137_v4 = vld [vmem:[#allocation9 + $0x1a0] sm:$0xff]  }
 0x30d   : > { %v1409_v5 = vpop.f32.mrb[123].mxu0  ;;  %3081 = vmatmul.mubr.bf16.gmra.mrb[4].mxu1 %v20081_v31  ;;  %v1418_v6 = vadd.f32 %v20177_v42, %v16407_v2  ;;  %v1559_v0 = vmax.f32 %v1415_v28, 0.0 }
 0x30e   : > { %3088 = vmatprep.mubr.bf16.mxu1 %v20162_v24  ;;  %3334 = vmatpush1.bf16.msra.mxu1 %v18129_v59  ;;  %v1410_v63 = vadd.f32 %v20177_v42, %v1409_v5  ;;  %v1557_v57 = vmax.f32 %v1407_v23, 0.0 }
 0x30f   : > { %2695 = vmatmul.mubr.bf16.gmra.mrb[228].mxu0 %v20200_v11  ;;  %3335 = vmatprep.subr.bf16.mxu1 %v22682_v36  ;;  %v1560_v16 = vmax.f32 %v1418_v6, 0.0 }
 0x310   : > { %2702 = vmatprep.mubr.bf16.mxu0 %v20266_v61  ;;  %v1558_v55 = vmax.f32 %v1410_v63, 0.0 }
 0x311   : > { %v20471_v34 = vpack.c.bf16 %v1560_v16, %v1559_v0 }
 0x312   : > { %v16410_v31 = vpop.f32.mrb[124].mxu0  ;;  %3336 = vmatpush1.bf16.msra.mxu1 %v18133_v30  ;;  %v20473_v24 = vpack.c.bf16 %v1558_v55, %v1557_v57  ;;  %v18141_v30 = vld [vmem:[#allocation9 + $0x1a8] sm:$0xff]  }
 0x313   : > { %v1422_v59 = vpop.f32.mrb[125].mxu0  ;;  %3337 = vmatprep.subr.bf16.mxu1 %v22682_v36  ;;  %v1431_v2 = vadd.f32 %v20177_v42, %v16410_v31 }
 0x314   : > { %v16411_v5 = vpop.f32.mrb[126].mxu0  ;;  %v1423_v28 = vadd.f32 %v20177_v42, %v1422_v59 }
 0x315   : > { %v1425_v6 = vpop.f32.mrb[127].mxu0  ;;  %3089 = vmatmul.mubr.bf16.gmra.mrb[8].mxu1 %v20094_v50  ;;  %v1434_v23 = vadd.f32 %v20177_v42, %v16411_v5  ;;  %v1563_v0 = vmax.f32 %v1431_v2, 0.0  ;;  %v18149_v2 = vld [vmem:[#allocation9 + $0x1b8] sm:$0xff]  }
 0x316   : > { %3096 = vmatprep.mubr.bf16.mxu1 %v20160_v19  ;;  %3338 = vmatpush1.bf16.msra.mxu1 %v18137_v4  ;;  %v1426_v63 = vadd.f32 %v20177_v42, %v1425_v6  ;;  %v1561_v57 = vmax.f32 %v1423_v28, 0.0  ;;  %v18145_v19 = vld [vmem:[#allocation9 + $0x1b0] sm:$0xff]  }
 0x317   : > { %2703 = vmatmul.mubr.bf16.gmra.mrb[232].mxu0 %v20214_v35  ;;  %3339 = vmatprep.subr.bf16.mxu1 %v22682_v36  ;;  %v1564_v16 = vmax.f32 %v1434_v23, 0.0 }
 0x318   : > { %2710 = vmatprep.mubr.bf16.mxu0 %v20264_v60  ;;  %v1562_v55 = vmax.f32 %v1426_v63, 0.0 }
 0x319   : > { %v20485_v31 = vpack.c.bf16 %v1564_v16, %v1563_v0 }
 0x31a   : > { %v20487_v50 = vpop.f32.mrb[128].mxu0  ;;  %3340 = vmatpush1.bf16.msra.mxu1 %v18141_v30  ;;  %v20489_v4 = vpack.c.bf16 %v1562_v55, %v1561_v57 }
 0x31b   : > { %v2498_v59 = vpop.f32.mrb[129].mxu0  ;;  %3341 = vmatprep.subr.bf16.mxu1 %v22682_v36 }
 0x31c   : > { %v20492_v42 = vpop.f32.mrb[130].mxu0 }
 0x31d   : > { %v2501_v5 = vpop.f32.mrb[131].mxu0  ;;  %3097 = vmatmul.mubr.bf16.gmra.mrb[12].mxu1 %v20092_v48  ;;  %v18153_v48 = vld [vmem:[#allocation9 + $0x1c0] sm:$0xff]  }
 0x31e   : > { %3104 = vmatprep.mubr.bf16.mxu1 %v20175_v41  ;;  %3342 = vmatpush1.bf16.msra.mxu1 %v18145_v19  ;;  %v18157_v19 = vld [vmem:[#allocation9 + $0x1c8] sm:$0xff]  }
 0x31f   : > { %2711 = vmatmul.mubr.bf16.gmra.mrb[236].mxu0 %v20212_v33  ;;  %3343 = vmatprep.subr.bf16.mxu1 %v22682_v36 }
 0x320   : > { %2718 = vmatprep.mubr.bf16.mxu0 %v20278_v26 }
 0x322   : > { %v20499_v28 = vpop.f32.mrb[132].mxu0  ;;  %3344 = vmatpush1.bf16.msra.mxu1 %v18149_v2 }
 0x323   : > { %v2506_v6 = vpop.f32.mrb[133].mxu0  ;;  %3345 = vmatprep.subr.bf16.mxu1 %v22682_v36 }
 0x324   : > { %v20502_v23 = vpop.f32.mrb[134].mxu0  ;;  %v18126_v6 = vld [vmem:[#allocation12 + $0x80] ss:$8 sps:$4 sm:$0xff]  }
 0x325   : > { %v2509_v30 = vpop.f32.mrb[135].mxu0  ;;  %3105 = vmatmul.mubr.bf16.gmra.mrb[16].mxu1 %v20104_v3 }
 0x326   : > { %3112 = vmatprep.mubr.bf16.mxu1 %v20173_v38  ;;  %3346 = vmatpush1.bf16.msra.mxu1 %v18153_v48  ;;  %v18132_v48 = vld [vmem:[#allocation12 + $0x94] ss:$8 sps:$4 sm:$0xff]  }
 0x327   : > { %2719 = vmatmul.mubr.bf16.gmra.mrb[240].mxu0 %v20227_v53  ;;  %3347 = vmatprep.subr.bf16.mxu1 %v22682_v36 }
 0x328   : > { %2726 = vmatprep.mubr.bf16.mxu0 %v20276_v25 }
 0x32a   : > { %v20508_v41 = vpop.f32.mrb[136].mxu0  ;;  %3348 = vmatpush1.bf16.msra.mxu1 %v18157_v19 }
 0x32b   : > { %v2514_v63 = vpop.f32.mrb[137].mxu0  ;;  %3349 = vmatprep.subr.bf16.mxu1 %v22682_v36 }
 0x32c   : > { %v20511_v0 = vpop.f32.mrb[138].mxu0  ;;  %v18161_v63 = vld [vmem:[#allocation9 + $0x1d0] sm:$0xff]  }
 0x32d   : > { %22683 = vst [vmem:[#allocation33_spill] sm:$0xff] %v20511_v0  ;;  %v2517_v16 = vpop.f32.mrb[139].mxu0  ;;  %3113 = vmatmul.mubr.bf16.gmra.mrb[20].mxu1 %v20102_v1  ;;  %v18172_v0 = vld [vmem:[#allocation12 + $0x34] ss:$8 sps:$4 sm:$0xff]  }
 0x32e   : > { %3120 = vmatprep.mubr.bf16.mxu1 %v20189_v58  ;;  %v18136_v16 = vld [vmem:[#allocation12 + $0xa4] ss:$8 sps:$4 sm:$0xff]   ;;  %3350 = vmatpush1.bf16.msra.mxu1 %v18161_v63 }
 0x32f   : > { %2727 = vmatmul.mubr.bf16.gmra.mrb[244].mxu0 %v20225_v52  ;;  %3351 = vmatprep.subr.bf16.mxu1 %v22682_v36 }
 0x330   : > { %2734 = vmatprep.mubr.bf16.mxu0 %v20290_v47 }
 0x332   : > { %v20517_v3 = vpop.f32.mrb[140].mxu0 }
 0x333   : > { %22684 = vst [vmem:[#allocation34_spill] sm:$0xff] %v20517_v3  ;;  %v2522_v38 = vpop.f32.mrb[141].mxu0 }
 0x334   : > { %v20519_v57 = vpop.f32.mrb[142].mxu0 }
 0x335   : > { %22685 = vst [vmem:[#allocation35_spill] sm:$0xff] %v20519_v57  ;;  %v2525_v55 = vpop.f32.mrb[143].mxu0  ;;  %3121 = vmatmul.mubr.bf16.gmra.mrb[24].mxu1 %v20115_v21 }
 0x336   : > { %3128 = vmatprep.mubr.bf16.mxu1 %v20187_v56 }
 0x337   : > { %2735 = vmatmul.mubr.bf16.gmra.mrb[248].mxu0 %v20239_v14 }
 0x338   : > { %2742 = vmatprep.mubr.bf16.mxu0 %v20288_v46 }
 0x33a   : > { %v20525_v1 = vpop.f32.mrb[144].mxu0 }
 0x33b   : > { %22686 = vst [vmem:[#allocation36_spill] sm:$0xff] %v20525_v1  ;;  %v2530_v58 = vpop.f32.mrb[145].mxu0 }
 0x33c   : > { %v20528_v59 = vpop.f32.mrb[146].mxu0  ;;  %v18134_v58 = vld [vmem:[#allocation12 + $0xa0] ss:$8 sps:$4 sm:$0xff]  }
 0x33d   : > { %22687 = vst [vmem:[#allocation37_spill] sm:$0xff] %v20528_v59  ;;  %v2533_v5 = vpop.f32.mrb[147].mxu0  ;;  %3129 = vmatmul.mubr.bf16.gmra.mrb[28].mxu1 %v20113_v20  ;;  %v18130_v20 = vld [vmem:[#allocation12 + $0x90] ss:$8 sps:$4 sm:$0xff]  }
 0x33e   : > { %3136 = vmatprep.mubr.bf16.mxu1 %v20252_v39 }
 0x33f   : > { %2743 = vmatmul.mubr.bf16.gmra.mrb[252].mxu0 %v20237_v10 }
 0x340   : > { %16428 = vmatprep.mubr.bf16.mxu0 %v20302_v17 }
 0x342   : > { %v20534_v21 = vpop.f32.mrb[148].mxu0 }
 0x343   : > { %22688 = vst [vmem:[#allocation38_spill] sm:$0xff] %v20534_v21  ;;  %v2538_v56 = vpop.f32.mrb[149].mxu0 }
 0x344   : > { %v20536_v2 = vpop.f32.mrb[150].mxu0  ;;  %v18140_v56 = vld [vmem:[#allocation12 + $0xb4] ss:$8 sps:$4 sm:$0xff]  }
 0x345   : > { %22689 = vst [vmem:[#allocation39_spill] sm:$0xff] %v20536_v2  ;;  %v2541_v30 = vpop.f32.mrb[151].mxu0  ;;  %3137 = vmatmul.mubr.bf16.gmra.mrb[32].mxu1 %v20202_v13 }
 0x346   : > { %3144 = vmatprep.mubr.bf16.mxu1 %v20250_v37  ;;  %v18144_v30 = vld [vmem:[#allocation12 + $0xc4] ss:$8 sps:$4 sm:$0xff]  }
 0x347   : > { %16429 = vmatmul.mubr.bf16.vlgmr.msra.gmra.mrb[0].mxu0 %v20300_v9 }
 0x348   : > { %4302 = vmatpush1.bf16.msra.mxu0 %v18126_v6  ;;  %16432 = vmatprep.mubr.bf16.mxu0 %v20314_v45  ;;  %v18138_v6 = vld [vmem:[#allocation12 + $0xb0] ss:$8 sps:$4 sm:$0xff]  }
 0x349   : > { %4303 = vmatprep.subr.bf16.mxu0 %v18132_v48 }
 0x34a   : > { %v20542_v38 = vpop.f32.mrb[152].mxu0 }
 0x34b   : > { %22690 = vst [vmem:[#allocation40_spill] sm:$0xff] %v20542_v38  ;;  %v2546_v55 = vpop.f32.mrb[153].mxu0 }
 0x34c   : > { %v20545_v19 = vpop.f32.mrb[154].mxu0  ;;  %4304 = vmatpush1.bf16.msra.mxu0 %v18130_v20  ;;  %v18142_v55 = vld [vmem:[#allocation12 + $0xc0] ss:$8 sps:$4 sm:$0xff]  }
 0x34d   : > { %22691 = vst [vmem:[#allocation41_spill] sm:$0xff] %v20545_v19  ;;  %v2549_v5 = vpop.f32.mrb[155].mxu0  ;;  %3145 = vmatmul.mubr.bf16.gmra.mrb[36].mxu1 %v20200_v11  ;;  %4305 = vmatprep.subr.bf16.mxu0 %v18136_v16  ;;  %v18148_v16 = vld [vmem:[#allocation12 + $0xd4] ss:$8 sps:$4 sm:$0xff]  }
 0x34e   : > { %3152 = vmatprep.mubr.bf16.mxu1 %v20266_v61  ;;  %v18156_v19 = vld [vmem:[#allocation12 + $0xf4] ss:$8 sps:$4 sm:$0xff]  }
 0x34f   : > { %16433 = vmatmul.mubr.bf16.gmra.mrb[4].mxu0 %v20312_v43 }
 0x350   : > { %16436 = vmatprep.mubr.bf16.mxu0 %v20326_v18  ;;  %4306 = vmatpush1.bf16.msra.mxu0 %v18134_v58  ;;  %v18165_v58 = vld [vmem:[#allocation9 + $0x1d8] sm:$0xff]  }
 0x351   : > { %4307 = vmatprep.subr.bf16.mxu0 %v18140_v56  ;;  %v18146_v56 = vld [vmem:[#allocation12 + $0xd0] ss:$8 sps:$4 sm:$0xff]   ;;  %3352 = vmatpush1.bf16.msra.mxu1 %v18165_v58 }
 0x352   : > { %v20551_v48 = vpop.f32.mrb[156].mxu0  ;;  %3353 = vmatprep.subr.bf16.mxu1 %v22682_v36 }
 0x353   : > { %22692 = vst [vmem:[#allocation42_spill] sm:$0xff] %v20551_v48  ;;  %v2554_v63 = vpop.f32.mrb[157].mxu0 }
 0x354   : > { %v20553_v20 = vpop.f32.mrb[158].mxu0  ;;  %4308 = vmatpush1.bf16.msra.mxu0 %v18138_v6  ;;  %v18152_v63 = vld [vmem:[#allocation12 + $0xe4] ss:$8 sps:$4 sm:$0xff]  }
 0x355   : > { %22693 = vst [vmem:[#allocation43_spill] sm:$0xff] %v20553_v20  ;;  %v2557_v5 = vpop.f32.mrb[159].mxu0  ;;  %3153 = vmatmul.mubr.bf16.gmra.mrb[40].mxu1 %v20214_v35  ;;  %4309 = vmatprep.subr.bf16.mxu0 %v18144_v30  ;;  %v18150_v30 = vld [vmem:[#allocation12 + $0xe0] ss:$8 sps:$4 sm:$0xff]  }
 0x356   : > { %3160 = vmatprep.mubr.bf16.mxu1 %v20264_v60 }
 0x357   : > { %16437 = vmatmul.mubr.bf16.gmra.mrb[8].mxu0 %v20324_v8 }
 0x358   : > { %16440 = vmatprep.mubr.bf16.mxu0 %v20338_v51  ;;  %4310 = vmatpush1.bf16.msra.mxu0 %v18142_v55  ;;  %v18154_v55 = vld [vmem:[#allocation12 + $0xf0] ss:$8 sps:$4 sm:$0xff]  }
 0x359   : > { %4311 = vmatprep.subr.bf16.mxu0 %v18148_v16  ;;  %v18160_v16 = vld [vmem:[#allocation12 + $0x4] ss:$8 sps:$4 sm:$0xff]  }
 0x35a   : > { %v20559_v20 = vpop.f32.mrb[160].mxu0 }
 0x35b   : > { %22694 = vst [vmem:[#allocation44_spill] sm:$0xff] %v20559_v20  ;;  %v2562_v6 = vpop.f32.mrb[161].mxu0 }
 0x35c   : > { %v20562_v5 = vpop.f32.mrb[162].mxu0  ;;  %4312 = vmatpush1.bf16.msra.mxu0 %v18146_v56 }
 0x35d   : > { %22695 = vst [vmem:[#allocation45_spill] sm:$0xff] %v20562_v5  ;;  %v2565_v48 = vpop.f32.mrb[163].mxu0  ;;  %3161 = vmatmul.mubr.bf16.gmra.mrb[44].mxu1 %v20212_v33  ;;  %4313 = vmatprep.subr.bf16.mxu0 %v18152_v63  ;;  %v18169_v63 = vld [vmem:[#allocation9 + $0x1e0] sm:$0xff]  }
 0x35e   : > { %3168 = vmatprep.mubr.bf16.mxu1 %v20278_v26  ;;  %3354 = vmatpush1.bf16.msra.mxu1 %v18169_v63 }
 0x35f   : > { %16441 = vmatmul.mubr.bf16.gmra.mrb[12].mxu0 %v20336_v44  ;;  %3355 = vmatprep.subr.bf16.mxu1 %v22682_v36 }
 0x360   : > { %16444 = vmatprep.mubr.bf16.mxu0 %v20398_v32  ;;  %4314 = vmatpush1.bf16.msra.mxu0 %v18150_v30 }
 0x361   : > { %4315 = vmatprep.subr.bf16.mxu0 %v18156_v19 }
 0x362   : > { %v20568_v58 = vpop.f32.mrb[164].mxu0 }
 0x363   : > { %22696 = vst [vmem:[#allocation46_spill] sm:$0xff] %v20568_v58  ;;  %v2570_v6 = vpop.f32.mrb[165].mxu0 }
 0x364   : > { %v20570_v56 = vpop.f32.mrb[166].mxu0  ;;  %4316 = vmatpush1.bf16.msra.mxu0 %v18154_v55 }
 0x365   : > { %22697 = vst [vmem:[#allocation47_spill] sm:$0xff] %v20570_v56  ;;  %v2573_v48 = vpop.f32.mrb[167].mxu0  ;;  %3169 = vmatmul.mubr.bf16.gmra.mrb[48].mxu1 %v20227_v53  ;;  %4574 = vmatprep.subr.bf16.mxu0 %v18160_v16  ;;  %v22705_v56 = vld [vmem:[#allocation32_spill] sm:$0xff] }
 0x366   : > { %3176 = vmatprep.mubr.bf16.mxu1 %v20276_v25 }
 0x367   : > { %16445 = vmatmul.mubr.bf16.gmra.mrb[16].mxu0 %v20396_v12 }
 0x368   : > { %16448 = vmatprep.mubr.bf16.mxu0 %v20410_v29 }
 0x36a   : > { %v20576_v19 = vpop.f32.mrb[168].mxu0 }
 0x36b   : > { %22698 = vst [vmem:[#allocation48_spill] sm:$0xff] %v20576_v19  ;;  %v2578_v30 = vpop.f32.mrb[169].mxu0 }
 0x36c   : > { %v20579_v6 = vpop.f32.mrb[170].mxu0  ;;  %v18173_v30 = vld [vmem:[#allocation9 + $0x1e8] sm:$0xff]  }
 0x36d   : > { %22699 = vst [vmem:[#allocation49_spill] sm:$0xff] %v20579_v6  ;;  %v2581_v55 = vpop.f32.mrb[171].mxu0  ;;  %3177 = vmatmul.mubr.bf16.gmra.mrb[52].mxu1 %v20225_v52 }
 0x36e   : > { %3184 = vmatprep.mubr.bf16.mxu1 %v20290_v47  ;;  %3356 = vmatpush1.bf16.msra.mxu1 %v18173_v30  ;;  %v18175_v30 = vld [vmem:[#allocation9 + $0x1f8] sm:$0xff]  }
 0x36f   : > { %16449 = vmatmul.mubr.bf16.gmra.mrb[20].mxu0 %v20408_v22  ;;  %3357 = vmatprep.subr.bf16.mxu1 %v22682_v36 }
 0x370   : > { %16452 = vmatprep.mubr.bf16.mxu0 %v20422_v27 }
 0x372   : > { %v20585_v16 = vpop.f32.mrb[172].mxu0 }
 0x373   : > { %22700 = vst [vmem:[#allocation50_spill] sm:$0xff] %v20585_v16  ;;  %v2586_v48 = vpop.f32.mrb[173].mxu0 }
 0x374   : > { %v20587_v63 = vpop.f32.mrb[174].mxu0  ;;  %v18174_v48 = vld [vmem:[#allocation9 + $0x1f0] sm:$0xff]  }
 0x375   : > { %22701 = vst [vmem:[#allocation51_spill] sm:$0xff] %v20587_v63  ;;  %v2589_v19 = vpop.f32.mrb[175].mxu0  ;;  %3185 = vmatmul.mubr.bf16.gmra.mrb[56].mxu1 %v20239_v14 }
 0x376   : > { %3192 = vmatprep.mubr.bf16.mxu1 %v20288_v46  ;;  %v22704_v19 = vld [vmem:[#allocation25_spill] sm:$0xff]  ;;  %3358 = vmatpush1.bf16.msra.mxu1 %v18174_v48 }
 0x377   : > { %16453 = vmatmul.mubr.bf16.gmra.mrb[24].mxu0 %v20420_v7  ;;  %3359 = vmatprep.subr.bf16.mxu1 %v22682_v36 }
 0x378   : > { %16456 = vmatprep.mubr.bf16.mxu0 %v20434_v15 }
 0x37a   : > { %v20593_v55 = vpop.f32.mrb[176].mxu0  ;;  %3360 = vmatpush1.bf16.msra.mxu1 %v18175_v30  ;;  %v22711_v30 = vld [vmem:[#allocation27_spill] sm:$0xff] }
 0x37b   : > { %22702 = vst [vmem:[#allocation52_spill] sm:$0xff] %v20593_v55  ;;  %v2594_v6 = vpop.f32.mrb[177].mxu0 }
 0x37c   : > { %v20596_v16 = vpop.f32.mrb[178].mxu0 }
 0x37d   : > { %22703 = vst [vmem:[#allocation53_spill] sm:$0xff] %v20596_v16  ;;  %v2597_v63 = vpop.f32.mrb[179].mxu0  ;;  %3193 = vmatmul.mubr.bf16.gmra.mrb[60].mxu1 %v20237_v10 }
 0x37e   : > { %3200 = vmatprep.mubr.bf16.mxu1 %v22704_v19  ;;  %v22708_v63 = vld [vmem:[#allocation24_spill] sm:$0xff] }
 0x37f   : > { %16457 = vmatmul.mubr.bf16.gmra.mrb[28].mxu0 %v22705_v56 }
 0x380   : > { %16460 = vmatprep.mubr.bf16.mxu0 %v22682_v36 }
 0x382   : > { %v20603_v55 = vpop.f32.mrb[180].mxu0 }
 0x383   : > { %22706 = vst [vmem:[#allocation25_spill] sm:$0xff] %v20603_v55  ;;  %v2602_v6 = vpop.f32.mrb[181].mxu0 }
 0x384   : > { %v20605_v58 = vpop.f32.mrb[182].mxu0 }
 0x385   : > { %22707 = vst [vmem:[#allocation32_spill] sm:$0xff] %v20605_v58  ;;  %v2605_v16 = vpop.f32.mrb[183].mxu0  ;;  %3201 = vmatmul.mubr.bf16.gmra.mrb[64].mxu1 %v20302_v17 }
 0x386   : > { %3208 = vmatprep.mubr.bf16.mxu1 %v22708_v63 }
 0x387   : > { %16461 = vmatmul.mubr.bf16.gmra.mrb[32].mxu0 %v22682_v36 }
 0x388   : > { %16464 = vmatprep.mubr.bf16.mxu0 %v22682_v36 }
 0x38a   : > { %v20611_v48 = vpop.f32.mrb[184].mxu0 }
 0x38b   : > { %22709 = vst [vmem:[#allocation24_spill] sm:$0xff] %v20611_v48  ;;  %v2610_v5 = vpop.f32.mrb[185].mxu0 }
 0x38c   : > { %v20613_v20 = vpop.f32.mrb[186].mxu0  ;;  %v22714_v5 = vld [vmem:[#allocation26_spill] sm:$0xff] }
 0x38d   : > { %22710 = vst [vmem:[#allocation54_spill] sm:$0xff] %v20613_v20  ;;  %v2613_v38 = vpop.f32.mrb[187].mxu0  ;;  %3209 = vmatmul.mubr.bf16.gmra.mrb[68].mxu1 %v20300_v9 }
 0x38e   : > { %3216 = vmatprep.mubr.bf16.mxu1 %v22711_v30 }
 0x38f   : > { %16465 = vmatmul.mubr.bf16.gmra.mrb[36].mxu0 %v22682_v36 }
 0x390   : > { %16468 = vmatprep.mubr.bf16.mxu0 %v22682_v36 }
 0x392   : > { %v20619_v16 = vpop.f32.mrb[188].mxu0 }
 0x393   : > { %22712 = vst [vmem:[#allocation27_spill] sm:$0xff] %v20619_v16  ;;  %v2618_v6 = vpop.f32.mrb[189].mxu0 }
 0x394   : > { %v20621_v58 = vpop.f32.mrb[190].mxu0  ;;  %v22717_v6 = vld [vmem:[#allocation29_spill] sm:$0xff] }
 0x395   : > { %22713 = vst [vmem:[#allocation55_spill] sm:$0xff] %v20621_v58  ;;  %v2621_v55 = vpop.f32.mrb[191].mxu0  ;;  %3217 = vmatmul.mubr.bf16.gmra.mrb[72].mxu1 %v20314_v45 }
 0x396   : > { %3224 = vmatprep.mubr.bf16.mxu1 %v22714_v5 }
 0x397   : > { %16469 = vmatmul.mubr.bf16.gmra.mrb[40].mxu0 %v22682_v36 }
 0x398   : > { %16472 = vmatprep.mubr.bf16.mxu0 %v22682_v36 }
 0x39a   : > { %v20627_v38 = vpop.f32.mrb[192].mxu0 }
 0x39b   : > { %22715 = vst [vmem:[#allocation26_spill] sm:$0xff] %v20627_v38  ;;  %v2626_v20 = vpop.f32.mrb[193].mxu0 }
 0x39c   : > { %v20629_v48 = vpop.f32.mrb[194].mxu0  ;;  %v22720_v20 = vld [vmem:[#allocation28_spill] sm:$0xff] }
 0x39d   : > { %22716 = vst [vmem:[#allocation56_spill] sm:$0xff] %v20629_v48  ;;  %v2629_v2 = vpop.f32.mrb[195].mxu0  ;;  %3225 = vmatmul.mubr.bf16.gmra.mrb[76].mxu1 %v20312_v43 }
 0x39e   : > { %3232 = vmatprep.mubr.bf16.mxu1 %v22717_v6 }
 0x39f   : > { %16473 = vmatmul.mubr.bf16.gmra.mrb[44].mxu0 %v22682_v36 }
 0x3a0   : > { %16476 = vmatprep.mubr.bf16.mxu0 %v22682_v36 }
 0x3a2   : > { %v20635_v55 = vpop.f32.mrb[196].mxu0 }
 0x3a3   : > { %22718 = vst [vmem:[#allocation29_spill] sm:$0xff] %v20635_v55  ;;  %v2634_v58 = vpop.f32.mrb[197].mxu0 }
 0x3a4   : > { %v20637_v16 = vpop.f32.mrb[198].mxu0  ;;  %v22723_v58 = vld [vmem:[#allocation31_spill] sm:$0xff] }
 0x3a5   : > { %22719 = vst [vmem:[#allocation57_spill] sm:$0xff] %v20637_v16  ;;  %v2637_v21 = vpop.f32.mrb[199].mxu0  ;;  %3233 = vmatmul.mubr.bf16.gmra.mrb[80].mxu1 %v20326_v18 }
 0x3a6   : > { %3240 = vmatprep.mubr.bf16.mxu1 %v22720_v20 }
 0x3a7   : > { %16477 = vmatmul.mubr.bf16.gmra.mrb[48].mxu0 %v22682_v36 }
 0x3a8   : > { %16480 = vmatprep.mubr.bf16.mxu0 %v22682_v36 }
 0x3aa   : > { %v20643_v2 = vpop.f32.mrb[200].mxu0 }
 0x3ab   : > { %22721 = vst [vmem:[#allocation28_spill] sm:$0xff] %v20643_v2  ;;  %v2642_v48 = vpop.f32.mrb[201].mxu0 }
 0x3ac   : > { %v20645_v38 = vpop.f32.mrb[202].mxu0  ;;  %v22726_v48 = vld [vmem:[#allocation30_spill] sm:$0xff] }
 0x3ad   : > { %22722 = vst [vmem:[#allocation58_spill] sm:$0xff] %v20645_v38  ;;  %v2645_v59 = vpop.f32.mrb[203].mxu0  ;;  %3241 = vmatmul.mubr.bf16.gmra.mrb[84].mxu1 %v20324_v8 }
 0x3ae   : > { %3248 = vmatprep.mubr.bf16.mxu1 %v22723_v58 }
 0x3af   : > { %16481 = vmatmul.mubr.bf16.gmra.mrb[52].mxu0 %v22682_v36 }
 0x3b0   : > { %16484 = vmatprep.mubr.bf16.mxu0 %v22682_v36 }
 0x3b2   : > { %v20651_v21 = vpop.f32.mrb[204].mxu0 }
 0x3b3   : > { %22724 = vst [vmem:[#allocation31_spill] sm:$0xff] %v20651_v21  ;;  %v2650_v16 = vpop.f32.mrb[205].mxu0  ;;  %v18158_v21 = vld [vmem:[#allocation12] ss:$8 sps:$4 sm:$0xff]  }
 0x3b4   : > { %v20653_v55 = vpop.f32.mrb[206].mxu0 }
 0x3b5   : > { %22725 = vst [vmem:[#allocation59_spill] sm:$0xff] %v20653_v55  ;;  %v2653_v1 = vpop.f32.mrb[207].mxu0  ;;  %3249 = vmatmul.mubr.bf16.gmra.mrb[88].mxu1 %v20338_v51 }
 0x3b6   : > { %3256 = vmatprep.mubr.bf16.mxu1 %v22726_v48 }
 0x3b7   : > { %16485 = vmatmul.mubr.bf16.gmra.mrb[56].mxu0 %v22682_v36 }
 0x3b8   : > { %16488 = vmatprep.mubr.bf16.mxu0 %v22682_v36 }
 0x3ba   : > { %v20659_v59 = vpop.f32.mrb[208].mxu0 }
 0x3bb   : > { %22727 = vst [vmem:[#allocation30_spill] sm:$0xff] %v20659_v59  ;;  %v2658_v38 = vpop.f32.mrb[209].mxu0 }
 0x3bc   : > { %v20661_v2 = vpop.f32.mrb[210].mxu0  ;;  %v18164_v38 = vld [vmem:[#allocation12 + $0x14] ss:$8 sps:$4 sm:$0xff]  }
 0x3bd   : > { %22728 = vst [vmem:[#allocation60_spill] sm:$0xff] %v20661_v2  ;;  %v2661_v57 = vpop.f32.mrb[211].mxu0  ;;  %3257 = vmatmul.mubr.bf16.gmra.mrb[92].mxu1 %v20336_v44  ;;  %v18168_v2 = vld [vmem:[#allocation12 + $0x24] ss:$8 sps:$4 sm:$0xff]  }
 0x3be   : > { %3264 = vmatprep.mubr.bf16.mxu1 %v20446_v40  ;;  %v18162_v57 = vld [vmem:[#allocation12 + $0x10] ss:$8 sps:$4 sm:$0xff]  }
 0x3bf   : > { %16489 = vmatmul.mubr.bf16.gmra.mrb[60].mxu0 %v22682_v36 }
 0x3c0   : > { %4333 = vmatprep.mubr.bf16.mxu0 %v22682_v36 }
 0x3c2   : > { %v20667_v1 = vpop.f32.mrb[212].mxu0 }
 0x3c3   : > { %22729 = vst [vmem:[#allocation61_spill] sm:$0xff] %v20667_v1  ;;  %v2666_v16 = vpop.f32.mrb[213].mxu0 }
 0x3c4   : > { %v20669_v55 = vpop.f32.mrb[214].mxu0 }
 0x3c5   : > { %22730 = vst [vmem:[#allocation62_spill] sm:$0xff] %v20669_v55  ;;  %v2669_v3 = vpop.f32.mrb[215].mxu0  ;;  %3265 = vmatmul.mubr.bf16.gmra.mrb[96].mxu1 %v20398_v32 }
 0x3c6   : > { %3272 = vmatprep.mubr.bf16.mxu1 %v20444_v49  ;;  %v18166_v3 = vld [vmem:[#allocation12 + $0x20] ss:$8 sps:$4 sm:$0xff]  }
 0x3c7   : > { %4334 = vmatmul.mubr.bf16.vlgmr.msra.gmra.mrb[64].mxu0 %v22682_v36 }
 0x3c8   : > { %4575 = vmatpush1.bf16.msra.mxu0 %v18158_v21  ;;  %4343 = vmatprep.mubr.bf16.mxu0 %v22682_v36  ;;  %v18170_v21 = vld [vmem:[#allocation12 + $0x30] ss:$8 sps:$4 sm:$0xff]  }
 0x3c9   : > { %4576 = vmatprep.subr.bf16.mxu0 %v18164_v38  ;;  %v18178_v38 = vld [vmem:[#allocation12 + $0x44] ss:$8 sps:$4 sm:$0xff]  }
 0x3ca   : > { %v20675_v59 = vpop.f32.mrb[216].mxu0 }
 0x3cb   : > { %22731 = vst [vmem:[#allocation63_spill] sm:$0xff] %v20675_v59  ;;  %v2674_v16 = vpop.f32.mrb[217].mxu0 }
 0x3cc   : > { %v20677_v1 = vpop.f32.mrb[218].mxu0  ;;  %4577 = vmatpush1.bf16.msra.mxu0 %v18162_v57 }
 0x3cd   : > { %22732 = vst [vmem:[#allocation64_spill] sm:$0xff] %v20677_v1  ;;  %v2677_v55 = vpop.f32.mrb[219].mxu0  ;;  %3273 = vmatmul.mubr.bf16.gmra.mrb[100].mxu1 %v20396_v12  ;;  %4578 = vmatprep.subr.bf16.mxu0 %v18168_v2  ;;  %v18181_v2 = vld [vmem:[#allocation12 + $0x54] ss:$8 sps:$4 sm:$0xff]  }
 0x3ce   : > { %3280 = vmatprep.mubr.bf16.mxu1 %v20459_v62  ;;  %v18176_v55 = vld [vmem:[#allocation12 + $0x40] ss:$8 sps:$4 sm:$0xff]  }
 0x3cf   : > { %4344 = vmatmul.mubr.bf16.gmra.mrb[68].mxu0 %v22682_v36 }
 0x3d0   : > { %4353 = vmatprep.mubr.bf16.mxu0 %v22682_v36  ;;  %4579 = vmatpush1.bf16.msra.mxu0 %v18166_v3  ;;  %v18184_v3 = vld [vmem:[#allocation12 + $0x64] ss:$8 sps:$4 sm:$0xff]  }
 0x3d1   : > { %4580 = vmatprep.subr.bf16.mxu0 %v18172_v0  ;;  %v18179_v0 = vld [vmem:[#allocation12 + $0x50] ss:$8 sps:$4 sm:$0xff]  }
 0x3d2   : > { %v20683_v16 = vpop.f32.mrb[220].mxu0 }
 0x3d3   : > { %22733 = vst [vmem:[#allocation65_spill] sm:$0xff] %v20683_v16  ;;  %v2682_v1 = vpop.f32.mrb[221].mxu0 }
 0x3d4   : > { %v20685_v57 = vpop.f32.mrb[222].mxu0  ;;  %4581 = vmatpush1.bf16.msra.mxu0 %v18170_v21 }
 0x3d5   : > { %22734 = vst [vmem:[#allocation66_spill] sm:$0xff] %v20685_v57  ;;  %v2685_v59 = vpop.f32.mrb[223].mxu0  ;;  %3281 = vmatmul.mubr.bf16.gmra.mrb[104].mxu1 %v20410_v29  ;;  %4582 = vmatprep.subr.bf16.mxu0 %v18178_v38  ;;  %v18187_v38 = vld [vmem:[#allocation12 + $0x74] ss:$8 sps:$4 sm:$0xff]  }
 0x3d6   : > { %3288 = vmatprep.mubr.bf16.mxu1 %v20457_v54  ;;  %v18182_v59 = vld [vmem:[#allocation12 + $0x60] ss:$8 sps:$4 sm:$0xff]  }
 0x3d7   : > { %4354 = vmatmul.mubr.bf16.gmra.mrb[72].mxu0 %v22682_v36 }
 0x3d8   : > { %4363 = vmatprep.mubr.bf16.mxu0 %v22682_v36  ;;  %4583 = vmatpush1.bf16.msra.mxu0 %v18176_v55  ;;  %v18185_v55 = vld [vmem:[#allocation12 + $0x70] ss:$8 sps:$4 sm:$0xff]  }
 0x3d9   : > { %4584 = vmatprep.subr.bf16.mxu0 %v18181_v2  ;;  %v18190_v2 = vld [vmem:[#allocation12 + $0x104] ss:$8 sps:$4 sm:$0xff]  }
 0x3da   : > { %v20691_v1 = vpop.f32.mrb[224].mxu0 }
 0x3db   : > { %22735 = vst [vmem:[#allocation67_spill] sm:$0xff] %v20691_v1  ;;  %v2690_v57 = vpop.f32.mrb[225].mxu0 }
 0x3dc   : > { %v20693_v21 = vpop.f32.mrb[226].mxu0  ;;  %4585 = vmatpush1.bf16.msra.mxu0 %v18179_v0 }
 0x3dd   : > { %22736 = vst [vmem:[#allocation68_spill] sm:$0xff] %v20693_v21  ;;  %v2693_v16 = vpop.f32.mrb[227].mxu0  ;;  %3289 = vmatmul.mubr.bf16.gmra.mrb[108].mxu1 %v20408_v22  ;;  %4586 = vmatprep.subr.bf16.mxu0 %v18184_v3 }
 0x3de   : > { %3296 = vmatprep.mubr.bf16.mxu1 %v20473_v24 }
 0x3df   : > { %4364 = vmatmul.mubr.bf16.gmra.mrb[76].mxu0 %v22682_v36 }
 0x3e0   : > { %4373 = vmatprep.mubr.bf16.mxu0 %v22682_v36  ;;  %4587 = vmatpush1.bf16.msra.mxu0 %v18182_v59 }
 0x3e1   : > { %4588 = vmatprep.subr.bf16.mxu0 %v18187_v38 }
 0x3e2   : > { %v20699_v57 = vpop.f32.mrb[228].mxu0 }
 0x3e3   : > { %22737 = vst [vmem:[#allocation69_spill] sm:$0xff] %v20699_v57  ;;  %v2698_v21 = vpop.f32.mrb[229].mxu0 }
 0x3e4   : > { %v20701_v0 = vpop.f32.mrb[230].mxu0  ;;  %4589 = vmatpush1.bf16.msra.mxu0 %v18185_v55 }
 0x3e5   : > { %22738 = vst [vmem:[#allocation70_spill] sm:$0xff] %v20701_v0  ;;  %v2701_v16 = vpop.f32.mrb[231].mxu0  ;;  %3297 = vmatmul.mubr.bf16.gmra.mrb[112].mxu1 %v20422_v27  ;;  %4863 = vmatprep.subr.bf16.mxu0 %v18190_v2  ;;  %v18188_v0 = vld [vmem:[#allocation12 + $0x100] ss:$8 sps:$4 sm:$0xff]  }
 0x3e6   : > { %3304 = vmatprep.mubr.bf16.mxu1 %v20471_v34 }
 0x3e7   : > { %4374 = vmatmul.mubr.bf16.gmra.mrb[80].mxu0 %v22682_v36 }
 0x3e8   : > { %4383 = vmatprep.mubr.bf16.mxu0 %v22682_v36 }
 0x3ea   : > { %v20707_v3 = vpop.f32.mrb[232].mxu0 }
 0x3eb   : > { %22739 = vst [vmem:[#allocation71_spill] sm:$0xff] %v20707_v3  ;;  %v2706_v59 = vpop.f32.mrb[233].mxu0 }
 0x3ec   : > { %v20709_v38 = vpop.f32.mrb[234].mxu0 }
 0x3ed   : > { %22740 = vst [vmem:[#allocation72_spill] sm:$0xff] %v20709_v38  ;;  %v2709_v57 = vpop.f32.mrb[235].mxu0  ;;  %3305 = vmatmul.mubr.bf16.gmra.mrb[116].mxu1 %v20420_v7 }
 0x3ee   : > { %3312 = vmatprep.mubr.bf16.mxu1 %v20489_v4 }
 0x3ef   : > { %4384 = vmatmul.mubr.bf16.gmra.mrb[84].mxu0 %v22682_v36 }
 0x3f0   : > { %4393 = vmatprep.mubr.bf16.mxu0 %v22682_v36 }
 0x3f2   : > { %v20715_v21 = vpop.f32.mrb[236].mxu0 }
 0x3f3   : > { %22741 = vst [vmem:[#allocation73_spill] sm:$0xff] %v20715_v21  ;;  %v2714_v55 = vpop.f32.mrb[237].mxu0 }
 0x3f4   : > { %v20717_v2 = vpop.f32.mrb[238].mxu0 }
 0x3f5   : > { %22742 = vst [vmem:[#allocation74_spill] sm:$0xff] %v20717_v2  ;;  %v2717_v16 = vpop.f32.mrb[239].mxu0  ;;  %3313 = vmatmul.mubr.bf16.gmra.mrb[120].mxu1 %v20434_v15 }
 0x3f6   : > { %3320 = vmatprep.mubr.bf16.mxu1 %v20485_v31 }
 0x3f7   : > { %4394 = vmatmul.mubr.bf16.gmra.mrb[88].mxu0 %v22682_v36 }
 0x3f8   : > { %4403 = vmatprep.mubr.bf16.mxu0 %v22682_v36 }
 0x3fa   : > { %v20723_v57 = vpop.f32.mrb[240].mxu0 }
 0x3fb   : > { %22743 = vst [vmem:[#allocation75_spill] sm:$0xff] %v20723_v57  ;;  %v2722_v59 = vpop.f32.mrb[241].mxu0 }
 0x3fc   : > { %v20725_v38 = vpop.f32.mrb[242].mxu0 }
 0x3fd   : > { %22744 = vst [vmem:[#allocation76_spill] sm:$0xff] %v20725_v38  ;;  %v2725_v3 = vpop.f32.mrb[243].mxu0  ;;  %3321 = vmatmul.mubr.bf16.gmra.mrb[124].mxu1 %v22705_v56 }
 0x3fe   : > { %3361 = vmatprep.mubr.bf16.mxu1 %v20252_v39 }
 0x3ff   : > { %4404 = vmatmul.mubr.bf16.gmra.mrb[92].mxu0 %v22682_v36 }
 0x400   : > { %4413 = vmatprep.mubr.bf16.mxu0 %v22682_v36 }
 0x402   : > { %v20731_v55 = vpop.f32.mrb[244].mxu0 }
 0x403   : > { %22745 = vst [vmem:[#allocation77_spill] sm:$0xff] %v20731_v55  ;;  %v2730_v16 = vpop.f32.mrb[245].mxu0 }
 0x404   : > { %v20733_v2 = vpop.f32.mrb[246].mxu0 }
 0x405   : > { %22746 = vst [vmem:[#allocation78_spill] sm:$0xff] %v20733_v2  ;;  %v2733_v21 = vpop.f32.mrb[247].mxu0  ;;  %3362 = vmatmul.mubr.bf16.vlgmr.msra.gmra.mrb[0].mxu1 %v20202_v13 }
 0x406   : > { %3369 = vmatprep.mubr.bf16.mxu1 %v20250_v37 }
 0x407   : > { %4414 = vmatmul.mubr.bf16.gmra.mrb[96].mxu0 %v22682_v36 }
 0x408   : > { %4423 = vmatprep.mubr.bf16.mxu0 %v22682_v36 }
 0x40a   : > { %v20739_v3 = vpop.f32.mrb[248].mxu0 }
 0x40b   : > { %22747 = vst [vmem:[#allocation79_spill] sm:$0xff] %v20739_v3  ;;  %v2738_v39 = vpop.f32.mrb[249].mxu0 }
 0x40c   : > { %v20741_v59 = vpop.f32.mrb[250].mxu0 }
 0x40d   : > { %22748 = vst [vmem:[#allocation80_spill] sm:$0xff] %v20741_v59  ;;  %v2741_v38 = vpop.f32.mrb[251].mxu0  ;;  %3370 = vmatmul.mubr.bf16.gmra.mrb[4].mxu1 %v20200_v11 }
 0x40e   : > { %3377 = vmatprep.mubr.bf16.mxu1 %v20266_v61 }
 0x40f   : > { %4424 = vmatmul.mubr.bf16.gmra.mrb[100].mxu0 %v22682_v36 }
 0x410   : > { %4433 = vmatprep.mubr.bf16.mxu0 %v22682_v36 }
 0x412   : > { %v20747_v13 = vpop.f32.mrb[252].mxu0 }
 0x413   : > { %22749 = vst [vmem:[#allocation81_spill] sm:$0xff] %v20747_v13  ;;  %v2746_v37 = vpop.f32.mrb[253].mxu0 }
 0x414   : > { %v20749_v21 = vpop.f32.mrb[254].mxu0 }
 0x415   : > { %22750 = vst [vmem:[#allocation82_spill] sm:$0xff] %v20749_v21  ;;  %v2749_v16 = vpop.f32.mrb[255].mxu0  ;;  %3378 = vmatmul.mubr.bf16.gmra.mrb[8].mxu1 %v20214_v35 }
 0x416   : > { %3385 = vmatprep.mubr.bf16.mxu1 %v20264_v60 }
 0x417   : > { %4434 = vmatmul.mubr.bf16.gmra.mrb[104].mxu0 %v22682_v36 }
 0x418   : > { %4443 = vmatprep.mubr.bf16.mxu0 %v22682_v36 }
 0x41a   : > { %v20755_v11 = vpop.f32.mrb[0].mxu0 }
 0x41b   : > { %v20757_v61 = vpop.f32.mrb[1].mxu0 }
 0x41c   : > { %v20759_v38 = vpop.f32.mrb[2].mxu0 }
 0x41d   : > { %3386 = vmatmul.mubr.bf16.gmra.mrb[12].mxu1 %v20212_v33  ;;  %v20762_v39 = vpop.f32.mrb[3].mxu0 }
 0x41e   : > { %3393 = vmatprep.mubr.bf16.mxu1 %v20278_v26 }
 0x41f   : > { %4444 = vmatmul.mubr.bf16.gmra.mrb[108].mxu0 %v22682_v36 }
 0x420   : > { %4453 = vmatprep.mubr.bf16.mxu0 %v22682_v36 }
 0x422   : > { %v20767_v35 = vpop.f32.mrb[4].mxu0 }
 0x423   : > { %v20769_v60 = vpop.f32.mrb[5].mxu0 }
 0x424   : > { %v20771_v37 = vpop.f32.mrb[6].mxu0 }
 0x425   : > { %3394 = vmatmul.mubr.bf16.gmra.mrb[16].mxu1 %v20227_v53  ;;  %v20774_v16 = vpop.f32.mrb[7].mxu0 }
 0x426   : > { %3401 = vmatprep.mubr.bf16.mxu1 %v20276_v25 }
 0x427   : > { %4454 = vmatmul.mubr.bf16.gmra.mrb[112].mxu0 %v22682_v36 }
 0x428   : > { %4463 = vmatprep.mubr.bf16.mxu0 %v22682_v36 }
 0x42a   : > { %v20779_v33 = vpop.f32.mrb[8].mxu0 }
 0x42b   : > { %v20781_v26 = vpop.f32.mrb[9].mxu0 }
 0x42c   : > { %v20783_v21 = vpop.f32.mrb[10].mxu0 }
 0x42d   : > { %3402 = vmatmul.mubr.bf16.gmra.mrb[20].mxu1 %v20225_v52  ;;  %v20786_v13 = vpop.f32.mrb[11].mxu0 }
 0x42e   : > { %3409 = vmatprep.mubr.bf16.mxu1 %v20290_v47 }
 0x42f   : > { %4464 = vmatmul.mubr.bf16.gmra.mrb[116].mxu0 %v22682_v36 }
 0x430   : > { %4473 = vmatprep.mubr.bf16.mxu0 %v22682_v36 }
 0x432   : > { %v20791_v53 = vpop.f32.mrb[12].mxu0 }
 0x433   : > { %v20793_v25 = vpop.f32.mrb[13].mxu0 }
 0x434   : > { %v20795_v59 = vpop.f32.mrb[14].mxu0 }
 0x435   : > { %3410 = vmatmul.mubr.bf16.gmra.mrb[24].mxu1 %v20239_v14  ;;  %v20798_v3 = vpop.f32.mrb[15].mxu0 }
 0x436   : > { %3417 = vmatprep.mubr.bf16.mxu1 %v20288_v46 }
 0x437   : > { %4474 = vmatmul.mubr.bf16.gmra.mrb[120].mxu0 %v22682_v36 }
 0x438   : > { %4483 = vmatprep.mubr.bf16.mxu0 %v22682_v36 }
 0x43a   : > { %v20803_v52 = vpop.f32.mrb[16].mxu0 }
 0x43b   : > { %v20805_v47 = vpop.f32.mrb[17].mxu0 }
 0x43c   : > { %v20807_v2 = vpop.f32.mrb[18].mxu0 }
 0x43d   : > { %22751 = vst [vmem:[#allocation83_spill] sm:$0xff] %v20807_v2  ;;  %3418 = vmatmul.mubr.bf16.gmra.mrb[28].mxu1 %v20237_v10  ;;  %v20810_v55 = vpop.f32.mrb[19].mxu0  ;;  %v18193_v10 = vld [vmem:[#allocation12 + $0x114] ss:$8 sps:$4 sm:$0xff]  }
 0x43e   : > { %3425 = vmatprep.mubr.bf16.mxu1 %v22704_v19  ;;  %v18191_v19 = vld [vmem:[#allocation12 + $0x110] ss:$8 sps:$4 sm:$0xff]  }
 0x43f   : > { %4484 = vmatmul.mubr.bf16.gmra.mrb[124].mxu0 %v22682_v36 }
 0x440   : > { %4606 = vmatprep.mubr.bf16.mxu0 %v22682_v36 }
 0x442   : > { %v20815_v14 = vpop.f32.mrb[20].mxu0 }
 0x443   : > { %22752 = vst [vmem:[#allocation84_spill] sm:$0xff] %v20815_v14  ;;  %v20817_v46 = vpop.f32.mrb[21].mxu0  ;;  %v18196_v14 = vld [vmem:[#allocation12 + $0x124] ss:$8 sps:$4 sm:$0xff]  }
 0x444   : > { %22753 = vst [vmem:[#allocation85_spill] sm:$0xff] %v20817_v46  ;;  %v20819_v57 = vpop.f32.mrb[22].mxu0 }
 0x445   : > { %22754 = vst [vmem:[#allocation86_spill] sm:$0xff] %v20819_v57  ;;  %3426 = vmatmul.mubr.bf16.gmra.mrb[32].mxu1 %v20302_v17  ;;  %v20822_v1 = vpop.f32.mrb[23].mxu0  ;;  %v18194_v17 = vld [vmem:[#allocation12 + $0x120] ss:$8 sps:$4 sm:$0xff]  }
 0x446   : > { %22755 = vst [vmem:[#allocation87_spill] sm:$0xff] %v20822_v1  ;;  %3433 = vmatprep.mubr.bf16.mxu1 %v22708_v63  ;;  %v18199_v63 = vld [vmem:[#allocation12 + $0x134] ss:$8 sps:$4 sm:$0xff]  }
 0x447   : > { %4607 = vmatmul.mubr.bf16.vlgmr.msra.gmra.mrb[64].mxu0 %v22682_v36 }
 0x448   : > { %4864 = vmatpush1.bf16.msra.mxu0 %v18188_v0  ;;  %4616 = vmatprep.mubr.bf16.mxu0 %v22682_v36  ;;  %v18197_v0 = vld [vmem:[#allocation12 + $0x130] ss:$8 sps:$4 sm:$0xff]  }
 0x449   : > { %4865 = vmatprep.subr.bf16.mxu0 %v18193_v10  ;;  %v18202_v10 = vld [vmem:[#allocation12 + $0x144] ss:$8 sps:$4 sm:$0xff]  }
 0x44a   : > { %v20827_v2 = vpop.f32.mrb[24].mxu0 }
 0x44b   : > { %22756 = vst [vmem:[#allocation88_spill] sm:$0xff] %v20827_v2  ;;  %v20829_v46 = vpop.f32.mrb[25].mxu0 }
 0x44c   : > { %v20831_v57 = vpop.f32.mrb[26].mxu0  ;;  %4866 = vmatpush1.bf16.msra.mxu0 %v18191_v19 }
 0x44d   : > { %22757 = vst [vmem:[#allocation89_spill] sm:$0xff] %v20831_v57  ;;  %3434 = vmatmul.mubr.bf16.gmra.mrb[36].mxu1 %v20300_v9  ;;  %v20834_v1 = vpop.f32.mrb[27].mxu0  ;;  %4867 = vmatprep.subr.bf16.mxu0 %v18196_v14  ;;  %v18200_v9 = vld [vmem:[#allocation12 + $0x140] ss:$8 sps:$4 sm:$0xff]  }
 0x44e   : > { %3441 = vmatprep.mubr.bf16.mxu1 %v22711_v30  ;;  %v18205_v30 = vld [vmem:[#allocation12 + $0x154] ss:$8 sps:$4 sm:$0xff]  }
 0x44f   : > { %4617 = vmatmul.mubr.bf16.gmra.mrb[68].mxu0 %v22682_v36 }
 0x450   : > { %4626 = vmatprep.mubr.bf16.mxu0 %v22682_v36  ;;  %4868 = vmatpush1.bf16.msra.mxu0 %v18194_v17  ;;  %v18203_v17 = vld [vmem:[#allocation12 + $0x150] ss:$8 sps:$4 sm:$0xff]  }
 0x451   : > { %4869 = vmatprep.subr.bf16.mxu0 %v18199_v63  ;;  %v18208_v63 = vld [vmem:[#allocation12 + $0x164] ss:$8 sps:$4 sm:$0xff]  }
 0x452   : > { %v20839_v2 = vpop.f32.mrb[28].mxu0 }
 0x453   : > { %22758 = vst [vmem:[#allocation90_spill] sm:$0xff] %v20839_v2  ;;  %v20841_v19 = vpop.f32.mrb[29].mxu0 }
 0x454   : > { %v20843_v57 = vpop.f32.mrb[30].mxu0  ;;  %4870 = vmatpush1.bf16.msra.mxu0 %v18197_v0 }
 0x455   : > { %22759 = vst [vmem:[#allocation91_spill] sm:$0xff] %v20843_v57  ;;  %3442 = vmatmul.mubr.bf16.gmra.mrb[40].mxu1 %v20314_v45  ;;  %v20846_v14 = vpop.f32.mrb[31].mxu0  ;;  %4871 = vmatprep.subr.bf16.mxu0 %v18202_v10  ;;  %v18206_v45 = vld [vmem:[#allocation12 + $0x160] ss:$8 sps:$4 sm:$0xff]  }
 0x456   : > { %3449 = vmatprep.mubr.bf16.mxu1 %v22714_v5  ;;  %v18211_v5 = vld [vmem:[#allocation12 + $0x174] ss:$8 sps:$4 sm:$0xff]  }
 0x457   : > { %4627 = vmatmul.mubr.bf16.gmra.mrb[72].mxu0 %v22682_v36 }
 0x458   : > { %4636 = vmatprep.mubr.bf16.mxu0 %v22682_v36  ;;  %4872 = vmatpush1.bf16.msra.mxu0 %v18200_v9  ;;  %v18209_v9 = vld [vmem:[#allocation12 + $0x170] ss:$8 sps:$4 sm:$0xff]  }
 0x459   : > { %4873 = vmatprep.subr.bf16.mxu0 %v18205_v30  ;;  %v18214_v30 = vld [vmem:[#allocation12 + $0x184] ss:$8 sps:$4 sm:$0xff]  }
 0x45a   : > { %v20851_v2 = vpop.f32.mrb[32].mxu0 }
 0x45b   : > { %22760 = vst [vmem:[#allocation92_spill] sm:$0xff] %v20851_v2  ;;  %v20853_v0 = vpop.f32.mrb[33].mxu0 }
 0x45c   : > { %v20855_v57 = vpop.f32.mrb[34].mxu0  ;;  %4874 = vmatpush1.bf16.msra.mxu0 %v18203_v17 }
 0x45d   : > { %22761 = vst [vmem:[#allocation93_spill] sm:$0xff] %v20855_v57  ;;  %3450 = vmatmul.mubr.bf16.gmra.mrb[44].mxu1 %v20312_v43  ;;  %v20858_v10 = vpop.f32.mrb[35].mxu0  ;;  %4875 = vmatprep.subr.bf16.mxu0 %v18208_v63 }
 0x45e   : > { %3457 = vmatprep.mubr.bf16.mxu1 %v22717_v6 }
 0x45f   : > { %4637 = vmatmul.mubr.bf16.gmra.mrb[76].mxu0 %v22682_v36 }
 0x460   : > { %4646 = vmatprep.mubr.bf16.mxu0 %v22682_v36  ;;  %4876 = vmatpush1.bf16.msra.mxu0 %v18206_v45 }
 0x461   : > { %4877 = vmatprep.subr.bf16.mxu0 %v18211_v5 }
 0x462   : > { %v20863_v2 = vpop.f32.mrb[36].mxu0 }
 0x463   : > { %v20865_v17 = vpop.f32.mrb[37].mxu0 }
 0x464   : > { %v20867_v57 = vpop.f32.mrb[38].mxu0  ;;  %4878 = vmatpush1.bf16.msra.mxu0 %v18209_v9 }
 0x465   : > { %3458 = vmatmul.mubr.bf16.gmra.mrb[48].mxu1 %v20326_v18  ;;  %v20870_v43 = vpop.f32.mrb[39].mxu0  ;;  %5216 = vmatprep.subr.bf16.mxu0 %v18214_v30 }
 0x466   : > { %3465 = vmatprep.mubr.bf16.mxu1 %v22720_v20 }
 0x467   : > { %4647 = vmatmul.mubr.bf16.gmra.mrb[80].mxu0 %v22682_v36 }
 0x468   : > { %4656 = vmatprep.mubr.bf16.mxu0 %v22682_v36 }
 0x46a   : > { %v20875_v6 = vpop.f32.mrb[40].mxu0 }
 0x46b   : > { %v20877_v63 = vpop.f32.mrb[41].mxu0 }
 0x46c   : > { %v20879_v45 = vpop.f32.mrb[42].mxu0 }
 0x46d   : > { %22762 = vst [vmem:[#allocation94_spill] sm:$0xff] %v20879_v45  ;;  %3466 = vmatmul.mubr.bf16.gmra.mrb[52].mxu1 %v20324_v8  ;;  %v20882_v5 = vpop.f32.mrb[43].mxu0 }
 0x46e   : > { %3473 = vmatprep.mubr.bf16.mxu1 %v22723_v58 }
 0x46f   : > { %4657 = vmatmul.mubr.bf16.gmra.mrb[84].mxu0 %v22682_v36 }
 0x470   : > { %4666 = vmatprep.mubr.bf16.mxu0 %v22682_v36 }
 0x472   : > { %v20887_v18 = vpop.f32.mrb[44].mxu0 }
 0x473   : > { %22763 = vst [vmem:[#allocation95_spill] sm:$0xff] %v20887_v18  ;;  %v20889_v20 = vpop.f32.mrb[45].mxu0 }
 0x474   : > { %v20891_v9 = vpop.f32.mrb[46].mxu0 }
 0x475   : > { %22764 = vst [vmem:[#allocation96_spill] sm:$0xff] %v20891_v9  ;;  %3474 = vmatmul.mubr.bf16.gmra.mrb[56].mxu1 %v20338_v51  ;;  %v20894_v30 = vpop.f32.mrb[47].mxu0 }
 0x476   : > { %3481 = vmatprep.mubr.bf16.mxu1 %v22726_v48 }
 0x477   : > { %4667 = vmatmul.mubr.bf16.gmra.mrb[88].mxu0 %v22682_v36 }
 0x478   : > { %4676 = vmatprep.mubr.bf16.mxu0 %v22682_v36 }
 0x47a   : > { %v20899_v8 = vpop.f32.mrb[48].mxu0 }
 0x47b   : > { %22765 = vst [vmem:[#allocation97_spill] sm:$0xff] %v20899_v8  ;;  %v20901_v58 = vpop.f32.mrb[49].mxu0 }
 0x47c   : > { %v20903_v45 = vpop.f32.mrb[50].mxu0 }
 0x47d   : > { %22766 = vst [vmem:[#allocation98_spill] sm:$0xff] %v20903_v45  ;;  %3482 = vmatmul.mubr.bf16.gmra.mrb[60].mxu1 %v20336_v44  ;;  %v20906_v18 = vpop.f32.mrb[51].mxu0 }
 0x47e   : > { %3489 = vmatprep.mubr.bf16.mxu1 %v20446_v40 }
 0x47f   : > { %4677 = vmatmul.mubr.bf16.gmra.mrb[92].mxu0 %v22682_v36 }
 0x480   : > { %4686 = vmatprep.mubr.bf16.mxu0 %v22682_v36 }
 0x482   : > { %v20911_v51 = vpop.f32.mrb[52].mxu0 }
 0x483   : > { %22767 = vst [vmem:[#allocation99_spill] sm:$0xff] %v20911_v51  ;;  %v20913_v48 = vpop.f32.mrb[53].mxu0 }
 0x484   : > { %v20915_v9 = vpop.f32.mrb[54].mxu0 }
 0x485   : > { %22768 = vst [vmem:[#allocation100_spill] sm:$0xff] %v20915_v9  ;;  %3490 = vmatmul.mubr.bf16.gmra.mrb[64].mxu1 %v20398_v32  ;;  %v20918_v8 = vpop.f32.mrb[55].mxu0 }
 0x486   : > { %3497 = vmatprep.mubr.bf16.mxu1 %v20444_v49 }
 0x487   : > { %4687 = vmatmul.mubr.bf16.gmra.mrb[96].mxu0 %v22682_v36 }
 0x488   : > { %4696 = vmatprep.mubr.bf16.mxu0 %v22682_v36 }
 0x48a   : > { %v20923_v44 = vpop.f32.mrb[56].mxu0 }
 0x48b   : > { %22769 = vst [vmem:[#allocation101_spill] sm:$0xff] %v20923_v44  ;;  %v20925_v40 = vpop.f32.mrb[57].mxu0 }
 0x48c   : > { %v20927_v45 = vpop.f32.mrb[58].mxu0 }
 0x48d   : > { %3498 = vmatmul.mubr.bf16.gmra.mrb[68].mxu1 %v20396_v12  ;;  %v20930_v51 = vpop.f32.mrb[59].mxu0  ;;  %v18212_v12 = vld [vmem:[#allocation12 + $0x180] ss:$8 sps:$4 sm:$0xff]  }
 0x48e   : > { %3505 = vmatprep.mubr.bf16.mxu1 %v20459_v62  ;;  %v18226_v62 = vld [vmem:[#allocation12 + $0x1c4] ss:$8 sps:$4 sm:$0xff]  }
 0x48f   : > { %4697 = vmatmul.mubr.bf16.gmra.mrb[100].mxu0 %v22682_v36 }
 0x490   : > { %4706 = vmatprep.mubr.bf16.mxu0 %v22682_v36 }
 0x492   : > { %v20935_v32 = vpop.f32.mrb[60].mxu0 }
 0x493   : > { %22770 = vst [vmem:[#allocation102_spill] sm:$0xff] %v20935_v32  ;;  %v20937_v49 = vpop.f32.mrb[61].mxu0  ;;  %v18230_v32 = vld [vmem:[#allocation12 + $0x1e0] ss:$8 sps:$4 sm:$0xff]  }
 0x494   : > { %v20939_v9 = vpop.f32.mrb[62].mxu0 }
 0x495   : > { %22771 = vst [vmem:[#allocation103_spill] sm:$0xff] %v20939_v9  ;;  %3506 = vmatmul.mubr.bf16.gmra.mrb[72].mxu1 %v20410_v29  ;;  %v20942_v44 = vpop.f32.mrb[63].mxu0  ;;  %v18215_v29 = vld [vmem:[#allocation12 + $0x190] ss:$8 sps:$4 sm:$0xff]  }
 0x496   : > { %3513 = vmatprep.mubr.bf16.mxu1 %v20457_v54  ;;  %v18221_v54 = vld [vmem:[#allocation12 + $0x1b0] ss:$8 sps:$4 sm:$0xff]  }
 0x497   : > { %4707 = vmatmul.mubr.bf16.gmra.mrb[104].mxu0 %v22682_v36 }
 0x498   : > { %4716 = vmatprep.mubr.bf16.mxu0 %v22682_v36 }
 0x49d   : > { %3514 = vmatmul.mubr.bf16.gmra.mrb[76].mxu1 %v20408_v22  ;;  %v18217_v22 = vld [vmem:[#allocation12 + $0x194] ss:$8 sps:$4 sm:$0xff]  }
 0x49e   : > { %3521 = vmatprep.mubr.bf16.mxu1 %v20473_v24  ;;  %v18224_v24 = vld [vmem:[#allocation12 + $0x1c0] ss:$8 sps:$4 sm:$0xff]  }
 0x49f   : > { %4717 = vmatmul.mubr.bf16.gmra.mrb[108].mxu0 %v22682_v36 }
 0x4a0   : > { %4726 = vmatprep.mubr.bf16.mxu0 %v22682_v36 }
 0x4a5   : > { %3522 = vmatmul.mubr.bf16.gmra.mrb[80].mxu1 %v20422_v27  ;;  %v18218_v27 = vld [vmem:[#allocation12 + $0x1a0] ss:$8 sps:$4 sm:$0xff]  }
 0x4a6   : > { %3529 = vmatprep.mubr.bf16.mxu1 %v20471_v34  ;;  %v20975_v34 = vld [vmem:[#allocation10] ss:$0 sm:$0xff] }
 0x4a7   : > { %4727 = vmatmul.mubr.bf16.gmra.mrb[112].mxu0 %v22682_v36 }
 0x4a8   : > { %4736 = vmatprep.mubr.bf16.mxu0 %v22682_v36 }
 0x4ad   : > { %3530 = vmatmul.mubr.bf16.gmra.mrb[84].mxu1 %v20420_v7  ;;  %v18220_v7 = vld [vmem:[#allocation12 + $0x1a4] ss:$8 sps:$4 sm:$0xff]  }
 0x4ae   : > { %3537 = vmatprep.mubr.bf16.mxu1 %v20489_v4  ;;  %v2497_v4 = vadd.f32 %v20975_v34, %v20487_v50 }
 0x4af   : > { %4737 = vmatmul.mubr.bf16.gmra.mrb[116].mxu0 %v22682_v36 }
 0x4b0   : > { %4746 = vmatprep.mubr.bf16.mxu0 %v22682_v36 }
 0x4b5   : > { %3538 = vmatmul.mubr.bf16.gmra.mrb[88].mxu1 %v20434_v15  ;;  %v18223_v15 = vld [vmem:[#allocation12 + $0x1b4] ss:$8 sps:$4 sm:$0xff]  }
 0x4b6   : > { %3545 = vmatprep.mubr.bf16.mxu1 %v20485_v31  ;;  %v18229_v31 = vld [vmem:[#allocation12 + $0x1d4] ss:$8 sps:$4 sm:$0xff]  }
 0x4b7   : > { %4747 = vmatmul.mubr.bf16.gmra.mrb[120].mxu0 %v22682_v36 }
 0x4b8   : > { %4756 = vmatprep.mubr.bf16.mxu0 %v22682_v36 }
 0x4bd   : > { %3546 = vmatmul.mubr.bf16.gmra.mrb[92].mxu1 %v22705_v56 }
 0x4be   : > { %3553 = vmatprep.mubr.bf16.mxu1 %v22682_v36 }
 0x4bf   : > { %4757 = vmatmul.mubr.bf16.gmra.mrb[124].mxu0 %v22682_v36 }
 0x4c0   : > { %4895 = vmatprep.mubr.bf16.mxu0 %v22682_v36 }
 0x4c5   : > { %3554 = vmatmul.mubr.bf16.gmra.mrb[96].mxu1 %v22682_v36 }
 0x4c6   : > { %3561 = vmatprep.mubr.bf16.mxu1 %v22682_v36 }
 0x4c7   : > { %4896 = vmatmul.mubr.bf16.vlgmr.msra.gmra.mrb[64].mxu0 %v22682_v36 }
 0x4c8   : > { %5217 = vmatpush1.bf16.msra.mxu0 %v18212_v12  ;;  %4905 = vmatprep.mubr.bf16.mxu0 %v22682_v36  ;;  %v18227_v12 = vld [vmem:[#allocation12 + $0x1d0] ss:$8 sps:$4 sm:$0xff]  }
 0x4c9   : > { %5218 = vmatprep.subr.bf16.mxu0 %v18217_v22 }
 0x4cc   : > { %5219 = vmatpush1.bf16.msra.mxu0 %v18215_v29 }
 0x4cd   : > { %3562 = vmatmul.mubr.bf16.gmra.mrb[100].mxu1 %v22682_v36  ;;  %5220 = vmatprep.subr.bf16.mxu0 %v18220_v7  ;;  %v2500_v7 = vadd.f32 %v20975_v34, %v20492_v42  ;;  %v2505_v42 = vadd.f32 %v20975_v34, %v20499_v28 }
 0x4ce   : > { %3569 = vmatprep.mubr.bf16.mxu1 %v22682_v36 }
 0x4cf   : > { %4906 = vmatmul.mubr.bf16.gmra.mrb[68].mxu0 %v22682_v36 }
 0x4d0   : > { %4915 = vmatprep.mubr.bf16.mxu0 %v22682_v36  ;;  %5221 = vmatpush1.bf16.msra.mxu0 %v18218_v27  ;;  %v18232_v27 = vld [vmem:[#allocation12 + $0x1e4] ss:$8 sps:$4 sm:$0xff]  }
 0x4d1   : > { %5222 = vmatprep.subr.bf16.mxu0 %v18223_v15 }
 0x4d4   : > { %5223 = vmatpush1.bf16.msra.mxu0 %v18221_v54 }
 0x4d5   : > { %3570 = vmatmul.mubr.bf16.gmra.mrb[104].mxu1 %v22682_v36  ;;  %5224 = vmatprep.subr.bf16.mxu0 %v18226_v62 }
 0x4d6   : > { %3577 = vmatprep.mubr.bf16.mxu1 %v22682_v36 }
 0x4d7   : > { %4916 = vmatmul.mubr.bf16.gmra.mrb[72].mxu0 %v22682_v36 }
 0x4d8   : > { %v3363_v56 = vpop.f32.mrb[0].mxu1  ;;  %4925 = vmatprep.mubr.bf16.mxu0 %v22682_v36  ;;  %5225 = vmatpush1.bf16.msra.mxu0 %v18224_v24  ;;  %v18235_v24 = vld [vmem:[#allocation12 + $0x1f4] ss:$8 sps:$4 sm:$0xff]  }
 0x4d9   : > { %v16525_v22 = vadd.f32 %v3363_v56, %v2497_v4  ;;  %v3365_v29 = vpop.f32.mrb[1].mxu1  ;;  %5226 = vmatprep.subr.bf16.mxu0 %v18229_v31 }
 0x4da   : > { %v3366_v15 = vpop.f32.mrb[2].mxu1  ;;  %v18238_v29 = vld [vmem:[#allocation12 + $0x204] ss:$8 sps:$4 sm:$0xff]  }
 0x4db   : > { %v3653_v54 = vadd.f32 %v16525_v22, %v20757_v61  ;;  %v16527_v62 = vadd.f32 %v3366_v15, %v2500_v7  ;;  %v3368_v9 = vpop.f32.mrb[3].mxu1  ;;  %v2508_v22 = vadd.f32 %v20975_v34, %v20502_v23  ;;  %v2513_v23 = vadd.f32 %v20975_v34, %v20508_v41 }
 0x4dc   : > { %5227 = vmatpush1.bf16.msra.mxu0 %v18227_v12  ;;  %v18233_v9 = vld [vmem:[#allocation12 + $0x1f0] ss:$8 sps:$4 sm:$0xff]  }
 0x4dd   : > { %v3656_v50 = vadd.f32 %v16527_v62, %v20762_v39  ;;  %3578 = vmatmul.mubr.bf16.gmra.mrb[108].mxu1 %v22682_v36  ;;  %5228 = vmatprep.subr.bf16.mxu0 %v18232_v27  ;;  %v3907_v4 = vmax.f32 %v3653_v54, 0.0 }
 0x4de   : > { %3585 = vmatprep.mubr.bf16.mxu1 %v22682_v36 }
 0x4df   : > { %v3908_v56 = vmax.f32 %v3656_v50, 0.0  ;;  %4926 = vmatmul.mubr.bf16.gmra.mrb[76].mxu0 %v22682_v36 }
 0x4e0   : > { %v3371_v61 = vpop.f32.mrb[4].mxu1  ;;  %4935 = vmatprep.mubr.bf16.mxu0 %v22682_v36  ;;  %5229 = vmatpush1.bf16.msra.mxu0 %v18230_v32 }
 0x4e1   : > { %v20993_v31 = vpack.c.bf16 %v3908_v56, %v3907_v4  ;;  %v16529_v39 = vadd.f32 %v3371_v61, %v2505_v42  ;;  %v3373_v12 = vpop.f32.mrb[5].mxu1  ;;  %5230 = vmatprep.subr.bf16.mxu0 %v18235_v24 }
 0x4e2   : > { %v3374_v7 = vpop.f32.mrb[6].mxu1 }
 0x4e3   : > { %v3661_v27 = vadd.f32 %v16529_v39, %v20755_v11  ;;  %v16531_v15 = vadd.f32 %v3374_v7, %v2508_v22  ;;  %v3376_v54 = vpop.f32.mrb[7].mxu1 }
 0x4e4   : > { %5231 = vmatpush1.bf16.msra.mxu0 %v18233_v9 }
 0x4e5   : > { %v3664_v28 = vadd.f32 %v16531_v15, %v20759_v38  ;;  %3586 = vmatmul.mubr.bf16.gmra.mrb[112].mxu1 %v22682_v36  ;;  %5569 = vmatprep.subr.bf16.mxu0 %v18238_v29  ;;  %v3909_v32 = vmax.f32 %v3661_v27, 0.0  ;;  %v22772_v38 = vld [vmem:[#allocation33_spill] sm:$0xff]  ;;  %v22773_v29 = vld [vmem:[#allocation34_spill] sm:$0xff] }
 0x4e6   : > { %3593 = vmatprep.mubr.bf16.mxu1 %v22682_v36  ;;  %v2516_v56 = vadd.f32 %v20975_v34, %v22772_v38  ;;  %v2521_v7 = vadd.f32 %v20975_v34, %v22773_v29 }
 0x4e7   : > { %v3910_v62 = vmax.f32 %v3664_v28, 0.0  ;;  %4936 = vmatmul.mubr.bf16.gmra.mrb[80].mxu0 %v22682_v36  ;;  %v22774_v28 = vld [vmem:[#allocation35_spill] sm:$0xff] }
 0x4e8   : > { %v3379_v50 = vpop.f32.mrb[8].mxu1  ;;  %4945 = vmatprep.mubr.bf16.mxu0 %v22682_v36 }
 0x4e9   : > { %v21005_v11 = vpack.c.bf16 %v3910_v62, %v3909_v32  ;;  %v16533_v24 = vadd.f32 %v3379_v50, %v2513_v23  ;;  %v3381_v4 = vpop.f32.mrb[9].mxu1 }
 0x4ea   : > { %v3382_v42 = vpop.f32.mrb[10].mxu1 }
 0x4eb   : > { %v3669_v61 = vadd.f32 %v16533_v24, %v20769_v60  ;;  %v16535_v9 = vadd.f32 %v3382_v42, %v2516_v56  ;;  %v3384_v39 = vpop.f32.mrb[11].mxu1  ;;  %v22775_v56 = vld [vmem:[#allocation36_spill] sm:$0xff] }
 0x4ec   : > { %v2529_v42 = vadd.f32 %v20975_v34, %v22775_v56 }
 0x4ed   : > { %v3672_v12 = vadd.f32 %v16535_v9, %v20774_v16  ;;  %3594 = vmatmul.mubr.bf16.gmra.mrb[116].mxu1 %v22682_v36  ;;  %v3911_v41 = vmax.f32 %v3669_v61, 0.0  ;;  %v2524_v16 = vadd.f32 %v20975_v34, %v22774_v28  ;;  %v22777_v28 = vld [vmem:[#allocation38_spill] sm:$0xff] }
 0x4ee   : > { %3601 = vmatprep.mubr.bf16.mxu1 %v22682_v36 }
 0x4ef   : > { %v3912_v22 = vmax.f32 %v3672_v12, 0.0  ;;  %4946 = vmatmul.mubr.bf16.gmra.mrb[84].mxu0 %v22682_v36  ;;  %v22776_v12 = vld [vmem:[#allocation37_spill] sm:$0xff] }
 0x4f0   : > { %v3387_v27 = vpop.f32.mrb[12].mxu1  ;;  %4955 = vmatprep.mubr.bf16.mxu0 %v22682_v36 }
 0x4f1   : > { %v21017_v15 = vpack.c.bf16 %v3912_v22, %v3911_v41  ;;  %v16537_v60 = vadd.f32 %v3387_v27, %v2521_v7  ;;  %v3389_v54 = vpop.f32.mrb[13].mxu1 }
 0x4f2   : > { %v3390_v32 = vpop.f32.mrb[14].mxu1 }
 0x4f3   : > { %v3677_v62 = vadd.f32 %v16537_v60, %v20767_v35  ;;  %v16539_v23 = vadd.f32 %v3390_v32, %v2524_v16  ;;  %v3392_v50 = vpop.f32.mrb[15].mxu1  ;;  %v2537_v16 = vadd.f32 %v20975_v34, %v22777_v28 }
 0x4f4   : > { %v22778_v50 = vld [vmem:[#allocation39_spill] sm:$0xff] }
 0x4f5   : > { %v3680_v24 = vadd.f32 %v16539_v23, %v20771_v37  ;;  %3602 = vmatmul.mubr.bf16.gmra.mrb[120].mxu1 %v22682_v36  ;;  %v3913_v4 = vmax.f32 %v3677_v62, 0.0  ;;  %v2532_v37 = vadd.f32 %v20975_v34, %v22776_v12 }
 0x4f6   : > { %3609 = vmatprep.mubr.bf16.mxu1 %v22682_v36 }
 0x4f7   : > { %v3914_v38 = vmax.f32 %v3680_v24, 0.0  ;;  %4956 = vmatmul.mubr.bf16.gmra.mrb[88].mxu0 %v22682_v36 }
 0x4f8   : > { %v3395_v61 = vpop.f32.mrb[16].mxu1  ;;  %4965 = vmatprep.mubr.bf16.mxu0 %v22682_v36 }
 0x4f9   : > { %v21029_v9 = vpack.c.bf16 %v3914_v38, %v3913_v4  ;;  %v16541_v35 = vadd.f32 %v3395_v61, %v2529_v42  ;;  %v3397_v39 = vpop.f32.mrb[17].mxu1 }
 0x4fa   : > { %v3398_v41 = vpop.f32.mrb[18].mxu1  ;;  %v22779_v39 = vld [vmem:[#allocation40_spill] sm:$0xff] }
 0x4fb   : > { %v3685_v22 = vadd.f32 %v16541_v35, %v20781_v26  ;;  %v16543_v29 = vadd.f32 %v3398_v41, %v2532_v37  ;;  %v3400_v7 = vpop.f32.mrb[19].mxu1  ;;  %v2545_v12 = vadd.f32 %v20975_v34, %v22779_v39 }
 0x4fc   : > { %v22780_v7 = vld [vmem:[#allocation41_spill] sm:$0xff] }
 0x4fd   : > { %v3688_v27 = vadd.f32 %v16543_v29, %v20786_v13  ;;  %3610 = vmatmul.mubr.bf16.gmra.mrb[124].mxu1 %v22682_v36  ;;  %v3915_v60 = vmax.f32 %v3685_v22, 0.0  ;;  %v2540_v13 = vadd.f32 %v20975_v34, %v22778_v50 }
 0x4fe   : > { %8196 = vmatprep.mubr.bf16.mxu1 %v22682_v36 }
 0x4ff   : > { %v3916_v54 = vmax.f32 %v3688_v27, 0.0  ;;  %4966 = vmatmul.mubr.bf16.gmra.mrb[92].mxu0 %v22682_v36 }
 0x500   : > { %v3403_v32 = vpop.f32.mrb[20].mxu1  ;;  %4975 = vmatprep.mubr.bf16.mxu0 %v22682_v36 }
 0x501   : > { %v21041_v62 = vpack.c.bf16 %v3916_v54, %v3915_v60  ;;  %v16545_v26 = vadd.f32 %v3403_v32, %v2537_v16  ;;  %v3405_v23 = vpop.f32.mrb[21].mxu1 }
 0x502   : > { %v3406_v24 = vpop.f32.mrb[22].mxu1 }
 0x503   : > { %v3693_v4 = vadd.f32 %v16545_v26, %v20779_v33  ;;  %v16547_v38 = vadd.f32 %v3406_v24, %v2540_v13  ;;  %v3408_v56 = vpop.f32.mrb[23].mxu1  ;;  %v2548_v33 = vadd.f32 %v20975_v34, %v22780_v7  ;;  %v22781_v26 = vld [vmem:[#allocation42_spill] sm:$0xff] }
 0x504   : > { %v2553_v23 = vadd.f32 %v20975_v34, %v22781_v26 }
 0x505   : > { %v3696_v42 = vadd.f32 %v16547_v38, %v20783_v21  ;;  %v3917_v61 = vmax.f32 %v3693_v4, 0.0  ;;  %v22782_v38 = vld [vmem:[#allocation43_spill] sm:$0xff] }
 0x507   : > { %v3918_v35 = vmax.f32 %v3696_v42, 0.0  ;;  %4976 = vmatmul.mubr.bf16.gmra.mrb[96].mxu0 %v20993_v31 }
 0x508   : > { %v3411_v37 = vpop.f32.mrb[24].mxu1  ;;  %4985 = vmatprep.mubr.bf16.mxu0 %v22682_v36 }
 0x509   : > { %v21051_v41 = vpack.c.bf16 %v3918_v35, %v3917_v61  ;;  %v16549_v22 = vadd.f32 %v3411_v37, %v2545_v12  ;;  %v3413_v29 = vpop.f32.mrb[25].mxu1  ;;  %v22783_v37 = vld [vmem:[#allocation44_spill] sm:$0xff] }
 0x50a   : > { %v3414_v27 = vpop.f32.mrb[26].mxu1 }
 0x50b   : > { %v3701_v21 = vadd.f32 %v16549_v22, %v20793_v25  ;;  %v16551_v60 = vadd.f32 %v3414_v27, %v2548_v33  ;;  %v3416_v54 = vpop.f32.mrb[27].mxu1  ;;  %v2556_v25 = vadd.f32 %v20975_v34, %v22782_v38  ;;  %v2561_v22 = vadd.f32 %v20975_v34, %v22783_v37 }
 0x50d   : > { %v3704_v28 = vadd.f32 %v16551_v60, %v20798_v3  ;;  %v3919_v16 = vmax.f32 %v3701_v21, 0.0  ;;  %v22784_v21 = vld [vmem:[#allocation45_spill] sm:$0xff] }
 0x50f   : > { %v3920_v32 = vmax.f32 %v3704_v28, 0.0  ;;  %4986 = vmatmul.mubr.bf16.gmra.mrb[100].mxu0 %v21005_v11 }
 0x510   : > { %v3419_v50 = vpop.f32.mrb[28].mxu1  ;;  %4995 = vmatprep.mubr.bf16.mxu0 %v22682_v36 }
 0x511   : > { %v21061_v13 = vpack.c.bf16 %v3920_v32, %v3919_v16  ;;  %v16553_v24 = vadd.f32 %v3419_v50, %v2553_v23  ;;  %v3421_v4 = vpop.f32.mrb[29].mxu1  ;;  %v22785_v23 = vld [vmem:[#allocation46_spill] sm:$0xff] }
 0x512   : > { %v3422_v56 = vpop.f32.mrb[30].mxu1  ;;  %v2569_v50 = vadd.f32 %v20975_v34, %v22785_v23 }
 0x513   : > { %v3709_v3 = vadd.f32 %v16553_v24, %v20791_v53  ;;  %v16555_v42 = vadd.f32 %v3422_v56, %v2556_v25  ;;  %v3424_v61 = vpop.f32.mrb[31].mxu1  ;;  %v2564_v53 = vadd.f32 %v20975_v34, %v22784_v21  ;;  %v22786_v56 = vld [vmem:[#allocation47_spill] sm:$0xff] }
 0x515   : > { %v3712_v35 = vadd.f32 %v16555_v42, %v20795_v59  ;;  %v3921_v39 = vmax.f32 %v3709_v3, 0.0 }
 0x517   : > { %v3922_v12 = vmax.f32 %v3712_v35, 0.0  ;;  %4996 = vmatmul.mubr.bf16.gmra.mrb[104].mxu0 %v21017_v15  ;;  %v22787_v35 = vld [vmem:[#allocation83_spill] sm:$0xff] }
 0x518   : > { %v3427_v29 = vpop.f32.mrb[32].mxu1  ;;  %5005 = vmatprep.mubr.bf16.mxu0 %v22682_v36 }
 0x519   : > { %v21071_v7 = vpack.c.bf16 %v3922_v12, %v3921_v39  ;;  %v16557_v33 = vadd.f32 %v3427_v29, %v2561_v22  ;;  %v3429_v27 = vpop.f32.mrb[33].mxu1  ;;  %v22788_v22 = vld [vmem:[#allocation48_spill] sm:$0xff] }
 0x51a   : > { %v3430_v60 = vpop.f32.mrb[34].mxu1  ;;  %v2577_v29 = vadd.f32 %v20975_v34, %v22788_v22 }
 0x51b   : > { %v3717_v59 = vadd.f32 %v16557_v33, %v20805_v47  ;;  %v16559_v54 = vadd.f32 %v3430_v60, %v2564_v53  ;;  %v3432_v28 = vpop.f32.mrb[35].mxu1  ;;  %v2572_v47 = vadd.f32 %v20975_v34, %v22786_v56  ;;  %v22789_v60 = vld [vmem:[#allocation49_spill] sm:$0xff]  ;;  %v22792_v56 = vld [vmem:[#allocation50_spill] sm:$0xff] }
 0x51d   : > { %v3720_v16 = vadd.f32 %v16559_v54, %v20810_v55  ;;  %v3923_v32 = vmax.f32 %v3717_v59, 0.0  ;;  %v18254_v59 = vld [vmem:[#allocation15 + $0x200] ss:$16 sps:$4 sm:$0xff]   ;;  %v18256_v54 = vld [vmem:[#allocation15 + $0x204] ss:$16 sps:$4 sm:$0xff]  }
 0x51e   : > { %8164 = vmatprep.subr.bf16.mxu1 %v18256_v54 }
 0x51f   : > { %v3924_v26 = vmax.f32 %v3720_v16, 0.0  ;;  %5006 = vmatmul.mubr.bf16.gmra.mrb[108].mxu0 %v21029_v9  ;;  %v22790_v16 = vld [vmem:[#allocation85_spill] sm:$0xff]  ;;  %8165 = vmatpush1.bf16.msra.mxu1 %v18254_v59  ;;  %v22796_v59 = vld [vmem:[#allocation52_spill] sm:$0xff] }
 0x520   : > { %v3435_v24 = vpop.f32.mrb[36].mxu1  ;;  %5015 = vmatprep.mubr.bf16.mxu0 %v22682_v36  ;;  %v2593_v54 = vadd.f32 %v20975_v34, %v22796_v59 }
 0x521   : > { %v21081_v4 = vpack.c.bf16 %v3924_v26, %v3923_v32  ;;  %v16561_v38 = vadd.f32 %v3435_v24, %v2569_v50  ;;  %v3437_v25 = vpop.f32.mrb[37].mxu1  ;;  %v22791_v50 = vld [vmem:[#allocation87_spill] sm:$0xff] }
 0x522   : > { %v3438_v3 = vpop.f32.mrb[38].mxu1 }
 0x523   : > { %v3725_v55 = vadd.f32 %v16561_v38, %v20803_v52  ;;  %v16563_v42 = vadd.f32 %v3438_v3, %v2572_v47  ;;  %v3440_v61 = vpop.f32.mrb[39].mxu1  ;;  %v2580_v52 = vadd.f32 %v20975_v34, %v22789_v60  ;;  %v2585_v47 = vadd.f32 %v20975_v34, %v22792_v56 }
 0x525   : > { %v3728_v39 = vadd.f32 %v16563_v42, %v22787_v35  ;;  %v3925_v12 = vmax.f32 %v3725_v55, 0.0  ;;  %v22793_v35 = vld [vmem:[#allocation51_spill] sm:$0xff] }
 0x527   : > { %v3926_v37 = vmax.f32 %v3728_v39, 0.0  ;;  %5016 = vmatmul.mubr.bf16.gmra.mrb[112].mxu0 %v21041_v62  ;;  %v2588_v39 = vadd.f32 %v20975_v34, %v22793_v35 }
 0x528   : > { %v3443_v33 = vpop.f32.mrb[40].mxu1  ;;  %5025 = vmatprep.mubr.bf16.mxu0 %v22682_v36 }
 0x529   : > { %v21091_v27 = vpack.c.bf16 %v3926_v37, %v3925_v12  ;;  %v16565_v21 = vadd.f32 %v3443_v33, %v2577_v29  ;;  %v3445_v53 = vpop.f32.mrb[41].mxu1  ;;  %v22794_v37 = vld [vmem:[#allocation84_spill] sm:$0xff] }
 0x52a   : > { %v3446_v28 = vpop.f32.mrb[42].mxu1 }
 0x52b   : > { %v3733_v32 = vadd.f32 %v16565_v21, %v22790_v16  ;;  %v16567_v26 = vadd.f32 %v3446_v28, %v2580_v52  ;;  %v3448_v23 = vpop.f32.mrb[43].mxu1  ;;  %v22795_v21 = vld [vmem:[#allocation86_spill] sm:$0xff] }
 0x52c   : > { %v22797_v23 = vld [vmem:[#allocation53_spill] sm:$0xff] }
 0x52d   : > { %v3736_v24 = vadd.f32 %v16567_v26, %v22791_v50  ;;  %v3927_v38 = vmax.f32 %v3733_v32, 0.0  ;;  %v2596_v50 = vadd.f32 %v20975_v34, %v22797_v23 }
 0x52f   : > { %v3928_v25 = vmax.f32 %v3736_v24, 0.0  ;;  %5026 = vmatmul.mubr.bf16.gmra.mrb[116].mxu0 %v21051_v41  ;;  %v18260_v24 = vld [vmem:[#allocation15 + $0x220] ss:$16 sps:$4 sm:$0xff]  }
 0x530   : > { %v3451_v3 = vpop.f32.mrb[44].mxu1  ;;  %5035 = vmatprep.mubr.bf16.mxu0 %v22682_v36 }
 0x531   : > { %v21101_v55 = vpack.c.bf16 %v3928_v25, %v3927_v38  ;;  %v16569_v42 = vadd.f32 %v3451_v3, %v2585_v47  ;;  %v3453_v61 = vpop.f32.mrb[45].mxu1  ;;  %v18262_v38 = vld [vmem:[#allocation15 + $0x224] ss:$16 sps:$4 sm:$0xff]  }
 0x532   : > { %v3454_v12 = vpop.f32.mrb[46].mxu1  ;;  %8166 = vmatprep.subr.bf16.mxu1 %v18262_v38 }
 0x533   : > { %v3741_v22 = vadd.f32 %v16569_v42, %v22794_v37  ;;  %v16571_v29 = vadd.f32 %v3454_v12, %v2588_v39  ;;  %v3456_v33 = vpop.f32.mrb[47].mxu1  ;;  %8167 = vmatpush1.bf16.msra.mxu1 %v18260_v24  ;;  %v22798_v39 = vld [vmem:[#allocation25_spill] sm:$0xff]  ;;  %v22802_v24 = vld [vmem:[#allocation24_spill] sm:$0xff] }
 0x534   : > { %v2601_v12 = vadd.f32 %v20975_v34, %v22798_v39  ;;  %v22799_v33 = vld [vmem:[#allocation32_spill] sm:$0xff]  ;;  %v2609_v38 = vadd.f32 %v20975_v34, %v22802_v24  ;;  %v22805_v24 = vld [vmem:[#allocation55_spill] sm:$0xff] }
 0x535   : > { %v3744_v53 = vadd.f32 %v16571_v29, %v22795_v21  ;;  %v3929_v60 = vmax.f32 %v3741_v22, 0.0  ;;  %v2604_v21 = vadd.f32 %v20975_v34, %v22799_v33 }
 0x537   : > { %v3930_v52 = vmax.f32 %v3744_v53, 0.0  ;;  %5036 = vmatmul.mubr.bf16.gmra.mrb[120].mxu0 %v21061_v13 }
 0x538   : > { %v3459_v28 = vpop.f32.mrb[48].mxu1  ;;  %5045 = vmatprep.mubr.bf16.mxu0 %v22682_v36 }
 0x539   : > { %v21111_v16 = vpack.c.bf16 %v3930_v52, %v3929_v60  ;;  %v16573_v32 = vadd.f32 %v3459_v28, %v2593_v54  ;;  %v3461_v26 = vpop.f32.mrb[49].mxu1  ;;  %v22800_v60 = vld [vmem:[#allocation88_spill] sm:$0xff]  ;;  %v22801_v28 = vld [vmem:[#allocation89_spill] sm:$0xff] }
 0x53a   : > { %v3462_v25 = vpop.f32.mrb[50].mxu1  ;;  %v18236_v54 = vld [vmem:[#allocation12 + $0x200] ss:$8 sps:$4 sm:$0xff]   ;;  %v18241_v26 = vld [vmem:[#allocation12 + $0x214] ss:$8 sps:$4 sm:$0xff]  }
 0x53b   : > { %v3749_v56 = vadd.f32 %v16573_v32, %v20829_v46  ;;  %v16575_v47 = vadd.f32 %v3462_v25, %v2596_v50  ;;  %v3464_v3 = vpop.f32.mrb[51].mxu1 }
 0x53d   : > { %v3752_v42 = vadd.f32 %v16575_v47, %v20834_v1  ;;  %v3931_v61 = vmax.f32 %v3749_v56, 0.0  ;;  %v18239_v56 = vld [vmem:[#allocation12 + $0x210] ss:$8 sps:$4 sm:$0xff]   ;;  %v18244_v47 = vld [vmem:[#allocation12 + $0x224] ss:$8 sps:$4 sm:$0xff]  }
 0x53f   : > { %v3932_v35 = vmax.f32 %v3752_v42, 0.0  ;;  %5046 = vmatmul.mubr.bf16.gmra.mrb[124].mxu0 %v21071_v7 }
 0x540   : > { %v3467_v37 = vpop.f32.mrb[52].mxu1  ;;  %5248 = vmatprep.mubr.bf16.mxu0 %v22682_v36 }
 0x541   : > { %v21121_v22 = vpack.c.bf16 %v3932_v35, %v3931_v61  ;;  %v16577_v29 = vadd.f32 %v3467_v37, %v2601_v12  ;;  %v3469_v46 = vpop.f32.mrb[53].mxu1  ;;  %v22803_v35 = vld [vmem:[#allocation54_spill] sm:$0xff]  ;;  %v18266_v12 = vld [vmem:[#allocation15 + $0x240] ss:$16 sps:$4 sm:$0xff]  }
 0x542   : > { %v3470_v53 = vpop.f32.mrb[54].mxu1  ;;  %v2612_v39 = vadd.f32 %v20975_v34, %v22803_v35  ;;  %v18268_v37 = vld [vmem:[#allocation15 + $0x244] ss:$16 sps:$4 sm:$0xff]  }
 0x543   : > { %v3757_v1 = vadd.f32 %v16577_v29, %v22800_v60  ;;  %v16579_v52 = vadd.f32 %v3470_v53, %v2604_v21  ;;  %v3472_v59 = vpop.f32.mrb[55].mxu1  ;;  %8168 = vmatprep.subr.bf16.mxu1 %v18268_v37  ;;  %v18242_v53 = vld [vmem:[#allocation12 + $0x220] ss:$8 sps:$4 sm:$0xff]   ;;  %v18253_v37 = vld [vmem:[#allocation12 + $0x254] ss:$8 sps:$4 sm:$0xff]  }
 0x544   : > { %8169 = vmatpush1.bf16.msra.mxu1 %v18266_v12  ;;  %v18248_v35 = vld [vmem:[#allocation12 + $0x240] ss:$8 sps:$4 sm:$0xff]  }
 0x545   : > { %v3760_v32 = vadd.f32 %v16579_v52, %v22801_v28  ;;  %v3933_v23 = vmax.f32 %v3757_v1, 0.0  ;;  %v18247_v1 = vld [vmem:[#allocation12 + $0x234] ss:$8 sps:$4 sm:$0xff]  }
 0x547   : > { %v3934_v50 = vmax.f32 %v3760_v32, 0.0  ;;  %5249 = vmatmul.mubr.bf16.vlgmr.msra.gmra.mrb[64].mxu0 %v22682_v36 }
 0x548   : > { %5570 = vmatpush1.bf16.msra.mxu0 %v18236_v54  ;;  %v3475_v25 = vpop.f32.mrb[56].mxu1  ;;  %5258 = vmatprep.mubr.bf16.mxu0 %v22682_v36  ;;  %v22804_v54 = vld [vmem:[#allocation27_spill] sm:$0xff] }
 0x549   : > { %v21131_v3 = vpack.c.bf16 %v3934_v50, %v3933_v23  ;;  %v16581_v42 = vadd.f32 %v3475_v25, %v2609_v38  ;;  %v3477_v61 = vpop.f32.mrb[57].mxu1  ;;  %5571 = vmatprep.subr.bf16.mxu0 %v18241_v26  ;;  %v2617_v28 = vadd.f32 %v20975_v34, %v22804_v54  ;;  %v18250_v38 = vld [vmem:[#allocation12 + $0x244] ss:$8 sps:$4 sm:$0xff]  }
 0x54a   : > { %v3478_v29 = vpop.f32.mrb[58].mxu1 }
 0x54b   : > { %v3765_v46 = vadd.f32 %v16581_v42, %v20841_v19  ;;  %v16583_v33 = vadd.f32 %v3478_v29, %v2612_v39  ;;  %v3480_v21 = vpop.f32.mrb[59].mxu1  ;;  %v18245_v19 = vld [vmem:[#allocation12 + $0x230] ss:$8 sps:$4 sm:$0xff]   ;;  %v22807_v39 = vld [vmem:[#allocation91_spill] sm:$0xff] }
 0x54c   : > { %5572 = vmatpush1.bf16.msra.mxu0 %v18239_v56  ;;  %v22806_v56 = vld [vmem:[#allocation90_spill] sm:$0xff] }
 0x54d   : > { %v3768_v60 = vadd.f32 %v16583_v33, %v20846_v14  ;;  %5573 = vmatprep.subr.bf16.mxu0 %v18244_v47  ;;  %v3935_v52 = vmax.f32 %v3765_v46, 0.0  ;;  %v2620_v14 = vadd.f32 %v20975_v34, %v22805_v24  ;;  %v22808_v33 = vld [vmem:[#allocation26_spill] sm:$0xff] }
 0x54e   : > { %v2625_v21 = vadd.f32 %v20975_v34, %v22808_v33 }
 0x54f   : > { %v3936_v59 = vmax.f32 %v3768_v60, 0.0  ;;  %5259 = vmatmul.mubr.bf16.gmra.mrb[68].mxu0 %v22682_v36  ;;  %v18251_v60 = vld [vmem:[#allocation12 + $0x250] ss:$8 sps:$4 sm:$0xff]  }
 0x550   : > { %v3483_v32 = vpop.f32.mrb[60].mxu1  ;;  %5268 = vmatprep.mubr.bf16.mxu0 %v22682_v36  ;;  %5574 = vmatpush1.bf16.msra.mxu0 %v18242_v53 }
 0x551   : > { %v21141_v26 = vpack.c.bf16 %v3936_v59, %v3935_v52  ;;  %v16585_v23 = vadd.f32 %v3483_v32, %v2617_v28  ;;  %v3485_v50 = vpop.f32.mrb[61].mxu1  ;;  %5575 = vmatprep.subr.bf16.mxu0 %v18247_v1  ;;  %v18259_v1 = vld [vmem:[#allocation12 + $0x264] ss:$8 sps:$4 sm:$0xff]  }
 0x552   : > { %v3486_v25 = vpop.f32.mrb[62].mxu1  ;;  %v22809_v28 = vld [vmem:[#allocation56_spill] sm:$0xff] }
 0x553   : > { %v3773_v47 = vadd.f32 %v16585_v23, %v22806_v56  ;;  %v16587_v42 = vadd.f32 %v3486_v25, %v2620_v14  ;;  %v3488_v61 = vpop.f32.mrb[63].mxu1  ;;  %v2628_v32 = vadd.f32 %v20975_v34, %v22809_v28  ;;  %v18274_v23 = vld [vmem:[#allocation15 + $0x264] ss:$16 sps:$4 sm:$0xff]  }
 0x554   : > { %5576 = vmatpush1.bf16.msra.mxu0 %v18245_v19  ;;  %v18272_v19 = vld [vmem:[#allocation15 + $0x260] ss:$16 sps:$4 sm:$0xff]   ;;  %8170 = vmatprep.subr.bf16.mxu1 %v18274_v23 }
 0x555   : > { %v3776_v12 = vadd.f32 %v16587_v42, %v22807_v39  ;;  %5577 = vmatprep.subr.bf16.mxu0 %v18250_v38  ;;  %v3937_v29 = vmax.f32 %v3773_v47, 0.0  ;;  %v18257_v25 = vld [vmem:[#allocation12 + $0x260] ss:$8 sps:$4 sm:$0xff]   ;;  %8171 = vmatpush1.bf16.msra.mxu1 %v18272_v19  ;;  %v18265_v47 = vld [vmem:[#allocation12 + $0x274] ss:$8 sps:$4 sm:$0xff]  }
 0x556   : > { %v22813_v19 = vld [vmem:[#allocation93_spill] sm:$0xff] }
 0x557   : > { %v3938_v46 = vmax.f32 %v3776_v12, 0.0  ;;  %5269 = vmatmul.mubr.bf16.gmra.mrb[72].mxu0 %v22682_v36  ;;  %v18278_v12 = vld [vmem:[#allocation15 + $0x280] ss:$16 sps:$4 sm:$0xff]  }
 0x558   : > { %v3491_v53 = vpop.f32.mrb[64].mxu1  ;;  %5278 = vmatprep.mubr.bf16.mxu0 %v22682_v36  ;;  %5578 = vmatpush1.bf16.msra.mxu0 %v18248_v35  ;;  %v22810_v35 = vld [vmem:[#allocation29_spill] sm:$0xff] }
 0x559   : > { %v21151_v52 = vpack.c.bf16 %v3938_v46, %v3937_v29  ;;  %v16589_v59 = vadd.f32 %v3491_v53, %v2625_v21  ;;  %v3493_v54 = vpop.f32.mrb[65].mxu1  ;;  %5579 = vmatprep.subr.bf16.mxu0 %v18253_v37  ;;  %v2633_v39 = vadd.f32 %v20975_v34, %v22810_v35  ;;  %v18280_v37 = vld [vmem:[#allocation15 + $0x284] ss:$16 sps:$4 sm:$0xff]  }
 0x55a   : > { %v3494_v50 = vpop.f32.mrb[66].mxu1  ;;  %v18263_v29 = vld [vmem:[#allocation12 + $0x270] ss:$8 sps:$4 sm:$0xff]   ;;  %8172 = vmatprep.subr.bf16.mxu1 %v18280_v37 }
 0x55b   : > { %v3781_v24 = vadd.f32 %v16589_v59, %v20853_v0  ;;  %v16591_v14 = vadd.f32 %v3494_v50, %v2628_v32  ;;  %v3496_v38 = vpop.f32.mrb[67].mxu1  ;;  %v22811_v21 = vld [vmem:[#allocation57_spill] sm:$0xff]  ;;  %8173 = vmatpush1.bf16.msra.mxu1 %v18278_v12  ;;  %v22812_v59 = vld [vmem:[#allocation92_spill] sm:$0xff] }
 0x55c   : > { %5580 = vmatpush1.bf16.msra.mxu0 %v18251_v60  ;;  %v2636_v53 = vadd.f32 %v20975_v34, %v22811_v21  ;;  %v18271_v60 = vld [vmem:[#allocation12 + $0x284] ss:$8 sps:$4 sm:$0xff]  }
 0x55d   : > { %v3784_v56 = vadd.f32 %v16591_v14, %v20858_v10  ;;  %5581 = vmatprep.subr.bf16.mxu0 %v18259_v1  ;;  %v3939_v42 = vmax.f32 %v3781_v24, 0.0  ;;  %v22814_v14 = vld [vmem:[#allocation28_spill] sm:$0xff]  ;;  %v22816_v21 = vld [vmem:[#allocation31_spill] sm:$0xff] }
 0x55e   : > { %v2641_v38 = vadd.f32 %v20975_v34, %v22814_v14 }
 0x55f   : > { %v3940_v61 = vmax.f32 %v3784_v56, 0.0  ;;  %5279 = vmatmul.mubr.bf16.gmra.mrb[76].mxu0 %v22682_v36 }
 0x560   : > { %v3499_v0 = vpop.f32.mrb[68].mxu1  ;;  %5288 = vmatprep.mubr.bf16.mxu0 %v22682_v36  ;;  %5582 = vmatpush1.bf16.msra.mxu0 %v18257_v25 }
 0x561   : > { %v21161_v46 = vpack.c.bf16 %v3940_v61, %v3939_v42  ;;  %v16593_v33 = vadd.f32 %v3499_v0, %v2633_v39  ;;  %v3501_v10 = vpop.f32.mrb[69].mxu1  ;;  %5583 = vmatprep.subr.bf16.mxu0 %v18265_v47  ;;  %v22815_v61 = vld [vmem:[#allocation58_spill] sm:$0xff] }
 0x562   : > { %v3502_v1 = vpop.f32.mrb[70].mxu1  ;;  %v2644_v35 = vadd.f32 %v20975_v34, %v22815_v61 }
 0x563   : > { %v3789_v54 = vadd.f32 %v16593_v33, %v22812_v59  ;;  %v16595_v28 = vadd.f32 %v3502_v1, %v2636_v53  ;;  %v3504_v32 = vpop.f32.mrb[71].mxu1  ;;  %v2649_v53 = vadd.f32 %v20975_v34, %v22816_v21  ;;  %v18286_v1 = vld [vmem:[#allocation15 + $0x2a4] ss:$16 sps:$4 sm:$0xff]  }
 0x564   : > { %5584 = vmatpush1.bf16.msra.mxu0 %v18263_v29  ;;  %v22817_v32 = vld [vmem:[#allocation59_spill] sm:$0xff]  ;;  %8174 = vmatprep.subr.bf16.mxu1 %v18286_v1  ;;  %v22820_v21 = vld [vmem:[#allocation61_spill] sm:$0xff] }
 0x565   : > { %v3792_v23 = vadd.f32 %v16595_v28, %v22813_v19  ;;  %5922 = vmatprep.subr.bf16.mxu0 %v18271_v60  ;;  %v3941_v50 = vmax.f32 %v3789_v54, 0.0  ;;  %v18284_v60 = vld [vmem:[#allocation15 + $0x2a0] ss:$16 sps:$4 sm:$0xff]   ;;  %v2652_v19 = vadd.f32 %v20975_v34, %v22817_v32  ;;  %v22821_v32 = vld [vmem:[#allocation62_spill] sm:$0xff] }
 0x566   : > { %8175 = vmatpush1.bf16.msra.mxu1 %v18284_v60 }
 0x567   : > { %v3942_v24 = vmax.f32 %v3792_v23, 0.0  ;;  %5289 = vmatmul.mubr.bf16.gmra.mrb[80].mxu0 %v22682_v36 }
 0x568   : > { %v3507_v25 = vpop.f32.mrb[72].mxu1  ;;  %5298 = vmatprep.mubr.bf16.mxu0 %v22682_v36 }
 0x569   : > { %v21171_v56 = vpack.c.bf16 %v3942_v24, %v3941_v50  ;;  %v16597_v47 = vadd.f32 %v3507_v25, %v2641_v38  ;;  %v3509_v42 = vpop.f32.mrb[73].mxu1  ;;  %v22818_v38 = vld [vmem:[#allocation30_spill] sm:$0xff] }
 0x56a   : > { %v3510_v39 = vpop.f32.mrb[74].mxu1  ;;  %v2657_v25 = vadd.f32 %v20975_v34, %v22818_v38  ;;  %v22822_v38 = vld [vmem:[#allocation94_spill] sm:$0xff] }
 0x56b   : > { %v3797_v12 = vadd.f32 %v16597_v47, %v20865_v17  ;;  %v16599_v37 = vadd.f32 %v3510_v39, %v2644_v35  ;;  %v3512_v0 = vpop.f32.mrb[75].mxu1  ;;  %v22819_v35 = vld [vmem:[#allocation60_spill] sm:$0xff] }
 0x56c   : > { %v2660_v39 = vadd.f32 %v20975_v34, %v22819_v35 }
 0x56d   : > { %v3800_v29 = vadd.f32 %v16599_v37, %v20870_v43  ;;  %v3943_v33 = vmax.f32 %v3797_v12, 0.0 }
 0x56f   : > { %v3944_v10 = vmax.f32 %v3800_v29, 0.0  ;;  %5299 = vmatmul.mubr.bf16.gmra.mrb[84].mxu0 %v22682_v36 }
 0x570   : > { %v3515_v59 = vpop.f32.mrb[76].mxu1  ;;  %5308 = vmatprep.mubr.bf16.mxu0 %v22682_v36 }
 0x571   : > { %v21181_v54 = vpack.c.bf16 %v3944_v10, %v3943_v33  ;;  %v16601_v28 = vadd.f32 %v3515_v59, %v2649_v53  ;;  %v3517_v17 = vpop.f32.mrb[77].mxu1  ;;  %v2665_v53 = vadd.f32 %v20975_v34, %v22820_v21  ;;  %v18290_v59 = vld [vmem:[#allocation15 + $0x2c0] ss:$16 sps:$4 sm:$0xff]  }
 0x572   : > { %v3518_v43 = vpop.f32.mrb[78].mxu1 }
 0x573   : > { %v3805_v23 = vadd.f32 %v16601_v28, %v20863_v2  ;;  %v16603_v50 = vadd.f32 %v3518_v43, %v2652_v19  ;;  %v3520_v24 = vpop.f32.mrb[79].mxu1  ;;  %v18292_v28 = vld [vmem:[#allocation15 + $0x2c4] ss:$16 sps:$4 sm:$0xff]   ;;  %v2668_v19 = vadd.f32 %v20975_v34, %v22821_v32 }
 0x574   : > { %8176 = vmatprep.subr.bf16.mxu1 %v18292_v28  ;;  %v18298_v32 = vld [vmem:[#allocation15 + $0x2e4] ss:$16 sps:$4 sm:$0xff]  }
 0x575   : > { %v3808_v14 = vadd.f32 %v16603_v50, %v20867_v57  ;;  %v3945_v47 = vmax.f32 %v3805_v23, 0.0  ;;  %8177 = vmatpush1.bf16.msra.mxu1 %v18290_v59 }
 0x576   : > { %8178 = vmatprep.subr.bf16.mxu1 %v18298_v32 }
 0x577   : > { %v3946_v42 = vmax.f32 %v3808_v14, 0.0  ;;  %5309 = vmatmul.mubr.bf16.gmra.mrb[88].mxu0 %v22682_v36 }
 0x578   : > { %v3523_v61 = vpop.f32.mrb[80].mxu1  ;;  %5318 = vmatprep.mubr.bf16.mxu0 %v22682_v36 }
 0x579   : > { %v21193_v12 = vpack.c.bf16 %v3946_v42, %v3945_v47  ;;  %v16605_v2 = vadd.f32 %v3523_v61, %v2657_v25  ;;  %v3525_v37 = vpop.f32.mrb[81].mxu1  ;;  %v22823_v47 = vld [vmem:[#allocation63_spill] sm:$0xff] }
 0x57a   : > { %v3526_v0 = vpop.f32.mrb[82].mxu1  ;;  %v2673_v42 = vadd.f32 %v20975_v34, %v22823_v47  ;;  %v22828_v47 = vld [vmem:[#allocation96_spill] sm:$0xff] }
 0x57b   : > { %v3813_v57 = vadd.f32 %v16605_v2, %v20877_v63  ;;  %v16607_v29 = vadd.f32 %v3526_v0, %v2660_v39  ;;  %v3528_v33 = vpop.f32.mrb[83].mxu1  ;;  %v22824_v2 = vld [vmem:[#allocation64_spill] sm:$0xff] }
 0x57c   : > { %v2676_v37 = vadd.f32 %v20975_v34, %v22824_v2 }
 0x57d   : > { %v3816_v10 = vadd.f32 %v16607_v29, %v20882_v5  ;;  %v3947_v60 = vmax.f32 %v3813_v57, 0.0 }
 0x57f   : > { %v3948_v1 = vmax.f32 %v3816_v10, 0.0  ;;  %5319 = vmatmul.mubr.bf16.gmra.mrb[92].mxu0 %v22682_v36 }
 0x580   : > { %v3531_v17 = vpop.f32.mrb[84].mxu1  ;;  %5328 = vmatprep.mubr.bf16.mxu0 %v22682_v36 }
 0x581   : > { %v21203_v63 = vpack.c.bf16 %v3948_v1, %v3947_v60  ;;  %v16609_v43 = vadd.f32 %v3531_v17, %v2665_v53  ;;  %v3533_v23 = vpop.f32.mrb[85].mxu1  ;;  %v22825_v60 = vld [vmem:[#allocation65_spill] sm:$0xff] }
 0x582   : > { %v3534_v5 = vpop.f32.mrb[86].mxu1  ;;  %v2681_v1 = vadd.f32 %v20975_v34, %v22825_v60  ;;  %v18296_v17 = vld [vmem:[#allocation15 + $0x2e0] ss:$16 sps:$4 sm:$0xff]  }
 0x583   : > { %v3821_v50 = vadd.f32 %v16609_v43, %v20875_v6  ;;  %v16611_v24 = vadd.f32 %v3534_v5, %v2668_v19  ;;  %v3536_v14 = vpop.f32.mrb[87].mxu1  ;;  %v22826_v43 = vld [vmem:[#allocation66_spill] sm:$0xff]  ;;  %8179 = vmatpush1.bf16.msra.mxu1 %v18296_v17 }
 0x584   : > { %v2684_v23 = vadd.f32 %v20975_v34, %v22826_v43  ;;  %v18302_v43 = vld [vmem:[#allocation15 + $0x300] ss:$16 sps:$4 sm:$0xff]  }
 0x585   : > { %v3824_v25 = vadd.f32 %v16611_v24, %v22822_v38  ;;  %v3949_v61 = vmax.f32 %v3821_v50, 0.0  ;;  %v22827_v24 = vld [vmem:[#allocation95_spill] sm:$0xff] }
 0x587   : > { %v3950_v35 = vmax.f32 %v3824_v25, 0.0  ;;  %5329 = vmatmul.mubr.bf16.gmra.mrb[96].mxu0 %v21081_v4 }
 0x588   : > { %v3539_v39 = vpop.f32.mrb[88].mxu1  ;;  %5338 = vmatprep.mubr.bf16.mxu0 %v22682_v36 }
 0x589   : > { %v21213_v0 = vpack.c.bf16 %v3950_v35, %v3949_v61  ;;  %v16613_v6 = vadd.f32 %v3539_v39, %v2673_v42  ;;  %v3541_v57 = vpop.f32.mrb[89].mxu1  ;;  %v22829_v61 = vld [vmem:[#allocation67_spill] sm:$0xff] }
 0x58a   : > { %v3542_v29 = vpop.f32.mrb[90].mxu1  ;;  %v2689_v35 = vadd.f32 %v20975_v34, %v22829_v61  ;;  %v22834_v61 = vld [vmem:[#allocation98_spill] sm:$0xff] }
 0x58b   : > { %v3829_v33 = vadd.f32 %v16613_v6, %v20889_v20  ;;  %v16615_v10 = vadd.f32 %v3542_v29, %v2676_v37  ;;  %v3544_v21 = vpop.f32.mrb[91].mxu1  ;;  %v22830_v6 = vld [vmem:[#allocation68_spill] sm:$0xff] }
 0x58c   : > { %v2692_v57 = vadd.f32 %v20975_v34, %v22830_v6 }
 0x58d   : > { %v3832_v53 = vadd.f32 %v16615_v10, %v20894_v30  ;;  %v3951_v59 = vmax.f32 %v3829_v33, 0.0 }
 0x58f   : > { %v3952_v28 = vmax.f32 %v3832_v53, 0.0  ;;  %5339 = vmatmul.mubr.bf16.gmra.mrb[100].mxu0 %v21091_v27 }
 0x590   : > { %v3547_v19 = vpop.f32.mrb[92].mxu1  ;;  %5348 = vmatprep.mubr.bf16.mxu0 %v22682_v36 }
 0x591   : > { %v21223_v20 = vpack.c.bf16 %v3952_v28, %v3951_v59  ;;  %v16617_v5 = vadd.f32 %v3547_v19, %v2681_v1  ;;  %v3549_v50 = vpop.f32.mrb[93].mxu1  ;;  %v22831_v28 = vld [vmem:[#allocation69_spill] sm:$0xff] }
 0x592   : > { %v3550_v30 = vpop.f32.mrb[94].mxu1  ;;  %v2697_v17 = vadd.f32 %v20975_v34, %v22831_v28  ;;  %v22832_v50 = vld [vmem:[#allocation70_spill] sm:$0xff] }
 0x593   : > { %v3837_v14 = vadd.f32 %v16617_v5, %v22827_v24  ;;  %v16619_v38 = vadd.f32 %v3550_v30, %v2684_v23  ;;  %v3552_v25 = vpop.f32.mrb[95].mxu1  ;;  %v18304_v23 = vld [vmem:[#allocation15 + $0x304] ss:$16 sps:$4 sm:$0xff]   ;;  %v2700_v30 = vadd.f32 %v20975_v34, %v22832_v50  ;;  %v18308_v50 = vld [vmem:[#allocation15 + $0x320] ss:$16 sps:$4 sm:$0xff]  }
 0x594   : > { %8180 = vmatprep.subr.bf16.mxu1 %v18304_v23 }
 0x595   : > { %v3840_v42 = vadd.f32 %v16619_v38, %v22828_v47  ;;  %v3953_v39 = vmax.f32 %v3837_v14, 0.0  ;;  %8181 = vmatpush1.bf16.msra.mxu1 %v18302_v43  ;;  %v22833_v38 = vld [vmem:[#allocation97_spill] sm:$0xff] }
 0x597   : > { %v3954_v2 = vmax.f32 %v3840_v42, 0.0  ;;  %5349 = vmatmul.mubr.bf16.gmra.mrb[104].mxu0 %v21101_v55 }
 0x598   : > { %v3555_v37 = vpop.f32.mrb[96].mxu1  ;;  %5358 = vmatprep.mubr.bf16.mxu0 %v22682_v36 }
 0x599   : > { %v21233_v29 = vpack.c.bf16 %v3954_v2, %v3953_v39  ;;  %v16621_v33 = vadd.f32 %v3555_v37, %v2689_v35  ;;  %v3557_v10 = vpop.f32.mrb[97].mxu1  ;;  %v22835_v39 = vld [vmem:[#allocation71_spill] sm:$0xff] }
 0x59a   : > { %v3558_v21 = vpop.f32.mrb[98].mxu1  ;;  %v2705_v2 = vadd.f32 %v20975_v34, %v22835_v39  ;;  %v22840_v39 = vld [vmem:[#allocation100_spill] sm:$0xff] }
 0x59b   : > { %v3845_v53 = vadd.f32 %v16621_v33, %v20901_v58  ;;  %v16623_v60 = vadd.f32 %v3558_v21, %v2692_v57  ;;  %v3560_v1 = vpop.f32.mrb[99].mxu1  ;;  %v22836_v33 = vld [vmem:[#allocation72_spill] sm:$0xff] }
 0x59c   : > { %v2708_v10 = vadd.f32 %v20975_v34, %v22836_v33 }
 0x59d   : > { %v3848_v59 = vadd.f32 %v16623_v60, %v20906_v18  ;;  %v3955_v32 = vmax.f32 %v3845_v53, 0.0 }
 0x59f   : > { %v3956_v19 = vmax.f32 %v3848_v59, 0.0  ;;  %5359 = vmatmul.mubr.bf16.gmra.mrb[108].mxu0 %v21111_v16 }
 0x5a0   : > { %v3563_v5 = vpop.f32.mrb[100].mxu1  ;;  %5368 = vmatprep.mubr.bf16.mxu0 %v22682_v36 }
 0x5a1   : > { %v21243_v58 = vpack.c.bf16 %v3956_v19, %v3955_v32  ;;  %v16625_v24 = vadd.f32 %v3563_v5, %v2697_v17  ;;  %v3565_v14 = vpop.f32.mrb[101].mxu1  ;;  %v22837_v19 = vld [vmem:[#allocation73_spill] sm:$0xff] }
 0x5a2   : > { %v3566_v18 = vpop.f32.mrb[102].mxu1  ;;  %v2713_v43 = vadd.f32 %v20975_v34, %v22837_v19  ;;  %v22838_v14 = vld [vmem:[#allocation74_spill] sm:$0xff] }
 0x5a3   : > { %v3853_v25 = vadd.f32 %v16625_v24, %v22833_v38  ;;  %v16627_v47 = vadd.f32 %v3566_v18, %v2700_v30  ;;  %v3568_v42 = vpop.f32.mrb[103].mxu1  ;;  %v18310_v30 = vld [vmem:[#allocation15 + $0x324] ss:$16 sps:$4 sm:$0xff]   ;;  %v2716_v18 = vadd.f32 %v20975_v34, %v22838_v14  ;;  %v18314_v14 = vld [vmem:[#allocation15 + $0x340] ss:$16 sps:$4 sm:$0xff]  }
 0x5a4   : > { %8182 = vmatprep.subr.bf16.mxu1 %v18310_v30 }
 0x5a5   : > { %v3856_v35 = vadd.f32 %v16627_v47, %v22834_v61  ;;  %v3957_v37 = vmax.f32 %v3853_v25, 0.0  ;;  %8183 = vmatpush1.bf16.msra.mxu1 %v18308_v50  ;;  %v22839_v47 = vld [vmem:[#allocation99_spill] sm:$0xff] }
 0x5a7   : > { %v3958_v6 = vmax.f32 %v3856_v35, 0.0  ;;  %5369 = vmatmul.mubr.bf16.gmra.mrb[112].mxu0 %v21121_v22 }
 0x5a8   : > { %v3571_v57 = vpop.f32.mrb[104].mxu1  ;;  %5378 = vmatprep.mubr.bf16.mxu0 %v22682_v36 }
 0x5a9   : > { %v21253_v21 = vpack.c.bf16 %v3958_v6, %v3957_v37  ;;  %v16629_v53 = vadd.f32 %v3571_v57, %v2705_v2  ;;  %v3573_v60 = vpop.f32.mrb[105].mxu1  ;;  %v21267_v37 = vld [vmem:[#allocation10] ss:$0 sm:$0xff]  ;;  %v22841_v6 = vld [vmem:[#allocation75_spill] sm:$0xff] }
 0x5aa   : > { %v3574_v1 = vpop.f32.mrb[106].mxu1  ;;  %v2721_v57 = vadd.f32 %v21267_v37, %v22841_v6  ;;  %v18269_v6 = vld [vmem:[#allocation12 + $0x280] ss:$8 sps:$4 sm:$0xff]  }
 0x5ab   : > { %v3861_v59 = vadd.f32 %v16629_v53, %v20913_v48  ;;  %v16631_v28 = vadd.f32 %v3574_v1, %v2708_v10  ;;  %v3576_v17 = vpop.f32.mrb[107].mxu1  ;;  %v22842_v53 = vld [vmem:[#allocation76_spill] sm:$0xff] }
 0x5ac   : > { %v2724_v60 = vadd.f32 %v21267_v37, %v22842_v53 }
 0x5ad   : > { %v3864_v32 = vadd.f32 %v16631_v28, %v20918_v8  ;;  %v3959_v23 = vmax.f32 %v3861_v59, 0.0 }
 0x5af   : > { %v3960_v5 = vmax.f32 %v3864_v32, 0.0  ;;  %5379 = vmatmul.mubr.bf16.gmra.mrb[116].mxu0 %v21131_v3 }
 0x5b0   : > { %v3579_v24 = vpop.f32.mrb[108].mxu1  ;;  %5388 = vmatprep.mubr.bf16.mxu0 %v22682_v36 }
 0x5b1   : > { %v21263_v48 = vpack.c.bf16 %v3960_v5, %v3959_v23  ;;  %v16633_v38 = vadd.f32 %v3579_v24, %v2713_v43  ;;  %v3581_v25 = vpop.f32.mrb[109].mxu1  ;;  %v22843_v5 = vld [vmem:[#allocation77_spill] sm:$0xff] }
 0x5b2   : > { %v3582_v8 = vpop.f32.mrb[110].mxu1  ;;  %v2729_v50 = vadd.f32 %v21267_v37, %v22843_v5  ;;  %v22844_v25 = vld [vmem:[#allocation78_spill] sm:$0xff] }
 0x5b3   : > { %v3869_v42 = vadd.f32 %v16633_v38, %v22839_v47  ;;  %v16635_v61 = vadd.f32 %v3582_v8, %v2716_v18  ;;  %v3584_v35 = vpop.f32.mrb[111].mxu1  ;;  %v18316_v18 = vld [vmem:[#allocation15 + $0x344] ss:$16 sps:$4 sm:$0xff]   ;;  %v2732_v8 = vadd.f32 %v21267_v37, %v22844_v25 }
 0x5b4   : > { %8184 = vmatprep.subr.bf16.mxu1 %v18316_v18  ;;  %v18289_v18 = vld [vmem:[#allocation12 + $0x2b4] ss:$8 sps:$4 sm:$0xff]  }
 0x5b5   : > { %v3872_v2 = vadd.f32 %v16635_v61, %v22840_v39  ;;  %v3961_v33 = vmax.f32 %v3869_v42, 0.0  ;;  %8185 = vmatpush1.bf16.msra.mxu1 %v18314_v14  ;;  %v22845_v61 = vld [vmem:[#allocation101_spill] sm:$0xff] }
 0x5b7   : > { %v3962_v34 = vmax.f32 %v3872_v2, 0.0  ;;  %5389 = vmatmul.mubr.bf16.gmra.mrb[120].mxu0 %v21141_v26 }
 0x5b8   : > { %v3587_v10 = vpop.f32.mrb[112].mxu1  ;;  %5398 = vmatprep.mubr.bf16.mxu0 %v22682_v36 }
 0x5b9   : > { %v21275_v1 = vpack.c.bf16 %v3962_v34, %v3961_v33  ;;  %v16637_v59 = vadd.f32 %v3587_v10, %v2721_v57  ;;  %v3589_v28 = vpop.f32.mrb[113].mxu1  ;;  %v18277_v33 = vld [vmem:[#allocation12 + $0x294] ss:$8 sps:$4 sm:$0xff]   ;;  %v22846_v34 = vld [vmem:[#allocation79_spill] sm:$0xff] }
 0x5ba   : > { %v3590_v17 = vpop.f32.mrb[114].mxu1  ;;  %v2737_v10 = vadd.f32 %v21267_v37, %v22846_v34  ;;  %v18275_v28 = vld [vmem:[#allocation12 + $0x290] ss:$8 sps:$4 sm:$0xff]  }
 0x5bb   : > { %v3877_v32 = vadd.f32 %v16637_v59, %v20925_v40  ;;  %v16639_v19 = vadd.f32 %v3590_v17, %v2724_v60  ;;  %v3592_v43 = vpop.f32.mrb[115].mxu1  ;;  %v22847_v17 = vld [vmem:[#allocation80_spill] sm:$0xff] }
 0x5bd   : > { %v3880_v23 = vadd.f32 %v16639_v19, %v20930_v51  ;;  %v3963_v30 = vmax.f32 %v3877_v32, 0.0  ;;  %v2740_v32 = vadd.f32 %v21267_v37, %v22847_v17  ;;  %v18301_v17 = vld [vmem:[#allocation12 + $0x2d4] ss:$8 sps:$4 sm:$0xff]  }
 0x5bf   : > { %v3964_v24 = vmax.f32 %v3880_v23, 0.0  ;;  %5399 = vmatmul.mubr.bf16.gmra.mrb[124].mxu0 %v21151_v52  ;;  %v18283_v23 = vld [vmem:[#allocation12 + $0x2a4] ss:$8 sps:$4 sm:$0xff]  }
 0x5c0   : > { %v3595_v38 = vpop.f32.mrb[116].mxu1  ;;  %5601 = vmatprep.mubr.bf16.mxu0 %v22682_v36 }
 0x5c1   : > { %v21285_v40 = vpack.c.bf16 %v3964_v24, %v3963_v30  ;;  %v16641_v47 = vadd.f32 %v3595_v38, %v2729_v50  ;;  %v3597_v42 = vpop.f32.mrb[117].mxu1  ;;  %v22848_v38 = vld [vmem:[#allocation81_spill] sm:$0xff] }
 0x5c2   : > { %v3598_v51 = vpop.f32.mrb[118].mxu1  ;;  %v2745_v25 = vadd.f32 %v21267_v37, %v22848_v38  ;;  %v18320_v42 = vld [vmem:[#allocation15 + $0x360] ss:$16 sps:$4 sm:$0xff]   ;;  %v18340_v38 = vld [vmem:[#allocation15 + $0x3c4] ss:$16 sps:$4 sm:$0xff]  }
 0x5c3   : > { %v3885_v35 = vadd.f32 %v16641_v47, %v22845_v61  ;;  %v16643_v39 = vadd.f32 %v3598_v51, %v2732_v8  ;;  %v3600_v2 = vpop.f32.mrb[119].mxu1  ;;  %v18322_v51 = vld [vmem:[#allocation15 + $0x364] ss:$16 sps:$4 sm:$0xff]  }
 0x5c4   : > { %8186 = vmatprep.subr.bf16.mxu1 %v18322_v51  ;;  %v18362_v51 = vld [vmem:[#allocation15 + $0x268] ss:$16 sps:$4 sm:$0xff]  }
 0x5c5   : > { %v3888_v57 = vadd.f32 %v16643_v39, %v20927_v45  ;;  %v3965_v53 = vmax.f32 %v3885_v35, 0.0  ;;  %v22849_v35 = vld [vmem:[#allocation82_spill] sm:$0xff]  ;;  %8187 = vmatpush1.bf16.msra.mxu1 %v18320_v42 }
 0x5c6   : > { %v2748_v39 = vadd.f32 %v21267_v37, %v22849_v35  ;;  %v18359_v42 = vld [vmem:[#allocation15 + $0x248] ss:$16 sps:$4 sm:$0xff]  }
 0x5c7   : > { %v3966_v60 = vmax.f32 %v3888_v57, 0.0  ;;  %5602 = vmatmul.mubr.bf16.vlgmr.msra.gmra.mrb[64].mxu0 %v20993_v31  ;;  %v18281_v31 = vld [vmem:[#allocation12 + $0x2a0] ss:$8 sps:$4 sm:$0xff]   ;;  %v18295_v57 = vld [vmem:[#allocation12 + $0x2c4] ss:$8 sps:$4 sm:$0xff]  }
 0x5c8   : > { %5923 = vmatpush1.bf16.msra.mxu0 %v18269_v6  ;;  %v3603_v59 = vpop.f32.mrb[120].mxu1  ;;  %5611 = vmatprep.mubr.bf16.mxu0 %v22682_v36  ;;  %v18365_v35 = vld [vmem:[#allocation15 + $0x288] ss:$16 sps:$4 sm:$0xff]  }
 0x5c9   : > { %v21295_v19 = vpack.c.bf16 %v3966_v60, %v3965_v53  ;;  %v16645_v43 = vadd.f32 %v3603_v59, %v2737_v10  ;;  %v3605_v45 = vpop.f32.mrb[121].mxu1  ;;  %5924 = vmatprep.subr.bf16.mxu0 %v18277_v33  ;;  %v18293_v60 = vld [vmem:[#allocation12 + $0x2c0] ss:$8 sps:$4 sm:$0xff]  }
 0x5ca   : > { %v3606_v5 = vpop.f32.mrb[122].mxu1  ;;  %v22851_v59 = vld [vmem:[#allocation103_spill] sm:$0xff] }
 0x5cb   : > { %v3893_v50 = vadd.f32 %v16645_v43, %v20937_v49  ;;  %v16647_v30 = vadd.f32 %v3606_v5, %v2740_v32  ;;  %v3608_v24 = vpop.f32.mrb[123].mxu1  ;;  %v18287_v49 = vld [vmem:[#allocation12 + $0x2b0] ss:$8 sps:$4 sm:$0xff]   ;;  %v18305_v5 = vld [vmem:[#allocation12 + $0x2e0] ss:$8 sps:$4 sm:$0xff]  }
 0x5cc   : > { %5925 = vmatpush1.bf16.msra.mxu0 %v18275_v28  ;;  %v18299_v43 = vld [vmem:[#allocation12 + $0x2d0] ss:$8 sps:$4 sm:$0xff]  }
 0x5cd   : > { %v3896_v14 = vadd.f32 %v16647_v30, %v20942_v44  ;;  %5926 = vmatprep.subr.bf16.mxu0 %v18283_v23  ;;  %v3967_v8 = vmax.f32 %v3893_v50, 0.0  ;;  %v18307_v23 = vld [vmem:[#allocation12 + $0x2e4] ss:$8 sps:$4 sm:$0xff]   ;;  %v18313_v50 = vld [vmem:[#allocation12 + $0x2f4] ss:$8 sps:$4 sm:$0xff]  }
 0x5ce   : > { %v18326_v30 = vld [vmem:[#allocation15 + $0x380] ss:$16 sps:$4 sm:$0xff]   ;;  %v18328_v24 = vld [vmem:[#allocation15 + $0x384] ss:$16 sps:$4 sm:$0xff]  }
 0x5cf   : > { %v3968_v47 = vmax.f32 %v3896_v14, 0.0  ;;  %5612 = vmatmul.mubr.bf16.gmra.mrb[68].mxu0 %v21005_v11  ;;  %v22850_v11 = vld [vmem:[#allocation102_spill] sm:$0xff]  ;;  %8188 = vmatprep.subr.bf16.mxu1 %v18328_v24  ;;  %v18332_v14 = vld [vmem:[#allocation15 + $0x3a0] ss:$16 sps:$4 sm:$0xff]  }
 0x5d0   : > { %v3611_v61 = vpop.f32.mrb[124].mxu1  ;;  %5621 = vmatprep.mubr.bf16.mxu0 %v22682_v36  ;;  %5927 = vmatpush1.bf16.msra.mxu0 %v18281_v31  ;;  %v18319_v31 = vld [vmem:[#allocation12 + $0x304] ss:$8 sps:$4 sm:$0xff]  }
 0x5d1   : > { %v21305_v44 = vpack.c.bf16 %v3968_v47, %v3967_v8  ;;  %v16649_v2 = vadd.f32 %v3611_v61, %v2745_v25  ;;  %v3613_v6 = vpop.f32.mrb[125].mxu1  ;;  %5928 = vmatprep.subr.bf16.mxu0 %v18289_v18  ;;  %8189 = vmatpush1.bf16.msra.mxu1 %v18326_v30  ;;  %v18338_v18 = vld [vmem:[#allocation15 + $0x3c0] ss:$16 sps:$4 sm:$0xff]   ;;  %v18356_v25 = vld [vmem:[#allocation15 + $0x228] ss:$16 sps:$4 sm:$0xff]  }
 0x5d2   : > { %v3614_v33 = vpop.f32.mrb[126].mxu1  ;;  %v18358_v8 = vld [vmem:[#allocation15 + $0x22c] ss:$16 sps:$4 sm:$0xff]  }
 0x5d3   : > { %v3901_v34 = vadd.f32 %v16649_v2, %v22850_v11  ;;  %v16651_v10 = vadd.f32 %v3614_v33, %v2748_v39  ;;  %v3616_v53 = vpop.f32.mrb[127].mxu1  ;;  %v18361_v47 = vld [vmem:[#allocation15 + $0x24c] ss:$16 sps:$4 sm:$0xff]   ;;  %v18371_v39 = vld [vmem:[#allocation15 + $0x2a8] ss:$16 sps:$4 sm:$0xff]  }
 0x5d4   : > { %5929 = vmatpush1.bf16.msra.mxu0 %v18287_v49  ;;  %v18364_v61 = vld [vmem:[#allocation15 + $0x26c] ss:$16 sps:$4 sm:$0xff]   ;;  %v18377_v33 = vld [vmem:[#allocation15 + $0x2e8] ss:$16 sps:$4 sm:$0xff]  }
 0x5d5   : > { %v3904_v28 = vadd.f32 %v16651_v10, %v22851_v59  ;;  %5930 = vmatprep.subr.bf16.mxu0 %v18295_v57  ;;  %v3969_v37 = vmax.f32 %v3901_v34, 0.0  ;;  %v18367_v49 = vld [vmem:[#allocation15 + $0x28c] ss:$16 sps:$4 sm:$0xff]   ;;  %v18374_v57 = vld [vmem:[#allocation15 + $0x2c8] ss:$16 sps:$4 sm:$0xff]  }
 0x5d6   : > { %v18373_v2 = vld [vmem:[#allocation15 + $0x2ac] ss:$16 sps:$4 sm:$0xff]   ;;  %v18380_v10 = vld [vmem:[#allocation15 + $0x308] ss:$16 sps:$4 sm:$0xff]  }
 0x5d7   : > { %v3970_v32 = vmax.f32 %v3904_v28, 0.0  ;;  %5622 = vmatmul.mubr.bf16.gmra.mrb[72].mxu0 %v21017_v15  ;;  %v18311_v15 = vld [vmem:[#allocation12 + $0x2f0] ss:$8 sps:$4 sm:$0xff]   ;;  %v18317_v53 = vld [vmem:[#allocation12 + $0x300] ss:$8 sps:$4 sm:$0xff]  }
 0x5d8   : > { %5631 = vmatprep.mubr.bf16.mxu0 %v22682_v36  ;;  %5931 = vmatpush1.bf16.msra.mxu0 %v18293_v60  ;;  %v18376_v6 = vld [vmem:[#allocation15 + $0x2cc] ss:$16 sps:$4 sm:$0xff]  }
 0x5d9   : > { %v21311_v45 = vpack.c.bf16 %v3970_v32, %v3969_v37  ;;  %5932 = vmatprep.subr.bf16.mxu0 %v18301_v17  ;;  %v18379_v11 = vld [vmem:[#allocation15 + $0x2ec] ss:$16 sps:$4 sm:$0xff]   ;;  %v18386_v17 = vld [vmem:[#allocation15 + $0x328] ss:$16 sps:$4 sm:$0xff]  }
 0x5da   : > { %v18382_v34 = vld [vmem:[#allocation15 + $0x30c] ss:$16 sps:$4 sm:$0xff]  }
 0x5db   : > { %v18325_v60 = vld [vmem:[#allocation12 + $0x314] ss:$8 sps:$4 sm:$0xff]   ;;  %v18323_v28 = vld [vmem:[#allocation12 + $0x310] ss:$8 sps:$4 sm:$0xff]   ;;  %v18331_v32 = vld [vmem:[#allocation12 + $0x324] ss:$8 sps:$4 sm:$0xff]  }
 0x5dc   : > { %5933 = vmatpush1.bf16.msra.mxu0 %v18299_v43  ;;  %v18388_v59 = vld [vmem:[#allocation15 + $0x32c] ss:$16 sps:$4 sm:$0xff]   ;;  %v18389_v43 = vld [vmem:[#allocation15 + $0x348] ss:$16 sps:$4 sm:$0xff]  }
 0x5dd   : > { %5934 = vmatprep.subr.bf16.mxu0 %v18307_v23  ;;  %v18391_v37 = vld [vmem:[#allocation15 + $0x34c] ss:$16 sps:$4 sm:$0xff]  }
 0x5de   : > { %v18329_v23 = vld [vmem:[#allocation12 + $0x320] ss:$8 sps:$4 sm:$0xff]   ;;  %v18335_v30 = vld [vmem:[#allocation12 + $0x330] ss:$8 sps:$4 sm:$0xff]  }
 0x5df   : > { %5632 = vmatmul.mubr.bf16.gmra.mrb[76].mxu0 %v21029_v9  ;;  %v18334_v9 = vld [vmem:[#allocation15 + $0x3a4] ss:$16 sps:$4 sm:$0xff]   ;;  %v18397_v24 = vld [vmem:[#allocation15 + $0x38c] ss:$16 sps:$4 sm:$0xff]  }
 0x5e0   : > { %5641 = vmatprep.mubr.bf16.mxu0 %v22682_v36  ;;  %5935 = vmatpush1.bf16.msra.mxu0 %v18305_v5  ;;  %v18337_v5 = vld [vmem:[#allocation12 + $0x334] ss:$8 sps:$4 sm:$0xff]  }
 0x5e1   : > { %5936 = vmatprep.subr.bf16.mxu0 %v18313_v50  ;;  %8190 = vmatprep.subr.bf16.mxu1 %v18334_v9  ;;  %v18394_v50 = vld [vmem:[#allocation15 + $0x36c] ss:$16 sps:$4 sm:$0xff]  }
 0x5e2   : > { %8191 = vmatpush1.bf16.msra.mxu1 %v18332_v14  ;;  %v18341_v14 = vld [vmem:[#allocation12 + $0x340] ss:$8 sps:$4 sm:$0xff]   ;;  %v18349_v9 = vld [vmem:[#allocation12 + $0x354] ss:$8 sps:$4 sm:$0xff]  }
 0x5e3   : > { %8192 = vmatprep.subr.bf16.mxu1 %v18340_v38  ;;  %v18347_v38 = vld [vmem:[#allocation12 + $0x350] ss:$8 sps:$4 sm:$0xff]  }
 0x5e4   : > { %5937 = vmatpush1.bf16.msra.mxu0 %v18311_v15  ;;  %v18343_v15 = vld [vmem:[#allocation12 + $0x344] ss:$8 sps:$4 sm:$0xff]  }
 0x5e5   : > { %6275 = vmatprep.subr.bf16.mxu0 %v18319_v31  ;;  %v18395_v31 = vld [vmem:[#allocation15 + $0x388] ss:$16 sps:$4 sm:$0xff]  }
 0x5e6   : > { %8193 = vmatpush1.bf16.msra.mxu1 %v18338_v18  ;;  %v18403_v18 = vld [vmem:[#allocation15 + $0x3ac] ss:$16 sps:$4 sm:$0xff]  }
 0x5e7   : > { %5642 = vmatmul.mubr.bf16.gmra.mrb[80].mxu0 %v21041_v62  ;;  %v18344_v62 = vld [vmem:[#allocation15 + $0x3e0] ss:$16 sps:$4 sm:$0xff]  }
 0x5e8   : > { %5651 = vmatprep.mubr.bf16.mxu0 %v22682_v36 }
 0x5ef   : > { %5652 = vmatmul.mubr.bf16.gmra.mrb[84].mxu0 %v21051_v41  ;;  %v18346_v41 = vld [vmem:[#allocation15 + $0x3e4] ss:$16 sps:$4 sm:$0xff]  }
 0x5f0   : > { %5661 = vmatprep.mubr.bf16.mxu0 %v22682_v36  ;;  %8194 = vmatprep.subr.bf16.mxu1 %v18346_v41  ;;  %v18355_v41 = vld [vmem:[#allocation12 + $0x364] ss:$8 sps:$4 sm:$0xff]  }
 0x5f1   : > { %8195 = vmatpush1.bf16.msra.mxu1 %v18344_v62  ;;  %v18406_v62 = vld [vmem:[#allocation15 + $0x3cc] ss:$16 sps:$4 sm:$0xff]  }
 0x5f4   : > { %8197 = vmatmul.mubr.bf16.vlgmr.msra.gmra.mrb[128].mxu1 %v22682_v36 }
 0x5f5   : > { %8206 = vmatprep.mubr.bf16.mxu1 %v22682_v36 }
 0x5f7   : > { %5662 = vmatmul.mubr.bf16.gmra.mrb[88].mxu0 %v21061_v13  ;;  %v18350_v13 = vld [vmem:[#allocation15 + $0x208] ss:$16 sps:$4 sm:$0xff]  }
 0x5f8   : > { %5671 = vmatprep.mubr.bf16.mxu0 %v22682_v36 }
 0x5fc   : > { %8207 = vmatmul.mubr.bf16.gmra.mrb[132].mxu1 %v22682_v36 }
 0x5fd   : > { %8216 = vmatprep.mubr.bf16.mxu1 %v22682_v36 }
 0x5ff   : > { %5672 = vmatmul.mubr.bf16.gmra.mrb[92].mxu0 %v21071_v7  ;;  %v18352_v7 = vld [vmem:[#allocation15 + $0x20c] ss:$16 sps:$4 sm:$0xff]  }
 0x600   : > { %5681 = vmatprep.mubr.bf16.mxu0 %v22682_v36  ;;  %8277 = vmatprep.subr.bf16.mxu1 %v18352_v7  ;;  %v18353_v7 = vld [vmem:[#allocation12 + $0x360] ss:$8 sps:$4 sm:$0xff]  }
 0x601   : > { %8278 = vmatpush1.bf16.msra.mxu1 %v18350_v13  ;;  %v18404_v13 = vld [vmem:[#allocation15 + $0x3c8] ss:$16 sps:$4 sm:$0xff]  }
 0x602   : > { %8279 = vmatprep.subr.bf16.mxu1 %v18358_v8  ;;  %v18409_v8 = vld [vmem:[#allocation15 + $0x3ec] ss:$16 sps:$4 sm:$0xff]  }
 0x604   : > { %8217 = vmatmul.mubr.bf16.gmra.mrb[136].mxu1 %v22682_v36 }
 0x605   : > { %8226 = vmatprep.mubr.bf16.mxu1 %v22682_v36  ;;  %8280 = vmatpush1.bf16.msra.mxu1 %v18356_v25  ;;  %v18370_v25 = vld [vmem:[#allocation12 + $0x374] ss:$8 sps:$4 sm:$0xff]  }
 0x606   : > { %8281 = vmatprep.subr.bf16.mxu1 %v18361_v47  ;;  %v18368_v47 = vld [vmem:[#allocation12 + $0x370] ss:$8 sps:$4 sm:$0xff]  }
 0x607   : > { %5682 = vmatmul.mubr.bf16.gmra.mrb[96].mxu0 %v21161_v46 }
 0x608   : > { %5691 = vmatprep.mubr.bf16.mxu0 %v22682_v36 }
 0x609   : > { %8282 = vmatpush1.bf16.msra.mxu1 %v18359_v42  ;;  %v18412_v42 = vld [vmem:[#allocation15 + $0x4] ss:$16 sps:$4 sm:$0xff]  }
 0x60a   : > { %8283 = vmatprep.subr.bf16.mxu1 %v18364_v61  ;;  %v18410_v61 = vld [vmem:[#allocation15] ss:$16 sps:$4 sm:$0xff]  }
 0x60c   : > { %8227 = vmatmul.mubr.bf16.gmra.mrb[140].mxu1 %v22682_v36 }
 0x60d   : > { %8236 = vmatprep.mubr.bf16.mxu1 %v22682_v36  ;;  %8284 = vmatpush1.bf16.msra.mxu1 %v18362_v51  ;;  %v18385_v51 = vld [vmem:[#allocation12 + $0x384] ss:$8 sps:$4 sm:$0xff]  }
 0x60e   : > { %8285 = vmatprep.subr.bf16.mxu1 %v18367_v49  ;;  %v18418_v49 = vld [vmem:[#allocation15 + $0x24] ss:$16 sps:$4 sm:$0xff]  }
 0x60f   : > { %5692 = vmatmul.mubr.bf16.gmra.mrb[100].mxu0 %v21171_v56 }
 0x610   : > { %5701 = vmatprep.mubr.bf16.mxu0 %v22682_v36 }
 0x611   : > { %8286 = vmatpush1.bf16.msra.mxu1 %v18365_v35  ;;  %v18421_v35 = vld [vmem:[#allocation15 + $0x44] ss:$16 sps:$4 sm:$0xff]  }
 0x612   : > { %8287 = vmatprep.subr.bf16.mxu1 %v18373_v2  ;;  %v18422_v2 = vld [vmem:[#allocation15 + $0x60] ss:$16 sps:$4 sm:$0xff]  }
 0x614   : > { %8237 = vmatmul.mubr.bf16.gmra.mrb[144].mxu1 %v22682_v36 }
 0x615   : > { %8246 = vmatprep.mubr.bf16.mxu1 %v22682_v36  ;;  %8288 = vmatpush1.bf16.msra.mxu1 %v18371_v39  ;;  %v18419_v39 = vld [vmem:[#allocation15 + $0x40] ss:$16 sps:$4 sm:$0xff]  }
 0x616   : > { %8289 = vmatprep.subr.bf16.mxu1 %v18376_v6  ;;  %v18424_v6 = vld [vmem:[#allocation15 + $0x64] ss:$16 sps:$4 sm:$0xff]  }
 0x617   : > { %5702 = vmatmul.mubr.bf16.gmra.mrb[104].mxu0 %v21181_v54 }
 0x618   : > { %5711 = vmatprep.mubr.bf16.mxu0 %v22682_v36 }
 0x619   : > { %8290 = vmatpush1.bf16.msra.mxu1 %v18374_v57  ;;  %v18425_v57 = vld [vmem:[#allocation15 + $0x80] ss:$16 sps:$4 sm:$0xff]  }
 0x61a   : > { %8291 = vmatprep.subr.bf16.mxu1 %v18379_v11  ;;  %v18433_v11 = vld [vmem:[#allocation15 + $0xa4] ss:$16 sps:$4 sm:$0xff]  }
 0x61c   : > { %8247 = vmatmul.mubr.bf16.gmra.mrb[148].mxu1 %v22682_v36 }
 0x61d   : > { %8256 = vmatprep.mubr.bf16.mxu1 %v22682_v36  ;;  %8292 = vmatpush1.bf16.msra.mxu1 %v18377_v33  ;;  %v18431_v33 = vld [vmem:[#allocation15 + $0xa0] ss:$16 sps:$4 sm:$0xff]  }
 0x61e   : > { %8293 = vmatprep.subr.bf16.mxu1 %v18382_v34  ;;  %v18434_v34 = vld [vmem:[#allocation15 + $0xc0] ss:$16 sps:$4 sm:$0xff]  }
 0x61f   : > { %5712 = vmatmul.mubr.bf16.gmra.mrb[108].mxu0 %v21193_v12 }
 0x620   : > { %5721 = vmatprep.mubr.bf16.mxu0 %v22682_v36 }
 0x621   : > { %8294 = vmatpush1.bf16.msra.mxu1 %v18380_v10  ;;  %v18437_v10 = vld [vmem:[#allocation15 + $0xe0] ss:$16 sps:$4 sm:$0xff]  }
 0x622   : > { %8295 = vmatprep.subr.bf16.mxu1 %v18388_v59  ;;  %v18446_v59 = vld [vmem:[#allocation15 + $0x120] ss:$16 sps:$4 sm:$0xff]  }
 0x624   : > { %8257 = vmatmul.mubr.bf16.gmra.mrb[152].mxu1 %v22682_v36 }
 0x625   : > { %8266 = vmatprep.mubr.bf16.mxu1 %v22682_v36  ;;  %8296 = vmatpush1.bf16.msra.mxu1 %v18386_v17  ;;  %v18449_v17 = vld [vmem:[#allocation15 + $0x140] ss:$16 sps:$4 sm:$0xff]  }
 0x626   : > { %8297 = vmatprep.subr.bf16.mxu1 %v18391_v37  ;;  %v18452_v37 = vld [vmem:[#allocation15 + $0x160] ss:$16 sps:$4 sm:$0xff]  }
 0x627   : > { %5722 = vmatmul.mubr.bf16.gmra.mrb[112].mxu0 %v21203_v63 }
 0x628   : > { %5731 = vmatprep.mubr.bf16.mxu0 %v22682_v36 }
 0x629   : > { %8298 = vmatpush1.bf16.msra.mxu1 %v18389_v43  ;;  %v18457_v43 = vld [vmem:[#allocation15 + $0x184] ss:$16 sps:$4 sm:$0xff]  }
 0x62a   : > { %8299 = vmatprep.subr.bf16.mxu1 %v18394_v50  ;;  %v18466_v50 = vld [vmem:[#allocation15 + $0x1c4] ss:$16 sps:$4 sm:$0xff]  }
 0x62c   : > { %8267 = vmatmul.mubr.bf16.gmra.mrb[156].mxu1 %v22682_v36 }
 0x62d   : > { %8309 = vmatprep.mubr.bf16.mxu1 %v22682_v36 }
 0x62f   : > { %5732 = vmatmul.mubr.bf16.gmra.mrb[116].mxu0 %v21213_v0 }
 0x630   : > { %5741 = vmatprep.mubr.bf16.mxu0 %v22682_v36 }
 0x637   : > { %5742 = vmatmul.mubr.bf16.gmra.mrb[120].mxu0 %v21223_v20 }
 0x638   : > { %5751 = vmatprep.mubr.bf16.mxu0 %v22682_v36 }
 0x63f   : > { %5752 = vmatmul.mubr.bf16.gmra.mrb[124].mxu0 %v21233_v29 }
 0x640   : > { %5954 = vmatprep.mubr.bf16.mxu0 %v22682_v36 }
 0x647   : > { %5955 = vmatmul.mubr.bf16.vlgmr.msra.gmra.mrb[64].mxu0 %v21081_v4  ;;  %v18392_v4 = vld [vmem:[#allocation15 + $0x368] ss:$16 sps:$4 sm:$0xff]  }
 0x648   : > { %6276 = vmatpush1.bf16.msra.mxu0 %v18317_v53  ;;  %5964 = vmatprep.mubr.bf16.mxu0 %v22682_v36  ;;  %v18439_v53 = vld [vmem:[#allocation15 + $0xe4] ss:$16 sps:$4 sm:$0xff]  }
 0x649   : > { %6277 = vmatprep.subr.bf16.mxu0 %v18325_v60  ;;  %8300 = vmatpush1.bf16.msra.mxu1 %v18392_v4  ;;  %v18440_v60 = vld [vmem:[#allocation15 + $0x100] ss:$16 sps:$4 sm:$0xff]   ;;  %v18463_v4 = vld [vmem:[#allocation15 + $0x1a4] ss:$16 sps:$4 sm:$0xff]  }
 0x64a   : > { %8301 = vmatprep.subr.bf16.mxu1 %v18397_v24  ;;  %v18467_v24 = vld [vmem:[#allocation15 + $0x1e0] ss:$16 sps:$4 sm:$0xff]  }
 0x64c   : > { %6278 = vmatpush1.bf16.msra.mxu0 %v18323_v28  ;;  %v18448_v28 = vld [vmem:[#allocation15 + $0x124] ss:$16 sps:$4 sm:$0xff]  }
 0x64d   : > { %6279 = vmatprep.subr.bf16.mxu0 %v18331_v32  ;;  %8302 = vmatpush1.bf16.msra.mxu1 %v18395_v31  ;;  %v18454_v32 = vld [vmem:[#allocation15 + $0x164] ss:$16 sps:$4 sm:$0xff]   ;;  %v18472_v31 = vld [vmem:[#allocation15 + $0xc] ss:$16 sps:$4 sm:$0xff]  }
 0x64e   : > { %8303 = vmatprep.subr.bf16.mxu1 %v18403_v18  ;;  %v18481_v18 = vld [vmem:[#allocation15 + $0x4c] ss:$16 sps:$4 sm:$0xff]  }
 0x64f   : > { %5965 = vmatmul.mubr.bf16.gmra.mrb[68].mxu0 %v21091_v27  ;;  %v18401_v27 = vld [vmem:[#allocation15 + $0x3a8] ss:$16 sps:$4 sm:$0xff]  }
 0x650   : > { %5974 = vmatprep.mubr.bf16.mxu0 %v22682_v36  ;;  %6280 = vmatpush1.bf16.msra.mxu0 %v18329_v23  ;;  %v18455_v23 = vld [vmem:[#allocation15 + $0x180] ss:$16 sps:$4 sm:$0xff]  }
 0x651   : > { %6281 = vmatprep.subr.bf16.mxu0 %v18337_v5  ;;  %8304 = vmatpush1.bf16.msra.mxu1 %v18401_v27  ;;  %v18461_v5 = vld [vmem:[#allocation15 + $0x1a0] ss:$16 sps:$4 sm:$0xff]   ;;  %v18478_v27 = vld [vmem:[#allocation15 + $0x2c] ss:$16 sps:$4 sm:$0xff]  }
 0x652   : > { %8305 = vmatprep.subr.bf16.mxu1 %v18406_v62  ;;  %v18482_v62 = vld [vmem:[#allocation15 + $0x68] ss:$16 sps:$4 sm:$0xff]  }
 0x654   : > { %6282 = vmatpush1.bf16.msra.mxu0 %v18335_v30  ;;  %v18464_v30 = vld [vmem:[#allocation15 + $0x1c0] ss:$16 sps:$4 sm:$0xff]  }
 0x655   : > { %6283 = vmatprep.subr.bf16.mxu0 %v18343_v15  ;;  %8306 = vmatpush1.bf16.msra.mxu1 %v18404_v13  ;;  %v18469_v15 = vld [vmem:[#allocation15 + $0x1e4] ss:$16 sps:$4 sm:$0xff]   ;;  %v18487_v13 = vld [vmem:[#allocation15 + $0x8c] ss:$16 sps:$4 sm:$0xff]  }
 0x656   : > { %8307 = vmatprep.subr.bf16.mxu1 %v18409_v8  ;;  %v18496_v8 = vld [vmem:[#allocation15 + $0xcc] ss:$16 sps:$4 sm:$0xff]  }
 0x657   : > { %5975 = vmatmul.mubr.bf16.gmra.mrb[72].mxu0 %v21101_v55  ;;  %v18407_v55 = vld [vmem:[#allocation15 + $0x3e8] ss:$16 sps:$4 sm:$0xff]  }
 0x658   : > { %5984 = vmatprep.mubr.bf16.mxu0 %v22682_v36  ;;  %6284 = vmatpush1.bf16.msra.mxu0 %v18341_v14  ;;  %v18470_v14 = vld [vmem:[#allocation15 + $0x8] ss:$16 sps:$4 sm:$0xff]  }
 0x659   : > { %6285 = vmatprep.subr.bf16.mxu0 %v18349_v9  ;;  %8308 = vmatpush1.bf16.msra.mxu1 %v18407_v55  ;;  %v18476_v9 = vld [vmem:[#allocation15 + $0x28] ss:$16 sps:$4 sm:$0xff]   ;;  %v18493_v55 = vld [vmem:[#allocation15 + $0xac] ss:$16 sps:$4 sm:$0xff]  }
 0x65a   : > { %8710 = vmatprep.subr.bf16.mxu1 %v18412_v42  ;;  %v18497_v42 = vld [vmem:[#allocation15 + $0xe8] ss:$16 sps:$4 sm:$0xff]  }
 0x65c   : > { %6286 = vmatpush1.bf16.msra.mxu0 %v18347_v38  ;;  %8310 = vmatmul.mubr.bf16.vlgmr.msra.gmra.mrb[160].mxu1 %v22682_v36  ;;  %v18479_v38 = vld [vmem:[#allocation15 + $0x48] ss:$16 sps:$4 sm:$0xff]  }
 0x65d   : > { %6287 = vmatprep.subr.bf16.mxu0 %v18355_v41  ;;  %8711 = vmatpush1.bf16.msra.mxu1 %v18410_v61  ;;  %v18484_v41 = vld [vmem:[#allocation15 + $0x6c] ss:$16 sps:$4 sm:$0xff]  }
 0x65e   : > { %8319 = vmatprep.mubr.bf16.mxu1 %v22682_v36  ;;  %8712 = vmatprep.subr.bf16.mxu1 %v18418_v49  ;;  %v18502_v61 = vld [vmem:[#allocation15 + $0x10c] ss:$16 sps:$4 sm:$0xff]  }
 0x65f   : > { %5985 = vmatmul.mubr.bf16.gmra.mrb[76].mxu0 %v21111_v16  ;;  %v18416_v16 = vld [vmem:[#allocation15 + $0x20] ss:$16 sps:$4 sm:$0xff]  }
 0x660   : > { %5994 = vmatprep.mubr.bf16.mxu0 %v22682_v36  ;;  %6288 = vmatpush1.bf16.msra.mxu0 %v18353_v7  ;;  %v18485_v7 = vld [vmem:[#allocation15 + $0x88] ss:$16 sps:$4 sm:$0xff]  }
 0x661   : > { %6289 = vmatprep.subr.bf16.mxu0 %v18370_v25  ;;  %8713 = vmatpush1.bf16.msra.mxu1 %v18416_v16  ;;  %v18491_v25 = vld [vmem:[#allocation15 + $0xa8] ss:$16 sps:$4 sm:$0xff]  }
 0x662   : > { %8714 = vmatprep.subr.bf16.mxu1 %v18421_v35  ;;  %v18500_v16 = vld [vmem:[#allocation15 + $0x108] ss:$16 sps:$4 sm:$0xff]  }
 0x663   : > { %v18383_v49 = vld [vmem:[#allocation12 + $0x380] ss:$8 sps:$4 sm:$0xff]   ;;  %v18400_v35 = vld [vmem:[#allocation12 + $0x394] ss:$8 sps:$4 sm:$0xff]  }
 0x664   : > { %6290 = vmatpush1.bf16.msra.mxu0 %v18368_v47  ;;  %8320 = vmatmul.mubr.bf16.gmra.mrb[164].mxu1 %v22682_v36  ;;  %v18494_v47 = vld [vmem:[#allocation15 + $0xc8] ss:$16 sps:$4 sm:$0xff]  }
 0x665   : > { %6628 = vmatprep.subr.bf16.mxu0 %v18385_v51  ;;  %8715 = vmatpush1.bf16.msra.mxu1 %v18419_v39  ;;  %v18499_v51 = vld [vmem:[#allocation15 + $0xec] ss:$16 sps:$4 sm:$0xff]  }
 0x666   : > { %8329 = vmatprep.mubr.bf16.mxu1 %v22682_v36  ;;  %8716 = vmatprep.subr.bf16.mxu1 %v18424_v6  ;;  %v18508_v39 = vld [vmem:[#allocation15 + $0x12c] ss:$16 sps:$4 sm:$0xff]   ;;  %v18506_v6 = vld [vmem:[#allocation15 + $0x128] ss:$16 sps:$4 sm:$0xff]  }
 0x667   : > { %5995 = vmatmul.mubr.bf16.gmra.mrb[80].mxu0 %v21121_v22  ;;  %v18427_v22 = vld [vmem:[#allocation15 + $0x84] ss:$16 sps:$4 sm:$0xff]  }
 0x668   : > { %6004 = vmatprep.mubr.bf16.mxu0 %v22682_v36 }
 0x669   : > { %8717 = vmatpush1.bf16.msra.mxu1 %v18422_v2  ;;  %v18398_v2 = vld [vmem:[#allocation12 + $0x390] ss:$8 sps:$4 sm:$0xff]  }
 0x66a   : > { %8718 = vmatprep.subr.bf16.mxu1 %v18427_v22  ;;  %v18511_v22 = vld [vmem:[#allocation15 + $0x14c] ss:$16 sps:$4 sm:$0xff]  }
 0x66c   : > { %8330 = vmatmul.mubr.bf16.gmra.mrb[168].mxu1 %v22682_v36 }
 0x66d   : > { %8719 = vmatpush1.bf16.msra.mxu1 %v18425_v57  ;;  %8339 = vmatprep.mubr.bf16.mxu1 %v22682_v36  ;;  %v18415_v57 = vld [vmem:[#allocation12 + $0x3a4] ss:$8 sps:$4 sm:$0xff]  }
 0x66e   : > { %8720 = vmatprep.subr.bf16.mxu1 %v18433_v11  ;;  %v18413_v11 = vld [vmem:[#allocation12 + $0x3a0] ss:$8 sps:$4 sm:$0xff]  }
 0x66f   : > { %6005 = vmatmul.mubr.bf16.gmra.mrb[84].mxu0 %v21131_v3  ;;  %v18436_v3 = vld [vmem:[#allocation15 + $0xc4] ss:$16 sps:$4 sm:$0xff]  }
 0x670   : > { %6014 = vmatprep.mubr.bf16.mxu0 %v22682_v36 }
 0x671   : > { %8721 = vmatpush1.bf16.msra.mxu1 %v18431_v33  ;;  %v18509_v33 = vld [vmem:[#allocation15 + $0x148] ss:$16 sps:$4 sm:$0xff]  }
 0x672   : > { %8722 = vmatprep.subr.bf16.mxu1 %v18436_v3  ;;  %v18430_v3 = vld [vmem:[#allocation12 + $0x3b4] ss:$8 sps:$4 sm:$0xff]  }
 0x674   : > { %8340 = vmatmul.mubr.bf16.gmra.mrb[172].mxu1 %v22682_v36 }
 0x675   : > { %8723 = vmatpush1.bf16.msra.mxu1 %v18434_v34  ;;  %8349 = vmatprep.mubr.bf16.mxu1 %v22682_v36  ;;  %v18514_v34 = vld [vmem:[#allocation15 + $0x16c] ss:$16 sps:$4 sm:$0xff]  }
 0x676   : > { %8724 = vmatprep.subr.bf16.mxu1 %v18439_v53  ;;  %v18517_v53 = vld [vmem:[#allocation15 + $0x18c] ss:$16 sps:$4 sm:$0xff]  }
 0x677   : > { %6015 = vmatmul.mubr.bf16.gmra.mrb[88].mxu0 %v21141_v26  ;;  %v18442_v26 = vld [vmem:[#allocation15 + $0x104] ss:$16 sps:$4 sm:$0xff]  }
 0x678   : > { %6024 = vmatprep.mubr.bf16.mxu0 %v22682_v36 }
 0x679   : > { %8725 = vmatpush1.bf16.msra.mxu1 %v18437_v10  ;;  %v18428_v10 = vld [vmem:[#allocation12 + $0x3b0] ss:$8 sps:$4 sm:$0xff]  }
 0x67a   : > { %8726 = vmatprep.subr.bf16.mxu1 %v18442_v26  ;;  %v18445_v26 = vld [vmem:[#allocation12 + $0x3c4] ss:$8 sps:$4 sm:$0xff]  }
 0x67c   : > { %8350 = vmatmul.mubr.bf16.gmra.mrb[176].mxu1 %v22682_v36 }
 0x67d   : > { %8727 = vmatpush1.bf16.msra.mxu1 %v18440_v60  ;;  %8359 = vmatprep.mubr.bf16.mxu1 %v22682_v36  ;;  %v18515_v60 = vld [vmem:[#allocation15 + $0x188] ss:$16 sps:$4 sm:$0xff]  }
 0x67e   : > { %8728 = vmatprep.subr.bf16.mxu1 %v18448_v28  ;;  %v18460_v28 = vld [vmem:[#allocation12 + $0x3d4] ss:$8 sps:$4 sm:$0xff]  }
 0x67f   : > { %6025 = vmatmul.mubr.bf16.gmra.mrb[92].mxu0 %v21151_v52  ;;  %v18451_v52 = vld [vmem:[#allocation15 + $0x144] ss:$16 sps:$4 sm:$0xff]  }
 0x680   : > { %6034 = vmatprep.mubr.bf16.mxu0 %v22682_v36 }
 0x681   : > { %8729 = vmatpush1.bf16.msra.mxu1 %v18446_v59  ;;  %v18443_v59 = vld [vmem:[#allocation12 + $0x3c0] ss:$8 sps:$4 sm:$0xff]  }
 0x682   : > { %8730 = vmatprep.subr.bf16.mxu1 %v18451_v52  ;;  %v18523_v52 = vld [vmem:[#allocation15 + $0x1ac] ss:$16 sps:$4 sm:$0xff]  }
 0x684   : > { %8360 = vmatmul.mubr.bf16.gmra.mrb[180].mxu1 %v22682_v36 }
 0x685   : > { %8731 = vmatpush1.bf16.msra.mxu1 %v18449_v17  ;;  %8369 = vmatprep.mubr.bf16.mxu1 %v22682_v36  ;;  %v18458_v17 = vld [vmem:[#allocation12 + $0x3d0] ss:$8 sps:$4 sm:$0xff]  }
 0x686   : > { %8732 = vmatprep.subr.bf16.mxu1 %v18454_v32  ;;  %v18475_v32 = vld [vmem:[#allocation12 + $0x3e4] ss:$8 sps:$4 sm:$0xff]  }
 0x687   : > { %6035 = vmatmul.mubr.bf16.gmra.mrb[96].mxu0 %v21243_v58 }
 0x688   : > { %6044 = vmatprep.mubr.bf16.mxu0 %v22682_v36 }
 0x689   : > { %8733 = vmatpush1.bf16.msra.mxu1 %v18452_v37  ;;  %v18526_v37 = vld [vmem:[#allocation15 + $0x1cc] ss:$16 sps:$4 sm:$0xff]  }
 0x68a   : > { %8734 = vmatprep.subr.bf16.mxu1 %v18457_v43  ;;  %v18524_v43 = vld [vmem:[#allocation15 + $0x1c8] ss:$16 sps:$4 sm:$0xff]  }
 0x68c   : > { %8370 = vmatmul.mubr.bf16.gmra.mrb[184].mxu1 %v22682_v36 }
 0x68d   : > { %8735 = vmatpush1.bf16.msra.mxu1 %v18455_v23  ;;  %8379 = vmatprep.mubr.bf16.mxu1 %v22682_v36  ;;  %v18473_v23 = vld [vmem:[#allocation12 + $0x3e0] ss:$8 sps:$4 sm:$0xff]  }
 0x68e   : > { %8736 = vmatprep.subr.bf16.mxu1 %v18463_v4  ;;  %v18529_v4 = vld [vmem:[#allocation15 + $0x1ec] ss:$16 sps:$4 sm:$0xff]  }
 0x68f   : > { %6045 = vmatmul.mubr.bf16.gmra.mrb[100].mxu0 %v21253_v21 }
 0x690   : > { %6054 = vmatprep.mubr.bf16.mxu0 %v22682_v36 }
 0x691   : > { %8737 = vmatpush1.bf16.msra.mxu1 %v18461_v5  ;;  %v18490_v5 = vld [vmem:[#allocation12 + $0x3f4] ss:$8 sps:$4 sm:$0xff]  }
 0x692   : > { %8738 = vmatprep.subr.bf16.mxu1 %v18466_v50  ;;  %v18488_v50 = vld [vmem:[#allocation12 + $0x3f0] ss:$8 sps:$4 sm:$0xff]  }
 0x694   : > { %8380 = vmatmul.mubr.bf16.gmra.mrb[188].mxu1 %v22682_v36 }
 0x695   : > { %8739 = vmatpush1.bf16.msra.mxu1 %v18464_v30  ;;  %8742 = vmatprep.mubr.bf16.mxu1 %v22682_v36  ;;  %v18532_v30 = vld [vmem:[#allocation15 + $0x404] ss:$16 sps:$4 sm:$0xff]  }
 0x696   : > { %8740 = vmatprep.subr.bf16.mxu1 %v18469_v15  ;;  %v18530_v15 = vld [vmem:[#allocation15 + $0x400] ss:$16 sps:$4 sm:$0xff]  }
 0x697   : > { %6055 = vmatmul.mubr.bf16.gmra.mrb[104].mxu0 %v21263_v48 }
 0x698   : > { %6064 = vmatprep.mubr.bf16.mxu0 %v22682_v36 }
 0x699   : > { %8741 = vmatpush1.bf16.msra.mxu1 %v18467_v24  ;;  %v18505_v24 = vld [vmem:[#allocation12 + $0x404] ss:$8 sps:$4 sm:$0xff]  }
 0x69a   : > { %8823 = vmatprep.subr.bf16.mxu1 %v18472_v31  ;;  %v18538_v31 = vld [vmem:[#allocation15 + $0x424] ss:$16 sps:$4 sm:$0xff]  }
 0x69c   : > { %8743 = vmatmul.mubr.bf16.vlgmr.msra.gmra.mrb[128].mxu1 %v22682_v36 }
 0x69d   : > { %8824 = vmatpush1.bf16.msra.mxu1 %v18470_v14  ;;  %8752 = vmatprep.mubr.bf16.mxu1 %v22682_v36  ;;  %v18541_v14 = vld [vmem:[#allocation15 + $0x444] ss:$16 sps:$4 sm:$0xff]  }
 0x69e   : > { %8825 = vmatprep.subr.bf16.mxu1 %v18478_v27  ;;  %v18542_v27 = vld [vmem:[#allocation15 + $0x460] ss:$16 sps:$4 sm:$0xff]  }
 0x69f   : > { %6065 = vmatmul.mubr.bf16.gmra.mrb[108].mxu0 %v21275_v1 }
 0x6a0   : > { %6074 = vmatprep.mubr.bf16.mxu0 %v22682_v36 }
 0x6a1   : > { %8826 = vmatpush1.bf16.msra.mxu1 %v18476_v9  ;;  %v18539_v9 = vld [vmem:[#allocation15 + $0x440] ss:$16 sps:$4 sm:$0xff]  }
 0x6a2   : > { %8827 = vmatprep.subr.bf16.mxu1 %v18481_v18  ;;  %v18544_v18 = vld [vmem:[#allocation15 + $0x464] ss:$16 sps:$4 sm:$0xff]  }
 0x6a4   : > { %8753 = vmatmul.mubr.bf16.gmra.mrb[132].mxu1 %v22682_v36 }
 0x6a5   : > { %8828 = vmatpush1.bf16.msra.mxu1 %v18479_v38  ;;  %8762 = vmatprep.mubr.bf16.mxu1 %v22682_v36  ;;  %v18545_v38 = vld [vmem:[#allocation15 + $0x480] ss:$16 sps:$4 sm:$0xff]  }
 0x6a6   : > { %8829 = vmatprep.subr.bf16.mxu1 %v18484_v41  ;;  %v18553_v41 = vld [vmem:[#allocation15 + $0x4a4] ss:$16 sps:$4 sm:$0xff]  }
 0x6a7   : > { %6075 = vmatmul.mubr.bf16.gmra.mrb[112].mxu0 %v21285_v40 }
 0x6a8   : > { %6084 = vmatprep.mubr.bf16.mxu0 %v22682_v36 }
 0x6a9   : > { %8830 = vmatpush1.bf16.msra.mxu1 %v18482_v62  ;;  %v18551_v62 = vld [vmem:[#allocation15 + $0x4a0] ss:$16 sps:$4 sm:$0xff]  }
 0x6aa   : > { %8831 = vmatprep.subr.bf16.mxu1 %v18487_v13  ;;  %v18554_v13 = vld [vmem:[#allocation15 + $0x4c0] ss:$16 sps:$4 sm:$0xff]  }
 0x6ac   : > { %8763 = vmatmul.mubr.bf16.gmra.mrb[136].mxu1 %v22682_v36 }
 0x6ad   : > { %8832 = vmatpush1.bf16.msra.mxu1 %v18485_v7  ;;  %8772 = vmatprep.mubr.bf16.mxu1 %v22682_v36  ;;  %v18557_v7 = vld [vmem:[#allocation15 + $0x4e0] ss:$16 sps:$4 sm:$0xff]  }
 0x6ae   : > { %8833 = vmatprep.subr.bf16.mxu1 %v18493_v55  ;;  %v18560_v55 = vld [vmem:[#allocation15 + $0x500] ss:$16 sps:$4 sm:$0xff]  }
 0x6af   : > { %6085 = vmatmul.mubr.bf16.gmra.mrb[116].mxu0 %v21295_v19 }
 0x6b0   : > { %6094 = vmatprep.mubr.bf16.mxu0 %v22682_v36 }
 0x6b1   : > { %8834 = vmatpush1.bf16.msra.mxu1 %v18491_v25  ;;  %v18559_v25 = vld [vmem:[#allocation15 + $0x4e4] ss:$16 sps:$4 sm:$0xff]  }
 0x6b2   : > { %8835 = vmatprep.subr.bf16.mxu1 %v18496_v8  ;;  %v18566_v8 = vld [vmem:[#allocation15 + $0x520] ss:$16 sps:$4 sm:$0xff]  }
 0x6b4   : > { %8773 = vmatmul.mubr.bf16.gmra.mrb[140].mxu1 %v22682_v36 }
 0x6b5   : > { %8836 = vmatpush1.bf16.msra.mxu1 %v18494_v47  ;;  %8782 = vmatprep.mubr.bf16.mxu1 %v22682_v36  ;;  %v18568_v47 = vld [vmem:[#allocation15 + $0x524] ss:$16 sps:$4 sm:$0xff]  }
 0x6b6   : > { %8837 = vmatprep.subr.bf16.mxu1 %v18499_v51  ;;  %v18572_v51 = vld [vmem:[#allocation15 + $0x560] ss:$16 sps:$4 sm:$0xff]  }
 0x6b7   : > { %6095 = vmatmul.mubr.bf16.gmra.mrb[120].mxu0 %v21305_v44 }
 0x6b8   : > { %6104 = vmatprep.mubr.bf16.mxu0 %v22682_v36 }
 0x6b9   : > { %8838 = vmatpush1.bf16.msra.mxu1 %v18497_v42  ;;  %v18569_v42 = vld [vmem:[#allocation15 + $0x540] ss:$16 sps:$4 sm:$0xff]  }
 0x6ba   : > { %8839 = vmatprep.subr.bf16.mxu1 %v18502_v61  ;;  %v18574_v61 = vld [vmem:[#allocation15 + $0x564] ss:$16 sps:$4 sm:$0xff]  }
 0x6bc   : > { %8783 = vmatmul.mubr.bf16.gmra.mrb[144].mxu1 %v22682_v36 }
 0x6bd   : > { %8840 = vmatpush1.bf16.msra.mxu1 %v18500_v16  ;;  %8792 = vmatprep.mubr.bf16.mxu1 %v22682_v36  ;;  %v18577_v16 = vld [vmem:[#allocation15 + $0x584] ss:$16 sps:$4 sm:$0xff]  }
 0x6be   : > { %8841 = vmatprep.subr.bf16.mxu1 %v18508_v39  ;;  %v18583_v39 = vld [vmem:[#allocation15 + $0x5a4] ss:$16 sps:$4 sm:$0xff]  }
 0x6bf   : > { %6105 = vmatmul.mubr.bf16.gmra.mrb[124].mxu0 %v21311_v45 }
 0x6c0   : > { %6307 = vmatprep.mubr.bf16.mxu0 %v22682_v36 }
 0x6c1   : > { %8842 = vmatpush1.bf16.msra.mxu1 %v18506_v6  ;;  %v18584_v6 = vld [vmem:[#allocation15 + $0x5c0] ss:$16 sps:$4 sm:$0xff]  }
 0x6c2   : > { %8843 = vmatprep.subr.bf16.mxu1 %v18511_v22  ;;  %v18587_v22 = vld [vmem:[#allocation15 + $0x5e0] ss:$16 sps:$4 sm:$0xff]  }
 0x6c4   : > { %8793 = vmatmul.mubr.bf16.gmra.mrb[148].mxu1 %v22682_v36 }
 0x6c5   : > { %8844 = vmatpush1.bf16.msra.mxu1 %v18509_v33  ;;  %8802 = vmatprep.mubr.bf16.mxu1 %v22682_v36  ;;  %v18592_v33 = vld [vmem:[#allocation15 + $0x40c] ss:$16 sps:$4 sm:$0xff]  }
 0x6c6   : > { %8845 = vmatprep.subr.bf16.mxu1 %v18514_v34  ;;  %v18601_v34 = vld [vmem:[#allocation15 + $0x44c] ss:$16 sps:$4 sm:$0xff]  }
 0x6c7   : > { %6308 = vmatmul.mubr.bf16.vlgmr.msra.gmra.mrb[64].mxu0 %v21161_v46  ;;  %v18512_v46 = vld [vmem:[#allocation15 + $0x168] ss:$16 sps:$4 sm:$0xff]  }
 0x6c8   : > { %6629 = vmatpush1.bf16.msra.mxu0 %v18383_v49  ;;  %6317 = vmatprep.mubr.bf16.mxu0 %v22682_v36  ;;  %v18575_v49 = vld [vmem:[#allocation15 + $0x580] ss:$16 sps:$4 sm:$0xff]  }
 0x6c9   : > { %6630 = vmatprep.subr.bf16.mxu0 %v18400_v35  ;;  %8846 = vmatpush1.bf16.msra.mxu1 %v18512_v46  ;;  %v18581_v35 = vld [vmem:[#allocation15 + $0x5a0] ss:$16 sps:$4 sm:$0xff]   ;;  %v18598_v46 = vld [vmem:[#allocation15 + $0x42c] ss:$16 sps:$4 sm:$0xff]  }
 0x6ca   : > { %8847 = vmatprep.subr.bf16.mxu1 %v18517_v53  ;;  %v18602_v53 = vld [vmem:[#allocation15 + $0x468] ss:$16 sps:$4 sm:$0xff]  }
 0x6cc   : > { %6631 = vmatpush1.bf16.msra.mxu0 %v18398_v2  ;;  %8803 = vmatmul.mubr.bf16.gmra.mrb[152].mxu1 %v22682_v36  ;;  %v18586_v2 = vld [vmem:[#allocation15 + $0x5c4] ss:$16 sps:$4 sm:$0xff]  }
 0x6cd   : > { %6632 = vmatprep.subr.bf16.mxu0 %v18415_v57  ;;  %8848 = vmatpush1.bf16.msra.mxu1 %v18515_v60  ;;  %v18589_v57 = vld [vmem:[#allocation15 + $0x5e4] ss:$16 sps:$4 sm:$0xff]   ;;  %v18607_v60 = vld [vmem:[#allocation15 + $0x48c] ss:$16 sps:$4 sm:$0xff]  }
 0x6ce   : > { %8812 = vmatprep.mubr.bf16.mxu1 %v22682_v36  ;;  %8849 = vmatprep.subr.bf16.mxu1 %v18523_v52  ;;  %v18616_v52 = vld [vmem:[#allocation15 + $0x4cc] ss:$16 sps:$4 sm:$0xff]  }
 0x6cf   : > { %6318 = vmatmul.mubr.bf16.gmra.mrb[68].mxu0 %v21171_v56  ;;  %v18521_v56 = vld [vmem:[#allocation15 + $0x1a8] ss:$16 sps:$4 sm:$0xff]  }
 0x6d0   : > { %6327 = vmatprep.mubr.bf16.mxu0 %v22682_v36  ;;  %6633 = vmatpush1.bf16.msra.mxu0 %v18413_v11  ;;  %v18590_v11 = vld [vmem:[#allocation15 + $0x408] ss:$16 sps:$4 sm:$0xff]  }
 0x6d1   : > { %6634 = vmatprep.subr.bf16.mxu0 %v18430_v3  ;;  %8850 = vmatpush1.bf16.msra.mxu1 %v18521_v56  ;;  %v18596_v3 = vld [vmem:[#allocation15 + $0x428] ss:$16 sps:$4 sm:$0xff]   ;;  %v18613_v56 = vld [vmem:[#allocation15 + $0x4ac] ss:$16 sps:$4 sm:$0xff]  }
 0x6d2   : > { %8851 = vmatprep.subr.bf16.mxu1 %v18526_v37  ;;  %v18617_v37 = vld [vmem:[#allocation15 + $0x4e8] ss:$16 sps:$4 sm:$0xff]  }
 0x6d4   : > { %6635 = vmatpush1.bf16.msra.mxu0 %v18428_v10  ;;  %8813 = vmatmul.mubr.bf16.gmra.mrb[156].mxu1 %v22682_v36  ;;  %v18599_v10 = vld [vmem:[#allocation15 + $0x448] ss:$16 sps:$4 sm:$0xff]  }
 0x6d5   : > { %6636 = vmatprep.subr.bf16.mxu0 %v18445_v26  ;;  %8852 = vmatpush1.bf16.msra.mxu1 %v18524_v43  ;;  %v18604_v26 = vld [vmem:[#allocation15 + $0x46c] ss:$16 sps:$4 sm:$0xff]  }
 0x6d6   : > { %8855 = vmatprep.mubr.bf16.mxu1 %v22682_v36  ;;  %8853 = vmatprep.subr.bf16.mxu1 %v18529_v4  ;;  %v18622_v43 = vld [vmem:[#allocation15 + $0x50c] ss:$16 sps:$4 sm:$0xff]   ;;  %v18623_v4 = vld [vmem:[#allocation15 + $0x528] ss:$16 sps:$4 sm:$0xff]  }
 0x6d7   : > { %6328 = vmatmul.mubr.bf16.gmra.mrb[72].mxu0 %v21181_v54  ;;  %v18527_v54 = vld [vmem:[#allocation15 + $0x1e8] ss:$16 sps:$4 sm:$0xff]  }
 0x6d8   : > { %6337 = vmatprep.mubr.bf16.mxu0 %v22682_v36  ;;  %6637 = vmatpush1.bf16.msra.mxu0 %v18443_v59  ;;  %v18605_v59 = vld [vmem:[#allocation15 + $0x488] ss:$16 sps:$4 sm:$0xff]  }
 0x6d9   : > { %6638 = vmatprep.subr.bf16.mxu0 %v18460_v28  ;;  %8854 = vmatpush1.bf16.msra.mxu1 %v18527_v54  ;;  %v18611_v28 = vld [vmem:[#allocation15 + $0x4a8] ss:$16 sps:$4 sm:$0xff]  }
 0x6da   : > { %9320 = vmatprep.subr.bf16.mxu1 %v18532_v30  ;;  %v18520_v54 = vld [vmem:[#allocation12 + $0x414] ss:$8 sps:$4 sm:$0xff]   ;;  %v18518_v30 = vld [vmem:[#allocation12 + $0x410] ss:$8 sps:$4 sm:$0xff]  }
 0x6dc   : > { %6639 = vmatpush1.bf16.msra.mxu0 %v18458_v17  ;;  %8856 = vmatmul.mubr.bf16.vlgmr.msra.gmra.mrb[160].mxu1 %v22682_v36  ;;  %v18614_v17 = vld [vmem:[#allocation15 + $0x4c8] ss:$16 sps:$4 sm:$0xff]  }
 0x6dd   : > { %6640 = vmatprep.subr.bf16.mxu0 %v18475_v32  ;;  %9321 = vmatpush1.bf16.msra.mxu1 %v18530_v15  ;;  %v18619_v32 = vld [vmem:[#allocation15 + $0x4ec] ss:$16 sps:$4 sm:$0xff]  }
 0x6de   : > { %8865 = vmatprep.mubr.bf16.mxu1 %v22682_v36  ;;  %9322 = vmatprep.subr.bf16.mxu1 %v18538_v31  ;;  %v18535_v15 = vld [vmem:[#allocation12 + $0x424] ss:$8 sps:$4 sm:$0xff]   ;;  %v18533_v31 = vld [vmem:[#allocation12 + $0x420] ss:$8 sps:$4 sm:$0xff]  }
 0x6df   : > { %6338 = vmatmul.mubr.bf16.gmra.mrb[76].mxu0 %v21193_v12  ;;  %v18536_v12 = vld [vmem:[#allocation15 + $0x420] ss:$16 sps:$4 sm:$0xff]  }
 0x6e0   : > { %6347 = vmatprep.mubr.bf16.mxu0 %v22682_v36  ;;  %6641 = vmatpush1.bf16.msra.mxu0 %v18473_v23  ;;  %v18620_v23 = vld [vmem:[#allocation15 + $0x508] ss:$16 sps:$4 sm:$0xff]  }
 0x6e1   : > { %6642 = vmatprep.subr.bf16.mxu0 %v18490_v5  ;;  %9323 = vmatpush1.bf16.msra.mxu1 %v18536_v12  ;;  %v18503_v5 = vld [vmem:[#allocation12 + $0x400] ss:$8 sps:$4 sm:$0xff]  }
 0x6e2   : > { %9324 = vmatprep.subr.bf16.mxu1 %v18541_v14  ;;  %v18626_v12 = vld [vmem:[#allocation15 + $0x548] ss:$16 sps:$4 sm:$0xff]  }
 0x6e3   : > { %v18550_v14 = vld [vmem:[#allocation12 + $0x434] ss:$8 sps:$4 sm:$0xff]  }
 0x6e4   : > { %6643 = vmatpush1.bf16.msra.mxu0 %v18488_v50  ;;  %8866 = vmatmul.mubr.bf16.gmra.mrb[164].mxu1 %v22682_v36  ;;  %v18625_v50 = vld [vmem:[#allocation15 + $0x52c] ss:$16 sps:$4 sm:$0xff]  }
 0x6e5   : > { %6981 = vmatprep.subr.bf16.mxu0 %v18505_v24  ;;  %9325 = vmatpush1.bf16.msra.mxu1 %v18539_v9  ;;  %v18628_v24 = vld [vmem:[#allocation15 + $0x54c] ss:$16 sps:$4 sm:$0xff]  }
 0x6e6   : > { %8875 = vmatprep.mubr.bf16.mxu1 %v22682_v36  ;;  %9326 = vmatprep.subr.bf16.mxu1 %v18544_v18  ;;  %v18631_v9 = vld [vmem:[#allocation15 + $0x56c] ss:$16 sps:$4 sm:$0xff]  }
 0x6e7   : > { %6348 = vmatmul.mubr.bf16.gmra.mrb[80].mxu0 %v21203_v63  ;;  %v18547_v63 = vld [vmem:[#allocation15 + $0x484] ss:$16 sps:$4 sm:$0xff]   ;;  %v18634_v18 = vld [vmem:[#allocation15 + $0x58c] ss:$16 sps:$4 sm:$0xff]  }
 0x6e8   : > { %6357 = vmatprep.mubr.bf16.mxu0 %v22682_v36 }
 0x6e9   : > { %9327 = vmatpush1.bf16.msra.mxu1 %v18542_v27  ;;  %v18548_v27 = vld [vmem:[#allocation12 + $0x430] ss:$8 sps:$4 sm:$0xff]  }
 0x6ea   : > { %9328 = vmatprep.subr.bf16.mxu1 %v18547_v63  ;;  %v18565_v63 = vld [vmem:[#allocation12 + $0x444] ss:$8 sps:$4 sm:$0xff]  }
 0x6ec   : > { %8876 = vmatmul.mubr.bf16.gmra.mrb[168].mxu1 %v22682_v36 }
 0x6ed   : > { %9329 = vmatpush1.bf16.msra.mxu1 %v18545_v38  ;;  %8885 = vmatprep.mubr.bf16.mxu1 %v22682_v36  ;;  %v18632_v38 = vld [vmem:[#allocation15 + $0x588] ss:$16 sps:$4 sm:$0xff]  }
 0x6ee   : > { %9330 = vmatprep.subr.bf16.mxu1 %v18553_v41  ;;  %v18580_v41 = vld [vmem:[#allocation12 + $0x454] ss:$8 sps:$4 sm:$0xff]  }
 0x6ef   : > { %6358 = vmatmul.mubr.bf16.gmra.mrb[84].mxu0 %v21213_v0  ;;  %v18556_v0 = vld [vmem:[#allocation15 + $0x4c4] ss:$16 sps:$4 sm:$0xff]  }
 0x6f0   : > { %6367 = vmatprep.mubr.bf16.mxu0 %v22682_v36 }
 0x6f1   : > { %9331 = vmatpush1.bf16.msra.mxu1 %v18551_v62  ;;  %v18563_v62 = vld [vmem:[#allocation12 + $0x440] ss:$8 sps:$4 sm:$0xff]  }
 0x6f2   : > { %9332 = vmatprep.subr.bf16.mxu1 %v18556_v0  ;;  %v18637_v0 = vld [vmem:[#allocation15 + $0x5ac] ss:$16 sps:$4 sm:$0xff]  }
 0x6f4   : > { %8886 = vmatmul.mubr.bf16.gmra.mrb[172].mxu1 %v22682_v36 }
 0x6f5   : > { %9333 = vmatpush1.bf16.msra.mxu1 %v18554_v13  ;;  %8895 = vmatprep.mubr.bf16.mxu1 %v22682_v36  ;;  %v18578_v13 = vld [vmem:[#allocation12 + $0x450] ss:$8 sps:$4 sm:$0xff]  }
 0x6f6   : > { %9334 = vmatprep.subr.bf16.mxu1 %v18559_v25  ;;  %v18595_v25 = vld [vmem:[#allocation12 + $0x464] ss:$8 sps:$4 sm:$0xff]  }
 0x6f7   : > { %6368 = vmatmul.mubr.bf16.gmra.mrb[88].mxu0 %v21223_v20  ;;  %v18562_v20 = vld [vmem:[#allocation15 + $0x504] ss:$16 sps:$4 sm:$0xff]  }
 0x6f8   : > { %6377 = vmatprep.mubr.bf16.mxu0 %v22682_v36 }
 0x6f9   : > { %9335 = vmatpush1.bf16.msra.mxu1 %v18557_v7  ;;  %v18640_v7 = vld [vmem:[#allocation15 + $0x5cc] ss:$16 sps:$4 sm:$0xff]  }
 0x6fa   : > { %9336 = vmatprep.subr.bf16.mxu1 %v18562_v20  ;;  %v18638_v20 = vld [vmem:[#allocation15 + $0x5c8] ss:$16 sps:$4 sm:$0xff]  }
 0x6fc   : > { %8896 = vmatmul.mubr.bf16.gmra.mrb[176].mxu1 %v22682_v36 }
 0x6fd   : > { %9337 = vmatpush1.bf16.msra.mxu1 %v18560_v55  ;;  %8905 = vmatprep.mubr.bf16.mxu1 %v22682_v36  ;;  %v18593_v55 = vld [vmem:[#allocation12 + $0x460] ss:$8 sps:$4 sm:$0xff]  }
 0x6fe   : > { %9338 = vmatprep.subr.bf16.mxu1 %v18568_v47  ;;  %v18643_v47 = vld [vmem:[#allocation15 + $0x5ec] ss:$16 sps:$4 sm:$0xff]  }
 0x6ff   : > { %6378 = vmatmul.mubr.bf16.gmra.mrb[92].mxu0 %v21233_v29  ;;  %v18571_v29 = vld [vmem:[#allocation15 + $0x544] ss:$16 sps:$4 sm:$0xff]  }
 0x700   : > { %6387 = vmatprep.mubr.bf16.mxu0 %v22682_v36 }
 0x701   : > { %9339 = vmatpush1.bf16.msra.mxu1 %v18566_v8  ;;  %v18610_v8 = vld [vmem:[#allocation12 + $0x474] ss:$8 sps:$4 sm:$0xff]  }
 0x702   : > { %9340 = vmatprep.subr.bf16.mxu1 %v18571_v29  ;;  %v18608_v29 = vld [vmem:[#allocation12 + $0x470] ss:$8 sps:$4 sm:$0xff]  }
 0x704   : > { %8906 = vmatmul.mubr.bf16.gmra.mrb[180].mxu1 %v22682_v36 }
 0x705   : > { %9341 = vmatpush1.bf16.msra.mxu1 %v18569_v42  ;;  %8915 = vmatprep.mubr.bf16.mxu1 %v22682_v36  ;;  %v18646_v42 = vld [vmem:[#allocation15 + $0x604] ss:$16 sps:$4 sm:$0xff]  }
 0x706   : > { %9342 = vmatprep.subr.bf16.mxu1 %v18574_v61  ;;  %v18649_v61 = vld [vmem:[#allocation15 + $0x624] ss:$16 sps:$4 sm:$0xff]  }
 0x707   : > { %6388 = vmatmul.mubr.bf16.gmra.mrb[96].mxu0 %v22682_v36 }
 0x708   : > { %6397 = vmatprep.mubr.bf16.mxu0 %v22682_v36 }
 0x709   : > { %9343 = vmatpush1.bf16.msra.mxu1 %v18572_v51  ;;  %v18644_v51 = vld [vmem:[#allocation15 + $0x600] ss:$16 sps:$4 sm:$0xff]  }
 0x70a   : > { %9344 = vmatprep.subr.bf16.mxu1 %v18577_v16  ;;  %v18652_v16 = vld [vmem:[#allocation15 + $0x644] ss:$16 sps:$4 sm:$0xff]  }
 0x70c   : > { %8916 = vmatmul.mubr.bf16.gmra.mrb[184].mxu1 %v22682_v36 }
 0x70d   : > { %9345 = vmatpush1.bf16.msra.mxu1 %v18575_v49  ;;  %8925 = vmatprep.mubr.bf16.mxu1 %v22682_v36  ;;  %v18650_v49 = vld [vmem:[#allocation15 + $0x640] ss:$16 sps:$4 sm:$0xff]  }
 0x70e   : > { %9346 = vmatprep.subr.bf16.mxu1 %v18583_v39  ;;  %v18655_v39 = vld [vmem:[#allocation15 + $0x664] ss:$16 sps:$4 sm:$0xff]  }
 0x70f   : > { %6398 = vmatmul.mubr.bf16.gmra.mrb[100].mxu0 %v22682_v36 }
 0x710   : > { %6407 = vmatprep.mubr.bf16.mxu0 %v22682_v36 }
 0x711   : > { %9347 = vmatpush1.bf16.msra.mxu1 %v18581_v35  ;;  %v18653_v35 = vld [vmem:[#allocation15 + $0x660] ss:$16 sps:$4 sm:$0xff]  }
 0x712   : > { %9348 = vmatprep.subr.bf16.mxu1 %v18586_v2  ;;  %v18656_v2 = vld [vmem:[#allocation15 + $0x680] ss:$16 sps:$4 sm:$0xff]  }
 0x714   : > { %8926 = vmatmul.mubr.bf16.gmra.mrb[188].mxu1 %v22682_v36 }
 0x715   : > { %9349 = vmatpush1.bf16.msra.mxu1 %v18584_v6  ;;  %9352 = vmatprep.mubr.bf16.mxu1 %v22682_v36  ;;  %v18659_v6 = vld [vmem:[#allocation15 + $0x6a0] ss:$16 sps:$4 sm:$0xff]  }
 0x716   : > { %9350 = vmatprep.subr.bf16.mxu1 %v18589_v57  ;;  %v18662_v57 = vld [vmem:[#allocation15 + $0x6c0] ss:$16 sps:$4 sm:$0xff]  }
 0x717   : > { %6408 = vmatmul.mubr.bf16.gmra.mrb[104].mxu0 %v22682_v36 }
 0x718   : > { %6417 = vmatprep.mubr.bf16.mxu0 %v22682_v36 }
 0x719   : > { %9351 = vmatpush1.bf16.msra.mxu1 %v18587_v22  ;;  %v18661_v22 = vld [vmem:[#allocation15 + $0x6a4] ss:$16 sps:$4 sm:$0xff]  }
 0x71a   : > { %9433 = vmatprep.subr.bf16.mxu1 %v18592_v33  ;;  %v18665_v33 = vld [vmem:[#allocation15 + $0x6e0] ss:$16 sps:$4 sm:$0xff]  }
 0x71c   : > { %9353 = vmatmul.mubr.bf16.vlgmr.msra.gmra.mrb[128].mxu1 %v22682_v36 }
 0x71d   : > { %9434 = vmatpush1.bf16.msra.mxu1 %v18590_v11  ;;  %9362 = vmatprep.mubr.bf16.mxu1 %v22682_v36  ;;  %v18667_v11 = vld [vmem:[#allocation15 + $0x6e4] ss:$16 sps:$4 sm:$0xff]  }
 0x71e   : > { %9435 = vmatprep.subr.bf16.mxu1 %v18598_v46  ;;  %v18671_v46 = vld [vmem:[#allocation15 + $0x720] ss:$16 sps:$4 sm:$0xff]  }
 0x71f   : > { %6418 = vmatmul.mubr.bf16.gmra.mrb[108].mxu0 %v22682_v36 }
 0x720   : > { %6427 = vmatprep.mubr.bf16.mxu0 %v22682_v36 }
 0x721   : > { %9436 = vmatpush1.bf16.msra.mxu1 %v18596_v3  ;;  %v18668_v3 = vld [vmem:[#allocation15 + $0x700] ss:$16 sps:$4 sm:$0xff]  }
 0x722   : > { %9437 = vmatprep.subr.bf16.mxu1 %v18601_v34  ;;  %v18673_v34 = vld [vmem:[#allocation15 + $0x724] ss:$16 sps:$4 sm:$0xff]  }
 0x724   : > { %9363 = vmatmul.mubr.bf16.gmra.mrb[132].mxu1 %v22682_v36 }
 0x725   : > { %9438 = vmatpush1.bf16.msra.mxu1 %v18599_v10  ;;  %9372 = vmatprep.mubr.bf16.mxu1 %v22682_v36  ;;  %v18674_v10 = vld [vmem:[#allocation15 + $0x740] ss:$16 sps:$4 sm:$0xff]  }
 0x726   : > { %9439 = vmatprep.subr.bf16.mxu1 %v18604_v26  ;;  %v18679_v26 = vld [vmem:[#allocation15 + $0x764] ss:$16 sps:$4 sm:$0xff]  }
 0x727   : > { %6428 = vmatmul.mubr.bf16.gmra.mrb[112].mxu0 %v22682_v36 }
 0x728   : > { %6437 = vmatprep.mubr.bf16.mxu0 %v22682_v36 }
 0x729   : > { %9440 = vmatpush1.bf16.msra.mxu1 %v18602_v53  ;;  %v18677_v53 = vld [vmem:[#allocation15 + $0x760] ss:$16 sps:$4 sm:$0xff]  }
 0x72a   : > { %9441 = vmatprep.subr.bf16.mxu1 %v18607_v60  ;;  %v18682_v60 = vld [vmem:[#allocation15 + $0x784] ss:$16 sps:$4 sm:$0xff]  }
 0x72c   : > { %9373 = vmatmul.mubr.bf16.gmra.mrb[136].mxu1 %v22682_v36 }
 0x72d   : > { %9442 = vmatpush1.bf16.msra.mxu1 %v18605_v59  ;;  %9382 = vmatprep.mubr.bf16.mxu1 %v22682_v36  ;;  %v18680_v59 = vld [vmem:[#allocation15 + $0x780] ss:$16 sps:$4 sm:$0xff]  }
 0x72e   : > { %9443 = vmatprep.subr.bf16.mxu1 %v18613_v56  ;;  %v18685_v56 = vld [vmem:[#allocation15 + $0x7a4] ss:$16 sps:$4 sm:$0xff]  }
 0x72f   : > { %6438 = vmatmul.mubr.bf16.gmra.mrb[116].mxu0 %v22682_v36 }
 0x730   : > { %6447 = vmatprep.mubr.bf16.mxu0 %v22682_v36 }
 0x731   : > { %9444 = vmatpush1.bf16.msra.mxu1 %v18611_v28  ;;  %v18683_v28 = vld [vmem:[#allocation15 + $0x7a0] ss:$16 sps:$4 sm:$0xff]  }
 0x732   : > { %9445 = vmatprep.subr.bf16.mxu1 %v18616_v52  ;;  %v18688_v52 = vld [vmem:[#allocation15 + $0x7c4] ss:$16 sps:$4 sm:$0xff]  }
 0x734   : > { %9383 = vmatmul.mubr.bf16.gmra.mrb[140].mxu1 %v22682_v36 }
 0x735   : > { %9446 = vmatpush1.bf16.msra.mxu1 %v18614_v17  ;;  %9392 = vmatprep.mubr.bf16.mxu1 %v22682_v36  ;;  %v18686_v17 = vld [vmem:[#allocation15 + $0x7c0] ss:$16 sps:$4 sm:$0xff]  }
 0x736   : > { %9447 = vmatprep.subr.bf16.mxu1 %v18619_v32  ;;  %v18691_v32 = vld [vmem:[#allocation15 + $0x7e4] ss:$16 sps:$4 sm:$0xff]  }
 0x737   : > { %6448 = vmatmul.mubr.bf16.gmra.mrb[120].mxu0 %v22682_v36 }
 0x738   : > { %6457 = vmatprep.mubr.bf16.mxu0 %v22682_v36 }
 0x739   : > { %9448 = vmatpush1.bf16.msra.mxu1 %v18617_v37  ;;  %v18689_v37 = vld [vmem:[#allocation15 + $0x7e0] ss:$16 sps:$4 sm:$0xff]  }
 0x73a   : > { %9449 = vmatprep.subr.bf16.mxu1 %v18622_v43  ;;  %v18694_v43 = vld [vmem:[#allocation15 + $0x60c] ss:$16 sps:$4 sm:$0xff]  }
 0x73c   : > { %9393 = vmatmul.mubr.bf16.gmra.mrb[144].mxu1 %v22682_v36 }
 0x73d   : > { %9450 = vmatpush1.bf16.msra.mxu1 %v18620_v23  ;;  %9402 = vmatprep.mubr.bf16.mxu1 %v22682_v36  ;;  %v18692_v23 = vld [vmem:[#allocation15 + $0x608] ss:$16 sps:$4 sm:$0xff]  }
 0x73e   : > { %9451 = vmatprep.subr.bf16.mxu1 %v18625_v50  ;;  %v18698_v50 = vld [vmem:[#allocation15 + $0x648] ss:$16 sps:$4 sm:$0xff]  }
 0x73f   : > { %6458 = vmatmul.mubr.bf16.gmra.mrb[124].mxu0 %v22682_v36 }
 0x740   : > { %6660 = vmatprep.mubr.bf16.mxu0 %v22682_v36 }
 0x741   : > { %9452 = vmatpush1.bf16.msra.mxu1 %v18623_v4  ;;  %v18700_v4 = vld [vmem:[#allocation15 + $0x64c] ss:$16 sps:$4 sm:$0xff]  }
 0x742   : > { %9453 = vmatprep.subr.bf16.mxu1 %v18628_v24  ;;  %v18703_v24 = vld [vmem:[#allocation15 + $0x66c] ss:$16 sps:$4 sm:$0xff]  }
 0x744   : > { %9403 = vmatmul.mubr.bf16.gmra.mrb[148].mxu1 %v22682_v36 }
 0x745   : > { %9454 = vmatpush1.bf16.msra.mxu1 %v18626_v12  ;;  %9412 = vmatprep.mubr.bf16.mxu1 %v22682_v36  ;;  %v18704_v12 = vld [vmem:[#allocation15 + $0x688] ss:$16 sps:$4 sm:$0xff]  }
 0x746   : > { %9455 = vmatprep.subr.bf16.mxu1 %v18631_v9  ;;  %v18710_v9 = vld [vmem:[#allocation15 + $0x6c8] ss:$16 sps:$4 sm:$0xff]  }
 0x747   : > { %6661 = vmatmul.mubr.bf16.vlgmr.msra.gmra.mrb[64].mxu0 %v21243_v58  ;;  %v18629_v58 = vld [vmem:[#allocation15 + $0x568] ss:$16 sps:$4 sm:$0xff]  }
 0x748   : > { %6982 = vmatpush1.bf16.msra.mxu0 %v18503_v5  ;;  %6670 = vmatprep.mubr.bf16.mxu0 %v22682_v36  ;;  %v18695_v5 = vld [vmem:[#allocation15 + $0x628] ss:$16 sps:$4 sm:$0xff]  }
 0x749   : > { %6983 = vmatprep.subr.bf16.mxu0 %v18520_v54  ;;  %9456 = vmatpush1.bf16.msra.mxu1 %v18629_v58  ;;  %v18697_v54 = vld [vmem:[#allocation15 + $0x62c] ss:$16 sps:$4 sm:$0xff]  }
 0x74a   : > { %9457 = vmatprep.subr.bf16.mxu1 %v18634_v18  ;;  %v18712_v58 = vld [vmem:[#allocation15 + $0x6cc] ss:$16 sps:$4 sm:$0xff]  }
 0x74b   : > { %v18715_v18 = vld [vmem:[#allocation15 + $0x6ec] ss:$16 sps:$4 sm:$0xff]  }
 0x74c   : > { %6984 = vmatpush1.bf16.msra.mxu0 %v18518_v30  ;;  %9413 = vmatmul.mubr.bf16.gmra.mrb[152].mxu1 %v22682_v36  ;;  %v18701_v30 = vld [vmem:[#allocation15 + $0x668] ss:$16 sps:$4 sm:$0xff]  }
 0x74d   : > { %6985 = vmatprep.subr.bf16.mxu0 %v18535_v15  ;;  %9458 = vmatpush1.bf16.msra.mxu1 %v18632_v38  ;;  %v18706_v15 = vld [vmem:[#allocation15 + $0x68c] ss:$16 sps:$4 sm:$0xff]   ;;  %v18716_v38 = vld [vmem:[#allocation15 + $0x708] ss:$16 sps:$4 sm:$0xff]  }
 0x74e   : > { %9422 = vmatprep.mubr.bf16.mxu1 %v22682_v36  ;;  %9459 = vmatprep.subr.bf16.mxu1 %v18637_v0  ;;  %v18722_v0 = vld [vmem:[#allocation15 + $0x748] ss:$16 sps:$4 sm:$0xff]  }
 0x74f   : > { %6671 = vmatmul.mubr.bf16.gmra.mrb[68].mxu0 %v21253_v21  ;;  %v18635_v21 = vld [vmem:[#allocation15 + $0x5a8] ss:$16 sps:$4 sm:$0xff]  }
 0x750   : > { %6680 = vmatprep.mubr.bf16.mxu0 %v22682_v36  ;;  %6986 = vmatpush1.bf16.msra.mxu0 %v18533_v31  ;;  %v18707_v31 = vld [vmem:[#allocation15 + $0x6a8] ss:$16 sps:$4 sm:$0xff]  }
 0x751   : > { %6987 = vmatprep.subr.bf16.mxu0 %v18550_v14  ;;  %9460 = vmatpush1.bf16.msra.mxu1 %v18635_v21  ;;  %v18709_v14 = vld [vmem:[#allocation15 + $0x6ac] ss:$16 sps:$4 sm:$0xff]  }
 0x752   : > { %9461 = vmatprep.subr.bf16.mxu1 %v18640_v7  ;;  %v18724_v21 = vld [vmem:[#allocation15 + $0x74c] ss:$16 sps:$4 sm:$0xff]   ;;  %v18725_v7 = vld [vmem:[#allocation15 + $0x768] ss:$16 sps:$4 sm:$0xff]  }
 0x754   : > { %6988 = vmatpush1.bf16.msra.mxu0 %v18548_v27  ;;  %9423 = vmatmul.mubr.bf16.gmra.mrb[156].mxu1 %v22682_v36  ;;  %v18713_v27 = vld [vmem:[#allocation15 + $0x6e8] ss:$16 sps:$4 sm:$0xff]  }
 0x755   : > { %6989 = vmatprep.subr.bf16.mxu0 %v18565_v63  ;;  %9462 = vmatpush1.bf16.msra.mxu1 %v18638_v20  ;;  %v18718_v63 = vld [vmem:[#allocation15 + $0x70c] ss:$16 sps:$4 sm:$0xff]   ;;  %v18728_v20 = vld [vmem:[#allocation15 + $0x788] ss:$16 sps:$4 sm:$0xff]  }
 0x756   : > { %9465 = vmatprep.mubr.bf16.mxu1 %v22682_v36  ;;  %9463 = vmatprep.subr.bf16.mxu1 %v18643_v47  ;;  %v18734_v47 = vld [vmem:[#allocation15 + $0x7c8] ss:$16 sps:$4 sm:$0xff]  }
 0x757   : > { %6681 = vmatmul.mubr.bf16.gmra.mrb[72].mxu0 %v21263_v48  ;;  %v18641_v48 = vld [vmem:[#allocation15 + $0x5e8] ss:$16 sps:$4 sm:$0xff]  }
 0x758   : > { %6690 = vmatprep.mubr.bf16.mxu0 %v22682_v36  ;;  %6990 = vmatpush1.bf16.msra.mxu0 %v18563_v62  ;;  %v18721_v62 = vld [vmem:[#allocation15 + $0x72c] ss:$16 sps:$4 sm:$0xff]  }
 0x759   : > { %6991 = vmatprep.subr.bf16.mxu0 %v18580_v41  ;;  %9464 = vmatpush1.bf16.msra.mxu1 %v18641_v48  ;;  %v18719_v41 = vld [vmem:[#allocation15 + $0x728] ss:$16 sps:$4 sm:$0xff]   ;;  %v18736_v48 = vld [vmem:[#allocation15 + $0x7cc] ss:$16 sps:$4 sm:$0xff]  }
 0x75a   : > { %9994 = vmatprep.subr.bf16.mxu1 %v18646_v42  ;;  %v18737_v42 = vld [vmem:[#allocation15 + $0x7e8] ss:$16 sps:$4 sm:$0xff]  }
 0x75c   : > { %6992 = vmatpush1.bf16.msra.mxu0 %v18578_v13  ;;  %9466 = vmatmul.mubr.bf16.vlgmr.msra.gmra.mrb[160].mxu1 %v22682_v36  ;;  %v18727_v13 = vld [vmem:[#allocation15 + $0x76c] ss:$16 sps:$4 sm:$0xff]  }
 0x75d   : > { %6993 = vmatprep.subr.bf16.mxu0 %v18595_v25  ;;  %9995 = vmatpush1.bf16.msra.mxu1 %v18644_v51  ;;  %v18730_v25 = vld [vmem:[#allocation15 + $0x78c] ss:$16 sps:$4 sm:$0xff]   ;;  %v18742_v51 = vld [vmem:[#allocation15 + $0x804] ss:$16 sps:$4 sm:$0xff]  }
 0x75e   : > { %9475 = vmatprep.mubr.bf16.mxu1 %v22682_v36  ;;  %9996 = vmatprep.subr.bf16.mxu1 %v18649_v61  ;;  %v18745_v61 = vld [vmem:[#allocation15 + $0x824] ss:$16 sps:$4 sm:$0xff]  }
 0x75f   : > { %6691 = vmatmul.mubr.bf16.gmra.mrb[76].mxu0 %v21275_v1  ;;  %v18647_v1 = vld [vmem:[#allocation15 + $0x620] ss:$16 sps:$4 sm:$0xff]  }
 0x760   : > { %6700 = vmatprep.mubr.bf16.mxu0 %v22682_v36  ;;  %6994 = vmatpush1.bf16.msra.mxu0 %v18593_v55  ;;  %v18733_v55 = vld [vmem:[#allocation15 + $0x7ac] ss:$16 sps:$4 sm:$0xff]  }
 0x761   : > { %6995 = vmatprep.subr.bf16.mxu0 %v18610_v8  ;;  %9997 = vmatpush1.bf16.msra.mxu1 %v18647_v1  ;;  %v18731_v8 = vld [vmem:[#allocation15 + $0x7a8] ss:$16 sps:$4 sm:$0xff]   ;;  %v18740_v1 = vld [vmem:[#allocation15 + $0x800] ss:$16 sps:$4 sm:$0xff]  }
 0x762   : > { %9998 = vmatprep.subr.bf16.mxu1 %v18652_v16  ;;  %v18743_v16 = vld [vmem:[#allocation15 + $0x820] ss:$16 sps:$4 sm:$0xff]  }
 0x764   : > { %6996 = vmatpush1.bf16.msra.mxu0 %v18608_v29  ;;  %9476 = vmatmul.mubr.bf16.gmra.mrb[164].mxu1 %v22682_v36  ;;  %v18739_v29 = vld [vmem:[#allocation15 + $0x7ec] ss:$16 sps:$4 sm:$0xff]  }
 0x765   : > { %9999 = vmatpush1.bf16.msra.mxu1 %v18650_v49  ;;  %9485 = vmatprep.mubr.bf16.mxu1 %v22682_v36  ;;  %v18748_v49 = vld [vmem:[#allocation15 + $0x844] ss:$16 sps:$4 sm:$0xff]  }
 0x766   : > { %10000 = vmatprep.subr.bf16.mxu1 %v18655_v39  ;;  %v18751_v39 = vld [vmem:[#allocation15 + $0x864] ss:$16 sps:$4 sm:$0xff]  }
 0x767   : > { %6701 = vmatmul.mubr.bf16.gmra.mrb[80].mxu0 %v21285_v40  ;;  %v18658_v40 = vld [vmem:[#allocation15 + $0x684] ss:$16 sps:$4 sm:$0xff]  }
 0x768   : > { %6710 = vmatprep.mubr.bf16.mxu0 %v22682_v36 }
 0x769   : > { %10001 = vmatpush1.bf16.msra.mxu1 %v18653_v35  ;;  %v18746_v35 = vld [vmem:[#allocation15 + $0x840] ss:$16 sps:$4 sm:$0xff]  }
 0x76a   : > { %10002 = vmatprep.subr.bf16.mxu1 %v18658_v40  ;;  %v18749_v40 = vld [vmem:[#allocation15 + $0x860] ss:$16 sps:$4 sm:$0xff]  }
 0x76c   : > { %9486 = vmatmul.mubr.bf16.gmra.mrb[168].mxu1 %v22682_v36 }
 0x76d   : > { %10003 = vmatpush1.bf16.msra.mxu1 %v18656_v2  ;;  %9495 = vmatprep.mubr.bf16.mxu1 %v22682_v36  ;;  %v18754_v2 = vld [vmem:[#allocation15 + $0x884] ss:$16 sps:$4 sm:$0xff]  }
 0x76e   : > { %10004 = vmatprep.subr.bf16.mxu1 %v18661_v22  ;;  %v18757_v22 = vld [vmem:[#allocation15 + $0x8a4] ss:$16 sps:$4 sm:$0xff]  }
 0x76f   : > { %6711 = vmatmul.mubr.bf16.gmra.mrb[84].mxu0 %v21295_v19  ;;  %v18664_v19 = vld [vmem:[#allocation15 + $0x6c4] ss:$16 sps:$4 sm:$0xff]  }
 0x770   : > { %6720 = vmatprep.mubr.bf16.mxu0 %v22682_v36 }
 0x771   : > { %10005 = vmatpush1.bf16.msra.mxu1 %v18659_v6  ;;  %v18752_v6 = vld [vmem:[#allocation15 + $0x880] ss:$16 sps:$4 sm:$0xff]  }
 0x772   : > { %10006 = vmatprep.subr.bf16.mxu1 %v18664_v19  ;;  %v18755_v19 = vld [vmem:[#allocation15 + $0x8a0] ss:$16 sps:$4 sm:$0xff]  }
 0x774   : > { %9496 = vmatmul.mubr.bf16.gmra.mrb[172].mxu1 %v22682_v36 }
 0x775   : > { %10007 = vmatpush1.bf16.msra.mxu1 %v18662_v57  ;;  %9505 = vmatprep.mubr.bf16.mxu1 %v22682_v36  ;;  %v18760_v57 = vld [vmem:[#allocation15 + $0x8c4] ss:$16 sps:$4 sm:$0xff]  }
 0x776   : > { %10008 = vmatprep.subr.bf16.mxu1 %v18667_v11  ;;  %v18763_v11 = vld [vmem:[#allocation15 + $0x8e4] ss:$16 sps:$4 sm:$0xff]  }
 0x777   : > { %6721 = vmatmul.mubr.bf16.gmra.mrb[88].mxu0 %v21305_v44  ;;  %v18670_v44 = vld [vmem:[#allocation15 + $0x704] ss:$16 sps:$4 sm:$0xff]  }
 0x778   : > { %6730 = vmatprep.mubr.bf16.mxu0 %v22682_v36 }
 0x779   : > { %10009 = vmatpush1.bf16.msra.mxu1 %v18665_v33  ;;  %v18758_v33 = vld [vmem:[#allocation15 + $0x8c0] ss:$16 sps:$4 sm:$0xff]  }
 0x77a   : > { %10010 = vmatprep.subr.bf16.mxu1 %v18670_v44  ;;  %v18761_v44 = vld [vmem:[#allocation15 + $0x8e0] ss:$16 sps:$4 sm:$0xff]  }
 0x77c   : > { %9506 = vmatmul.mubr.bf16.gmra.mrb[176].mxu1 %v22682_v36 }
 0x77d   : > { %10011 = vmatpush1.bf16.msra.mxu1 %v18668_v3  ;;  %9515 = vmatprep.mubr.bf16.mxu1 %v22682_v36  ;;  %v18766_v3 = vld [vmem:[#allocation15 + $0x904] ss:$16 sps:$4 sm:$0xff]  }
 0x77e   : > { %10012 = vmatprep.subr.bf16.mxu1 %v18673_v34  ;;  %v18769_v34 = vld [vmem:[#allocation15 + $0x924] ss:$16 sps:$4 sm:$0xff]  }
 0x77f   : > { %6731 = vmatmul.mubr.bf16.gmra.mrb[92].mxu0 %v21311_v45  ;;  %v18676_v45 = vld [vmem:[#allocation15 + $0x744] ss:$16 sps:$4 sm:$0xff]  }
 0x780   : > { %6740 = vmatprep.mubr.bf16.mxu0 %v22682_v36 }
 0x781   : > { %10013 = vmatpush1.bf16.msra.mxu1 %v18671_v46  ;;  %v18764_v46 = vld [vmem:[#allocation15 + $0x900] ss:$16 sps:$4 sm:$0xff]  }
 0x782   : > { %10014 = vmatprep.subr.bf16.mxu1 %v18676_v45  ;;  %v18767_v45 = vld [vmem:[#allocation15 + $0x920] ss:$16 sps:$4 sm:$0xff]  }
 0x784   : > { %9516 = vmatmul.mubr.bf16.gmra.mrb[180].mxu1 %v22682_v36 }
 0x785   : > { %10015 = vmatpush1.bf16.msra.mxu1 %v18674_v10  ;;  %9525 = vmatprep.mubr.bf16.mxu1 %v22682_v36  ;;  %v18772_v10 = vld [vmem:[#allocation15 + $0x944] ss:$16 sps:$4 sm:$0xff]  }
 0x786   : > { %10016 = vmatprep.subr.bf16.mxu1 %v18679_v26  ;;  %v18775_v26 = vld [vmem:[#allocation15 + $0x964] ss:$16 sps:$4 sm:$0xff]  }
 0x787   : > { %6741 = vmatmul.mubr.bf16.gmra.mrb[96].mxu0 %v22682_v36 }
 0x788   : > { %6750 = vmatprep.mubr.bf16.mxu0 %v22682_v36 }
 0x789   : > { %10017 = vmatpush1.bf16.msra.mxu1 %v18677_v53  ;;  %v18770_v53 = vld [vmem:[#allocation15 + $0x940] ss:$16 sps:$4 sm:$0xff]  }
 0x78a   : > { %10018 = vmatprep.subr.bf16.mxu1 %v18682_v60  ;;  %v18773_v60 = vld [vmem:[#allocation15 + $0x960] ss:$16 sps:$4 sm:$0xff]  }
 0x78c   : > { %9526 = vmatmul.mubr.bf16.gmra.mrb[184].mxu1 %v22682_v36 }
 0x78d   : > { %10019 = vmatpush1.bf16.msra.mxu1 %v18680_v59  ;;  %9535 = vmatprep.mubr.bf16.mxu1 %v22682_v36  ;;  %v18778_v59 = vld [vmem:[#allocation15 + $0x984] ss:$16 sps:$4 sm:$0xff]  }
 0x78e   : > { %10020 = vmatprep.subr.bf16.mxu1 %v18685_v56  ;;  %v18781_v56 = vld [vmem:[#allocation15 + $0x9a4] ss:$16 sps:$4 sm:$0xff]  }
 0x78f   : > { %6751 = vmatmul.mubr.bf16.gmra.mrb[100].mxu0 %v22682_v36 }
 0x790   : > { %6760 = vmatprep.mubr.bf16.mxu0 %v22682_v36 }
 0x791   : > { %10021 = vmatpush1.bf16.msra.mxu1 %v18683_v28  ;;  %v18776_v28 = vld [vmem:[#allocation15 + $0x980] ss:$16 sps:$4 sm:$0xff]  }
 0x792   : > { %10022 = vmatprep.subr.bf16.mxu1 %v18688_v52  ;;  %v18779_v52 = vld [vmem:[#allocation15 + $0x9a0] ss:$16 sps:$4 sm:$0xff]  }
 0x794   : > { %9536 = vmatmul.mubr.bf16.gmra.mrb[188].mxu1 %v22682_v36 }
 0x795   : > { %10023 = vmatpush1.bf16.msra.mxu1 %v18686_v17  ;;  %10026 = vmatprep.mubr.bf16.mxu1 %v22682_v36  ;;  %v18784_v17 = vld [vmem:[#allocation15 + $0x9c4] ss:$16 sps:$4 sm:$0xff]  }
 0x796   : > { %10024 = vmatprep.subr.bf16.mxu1 %v18691_v32  ;;  %v18787_v32 = vld [vmem:[#allocation15 + $0x9e4] ss:$16 sps:$4 sm:$0xff]  }
 0x797   : > { %6761 = vmatmul.mubr.bf16.gmra.mrb[104].mxu0 %v22682_v36 }
 0x798   : > { %6770 = vmatprep.mubr.bf16.mxu0 %v22682_v36 }
 0x799   : > { %10025 = vmatpush1.bf16.msra.mxu1 %v18689_v37  ;;  %v18782_v37 = vld [vmem:[#allocation15 + $0x9c0] ss:$16 sps:$4 sm:$0xff]  }
 0x79a   : > { %10107 = vmatprep.subr.bf16.mxu1 %v18694_v43  ;;  %v18785_v43 = vld [vmem:[#allocation15 + $0x9e0] ss:$16 sps:$4 sm:$0xff]  }
 0x79c   : > { %10027 = vmatmul.mubr.bf16.vlgmr.msra.gmra.mrb[128].mxu1 %v22682_v36 }
 0x79d   : > { %10108 = vmatpush1.bf16.msra.mxu1 %v18692_v23  ;;  %10036 = vmatprep.mubr.bf16.mxu1 %v22682_v36  ;;  %v18790_v23 = vld [vmem:[#allocation15 + $0x80c] ss:$16 sps:$4 sm:$0xff]  }
 0x79e   : > { %10109 = vmatprep.subr.bf16.mxu1 %v18697_v54 }
 0x79f   : > { %6771 = vmatmul.mubr.bf16.gmra.mrb[108].mxu0 %v22682_v36 }
 0x7a0   : > { %6780 = vmatprep.mubr.bf16.mxu0 %v22682_v36 }
 0x7a1   : > { %10110 = vmatpush1.bf16.msra.mxu1 %v18695_v5  ;;  %v7240_v5 = vlaneseq }
 0x7a2   : > { %10111 = vmatprep.subr.bf16.mxu1 %v18700_v4 }
 0x7a3   : > { %v21594_v54 = vshrl.u32 %v7240_v5, 7 }
 0x7a4   : > { %10037 = vmatmul.mubr.bf16.gmra.mrb[132].mxu1 %v22682_v36 }
 0x7a5   : > { %10112 = vmatpush1.bf16.msra.mxu1 %v18698_v50  ;;  %10046 = vmatprep.mubr.bf16.mxu1 %v22682_v36  ;;  %v7242_v4 = vsub.s32 0, %v21594_v54  ;;  %v7238_v50 = vld [vmem:[#allocation13] sm:$0x3] }
 0x7a6   : > { %10113 = vmatprep.subr.bf16.mxu1 %v18703_v24 }
 0x7a7   : > { %6781 = vmatmul.mubr.bf16.gmra.mrb[112].mxu0 %v22682_v36  ;;  %v21600_v24 = vrot.slane %v7238_v50, %v7242_v4 }
 0x7a8   : > { %6790 = vmatprep.mubr.bf16.mxu0 %v22682_v36 }
 0x7a9   : > { %10114 = vmatpush1.bf16.msra.mxu1 %v18701_v30  ;;  %v7246_v30 = vsub.s32 1, %v21594_v54 }
 0x7aa   : > { %10115 = vmatprep.subr.bf16.mxu1 %v18706_v15 }
 0x7ab   : > { %v21604_v15 = vrot.slane %v7238_v50, %v7246_v30 }
 0x7ac   : > { %10047 = vmatmul.mubr.bf16.gmra.mrb[136].mxu1 %v22682_v36 }
 0x7ad   : > { %10116 = vmatpush1.bf16.msra.mxu1 %v18704_v12  ;;  %10056 = vmatprep.mubr.bf16.mxu1 %v22682_v36 }
 0x7ae   : > { %10117 = vmatprep.subr.bf16.mxu1 %v18709_v14 }
 0x7af   : > { %6791 = vmatmul.mubr.bf16.gmra.mrb[116].mxu0 %v22682_v36 }
 0x7b0   : > { %6800 = vmatprep.mubr.bf16.mxu0 %v22682_v36 }
 0x7b1   : > { %10118 = vmatpush1.bf16.msra.mxu1 %v18707_v31 }
 0x7b2   : > { %10119 = vmatprep.subr.bf16.mxu1 %v18712_v58 }
 0x7b4   : > { %10057 = vmatmul.mubr.bf16.gmra.mrb[140].mxu1 %v22682_v36 }
 0x7b5   : > { %10120 = vmatpush1.bf16.msra.mxu1 %v18710_v9  ;;  %10066 = vmatprep.mubr.bf16.mxu1 %v22682_v36 }
 0x7b6   : > { %10121 = vmatprep.subr.bf16.mxu1 %v18715_v18 }
 0x7b7   : > { %6801 = vmatmul.mubr.bf16.gmra.mrb[120].mxu0 %v22682_v36 }
 0x7b8   : > { %6810 = vmatprep.mubr.bf16.mxu0 %v22682_v36 }
 0x7b9   : > { %10122 = vmatpush1.bf16.msra.mxu1 %v18713_v27 }
 0x7ba   : > { %10123 = vmatprep.subr.bf16.mxu1 %v18718_v63 }
 0x7bc   : > { %10067 = vmatmul.mubr.bf16.gmra.mrb[144].mxu1 %v22682_v36 }
 0x7bd   : > { %10124 = vmatpush1.bf16.msra.mxu1 %v18716_v38  ;;  %10076 = vmatprep.mubr.bf16.mxu1 %v22682_v36 }
 0x7be   : > { %10125 = vmatprep.subr.bf16.mxu1 %v18721_v62 }
 0x7bf   : > { %6811 = vmatmul.mubr.bf16.gmra.mrb[124].mxu0 %v22682_v36 }
 0x7c0   : > { %7013 = vmatprep.mubr.bf16.mxu0 %v22682_v36 }
 0x7c1   : > { %10126 = vmatpush1.bf16.msra.mxu1 %v18719_v41 }
 0x7c2   : > { %10127 = vmatprep.subr.bf16.mxu1 %v18724_v21 }
 0x7c4   : > { %10077 = vmatmul.mubr.bf16.gmra.mrb[148].mxu1 %v22682_v36 }
 0x7c5   : > { %10128 = vmatpush1.bf16.msra.mxu1 %v18722_v0  ;;  %10086 = vmatprep.mubr.bf16.mxu1 %v22682_v36 }
 0x7c6   : > { %10129 = vmatprep.subr.bf16.mxu1 %v18727_v13 }
 0x7c7   : > { %7014 = vmatmul.mubr.bf16.vlgmr.msra.gmra.mrb[64].mxu0 %v22682_v36 }
 0x7c8   : > { %7023 = vmatprep.mubr.bf16.mxu0 %v22682_v36 }
 0x7c9   : > { %10130 = vmatpush1.bf16.msra.mxu1 %v18725_v7 }
 0x7ca   : > { %10131 = vmatprep.subr.bf16.mxu1 %v18730_v25  ;;  %v18788_v25 = vld [vmem:[#allocation15 + $0x808] ss:$16 sps:$4 sm:$0xff]  }
 0x7cc   : > { %10087 = vmatmul.mubr.bf16.gmra.mrb[152].mxu1 %v22682_v36 }
 0x7cd   : > { %10132 = vmatpush1.bf16.msra.mxu1 %v18728_v20  ;;  %10096 = vmatprep.mubr.bf16.mxu1 %v22682_v36 }
 0x7ce   : > { %10133 = vmatprep.subr.bf16.mxu1 %v18733_v55 }
 0x7cf   : > { %7024 = vmatmul.mubr.bf16.gmra.mrb[68].mxu0 %v22682_v36 }
 0x7d0   : > { %7033 = vmatprep.mubr.bf16.mxu0 %v22682_v36 }
 0x7d1   : > { %10134 = vmatpush1.bf16.msra.mxu1 %v18731_v8  ;;  %v18793_v8 = vld [vmem:[#allocation15 + $0x82c] ss:$16 sps:$4 sm:$0xff]  }
 0x7d2   : > { %10135 = vmatprep.subr.bf16.mxu1 %v18736_v48 }
 0x7d4   : > { %10097 = vmatmul.mubr.bf16.gmra.mrb[156].mxu1 %v22682_v36 }
 0x7d5   : > { %10136 = vmatpush1.bf16.msra.mxu1 %v18734_v47  ;;  %10139 = vmatprep.mubr.bf16.mxu1 %v22682_v36 }
 0x7d6   : > { %10137 = vmatprep.subr.bf16.mxu1 %v18739_v29 }
 0x7d7   : > { %7034 = vmatmul.mubr.bf16.gmra.mrb[72].mxu0 %v22682_v36 }
 0x7d8   : > { %7043 = vmatprep.mubr.bf16.mxu0 %v22682_v36 }
 0x7d9   : > { %10138 = vmatpush1.bf16.msra.mxu1 %v18737_v42 }
 0x7da   : > { %10668 = vmatprep.subr.bf16.mxu1 %v18742_v51 }
 0x7dc   : > { %10140 = vmatmul.mubr.bf16.vlgmr.msra.gmra.mrb[160].mxu1 %v22682_v36 }
 0x7dd   : > { %10669 = vmatpush1.bf16.msra.mxu1 %v18740_v1  ;;  %10149 = vmatprep.mubr.bf16.mxu1 %v22682_v36  ;;  %v18791_v1 = vld [vmem:[#allocation15 + $0x828] ss:$16 sps:$4 sm:$0xff]  }
 0x7de   : > { %10670 = vmatprep.subr.bf16.mxu1 %v18745_v61 }
 0x7df   : > { %7044 = vmatmul.mubr.bf16.gmra.mrb[76].mxu0 %v22682_v36 }
 0x7e0   : > { %7053 = vmatprep.mubr.bf16.mxu0 %v22682_v36 }
 0x7e1   : > { %10671 = vmatpush1.bf16.msra.mxu1 %v18743_v16 }
 0x7e2   : > { %10672 = vmatprep.subr.bf16.mxu1 %v18748_v49  ;;  %v18796_v49 = vld [vmem:[#allocation15 + $0x84c] ss:$16 sps:$4 sm:$0xff]  }
 0x7e4   : > { %10150 = vmatmul.mubr.bf16.gmra.mrb[164].mxu1 %v22682_v36 }
 0x7e5   : > { %10673 = vmatpush1.bf16.msra.mxu1 %v18746_v35  ;;  %10159 = vmatprep.mubr.bf16.mxu1 %v22682_v36 }
 0x7e6   : > { %10674 = vmatprep.subr.bf16.mxu1 %v18751_v39 }
 0x7e7   : > { %7054 = vmatmul.mubr.bf16.gmra.mrb[80].mxu0 %v22682_v36 }
 0x7e8   : > { %7063 = vmatprep.mubr.bf16.mxu0 %v22682_v36 }
 0x7e9   : > { %10675 = vmatpush1.bf16.msra.mxu1 %v18749_v40 }
 0x7ea   : > { %10676 = vmatprep.subr.bf16.mxu1 %v18754_v2 }
 0x7ec   : > { %10160 = vmatmul.mubr.bf16.gmra.mrb[168].mxu1 %v22682_v36 }
 0x7ed   : > { %10677 = vmatpush1.bf16.msra.mxu1 %v18752_v6  ;;  %10169 = vmatprep.mubr.bf16.mxu1 %v22682_v36 }
 0x7ee   : > { %10678 = vmatprep.subr.bf16.mxu1 %v18757_v22  ;;  %v18794_v22 = vld [vmem:[#allocation15 + $0x848] ss:$16 sps:$4 sm:$0xff]  }
 0x7ef   : > { %7064 = vmatmul.mubr.bf16.gmra.mrb[84].mxu0 %v22682_v36 }
 0x7f0   : > { %7073 = vmatprep.mubr.bf16.mxu0 %v22682_v36 }
 0x7f1   : > { %10679 = vmatpush1.bf16.msra.mxu1 %v18755_v19 }
 0x7f2   : > { %10680 = vmatprep.subr.bf16.mxu1 %v18760_v57 }
 0x7f4   : > { %10170 = vmatmul.mubr.bf16.gmra.mrb[172].mxu1 %v22682_v36 }
 0x7f5   : > { %10681 = vmatpush1.bf16.msra.mxu1 %v18758_v33  ;;  %10179 = vmatprep.mubr.bf16.mxu1 %v22682_v36  ;;  %v18799_v33 = vld [vmem:[#allocation15 + $0x86c] ss:$16 sps:$4 sm:$0xff]  }
 0x7f6   : > { %10682 = vmatprep.subr.bf16.mxu1 %v18763_v11 }
 0x7f7   : > { %7074 = vmatmul.mubr.bf16.gmra.mrb[88].mxu0 %v22682_v36 }
 0x7f8   : > { %7083 = vmatprep.mubr.bf16.mxu0 %v22682_v36 }
 0x7f9   : > { %10683 = vmatpush1.bf16.msra.mxu1 %v18761_v44 }
 0x7fa   : > { %10684 = vmatprep.subr.bf16.mxu1 %v18766_v3 }
 0x7fc   : > { %10180 = vmatmul.mubr.bf16.gmra.mrb[176].mxu1 %v22682_v36 }
 0x7fd   : > { %10685 = vmatpush1.bf16.msra.mxu1 %v18764_v46  ;;  %10189 = vmatprep.mubr.bf16.mxu1 %v22682_v36 }
 0x7fe   : > { %10686 = vmatprep.subr.bf16.mxu1 %v18769_v34 }
 0x7ff   : > { %7084 = vmatmul.mubr.bf16.gmra.mrb[92].mxu0 %v22682_v36 }
 0x800   : > { %7093 = vmatprep.mubr.bf16.mxu0 %v22682_v36 }
 0x801   : > { %10687 = vmatpush1.bf16.msra.mxu1 %v18767_v45  ;;  %v18797_v45 = vld [vmem:[#allocation15 + $0x868] ss:$16 sps:$4 sm:$0xff]  }
 0x802   : > { %10688 = vmatprep.subr.bf16.mxu1 %v18772_v10 }
 0x804   : > { %10190 = vmatmul.mubr.bf16.gmra.mrb[180].mxu1 %v22682_v36 }
 0x805   : > { %10689 = vmatpush1.bf16.msra.mxu1 %v18770_v53  ;;  %10199 = vmatprep.mubr.bf16.mxu1 %v22682_v36 }
 0x806   : > { %10690 = vmatprep.subr.bf16.mxu1 %v18775_v26  ;;  %v18802_v26 = vld [vmem:[#allocation15 + $0x88c] ss:$16 sps:$4 sm:$0xff]  }
 0x807   : > { %7094 = vmatmul.mubr.bf16.gmra.mrb[96].mxu0 %v22682_v36 }
 0x808   : > { %7103 = vmatprep.mubr.bf16.mxu0 %v22682_v36 }
 0x809   : > { %10691 = vmatpush1.bf16.msra.mxu1 %v18773_v60 }
 0x80a   : > { %10692 = vmatprep.subr.bf16.mxu1 %v18778_v59 }
 0x80c   : > { %10200 = vmatmul.mubr.bf16.gmra.mrb[184].mxu1 %v22682_v36 }
 0x80d   : > { %10693 = vmatpush1.bf16.msra.mxu1 %v18776_v28  ;;  %10209 = vmatprep.mubr.bf16.mxu1 %v22682_v36 }
 0x80e   : > { %10694 = vmatprep.subr.bf16.mxu1 %v18781_v56 }
 0x80f   : > { %7104 = vmatmul.mubr.bf16.gmra.mrb[100].mxu0 %v22682_v36 }
 0x810   : > { %7113 = vmatprep.mubr.bf16.mxu0 %v22682_v36 }
 0x811   : > { %10695 = vmatpush1.bf16.msra.mxu1 %v18779_v52 }
 0x812   : > { %10696 = vmatprep.subr.bf16.mxu1 %v18784_v17  ;;  %v18800_v17 = vld [vmem:[#allocation15 + $0x888] ss:$16 sps:$4 sm:$0xff]  }
 0x814   : > { %10210 = vmatmul.mubr.bf16.gmra.mrb[188].mxu1 %v22682_v36 }
 0x815   : > { %10697 = vmatpush1.bf16.msra.mxu1 %v18782_v37 }
 0x816   : > { %10698 = vmatprep.subr.bf16.mxu1 %v18787_v32 }
 0x817   : > { %7114 = vmatmul.mubr.bf16.gmra.mrb[104].mxu0 %v22682_v36 }
 0x818   : > { %7123 = vmatprep.mubr.bf16.mxu0 %v22682_v36 }
 0x819   : > { %10699 = vmatpush1.bf16.msra.mxu1 %v18785_v43  ;;  %v18805_v43 = vld [vmem:[#allocation15 + $0x8ac] ss:$16 sps:$4 sm:$0xff]  }
 0x81a   : > { %10781 = vmatprep.subr.bf16.mxu1 %v18790_v23 }
 0x81f   : > { %7124 = vmatmul.mubr.bf16.gmra.mrb[108].mxu0 %v22682_v36 }
 0x820   : > { %7133 = vmatprep.mubr.bf16.mxu0 %v22682_v36 }
 0x827   : > { %7134 = vmatmul.mubr.bf16.gmra.mrb[112].mxu0 %v22682_v36 }
 0x828   : > { %7143 = vmatprep.mubr.bf16.mxu0 %v22682_v36 }
 0x82f   : > { %7144 = vmatmul.mubr.bf16.gmra.mrb[116].mxu0 %v22682_v36 }
 0x830   : > { %7153 = vmatprep.mubr.bf16.mxu0 %v22682_v36 }
 0x837   : > { %7154 = vmatmul.mubr.bf16.gmra.mrb[120].mxu0 %v22682_v36 }
 0x838   : > { %7163 = vmatprep.mubr.bf16.mxu0 %v22682_v36 }
 0x83f   : > { %7164 = vmatmul.mubr.bf16.gmra.mrb[124].mxu0 %v22682_v36 }
 0x840   : > { %13509 = vmatprep.mubr.bf16.mxu0 %v22682_v36 }
 0x89a   : > { %v7015_v12 = vpop.f32.mrb[64].mxu0 }
 0x89b   : > { %v7250_v31 = vadd.f32 %v21600_v24, %v7015_v12  ;;  %v7017_v14 = vpop.f32.mrb[65].mxu0 }
 0x89c   : > { %v7251_v58 = vadd.f32 %v21604_v15, %v7017_v14  ;;  %v7019_v9 = vpop.f32.mrb[66].mxu0  ;;  %v18803_v14 = vld [vmem:[#allocation15 + $0x8a8] ss:$16 sps:$4 sm:$0xff]  }
 0x89d   : > { %v7252_v27 = vadd.f32 %v21600_v24, %v7019_v9  ;;  %v7021_v18 = vpop.f32.mrb[67].mxu0  ;;  %v7314_v38 = vmax.f32 %v7250_v31, 0.0 }
 0x89e   : > { %v7253_v63 = vadd.f32 %v21604_v15, %v7021_v18  ;;  %v7315_v41 = vmax.f32 %v7251_v58, 0.0 }
 0x89f   : > { %v7316_v62 = vmax.f32 %v7252_v27, 0.0  ;;  %v18808_v27 = vld [vmem:[#allocation15 + $0x8cc] ss:$16 sps:$4 sm:$0xff]  }
 0x8a0   : > { %v7317_v21 = vmax.f32 %v7253_v63, 0.0 }
 0x8a1   : > { %v21610_v0 = vpack.c.bf16 %v7316_v62, %v7314_v38 }
 0x8a2   : > { %v21612_v13 = vpack.c.bf16 %v7317_v21, %v7315_v41  ;;  %v7025_v7 = vpop.f32.mrb[68].mxu0  ;;  %v18806_v21 = vld [vmem:[#allocation15 + $0x8c8] ss:$16 sps:$4 sm:$0xff]  }
 0x8a3   : > { %v7254_v20 = vadd.f32 %v21600_v24, %v7025_v7  ;;  %v7027_v55 = vpop.f32.mrb[69].mxu0 }
 0x8a4   : > { %v7255_v48 = vadd.f32 %v21604_v15, %v7027_v55  ;;  %v7029_v47 = vpop.f32.mrb[70].mxu0  ;;  %10700 = vmatprep.mubr.bf16.mxu1 %v21612_v13 }
 0x8a5   : > { %v7256_v29 = vadd.f32 %v21600_v24, %v7029_v47  ;;  %v7031_v42 = vpop.f32.mrb[71].mxu0  ;;  %10701 = vmatmul.mubr.bf16.vlgmr.msra.gmra.mrb[128].mxu1 %v21610_v0  ;;  %v7318_v61 = vmax.f32 %v7254_v20, 0.0  ;;  %v18811_v20 = vld [vmem:[#allocation15 + $0x8ec] ss:$16 sps:$4 sm:$0xff]  }
 0x8a6   : > { %v7257_v51 = vadd.f32 %v21604_v15, %v7031_v42  ;;  %10782 = vmatpush1.bf16.msra.mxu1 %v18788_v25  ;;  %v7319_v35 = vmax.f32 %v7255_v48, 0.0  ;;  %v18809_v42 = vld [vmem:[#allocation15 + $0x8e8] ss:$16 sps:$4 sm:$0xff]  }
 0x8a7   : > { %v7320_v16 = vmax.f32 %v7256_v29, 0.0  ;;  %10783 = vmatprep.subr.bf16.mxu1 %v18793_v8 }
 0x8a8   : > { %v7321_v39 = vmax.f32 %v7257_v51, 0.0 }
 0x8a9   : > { %v21620_v40 = vpack.c.bf16 %v7320_v16, %v7318_v61  ;;  %v18814_v61 = vld [vmem:[#allocation15 + $0x90c] ss:$16 sps:$4 sm:$0xff]  }
 0x8aa   : > { %v21622_v2 = vpack.c.bf16 %v7321_v39, %v7319_v35  ;;  %10784 = vmatpush1.bf16.msra.mxu1 %v18791_v1  ;;  %v7035_v6 = vpop.f32.mrb[72].mxu0 }
 0x8ab   : > { %v7258_v19 = vadd.f32 %v21600_v24, %v7035_v6  ;;  %v7037_v57 = vpop.f32.mrb[73].mxu0  ;;  %10785 = vmatprep.subr.bf16.mxu1 %v18796_v49 }
 0x8ac   : > { %v7259_v11 = vadd.f32 %v21604_v15, %v7037_v57  ;;  %v7039_v44 = vpop.f32.mrb[74].mxu0  ;;  %10710 = vmatprep.mubr.bf16.mxu1 %v21622_v2 }
 0x8ad   : > { %v7260_v3 = vadd.f32 %v21600_v24, %v7039_v44  ;;  %v7041_v46 = vpop.f32.mrb[75].mxu0  ;;  %10711 = vmatmul.mubr.bf16.gmra.mrb[132].mxu1 %v21620_v40  ;;  %v7322_v10 = vmax.f32 %v7258_v19, 0.0 }
 0x8ae   : > { %v7261_v34 = vadd.f32 %v21604_v15, %v7041_v46  ;;  %10786 = vmatpush1.bf16.msra.mxu1 %v18794_v22  ;;  %v7323_v60 = vmax.f32 %v7259_v11, 0.0  ;;  %v18812_v22 = vld [vmem:[#allocation15 + $0x908] ss:$16 sps:$4 sm:$0xff]  }
 0x8af   : > { %v7324_v53 = vmax.f32 %v7260_v3, 0.0  ;;  %10787 = vmatprep.subr.bf16.mxu1 %v18799_v33  ;;  %v18817_v33 = vld [vmem:[#allocation15 + $0x92c] ss:$16 sps:$4 sm:$0xff]  }
 0x8b0   : > { %v7325_v59 = vmax.f32 %v7261_v34, 0.0 }
 0x8b1   : > { %v21630_v28 = vpack.c.bf16 %v7324_v53, %v7322_v10 }
 0x8b2   : > { %v21632_v56 = vpack.c.bf16 %v7325_v59, %v7323_v60  ;;  %10788 = vmatpush1.bf16.msra.mxu1 %v18797_v45  ;;  %v7045_v52 = vpop.f32.mrb[76].mxu0  ;;  %v18815_v45 = vld [vmem:[#allocation15 + $0x928] ss:$16 sps:$4 sm:$0xff]  }
 0x8b3   : > { %v7262_v37 = vadd.f32 %v21600_v24, %v7045_v52  ;;  %v7047_v32 = vpop.f32.mrb[77].mxu0  ;;  %10789 = vmatprep.subr.bf16.mxu1 %v18802_v26  ;;  %v18820_v26 = vld [vmem:[#allocation15 + $0x94c] ss:$16 sps:$4 sm:$0xff]  }
 0x8b4   : > { %v7263_v23 = vadd.f32 %v21604_v15, %v7047_v32  ;;  %v7049_v5 = vpop.f32.mrb[78].mxu0  ;;  %10720 = vmatprep.mubr.bf16.mxu1 %v21632_v56  ;;  %v18818_v32 = vld [vmem:[#allocation15 + $0x948] ss:$16 sps:$4 sm:$0xff]  }
 0x8b5   : > { %v7264_v50 = vadd.f32 %v21600_v24, %v7049_v5  ;;  %v7051_v12 = vpop.f32.mrb[79].mxu0  ;;  %10721 = vmatmul.mubr.bf16.gmra.mrb[136].mxu1 %v21630_v28  ;;  %v7326_v58 = vmax.f32 %v7262_v37, 0.0  ;;  %v18823_v5 = vld [vmem:[#allocation15 + $0x96c] ss:$16 sps:$4 sm:$0xff]  }
 0x8b6   : > { %v7265_v31 = vadd.f32 %v21604_v15, %v7051_v12  ;;  %10790 = vmatpush1.bf16.msra.mxu1 %v18800_v17  ;;  %v7327_v18 = vmax.f32 %v7263_v23, 0.0 }
 0x8b7   : > { %v7328_v9 = vmax.f32 %v7264_v50, 0.0  ;;  %10791 = vmatprep.subr.bf16.mxu1 %v18805_v43 }
 0x8b8   : > { %v7329_v63 = vmax.f32 %v7265_v31, 0.0 }
 0x8b9   : > { %v21640_v38 = vpack.c.bf16 %v7328_v9, %v7326_v58  ;;  %v18821_v9 = vld [vmem:[#allocation15 + $0x968] ss:$16 sps:$4 sm:$0xff]  }
 0x8ba   : > { %v21642_v62 = vpack.c.bf16 %v7329_v63, %v7327_v18  ;;  %10792 = vmatpush1.bf16.msra.mxu1 %v18803_v14  ;;  %v7055_v41 = vpop.f32.mrb[80].mxu0  ;;  %v18826_v63 = vld [vmem:[#allocation15 + $0x98c] ss:$16 sps:$4 sm:$0xff]  }
 0x8bb   : > { %v7266_v7 = vadd.f32 %v21600_v24, %v7055_v41  ;;  %v7057_v25 = vpop.f32.mrb[81].mxu0  ;;  %10793 = vmatprep.subr.bf16.mxu1 %v18808_v27 }
 0x8bc   : > { %v7267_v55 = vadd.f32 %v21604_v15, %v7057_v25  ;;  %v7059_v8 = vpop.f32.mrb[82].mxu0  ;;  %10730 = vmatprep.mubr.bf16.mxu1 %v21642_v62 }
 0x8bd   : > { %v7268_v48 = vadd.f32 %v21600_v24, %v7059_v8  ;;  %v7061_v47 = vpop.f32.mrb[83].mxu0  ;;  %10731 = vmatmul.mubr.bf16.gmra.mrb[140].mxu1 %v21640_v38  ;;  %v7330_v51 = vmax.f32 %v7266_v7, 0.0 }
 0x8be   : > { %v7269_v29 = vadd.f32 %v21604_v15, %v7061_v47  ;;  %10794 = vmatpush1.bf16.msra.mxu1 %v18806_v21  ;;  %v7331_v16 = vmax.f32 %v7267_v55, 0.0  ;;  %v18824_v55 = vld [vmem:[#allocation15 + $0x988] ss:$16 sps:$4 sm:$0xff]   ;;  %v18829_v47 = vld [vmem:[#allocation15 + $0x9ac] ss:$16 sps:$4 sm:$0xff]  }
 0x8bf   : > { %v7332_v1 = vmax.f32 %v7268_v48, 0.0  ;;  %10795 = vmatprep.subr.bf16.mxu1 %v18811_v20 }
 0x8c0   : > { %v7333_v49 = vmax.f32 %v7269_v29, 0.0 }
 0x8c1   : > { %v21650_v35 = vpack.c.bf16 %v7332_v1, %v7330_v51 }
 0x8c2   : > { %v21652_v39 = vpack.c.bf16 %v7333_v49, %v7331_v16  ;;  %10796 = vmatpush1.bf16.msra.mxu1 %v18809_v42  ;;  %v7065_v6 = vpop.f32.mrb[84].mxu0  ;;  %v18827_v16 = vld [vmem:[#allocation15 + $0x9a8] ss:$16 sps:$4 sm:$0xff]  }
 0x8c3   : > { %v7270_v19 = vadd.f32 %v21600_v24, %v7065_v6  ;;  %v7067_v57 = vpop.f32.mrb[85].mxu0  ;;  %10797 = vmatprep.subr.bf16.mxu1 %v18814_v61 }
 0x8c4   : > { %v7271_v11 = vadd.f32 %v21604_v15, %v7067_v57  ;;  %v7069_v44 = vpop.f32.mrb[86].mxu0  ;;  %10740 = vmatprep.mubr.bf16.mxu1 %v21652_v39 }
 0x8c5   : > { %v7272_v3 = vadd.f32 %v21600_v24, %v7069_v44  ;;  %v7071_v46 = vpop.f32.mrb[87].mxu0  ;;  %10741 = vmatmul.mubr.bf16.gmra.mrb[144].mxu1 %v21650_v35  ;;  %v7334_v10 = vmax.f32 %v7270_v19, 0.0 }
 0x8c6   : > { %v7273_v34 = vadd.f32 %v21604_v15, %v7071_v46  ;;  %10798 = vmatpush1.bf16.msra.mxu1 %v18812_v22  ;;  %v7335_v60 = vmax.f32 %v7271_v11, 0.0  ;;  %v18832_v22 = vld [vmem:[#allocation15 + $0x9cc] ss:$16 sps:$4 sm:$0xff]  }
 0x8c7   : > { %v7336_v53 = vmax.f32 %v7272_v3, 0.0  ;;  %10799 = vmatprep.subr.bf16.mxu1 %v18817_v33  ;;  %v18830_v3 = vld [vmem:[#allocation15 + $0x9c8] ss:$16 sps:$4 sm:$0xff]  }
 0x8c8   : > { %v7337_v59 = vmax.f32 %v7273_v34, 0.0 }
 0x8c9   : > { %v21660_v52 = vpack.c.bf16 %v7336_v53, %v7334_v10 }
 0x8ca   : > { %v21662_v17 = vpack.c.bf16 %v7337_v59, %v7335_v60  ;;  %10800 = vmatpush1.bf16.msra.mxu1 %v18815_v45  ;;  %v7075_v37 = vpop.f32.mrb[88].mxu0  ;;  %v18835_v45 = vld [vmem:[#allocation15 + $0x9ec] ss:$16 sps:$4 sm:$0xff]  }
 0x8cb   : > { %v7274_v43 = vadd.f32 %v21600_v24, %v7075_v37  ;;  %v7077_v23 = vpop.f32.mrb[89].mxu0  ;;  %10801 = vmatprep.subr.bf16.mxu1 %v18820_v26  ;;  %v18833_v37 = vld [vmem:[#allocation15 + $0x9e8] ss:$16 sps:$4 sm:$0xff]  }
 0x8cc   : > { %v7275_v50 = vadd.f32 %v21604_v15, %v7077_v23  ;;  %v7079_v12 = vpop.f32.mrb[90].mxu0  ;;  %10750 = vmatprep.mubr.bf16.mxu1 %v21662_v17  ;;  %v18838_v23 = vld [vmem:[#allocation15 + $0xa04] ss:$16 sps:$4 sm:$0xff]  }
 0x8cd   : > { %v7276_v31 = vadd.f32 %v21600_v24, %v7079_v12  ;;  %v7081_v14 = vpop.f32.mrb[91].mxu0  ;;  %10751 = vmatmul.mubr.bf16.gmra.mrb[148].mxu1 %v21660_v52  ;;  %v7338_v27 = vmax.f32 %v7274_v43, 0.0 }
 0x8ce   : > { %v7277_v58 = vadd.f32 %v21604_v15, %v7081_v14  ;;  %10802 = vmatpush1.bf16.msra.mxu1 %v18818_v32  ;;  %v7339_v41 = vmax.f32 %v7275_v50, 0.0 }
 0x8cf   : > { %v7340_v18 = vmax.f32 %v7276_v31, 0.0  ;;  %10803 = vmatprep.subr.bf16.mxu1 %v18823_v5 }
 0x8d0   : > { %v7341_v21 = vmax.f32 %v7277_v58, 0.0  ;;  %v18836_v58 = vld [vmem:[#allocation15 + $0xa00] ss:$16 sps:$4 sm:$0xff]  }
 0x8d1   : > { %v21670_v7 = vpack.c.bf16 %v7340_v18, %v7338_v27  ;;  %v18841_v18 = vld [vmem:[#allocation15 + $0xa24] ss:$16 sps:$4 sm:$0xff]  }
 0x8d2   : > { %v21672_v25 = vpack.c.bf16 %v7341_v21, %v7339_v41  ;;  %10804 = vmatpush1.bf16.msra.mxu1 %v18821_v9  ;;  %v7085_v20 = vpop.f32.mrb[92].mxu0 }
 0x8d3   : > { %v7278_v8 = vadd.f32 %v21600_v24, %v7085_v20  ;;  %v7087_v48 = vpop.f32.mrb[93].mxu0  ;;  %10805 = vmatprep.subr.bf16.mxu1 %v18826_v63 }
 0x8d4   : > { %v7279_v29 = vadd.f32 %v21604_v15, %v7087_v48  ;;  %v7089_v42 = vpop.f32.mrb[94].mxu0  ;;  %10760 = vmatprep.mubr.bf16.mxu1 %v21672_v25 }
 0x8d5   : > { %v7280_v51 = vadd.f32 %v21600_v24, %v7089_v42  ;;  %v7091_v1 = vpop.f32.mrb[95].mxu0  ;;  %10761 = vmatmul.mubr.bf16.gmra.mrb[152].mxu1 %v21670_v7  ;;  %v7342_v49 = vmax.f32 %v7278_v8, 0.0 }
 0x8d6   : > { %v7281_v61 = vadd.f32 %v21604_v15, %v7091_v1  ;;  %10806 = vmatpush1.bf16.msra.mxu1 %v18824_v55  ;;  %v7343_v19 = vmax.f32 %v7279_v29, 0.0  ;;  %v18839_v55 = vld [vmem:[#allocation15 + $0xa20] ss:$16 sps:$4 sm:$0xff]  }
 0x8d7   : > { %v7344_v6 = vmax.f32 %v7280_v51, 0.0  ;;  %10807 = vmatprep.subr.bf16.mxu1 %v18829_v47  ;;  %v18844_v47 = vld [vmem:[#allocation15 + $0xa44] ss:$16 sps:$4 sm:$0xff]  }
 0x8d8   : > { %v7345_v57 = vmax.f32 %v7281_v61, 0.0 }
 0x8d9   : > { %v21680_v33 = vpack.c.bf16 %v7344_v6, %v7342_v49  ;;  %v18847_v6 = vld [vmem:[#allocation15 + $0xa64] ss:$16 sps:$4 sm:$0xff]  }
 0x8da   : > { %v21682_v11 = vpack.c.bf16 %v7345_v57, %v7343_v19  ;;  %10808 = vmatpush1.bf16.msra.mxu1 %v18827_v16  ;;  %v7095_v44 = vpop.f32.mrb[96].mxu0  ;;  %v18842_v16 = vld [vmem:[#allocation15 + $0xa40] ss:$16 sps:$4 sm:$0xff]  }
 0x8db   : > { %v7282_v46 = vadd.f32 %v21600_v24, %v7095_v44  ;;  %v7097_v34 = vpop.f32.mrb[97].mxu0  ;;  %10809 = vmatprep.subr.bf16.mxu1 %v18832_v22 }
 0x8dc   : > { %v7283_v10 = vadd.f32 %v21604_v15, %v7097_v34  ;;  %v7099_v53 = vpop.f32.mrb[98].mxu0  ;;  %10770 = vmatprep.mubr.bf16.mxu1 %v21682_v11 }
 0x8dd   : > { %v7284_v26 = vadd.f32 %v21600_v24, %v7099_v53  ;;  %v7101_v60 = vpop.f32.mrb[99].mxu0  ;;  %10771 = vmatmul.mubr.bf16.gmra.mrb[156].mxu1 %v21680_v33  ;;  %v7346_v32 = vmax.f32 %v7282_v46, 0.0 }
 0x8de   : > { %v7285_v59 = vadd.f32 %v21604_v15, %v7101_v60  ;;  %10810 = vmatpush1.bf16.msra.mxu1 %v18830_v3  ;;  %10813 = vmatprep.mubr.bf16.mxu1 %v21612_v13  ;;  %v7347_v5 = vmax.f32 %v7283_v10, 0.0  ;;  %v18845_v3 = vld [vmem:[#allocation15 + $0xa60] ss:$16 sps:$4 sm:$0xff]  }
 0x8df   : > { %v7348_v43 = vmax.f32 %v7284_v26, 0.0  ;;  %10811 = vmatprep.subr.bf16.mxu1 %v18835_v45  ;;  %v18850_v45 = vld [vmem:[#allocation15 + $0xa84] ss:$16 sps:$4 sm:$0xff]  }
 0x8e0   : > { %v7349_v50 = vmax.f32 %v7285_v59, 0.0 }
 0x8e1   : > { %v21691_v12 = vpack.c.bf16 %v7348_v43, %v7346_v32  ;;  %v18853_v43 = vld [vmem:[#allocation15 + $0xaa4] ss:$16 sps:$4 sm:$0xff]  }
 0x8e2   : > { %v21693_v31 = vpack.c.bf16 %v7349_v50, %v7347_v5  ;;  %10812 = vmatpush1.bf16.msra.mxu1 %v18833_v37  ;;  %v7105_v14 = vpop.f32.mrb[100].mxu0  ;;  %v18848_v37 = vld [vmem:[#allocation15 + $0xa80] ss:$16 sps:$4 sm:$0xff]  }
 0x8e3   : > { %v7286_v9 = vadd.f32 %v21600_v24, %v7105_v14  ;;  %v7107_v27 = vpop.f32.mrb[101].mxu0  ;;  %11342 = vmatprep.subr.bf16.mxu1 %v18838_v23 }
 0x8e4   : > { %v7287_v13 = vadd.f32 %v21604_v15, %v7107_v27  ;;  %v7109_v63 = vpop.f32.mrb[102].mxu0 }
 0x8e5   : > { %v7288_v41 = vadd.f32 %v21600_v24, %v7109_v63  ;;  %v7111_v21 = vpop.f32.mrb[103].mxu0  ;;  %10814 = vmatmul.mubr.bf16.vlgmr.msra.gmra.mrb[160].mxu1 %v21610_v0  ;;  %v7350_v8 = vmax.f32 %v7286_v9, 0.0 }
 0x8e6   : > { %v7289_v20 = vadd.f32 %v21604_v15, %v7111_v21  ;;  %11343 = vmatpush1.bf16.msra.mxu1 %v18836_v58  ;;  %10823 = vmatprep.mubr.bf16.mxu1 %v21622_v2  ;;  %v7351_v29 = vmax.f32 %v7287_v13, 0.0  ;;  %v18851_v58 = vld [vmem:[#allocation15 + $0xaa0] ss:$16 sps:$4 sm:$0xff]  }
 0x8e7   : > { %v7352_v48 = vmax.f32 %v7288_v41, 0.0  ;;  %11344 = vmatprep.subr.bf16.mxu1 %v18841_v18  ;;  %v18856_v18 = vld [vmem:[#allocation15 + $0xac4] ss:$16 sps:$4 sm:$0xff]  }
 0x8e8   : > { %v7353_v42 = vmax.f32 %v7289_v20, 0.0 }
 0x8e9   : > { %v21701_v51 = vpack.c.bf16 %v7352_v48, %v7350_v8  ;;  %v18859_v48 = vld [vmem:[#allocation15 + $0xae4] ss:$16 sps:$4 sm:$0xff]  }
 0x8ea   : > { %v21703_v1 = vpack.c.bf16 %v7353_v42, %v7351_v29  ;;  %11345 = vmatpush1.bf16.msra.mxu1 %v18839_v55  ;;  %v7115_v61 = vpop.f32.mrb[104].mxu0  ;;  %v18854_v55 = vld [vmem:[#allocation15 + $0xac0] ss:$16 sps:$4 sm:$0xff]  }
 0x8eb   : > { %v7290_v0 = vadd.f32 %v21600_v24, %v7115_v61  ;;  %v7117_v49 = vpop.f32.mrb[105].mxu0  ;;  %11346 = vmatprep.subr.bf16.mxu1 %v18844_v47 }
 0x8ec   : > { %v7291_v2 = vadd.f32 %v21604_v15, %v7117_v49  ;;  %v7119_v22 = vpop.f32.mrb[106].mxu0 }
 0x8ed   : > { %v7292_v19 = vadd.f32 %v21600_v24, %v7119_v22  ;;  %v7121_v57 = vpop.f32.mrb[107].mxu0  ;;  %10824 = vmatmul.mubr.bf16.gmra.mrb[164].mxu1 %v21620_v40  ;;  %v7354_v46 = vmax.f32 %v7290_v0, 0.0 }
 0x8ee   : > { %v7293_v44 = vadd.f32 %v21604_v15, %v7121_v57  ;;  %11347 = vmatpush1.bf16.msra.mxu1 %v18842_v16  ;;  %10833 = vmatprep.mubr.bf16.mxu1 %v21632_v56  ;;  %v7355_v10 = vmax.f32 %v7291_v2, 0.0  ;;  %v18857_v16 = vld [vmem:[#allocation15 + $0xae0] ss:$16 sps:$4 sm:$0xff]  }
 0x8ef   : > { %v7356_v34 = vmax.f32 %v7292_v19, 0.0  ;;  %11348 = vmatprep.subr.bf16.mxu1 %v18847_v6  ;;  %v18862_v6 = vld [vmem:[#allocation15 + $0xb04] ss:$16 sps:$4 sm:$0xff]  }
 0x8f0   : > { %v7357_v53 = vmax.f32 %v7293_v44, 0.0 }
 0x8f1   : > { %v21711_v26 = vpack.c.bf16 %v7356_v34, %v7354_v46  ;;  %v18865_v34 = vld [vmem:[#allocation15 + $0xb24] ss:$16 sps:$4 sm:$0xff]  }
 0x8f2   : > { %v21713_v60 = vpack.c.bf16 %v7357_v53, %v7355_v10  ;;  %11349 = vmatpush1.bf16.msra.mxu1 %v18845_v3  ;;  %v7125_v59 = vpop.f32.mrb[108].mxu0  ;;  %v18860_v3 = vld [vmem:[#allocation15 + $0xb00] ss:$16 sps:$4 sm:$0xff]  }
 0x8f3   : > { %v7294_v40 = vadd.f32 %v21600_v24, %v7125_v59  ;;  %v7127_v32 = vpop.f32.mrb[109].mxu0  ;;  %11350 = vmatprep.subr.bf16.mxu1 %v18850_v45 }
 0x8f4   : > { %v7295_v56 = vadd.f32 %v21604_v15, %v7127_v32  ;;  %v7129_v23 = vpop.f32.mrb[110].mxu0 }
 0x8f5   : > { %v7296_v5 = vadd.f32 %v21600_v24, %v7129_v23  ;;  %v7131_v50 = vpop.f32.mrb[111].mxu0  ;;  %10834 = vmatmul.mubr.bf16.gmra.mrb[168].mxu1 %v21630_v28  ;;  %v7358_v9 = vmax.f32 %v7294_v40, 0.0 }
 0x8f6   : > { %v7297_v14 = vadd.f32 %v21604_v15, %v7131_v50  ;;  %11351 = vmatpush1.bf16.msra.mxu1 %v18848_v37  ;;  %10843 = vmatprep.mubr.bf16.mxu1 %v21642_v62  ;;  %v7359_v13 = vmax.f32 %v7295_v56, 0.0  ;;  %v18863_v37 = vld [vmem:[#allocation15 + $0xb20] ss:$16 sps:$4 sm:$0xff]  }
 0x8f7   : > { %v7360_v27 = vmax.f32 %v7296_v5, 0.0  ;;  %11352 = vmatprep.subr.bf16.mxu1 %v18853_v43  ;;  %v18868_v43 = vld [vmem:[#allocation15 + $0xb44] ss:$16 sps:$4 sm:$0xff]  }
 0x8f8   : > { %v7361_v63 = vmax.f32 %v7297_v14, 0.0 }
 0x8f9   : > { %v21721_v41 = vpack.c.bf16 %v7360_v27, %v7358_v9  ;;  %v18871_v27 = vld [vmem:[#allocation15 + $0xb64] ss:$16 sps:$4 sm:$0xff]  }
 0x8fa   : > { %v21723_v21 = vpack.c.bf16 %v7361_v63, %v7359_v13  ;;  %11353 = vmatpush1.bf16.msra.mxu1 %v18851_v58  ;;  %v7135_v20 = vpop.f32.mrb[112].mxu0  ;;  %v18866_v58 = vld [vmem:[#allocation15 + $0xb40] ss:$16 sps:$4 sm:$0xff]  }
 0x8fb   : > { %v7298_v28 = vadd.f32 %v21600_v24, %v7135_v20  ;;  %v7137_v8 = vpop.f32.mrb[113].mxu0  ;;  %11354 = vmatprep.subr.bf16.mxu1 %v18856_v18 }
 0x8fc   : > { %v7299_v62 = vadd.f32 %v21604_v15, %v7137_v8  ;;  %v7139_v47 = vpop.f32.mrb[114].mxu0 }
 0x8fd   : > { %v7300_v29 = vadd.f32 %v21600_v24, %v7139_v47  ;;  %v7141_v42 = vpop.f32.mrb[115].mxu0  ;;  %10844 = vmatmul.mubr.bf16.gmra.mrb[172].mxu1 %v21640_v38  ;;  %v7362_v0 = vmax.f32 %v7298_v28, 0.0 }
 0x8fe   : > { %v7301_v61 = vadd.f32 %v21604_v15, %v7141_v42  ;;  %11355 = vmatpush1.bf16.msra.mxu1 %v18854_v55  ;;  %10853 = vmatprep.mubr.bf16.mxu1 %v21652_v39  ;;  %v7363_v2 = vmax.f32 %v7299_v62, 0.0  ;;  %v18869_v55 = vld [vmem:[#allocation15 + $0xb60] ss:$16 sps:$4 sm:$0xff]  }
 0x8ff   : > { %v7364_v49 = vmax.f32 %v7300_v29, 0.0  ;;  %11356 = vmatprep.subr.bf16.mxu1 %v18859_v48  ;;  %v18874_v48 = vld [vmem:[#allocation15 + $0xb84] ss:$16 sps:$4 sm:$0xff]  }
 0x900   : > { %v7365_v22 = vmax.f32 %v7301_v61, 0.0 }
 0x901   : > { %v21731_v19 = vpack.c.bf16 %v7364_v49, %v7362_v0  ;;  %v18877_v49 = vld [vmem:[#allocation15 + $0xba4] ss:$16 sps:$4 sm:$0xff]  }
 0x902   : > { %v21733_v57 = vpack.c.bf16 %v7365_v22, %v7363_v2  ;;  %11357 = vmatpush1.bf16.msra.mxu1 %v18857_v16  ;;  %v7145_v44 = vpop.f32.mrb[116].mxu0  ;;  %v18872_v16 = vld [vmem:[#allocation15 + $0xb80] ss:$16 sps:$4 sm:$0xff]  }
 0x903   : > { %v7302_v38 = vadd.f32 %v21600_v24, %v7145_v44  ;;  %v7147_v46 = vpop.f32.mrb[117].mxu0  ;;  %11358 = vmatprep.subr.bf16.mxu1 %v18862_v6 }
 0x904   : > { %v7303_v39 = vadd.f32 %v21604_v15, %v7147_v46  ;;  %v7149_v45 = vpop.f32.mrb[118].mxu0 }
 0x905   : > { %v7304_v10 = vadd.f32 %v21600_v24, %v7149_v45  ;;  %v7151_v53 = vpop.f32.mrb[119].mxu0  ;;  %10854 = vmatmul.mubr.bf16.gmra.mrb[176].mxu1 %v21650_v35  ;;  %v7366_v40 = vmax.f32 %v7302_v38, 0.0 }
 0x906   : > { %v7305_v59 = vadd.f32 %v21604_v15, %v7151_v53  ;;  %11359 = vmatpush1.bf16.msra.mxu1 %v18860_v3  ;;  %10863 = vmatprep.mubr.bf16.mxu1 %v21662_v17  ;;  %v7367_v56 = vmax.f32 %v7303_v39, 0.0  ;;  %v18875_v3 = vld [vmem:[#allocation15 + $0xba0] ss:$16 sps:$4 sm:$0xff]  }
 0x907   : > { %v7368_v32 = vmax.f32 %v7304_v10, 0.0  ;;  %11360 = vmatprep.subr.bf16.mxu1 %v18865_v34  ;;  %v18880_v34 = vld [vmem:[#allocation15 + $0xbc4] ss:$16 sps:$4 sm:$0xff]  }
 0x908   : > { %v7369_v23 = vmax.f32 %v7305_v59, 0.0  ;;  %v18884_v59 = vld [vmem:[#allocation15 + $0xa08] ss:$16 sps:$4 sm:$0xff]  }
 0x909   : > { %v21741_v5 = vpack.c.bf16 %v7368_v32, %v7366_v40  ;;  %v18887_v40 = vld [vmem:[#allocation15 + $0xa28] ss:$16 sps:$4 sm:$0xff]   ;;  %v18892_v32 = vld [vmem:[#allocation15 + $0xa4c] ss:$16 sps:$4 sm:$0xff]  }
 0x90a   : > { %v21743_v50 = vpack.c.bf16 %v7369_v23, %v7367_v56  ;;  %11361 = vmatpush1.bf16.msra.mxu1 %v18863_v37  ;;  %v7155_v14 = vpop.f32.mrb[120].mxu0  ;;  %v18889_v37 = vld [vmem:[#allocation15 + $0xa2c] ss:$16 sps:$4 sm:$0xff]   ;;  %v18893_v56 = vld [vmem:[#allocation15 + $0xa68] ss:$16 sps:$4 sm:$0xff]  }
 0x90b   : > { %v7306_v35 = vadd.f32 %v21600_v24, %v7155_v14  ;;  %v7157_v9 = vpop.f32.mrb[121].mxu0  ;;  %11362 = vmatprep.subr.bf16.mxu1 %v18868_v43  ;;  %v18895_v43 = vld [vmem:[#allocation15 + $0xa6c] ss:$16 sps:$4 sm:$0xff]   ;;  %v18896_v14 = vld [vmem:[#allocation15 + $0xa88] ss:$16 sps:$4 sm:$0xff]  }
 0x90c   : > { %v7307_v17 = vadd.f32 %v21604_v15, %v7157_v9  ;;  %v7159_v18 = vpop.f32.mrb[122].mxu0  ;;  %v18898_v23 = vld [vmem:[#allocation15 + $0xa8c] ss:$16 sps:$4 sm:$0xff]  }
 0x90d   : > { %v7308_v13 = vadd.f32 %v21600_v24, %v7159_v18  ;;  %v7161_v63 = vpop.f32.mrb[123].mxu0  ;;  %10864 = vmatmul.mubr.bf16.gmra.mrb[180].mxu1 %v21660_v52  ;;  %v7370_v28 = vmax.f32 %v7306_v35, 0.0  ;;  %v18899_v35 = vld [vmem:[#allocation15 + $0xaa8] ss:$16 sps:$4 sm:$0xff]   ;;  %v18904_v9 = vld [vmem:[#allocation15 + $0xacc] ss:$16 sps:$4 sm:$0xff]  }
 0x90e   : > { %v7309_v20 = vadd.f32 %v21604_v15, %v7161_v63  ;;  %11363 = vmatpush1.bf16.msra.mxu1 %v18866_v58  ;;  %10873 = vmatprep.mubr.bf16.mxu1 %v21672_v25  ;;  %v7371_v62 = vmax.f32 %v7307_v17, 0.0  ;;  %v18901_v58 = vld [vmem:[#allocation15 + $0xaac] ss:$16 sps:$4 sm:$0xff]   ;;  %v18905_v18 = vld [vmem:[#allocation15 + $0xae8] ss:$16 sps:$4 sm:$0xff]  }
 0x90f   : > { %v7372_v8 = vmax.f32 %v7308_v13, 0.0  ;;  %11364 = vmatprep.subr.bf16.mxu1 %v18871_v27  ;;  %v18902_v27 = vld [vmem:[#allocation15 + $0xac8] ss:$16 sps:$4 sm:$0xff]   ;;  %v18907_v17 = vld [vmem:[#allocation15 + $0xaec] ss:$16 sps:$4 sm:$0xff]  }
 0x910   : > { %v7373_v47 = vmax.f32 %v7309_v20, 0.0  ;;  %v18910_v13 = vld [vmem:[#allocation15 + $0xb0c] ss:$16 sps:$4 sm:$0xff]   ;;  %v18908_v63 = vld [vmem:[#allocation15 + $0xb08] ss:$16 sps:$4 sm:$0xff]  }
 0x911   : > { %v21751_v29 = vpack.c.bf16 %v7372_v8, %v7370_v28  ;;  %v18913_v20 = vld [vmem:[#allocation15 + $0xb2c] ss:$16 sps:$4 sm:$0xff]   ;;  %v18914_v8 = vld [vmem:[#allocation15 + $0xb48] ss:$16 sps:$4 sm:$0xff]  }
 0x912   : > { %v21753_v42 = vpack.c.bf16 %v7373_v47, %v7371_v62  ;;  %11365 = vmatpush1.bf16.msra.mxu1 %v18869_v55  ;;  %v7165_v61 = vpop.f32.mrb[124].mxu0  ;;  %v18911_v55 = vld [vmem:[#allocation15 + $0xb28] ss:$16 sps:$4 sm:$0xff]   ;;  %v18916_v28 = vld [vmem:[#allocation15 + $0xb4c] ss:$16 sps:$4 sm:$0xff]  }
 0x913   : > { %v7310_v52 = vadd.f32 %v21600_v24, %v7165_v61  ;;  %v7167_v0 = vpop.f32.mrb[125].mxu0  ;;  %11366 = vmatprep.subr.bf16.mxu1 %v18874_v48  ;;  %v18919_v48 = vld [vmem:[#allocation15 + $0xb6c] ss:$16 sps:$4 sm:$0xff]   ;;  %v18917_v62 = vld [vmem:[#allocation15 + $0xb68] ss:$16 sps:$4 sm:$0xff]  }
 0x914   : > { %v7311_v25 = vadd.f32 %v21604_v15, %v7167_v0  ;;  %v7169_v6 = vpop.f32.mrb[126].mxu0  ;;  %v18922_v47 = vld [vmem:[#allocation15 + $0xb8c] ss:$16 sps:$4 sm:$0xff]   ;;  %v18920_v61 = vld [vmem:[#allocation15 + $0xb88] ss:$16 sps:$4 sm:$0xff]  }
 0x915   : > { %v7312_v2 = vadd.f32 %v21600_v24, %v7169_v6  ;;  %v7171_v22 = vpop.f32.mrb[127].mxu0  ;;  %10874 = vmatmul.mubr.bf16.gmra.mrb[184].mxu1 %v21670_v7  ;;  %v7374_v38 = vmax.f32 %v7310_v52, 0.0  ;;  %v18878_v24 = vld [vmem:[#allocation15 + $0xbc0] ss:$16 sps:$4 sm:$0xff]   ;;  %v18883_v7 = vld [vmem:[#allocation15 + $0xbe4] ss:$16 sps:$4 sm:$0xff]  }
 0x916   : > { %v7313_v44 = vadd.f32 %v21604_v15, %v7171_v22  ;;  %11367 = vmatpush1.bf16.msra.mxu1 %v18872_v16  ;;  %10883 = vmatprep.mubr.bf16.mxu1 %v21682_v11  ;;  %v7375_v39 = vmax.f32 %v7311_v25, 0.0  ;;  %v18881_v15 = vld [vmem:[#allocation15 + $0xbe0] ss:$16 sps:$4 sm:$0xff]   ;;  %v18886_v11 = vld [vmem:[#allocation15 + $0xa0c] ss:$16 sps:$4 sm:$0xff]  }
 0x917   : > { %v7376_v46 = vmax.f32 %v7312_v2, 0.0  ;;  %11368 = vmatprep.subr.bf16.mxu1 %v18877_v49  ;;  %v18925_v16 = vld [vmem:[#allocation15 + $0xbac] ss:$16 sps:$4 sm:$0xff]   ;;  %v18923_v52 = vld [vmem:[#allocation15 + $0xba8] ss:$16 sps:$4 sm:$0xff]  }
 0x918   : > { %v7377_v45 = vmax.f32 %v7313_v44, 0.0  ;;  %v18928_v0 = vld [vmem:[#allocation15 + $0xbcc] ss:$16 sps:$4 sm:$0xff]   ;;  %v18926_v49 = vld [vmem:[#allocation15 + $0xbc8] ss:$16 sps:$4 sm:$0xff]  }
 0x919   : > { %v21761_v10 = vpack.c.bf16 %v7376_v46, %v7374_v38  ;;  %v18931_v25 = vld [vmem:[#allocation15 + $0xbec] ss:$16 sps:$4 sm:$0xff]   ;;  %v18929_v6 = vld [vmem:[#allocation15 + $0xbe8] ss:$16 sps:$4 sm:$0xff]   ;;  %v18934_v2 = vld [vmem:[#allocation15 + $0xc04] ss:$16 sps:$4 sm:$0xff]  }
 0x91a   : > { %v21763_v53 = vpack.c.bf16 %v7377_v45, %v7375_v39  ;;  %11369 = vmatpush1.bf16.msra.mxu1 %v18875_v3  ;;  %v18932_v22 = vld [vmem:[#allocation15 + $0xc00] ss:$16 sps:$4 sm:$0xff]   ;;  %v18937_v44 = vld [vmem:[#allocation15 + $0xc24] ss:$16 sps:$4 sm:$0xff]  }
 0x91b   : > { %11370 = vmatprep.subr.bf16.mxu1 %v18880_v34  ;;  %v18935_v3 = vld [vmem:[#allocation15 + $0xc20] ss:$16 sps:$4 sm:$0xff]   ;;  %v18940_v38 = vld [vmem:[#allocation15 + $0xc44] ss:$16 sps:$4 sm:$0xff]  }
 0x91c   : > { %v18938_v46 = vld [vmem:[#allocation15 + $0xc40] ss:$16 sps:$4 sm:$0xff]   ;;  %v18943_v34 = vld [vmem:[#allocation15 + $0xc64] ss:$16 sps:$4 sm:$0xff]  }
 0x91d   : > { %10884 = vmatmul.mubr.bf16.gmra.mrb[188].mxu1 %v21680_v33  ;;  %v18890_v33 = vld [vmem:[#allocation15 + $0xa48] ss:$16 sps:$4 sm:$0xff]   ;;  %v18946_v39 = vld [vmem:[#allocation15 + $0xc84] ss:$16 sps:$4 sm:$0xff]  }
 0x91e   : > { %11371 = vmatpush1.bf16.msra.mxu1 %v18878_v24  ;;  %11374 = vmatprep.mubr.bf16.mxu1 %v21693_v31  ;;  %v18949_v45 = vld [vmem:[#allocation15 + $0xca4] ss:$16 sps:$4 sm:$0xff]  }
 0x91f   : > { %11372 = vmatprep.subr.bf16.mxu1 %v18883_v7  ;;  %v18952_v24 = vld [vmem:[#allocation15 + $0xcc4] ss:$16 sps:$4 sm:$0xff]  }
 0x920   : > { %v18955_v7 = vld [vmem:[#allocation15 + $0xce4] ss:$16 sps:$4 sm:$0xff]  }
 0x922   : > { %11373 = vmatpush1.bf16.msra.mxu1 %v18881_v15  ;;  %v18958_v15 = vld [vmem:[#allocation15 + $0xd04] ss:$16 sps:$4 sm:$0xff]  }
 0x923   : > { %11455 = vmatprep.subr.bf16.mxu1 %v18886_v11  ;;  %v18961_v11 = vld [vmem:[#allocation15 + $0xd24] ss:$16 sps:$4 sm:$0xff]  }
 0x925   : > { %11375 = vmatmul.mubr.bf16.vlgmr.msra.gmra.mrb[128].mxu1 %v21691_v12 }
 0x926   : > { %11456 = vmatpush1.bf16.msra.mxu1 %v18884_v59  ;;  %11384 = vmatprep.mubr.bf16.mxu1 %v21703_v1  ;;  %v18964_v59 = vld [vmem:[#allocation15 + $0xd44] ss:$16 sps:$4 sm:$0xff]  }
 0x927   : > { %11457 = vmatprep.subr.bf16.mxu1 %v18889_v37  ;;  %v18967_v37 = vld [vmem:[#allocation15 + $0xd64] ss:$16 sps:$4 sm:$0xff]  }
 0x92a   : > { %11458 = vmatpush1.bf16.msra.mxu1 %v18887_v40  ;;  %v18970_v40 = vld [vmem:[#allocation15 + $0xd84] ss:$16 sps:$4 sm:$0xff]  }
 0x92b   : > { %11459 = vmatprep.subr.bf16.mxu1 %v18892_v32  ;;  %v18973_v32 = vld [vmem:[#allocation15 + $0xda4] ss:$16 sps:$4 sm:$0xff]  }
 0x92d   : > { %11385 = vmatmul.mubr.bf16.gmra.mrb[132].mxu1 %v21701_v51 }
 0x92e   : > { %11460 = vmatpush1.bf16.msra.mxu1 %v18890_v33  ;;  %11394 = vmatprep.mubr.bf16.mxu1 %v21713_v60  ;;  %v18976_v33 = vld [vmem:[#allocation15 + $0xdc4] ss:$16 sps:$4 sm:$0xff]  }
 0x92f   : > { %11461 = vmatprep.subr.bf16.mxu1 %v18895_v43  ;;  %v18979_v43 = vld [vmem:[#allocation15 + $0xde4] ss:$16 sps:$4 sm:$0xff]  }
 0x932   : > { %11462 = vmatpush1.bf16.msra.mxu1 %v18893_v56  ;;  %v18982_v56 = vld [vmem:[#allocation15 + $0xc0c] ss:$16 sps:$4 sm:$0xff]  }
 0x933   : > { %11463 = vmatprep.subr.bf16.mxu1 %v18898_v23  ;;  %v18985_v23 = vld [vmem:[#allocation15 + $0xc2c] ss:$16 sps:$4 sm:$0xff]  }
 0x935   : > { %11395 = vmatmul.mubr.bf16.gmra.mrb[136].mxu1 %v21711_v26 }
 0x936   : > { %11464 = vmatpush1.bf16.msra.mxu1 %v18896_v14  ;;  %11404 = vmatprep.mubr.bf16.mxu1 %v21723_v21  ;;  %v21801_v14 = vld [vmem:[#allocation15 + $0x1008] ss:$16 sps:$4 sm:$0xff]  }
 0x937   : > { %11465 = vmatprep.subr.bf16.mxu1 %v18901_v58  ;;  %v18988_v58 = vld [vmem:[#allocation15 + $0xc4c] ss:$16 sps:$4 sm:$0xff]  }
 0x93a   : > { %11466 = vmatpush1.bf16.msra.mxu1 %v18899_v35  ;;  %v21807_v35 = vld [vmem:[#allocation15 + $0x102c] ss:$16 sps:$4 sm:$0xff]  }
 0x93b   : > { %11467 = vmatprep.subr.bf16.mxu1 %v18904_v9  ;;  %v21809_v9 = vld [vmem:[#allocation15 + $0x1028] ss:$16 sps:$4 sm:$0xff]  }
 0x93d   : > { %11405 = vmatmul.mubr.bf16.gmra.mrb[140].mxu1 %v21721_v41 }
 0x93e   : > { %11468 = vmatpush1.bf16.msra.mxu1 %v18902_v27  ;;  %11414 = vmatprep.mubr.bf16.mxu1 %v21733_v57  ;;  %v18986_v27 = vld [vmem:[#allocation15 + $0xc48] ss:$16 sps:$4 sm:$0xff]  }
 0x93f   : > { %11469 = vmatprep.subr.bf16.mxu1 %v18907_v17  ;;  %v18991_v17 = vld [vmem:[#allocation15 + $0xc6c] ss:$16 sps:$4 sm:$0xff]  }
 0x942   : > { %11470 = vmatpush1.bf16.msra.mxu1 %v18905_v18  ;;  %v21813_v18 = vld [vmem:[#allocation15 + $0x104c] ss:$16 sps:$4 sm:$0xff]  }
 0x943   : > { %11471 = vmatprep.subr.bf16.mxu1 %v18910_v13  ;;  %v21815_v13 = vld [vmem:[#allocation15 + $0x1048] ss:$16 sps:$4 sm:$0xff]  }
 0x945   : > { %11415 = vmatmul.mubr.bf16.gmra.mrb[144].mxu1 %v21731_v19 }
 0x946   : > { %11472 = vmatpush1.bf16.msra.mxu1 %v18908_v63  ;;  %11424 = vmatprep.mubr.bf16.mxu1 %v21743_v50  ;;  %v18989_v63 = vld [vmem:[#allocation15 + $0xc68] ss:$16 sps:$4 sm:$0xff]  }
 0x947   : > { %11473 = vmatprep.subr.bf16.mxu1 %v18913_v20  ;;  %v18994_v20 = vld [vmem:[#allocation15 + $0xc8c] ss:$16 sps:$4 sm:$0xff]  }
 0x94a   : > { %11474 = vmatpush1.bf16.msra.mxu1 %v18911_v55  ;;  %v21821_v55 = vld [vmem:[#allocation15 + $0x106c] ss:$16 sps:$4 sm:$0xff]  }
 0x94b   : > { %11475 = vmatprep.subr.bf16.mxu1 %v18916_v28  ;;  %v21823_v28 = vld [vmem:[#allocation15 + $0x1068] ss:$16 sps:$4 sm:$0xff]  }
 0x94d   : > { %11425 = vmatmul.mubr.bf16.gmra.mrb[148].mxu1 %v21741_v5 }
 0x94e   : > { %11476 = vmatpush1.bf16.msra.mxu1 %v18914_v8  ;;  %11434 = vmatprep.mubr.bf16.mxu1 %v21753_v42  ;;  %v18992_v8 = vld [vmem:[#allocation15 + $0xc88] ss:$16 sps:$4 sm:$0xff]  }
 0x94f   : > { %11477 = vmatprep.subr.bf16.mxu1 %v18919_v48  ;;  %v18997_v48 = vld [vmem:[#allocation15 + $0xcac] ss:$16 sps:$4 sm:$0xff]  }
 0x952   : > { %11478 = vmatpush1.bf16.msra.mxu1 %v18917_v62  ;;  %v21827_v62 = vld [vmem:[#allocation15 + $0x108c] ss:$16 sps:$4 sm:$0xff]  }
 0x953   : > { %11479 = vmatprep.subr.bf16.mxu1 %v18922_v47  ;;  %v21829_v47 = vld [vmem:[#allocation15 + $0x1088] ss:$16 sps:$4 sm:$0xff]  }
 0x955   : > { %11435 = vmatmul.mubr.bf16.gmra.mrb[152].mxu1 %v21751_v29 }
 0x956   : > { %11480 = vmatpush1.bf16.msra.mxu1 %v18920_v61  ;;  %11444 = vmatprep.mubr.bf16.mxu1 %v21763_v53  ;;  %v18995_v61 = vld [vmem:[#allocation15 + $0xca8] ss:$16 sps:$4 sm:$0xff]  }
 0x957   : > { %11481 = vmatprep.subr.bf16.mxu1 %v18925_v16  ;;  %v19000_v16 = vld [vmem:[#allocation15 + $0xccc] ss:$16 sps:$4 sm:$0xff]  }
 0x95a   : > { %11482 = vmatpush1.bf16.msra.mxu1 %v18923_v52  ;;  %v21835_v52 = vld [vmem:[#allocation15 + $0x10ac] ss:$16 sps:$4 sm:$0xff]  }
 0x95b   : > { %11483 = vmatprep.subr.bf16.mxu1 %v18928_v0  ;;  %v21837_v0 = vld [vmem:[#allocation15 + $0x10a8] ss:$16 sps:$4 sm:$0xff]  }
 0x95d   : > { %11445 = vmatmul.mubr.bf16.gmra.mrb[156].mxu1 %v21761_v10 }
 0x95e   : > { %11484 = vmatpush1.bf16.msra.mxu1 %v18926_v49  ;;  %11487 = vmatprep.mubr.bf16.mxu1 %v21693_v31  ;;  %v18941_v31 = vld [vmem:[#allocation15 + $0xc60] ss:$16 sps:$4 sm:$0xff]   ;;  %v18998_v49 = vld [vmem:[#allocation15 + $0xcc8] ss:$16 sps:$4 sm:$0xff]  }
 0x95f   : > { %11485 = vmatprep.subr.bf16.mxu1 %v18931_v25  ;;  %v19003_v25 = vld [vmem:[#allocation15 + $0xcec] ss:$16 sps:$4 sm:$0xff]  }
 0x962   : > { %11486 = vmatpush1.bf16.msra.mxu1 %v18929_v6  ;;  %v21841_v6 = vld [vmem:[#allocation15 + $0x10cc] ss:$16 sps:$4 sm:$0xff]  }
 0x963   : > { %12016 = vmatprep.subr.bf16.mxu1 %v18934_v2  ;;  %v21843_v2 = vld [vmem:[#allocation15 + $0x10c8] ss:$16 sps:$4 sm:$0xff]  }
 0x965   : > { %11488 = vmatmul.mubr.bf16.vlgmr.msra.gmra.mrb[160].mxu1 %v21691_v12  ;;  %v18944_v12 = vld [vmem:[#allocation15 + $0xc80] ss:$16 sps:$4 sm:$0xff]  }
 0x966   : > { %12017 = vmatpush1.bf16.msra.mxu1 %v18932_v22  ;;  %11497 = vmatprep.mubr.bf16.mxu1 %v21703_v1  ;;  %v18947_v1 = vld [vmem:[#allocation15 + $0xca0] ss:$16 sps:$4 sm:$0xff]   ;;  %v19001_v22 = vld [vmem:[#allocation15 + $0xce8] ss:$16 sps:$4 sm:$0xff]  }
 0x967   : > { %12018 = vmatprep.subr.bf16.mxu1 %v18937_v44  ;;  %v19006_v44 = vld [vmem:[#allocation15 + $0xd0c] ss:$16 sps:$4 sm:$0xff]  }
 0x96a   : > { %12019 = vmatpush1.bf16.msra.mxu1 %v18935_v3  ;;  %v21849_v3 = vld [vmem:[#allocation15 + $0x10ec] ss:$16 sps:$4 sm:$0xff]  }
 0x96b   : > { %12020 = vmatprep.subr.bf16.mxu1 %v18940_v38  ;;  %v21851_v38 = vld [vmem:[#allocation15 + $0x10e8] ss:$16 sps:$4 sm:$0xff]  }
 0x96d   : > { %11498 = vmatmul.mubr.bf16.gmra.mrb[164].mxu1 %v21701_v51  ;;  %v18950_v51 = vld [vmem:[#allocation15 + $0xcc0] ss:$16 sps:$4 sm:$0xff]  }
 0x96e   : > { %12021 = vmatpush1.bf16.msra.mxu1 %v18938_v46  ;;  %11507 = vmatprep.mubr.bf16.mxu1 %v21713_v60  ;;  %v18953_v60 = vld [vmem:[#allocation15 + $0xce0] ss:$16 sps:$4 sm:$0xff]   ;;  %v19004_v46 = vld [vmem:[#allocation15 + $0xd08] ss:$16 sps:$4 sm:$0xff]  }
 0x96f   : > { %12022 = vmatprep.subr.bf16.mxu1 %v18943_v34  ;;  %v19009_v34 = vld [vmem:[#allocation15 + $0xd2c] ss:$16 sps:$4 sm:$0xff]  }
 0x972   : > { %12023 = vmatpush1.bf16.msra.mxu1 %v18941_v31  ;;  %v21855_v31 = vld [vmem:[#allocation15 + $0x110c] ss:$16 sps:$4 sm:$0xff]  }
 0x973   : > { %12024 = vmatprep.subr.bf16.mxu1 %v18946_v39  ;;  %v21857_v39 = vld [vmem:[#allocation15 + $0x1108] ss:$16 sps:$4 sm:$0xff]  }
 0x975   : > { %11508 = vmatmul.mubr.bf16.gmra.mrb[168].mxu1 %v21711_v26  ;;  %v18956_v26 = vld [vmem:[#allocation15 + $0xd00] ss:$16 sps:$4 sm:$0xff]  }
 0x976   : > { %12025 = vmatpush1.bf16.msra.mxu1 %v18944_v12  ;;  %11517 = vmatprep.mubr.bf16.mxu1 %v21723_v21  ;;  %v18959_v21 = vld [vmem:[#allocation15 + $0xd20] ss:$16 sps:$4 sm:$0xff]   ;;  %v19007_v12 = vld [vmem:[#allocation15 + $0xd28] ss:$16 sps:$4 sm:$0xff]  }
 0x977   : > { %12026 = vmatprep.subr.bf16.mxu1 %v18949_v45  ;;  %v19012_v45 = vld [vmem:[#allocation15 + $0xd4c] ss:$16 sps:$4 sm:$0xff]  }
 0x97a   : > { %12027 = vmatpush1.bf16.msra.mxu1 %v18947_v1  ;;  %v21863_v1 = vld [vmem:[#allocation15 + $0x112c] ss:$16 sps:$4 sm:$0xff]  }
 0x97b   : > { %12028 = vmatprep.subr.bf16.mxu1 %v18952_v24  ;;  %v21865_v24 = vld [vmem:[#allocation15 + $0x1128] ss:$16 sps:$4 sm:$0xff]  }
 0x97d   : > { %11518 = vmatmul.mubr.bf16.gmra.mrb[172].mxu1 %v21721_v41  ;;  %v18962_v41 = vld [vmem:[#allocation15 + $0xd40] ss:$16 sps:$4 sm:$0xff]  }
 0x97e   : > { %12029 = vmatpush1.bf16.msra.mxu1 %v18950_v51  ;;  %11527 = vmatprep.mubr.bf16.mxu1 %v21733_v57  ;;  %v18965_v57 = vld [vmem:[#allocation15 + $0xd60] ss:$16 sps:$4 sm:$0xff]   ;;  %v19010_v51 = vld [vmem:[#allocation15 + $0xd48] ss:$16 sps:$4 sm:$0xff]  }
 0x97f   : > { %12030 = vmatprep.subr.bf16.mxu1 %v18955_v7  ;;  %v19015_v7 = vld [vmem:[#allocation15 + $0xd6c] ss:$16 sps:$4 sm:$0xff]  }
 0x982   : > { %12031 = vmatpush1.bf16.msra.mxu1 %v18953_v60  ;;  %v21869_v60 = vld [vmem:[#allocation15 + $0x114c] ss:$16 sps:$4 sm:$0xff]  }
 0x983   : > { %12032 = vmatprep.subr.bf16.mxu1 %v18958_v15  ;;  %v21871_v15 = vld [vmem:[#allocation15 + $0x1148] ss:$16 sps:$4 sm:$0xff]  }
 0x985   : > { %11528 = vmatmul.mubr.bf16.gmra.mrb[176].mxu1 %v21731_v19  ;;  %v18968_v19 = vld [vmem:[#allocation15 + $0xd80] ss:$16 sps:$4 sm:$0xff]  }
 0x986   : > { %12033 = vmatpush1.bf16.msra.mxu1 %v18956_v26  ;;  %11537 = vmatprep.mubr.bf16.mxu1 %v21743_v50  ;;  %v18971_v50 = vld [vmem:[#allocation15 + $0xda0] ss:$16 sps:$4 sm:$0xff]   ;;  %v19013_v26 = vld [vmem:[#allocation15 + $0xd68] ss:$16 sps:$4 sm:$0xff]  }
 0x987   : > { %12034 = vmatprep.subr.bf16.mxu1 %v18961_v11  ;;  %v19018_v11 = vld [vmem:[#allocation15 + $0xd8c] ss:$16 sps:$4 sm:$0xff]  }
 0x98a   : > { %12035 = vmatpush1.bf16.msra.mxu1 %v18959_v21  ;;  %v21877_v21 = vld [vmem:[#allocation15 + $0x116c] ss:$16 sps:$4 sm:$0xff]  }
 0x98b   : > { %12036 = vmatprep.subr.bf16.mxu1 %v18964_v59  ;;  %v21879_v59 = vld [vmem:[#allocation15 + $0x1168] ss:$16 sps:$4 sm:$0xff]  }
 0x98d   : > { %11538 = vmatmul.mubr.bf16.gmra.mrb[180].mxu1 %v21741_v5  ;;  %v18974_v5 = vld [vmem:[#allocation15 + $0xdc0] ss:$16 sps:$4 sm:$0xff]  }
 0x98e   : > { %12037 = vmatpush1.bf16.msra.mxu1 %v18962_v41  ;;  %11547 = vmatprep.mubr.bf16.mxu1 %v21753_v42  ;;  %v18977_v42 = vld [vmem:[#allocation15 + $0xde0] ss:$16 sps:$4 sm:$0xff]   ;;  %v19016_v41 = vld [vmem:[#allocation15 + $0xd88] ss:$16 sps:$4 sm:$0xff]  }
 0x98f   : > { %12038 = vmatprep.subr.bf16.mxu1 %v18967_v37  ;;  %v19021_v37 = vld [vmem:[#allocation15 + $0xdac] ss:$16 sps:$4 sm:$0xff]  }
 0x992   : > { %12039 = vmatpush1.bf16.msra.mxu1 %v18965_v57  ;;  %v21883_v57 = vld [vmem:[#allocation15 + $0x118c] ss:$16 sps:$4 sm:$0xff]  }
 0x993   : > { %12040 = vmatprep.subr.bf16.mxu1 %v18970_v40  ;;  %v21885_v40 = vld [vmem:[#allocation15 + $0x1188] ss:$16 sps:$4 sm:$0xff]  }
 0x995   : > { %11548 = vmatmul.mubr.bf16.gmra.mrb[184].mxu1 %v21751_v29  ;;  %v18980_v29 = vld [vmem:[#allocation15 + $0xc08] ss:$16 sps:$4 sm:$0xff]  }
 0x996   : > { %12041 = vmatpush1.bf16.msra.mxu1 %v18968_v19  ;;  %11557 = vmatprep.mubr.bf16.mxu1 %v21763_v53  ;;  %v21799_v53 = vld [vmem:[#allocation15 + $0x100c] ss:$16 sps:$4 sm:$0xff]   ;;  %v19019_v19 = vld [vmem:[#allocation15 + $0xda8] ss:$16 sps:$4 sm:$0xff]  }
 0x997   : > { %12042 = vmatprep.subr.bf16.mxu1 %v18973_v32  ;;  %13477 = vmatprep.subr.bf16.mxu0 %v21799_v53  ;;  %v19024_v32 = vld [vmem:[#allocation15 + $0xdcc] ss:$16 sps:$4 sm:$0xff]  }
 0x998   : > { %13478 = vmatpush1.bf16.msra.mxu0 %v21801_v14 }
 0x999   : > { %13479 = vmatprep.subr.bf16.mxu0 %v21807_v35 }
 0x99a   : > { %12043 = vmatpush1.bf16.msra.mxu1 %v18971_v50  ;;  %v21891_v50 = vld [vmem:[#allocation15 + $0x11ac] ss:$16 sps:$4 sm:$0xff]  }
 0x99b   : > { %12044 = vmatprep.subr.bf16.mxu1 %v18976_v33  ;;  %v21893_v33 = vld [vmem:[#allocation15 + $0x11a8] ss:$16 sps:$4 sm:$0xff]  }
 0x99c   : > { %13480 = vmatpush1.bf16.msra.mxu0 %v21809_v9 }
 0x99d   : > { %11558 = vmatmul.mubr.bf16.gmra.mrb[188].mxu1 %v21761_v10  ;;  %v18983_v10 = vld [vmem:[#allocation15 + $0xc28] ss:$16 sps:$4 sm:$0xff]   ;;  %13481 = vmatprep.subr.bf16.mxu0 %v21813_v18 }
 0x99e   : > { %12045 = vmatpush1.bf16.msra.mxu1 %v18974_v5  ;;  %12048 = vmatprep.mubr.bf16.mxu1 %v22682_v36  ;;  %v19022_v5 = vld [vmem:[#allocation15 + $0xdc8] ss:$16 sps:$4 sm:$0xff]  }
 0x99f   : > { %12046 = vmatprep.subr.bf16.mxu1 %v18979_v43  ;;  %v19027_v43 = vld [vmem:[#allocation15 + $0xdec] ss:$16 sps:$4 sm:$0xff]  }
 0x9a0   : > { %13482 = vmatpush1.bf16.msra.mxu0 %v21815_v13 }
 0x9a1   : > { %13483 = vmatprep.subr.bf16.mxu0 %v21821_v55 }
 0x9a2   : > { %12047 = vmatpush1.bf16.msra.mxu1 %v18977_v42  ;;  %v21897_v42 = vld [vmem:[#allocation15 + $0x11cc] ss:$16 sps:$4 sm:$0xff]  }
 0x9a3   : > { %12129 = vmatprep.subr.bf16.mxu1 %v18982_v56  ;;  %v21899_v56 = vld [vmem:[#allocation15 + $0x11c8] ss:$16 sps:$4 sm:$0xff]  }
 0x9a4   : > { %13484 = vmatpush1.bf16.msra.mxu0 %v21823_v28 }
 0x9a5   : > { %12049 = vmatmul.mubr.bf16.vlgmr.msra.gmra.mrb[128].mxu1 %v22682_v36  ;;  %13485 = vmatprep.subr.bf16.mxu0 %v21827_v62 }
 0x9a6   : > { %12130 = vmatpush1.bf16.msra.mxu1 %v18980_v29  ;;  %12058 = vmatprep.mubr.bf16.mxu1 %v22682_v36  ;;  %v19025_v29 = vld [vmem:[#allocation15 + $0xde8] ss:$16 sps:$4 sm:$0xff]  }
 0x9a7   : > { %12131 = vmatprep.subr.bf16.mxu1 %v18985_v23  ;;  %v19030_v23 = vld [vmem:[#allocation15 + $0xe04] ss:$16 sps:$4 sm:$0xff]  }
 0x9a8   : > { %13486 = vmatpush1.bf16.msra.mxu0 %v21829_v47 }
 0x9a9   : > { %13487 = vmatprep.subr.bf16.mxu0 %v21835_v52 }
 0x9aa   : > { %12132 = vmatpush1.bf16.msra.mxu1 %v18983_v10  ;;  %v21905_v10 = vld [vmem:[#allocation15 + $0x11ec] ss:$16 sps:$4 sm:$0xff]  }
 0x9ab   : > { %12133 = vmatprep.subr.bf16.mxu1 %v18988_v58  ;;  %v21907_v58 = vld [vmem:[#allocation15 + $0x11e8] ss:$16 sps:$4 sm:$0xff]  }
 0x9ac   : > { %13488 = vmatpush1.bf16.msra.mxu0 %v21837_v0 }
 0x9ad   : > { %12059 = vmatmul.mubr.bf16.gmra.mrb[132].mxu1 %v22682_v36  ;;  %13489 = vmatprep.subr.bf16.mxu0 %v21841_v6 }
 0x9ae   : > { %12134 = vmatpush1.bf16.msra.mxu1 %v18986_v27  ;;  %12068 = vmatprep.mubr.bf16.mxu1 %v22682_v36  ;;  %v19028_v27 = vld [vmem:[#allocation15 + $0xe00] ss:$16 sps:$4 sm:$0xff]  }
 0x9af   : > { %12135 = vmatprep.subr.bf16.mxu1 %v18991_v17  ;;  %v19033_v17 = vld [vmem:[#allocation15 + $0xe24] ss:$16 sps:$4 sm:$0xff]  }
 0x9b0   : > { %13490 = vmatpush1.bf16.msra.mxu0 %v21843_v2 }
 0x9b1   : > { %13491 = vmatprep.subr.bf16.mxu0 %v21849_v3 }
 0x9b2   : > { %12136 = vmatpush1.bf16.msra.mxu1 %v18989_v63  ;;  %v19031_v63 = vld [vmem:[#allocation15 + $0xe20] ss:$16 sps:$4 sm:$0xff]  }
 0x9b3   : > { %12137 = vmatprep.subr.bf16.mxu1 %v18994_v20  ;;  %v19036_v20 = vld [vmem:[#allocation15 + $0xe44] ss:$16 sps:$4 sm:$0xff]  }
 0x9b4   : > { %13492 = vmatpush1.bf16.msra.mxu0 %v21851_v38 }
 0x9b5   : > { %12069 = vmatmul.mubr.bf16.gmra.mrb[136].mxu1 %v22682_v36  ;;  %13493 = vmatprep.subr.bf16.mxu0 %v21855_v31 }
 0x9b6   : > { %12138 = vmatpush1.bf16.msra.mxu1 %v18992_v8  ;;  %12078 = vmatprep.mubr.bf16.mxu1 %v22682_v36  ;;  %v19034_v8 = vld [vmem:[#allocation15 + $0xe40] ss:$16 sps:$4 sm:$0xff]  }
 0x9b7   : > { %12139 = vmatprep.subr.bf16.mxu1 %v18997_v48  ;;  %v19039_v48 = vld [vmem:[#allocation15 + $0xe64] ss:$16 sps:$4 sm:$0xff]  }
 0x9b8   : > { %13494 = vmatpush1.bf16.msra.mxu0 %v21857_v39 }
 0x9b9   : > { %13495 = vmatprep.subr.bf16.mxu0 %v21863_v1 }
 0x9ba   : > { %12140 = vmatpush1.bf16.msra.mxu1 %v18995_v61  ;;  %v19037_v61 = vld [vmem:[#allocation15 + $0xe60] ss:$16 sps:$4 sm:$0xff]  }
 0x9bb   : > { %12141 = vmatprep.subr.bf16.mxu1 %v19000_v16  ;;  %v19042_v16 = vld [vmem:[#allocation15 + $0xe84] ss:$16 sps:$4 sm:$0xff]  }
 0x9bc   : > { %13496 = vmatpush1.bf16.msra.mxu0 %v21865_v24 }
 0x9bd   : > { %12079 = vmatmul.mubr.bf16.gmra.mrb[140].mxu1 %v22682_v36  ;;  %13497 = vmatprep.subr.bf16.mxu0 %v21869_v60 }
 0x9be   : > { %12142 = vmatpush1.bf16.msra.mxu1 %v18998_v49  ;;  %12088 = vmatprep.mubr.bf16.mxu1 %v22682_v36  ;;  %v19040_v49 = vld [vmem:[#allocation15 + $0xe80] ss:$16 sps:$4 sm:$0xff]  }
 0x9bf   : > { %12143 = vmatprep.subr.bf16.mxu1 %v19003_v25  ;;  %v19045_v25 = vld [vmem:[#allocation15 + $0xea4] ss:$16 sps:$4 sm:$0xff]  }
 0x9c0   : > { %13498 = vmatpush1.bf16.msra.mxu0 %v21871_v15 }
 0x9c1   : > { %13499 = vmatprep.subr.bf16.mxu0 %v21877_v21 }
 0x9c2   : > { %12144 = vmatpush1.bf16.msra.mxu1 %v19001_v22  ;;  %v19043_v22 = vld [vmem:[#allocation15 + $0xea0] ss:$16 sps:$4 sm:$0xff]  }
 0x9c3   : > { %12145 = vmatprep.subr.bf16.mxu1 %v19006_v44  ;;  %v19048_v44 = vld [vmem:[#allocation15 + $0xec4] ss:$16 sps:$4 sm:$0xff]  }
 0x9c4   : > { %13500 = vmatpush1.bf16.msra.mxu0 %v21879_v59 }
 0x9c5   : > { %12089 = vmatmul.mubr.bf16.gmra.mrb[144].mxu1 %v22682_v36  ;;  %13501 = vmatprep.subr.bf16.mxu0 %v21883_v57 }
 0x9c6   : > { %12146 = vmatpush1.bf16.msra.mxu1 %v19004_v46  ;;  %12098 = vmatprep.mubr.bf16.mxu1 %v22682_v36  ;;  %v19046_v46 = vld [vmem:[#allocation15 + $0xec0] ss:$16 sps:$4 sm:$0xff]  }
 0x9c7   : > { %12147 = vmatprep.subr.bf16.mxu1 %v19009_v34  ;;  %v19051_v34 = vld [vmem:[#allocation15 + $0xee4] ss:$16 sps:$4 sm:$0xff]  }
 0x9c8   : > { %13502 = vmatpush1.bf16.msra.mxu0 %v21885_v40 }
 0x9c9   : > { %13503 = vmatprep.subr.bf16.mxu0 %v21891_v50 }
 0x9ca   : > { %12148 = vmatpush1.bf16.msra.mxu1 %v19007_v12  ;;  %v19049_v12 = vld [vmem:[#allocation15 + $0xee0] ss:$16 sps:$4 sm:$0xff]  }
 0x9cb   : > { %12149 = vmatprep.subr.bf16.mxu1 %v19012_v45  ;;  %v19054_v45 = vld [vmem:[#allocation15 + $0xf04] ss:$16 sps:$4 sm:$0xff]  }
 0x9cc   : > { %13504 = vmatpush1.bf16.msra.mxu0 %v21893_v33 }
 0x9cd   : > { %12099 = vmatmul.mubr.bf16.gmra.mrb[148].mxu1 %v22682_v36  ;;  %13505 = vmatprep.subr.bf16.mxu0 %v21897_v42 }
 0x9ce   : > { %12150 = vmatpush1.bf16.msra.mxu1 %v19010_v51  ;;  %12108 = vmatprep.mubr.bf16.mxu1 %v22682_v36  ;;  %v19052_v51 = vld [vmem:[#allocation15 + $0xf00] ss:$16 sps:$4 sm:$0xff]  }
 0x9cf   : > { %12151 = vmatprep.subr.bf16.mxu1 %v19015_v7  ;;  %v19057_v7 = vld [vmem:[#allocation15 + $0xf24] ss:$16 sps:$4 sm:$0xff]  }
 0x9d0   : > { %13506 = vmatpush1.bf16.msra.mxu0 %v21899_v56 }
 0x9d1   : > { %13507 = vmatprep.subr.bf16.mxu0 %v21905_v10 }
 0x9d2   : > { %12152 = vmatpush1.bf16.msra.mxu1 %v19013_v26  ;;  %v19055_v26 = vld [vmem:[#allocation15 + $0xf20] ss:$16 sps:$4 sm:$0xff]  }
 0x9d3   : > { %12153 = vmatprep.subr.bf16.mxu1 %v19018_v11  ;;  %v19060_v11 = vld [vmem:[#allocation15 + $0xf44] ss:$16 sps:$4 sm:$0xff]  }
 0x9d4   : > { %13508 = vmatpush1.bf16.msra.mxu0 %v21907_v58 }
 0x9d5   : > { %12109 = vmatmul.mubr.bf16.gmra.mrb[152].mxu1 %v22682_v36 }
 0x9d6   : > { %12154 = vmatpush1.bf16.msra.mxu1 %v19016_v41  ;;  %12118 = vmatprep.mubr.bf16.mxu1 %v22682_v36  ;;  %v19058_v41 = vld [vmem:[#allocation15 + $0xf40] ss:$16 sps:$4 sm:$0xff]  }
 0x9d7   : > { %12155 = vmatprep.subr.bf16.mxu1 %v19021_v37  ;;  %13510 = vmatmul.mubr.bf16.vlgmr.msra.gmra.mrb[128].mxu0 %v22682_v36  ;;  %v19063_v37 = vld [vmem:[#allocation15 + $0xf64] ss:$16 sps:$4 sm:$0xff]  }
 0x9d8   : > { %13519 = vmatprep.mubr.bf16.mxu0 %v22682_v36 }
 0x9da   : > { %12156 = vmatpush1.bf16.msra.mxu1 %v19019_v19  ;;  %v19061_v19 = vld [vmem:[#allocation15 + $0xf60] ss:$16 sps:$4 sm:$0xff]  }
 0x9db   : > { %12157 = vmatprep.subr.bf16.mxu1 %v19024_v32  ;;  %v19066_v32 = vld [vmem:[#allocation15 + $0xf84] ss:$16 sps:$4 sm:$0xff]  }
 0x9dd   : > { %12119 = vmatmul.mubr.bf16.gmra.mrb[156].mxu1 %v22682_v36 }
 0x9de   : > { %12158 = vmatpush1.bf16.msra.mxu1 %v19022_v5  ;;  %12161 = vmatprep.mubr.bf16.mxu1 %v22682_v36  ;;  %v19064_v5 = vld [vmem:[#allocation15 + $0xf80] ss:$16 sps:$4 sm:$0xff]  }
 0x9df   : > { %12159 = vmatprep.subr.bf16.mxu1 %v19027_v43  ;;  %13520 = vmatmul.mubr.bf16.gmra.mrb[132].mxu0 %v22682_v36  ;;  %v19069_v43 = vld [vmem:[#allocation15 + $0xfa4] ss:$16 sps:$4 sm:$0xff]  }
 0x9e0   : > { %13529 = vmatprep.mubr.bf16.mxu0 %v22682_v36 }
 0x9e2   : > { %12160 = vmatpush1.bf16.msra.mxu1 %v19025_v29  ;;  %v19067_v29 = vld [vmem:[#allocation15 + $0xfa0] ss:$16 sps:$4 sm:$0xff]  }
 0x9e3   : > { %12690 = vmatprep.subr.bf16.mxu1 %v19030_v23  ;;  %v19072_v23 = vld [vmem:[#allocation15 + $0xfc4] ss:$16 sps:$4 sm:$0xff]  }
 0x9e5   : > { %12162 = vmatmul.mubr.bf16.vlgmr.msra.gmra.mrb[160].mxu1 %v22682_v36 }
 0x9e6   : > { %12691 = vmatpush1.bf16.msra.mxu1 %v19028_v27  ;;  %12171 = vmatprep.mubr.bf16.mxu1 %v22682_v36  ;;  %v19070_v27 = vld [vmem:[#allocation15 + $0xfc0] ss:$16 sps:$4 sm:$0xff]  }
 0x9e7   : > { %12692 = vmatprep.subr.bf16.mxu1 %v19033_v17  ;;  %13530 = vmatmul.mubr.bf16.gmra.mrb[136].mxu0 %v22682_v36  ;;  %v19075_v17 = vld [vmem:[#allocation15 + $0xfe4] ss:$16 sps:$4 sm:$0xff]  }
 0x9e8   : > { %13539 = vmatprep.mubr.bf16.mxu0 %v22682_v36 }
 0x9ea   : > { %12693 = vmatpush1.bf16.msra.mxu1 %v19031_v63  ;;  %v19073_v63 = vld [vmem:[#allocation15 + $0xfe0] ss:$16 sps:$4 sm:$0xff]  }
 0x9eb   : > { %12694 = vmatprep.subr.bf16.mxu1 %v19036_v20  ;;  %v19078_v20 = vld [vmem:[#allocation15 + $0xe0c] ss:$16 sps:$4 sm:$0xff]  }
 0x9ed   : > { %12172 = vmatmul.mubr.bf16.gmra.mrb[164].mxu1 %v22682_v36 }
 0x9ee   : > { %12695 = vmatpush1.bf16.msra.mxu1 %v19034_v8  ;;  %12181 = vmatprep.mubr.bf16.mxu1 %v22682_v36  ;;  %v19076_v8 = vld [vmem:[#allocation15 + $0xe08] ss:$16 sps:$4 sm:$0xff]  }
 0x9ef   : > { %12696 = vmatprep.subr.bf16.mxu1 %v19039_v48  ;;  %13540 = vmatmul.mubr.bf16.gmra.mrb[140].mxu0 %v22682_v36  ;;  %v19084_v48 = vld [vmem:[#allocation15 + $0xe2c] ss:$16 sps:$4 sm:$0xff]  }
 0x9f2   : > { %12697 = vmatpush1.bf16.msra.mxu1 %v19037_v61  ;;  %v19082_v61 = vld [vmem:[#allocation15 + $0xe28] ss:$16 sps:$4 sm:$0xff]  }
 0x9f3   : > { %12698 = vmatprep.subr.bf16.mxu1 %v19042_v16  ;;  %v19090_v16 = vld [vmem:[#allocation15 + $0xe4c] ss:$16 sps:$4 sm:$0xff]  }
 0x9f5   : > { %12182 = vmatmul.mubr.bf16.gmra.mrb[168].mxu1 %v22682_v36 }
 0x9f6   : > { %12699 = vmatpush1.bf16.msra.mxu1 %v19040_v49  ;;  %12191 = vmatprep.mubr.bf16.mxu1 %v22682_v36  ;;  %v19088_v49 = vld [vmem:[#allocation15 + $0xe48] ss:$16 sps:$4 sm:$0xff]  }
 0x9f7   : > { %12700 = vmatprep.subr.bf16.mxu1 %v19045_v25  ;;  %v19096_v25 = vld [vmem:[#allocation15 + $0xe6c] ss:$16 sps:$4 sm:$0xff]  }
 0x9fa   : > { %12701 = vmatpush1.bf16.msra.mxu1 %v19043_v22  ;;  %v19094_v22 = vld [vmem:[#allocation15 + $0xe68] ss:$16 sps:$4 sm:$0xff]  }
 0x9fb   : > { %12702 = vmatprep.subr.bf16.mxu1 %v19048_v44  ;;  %v19102_v44 = vld [vmem:[#allocation15 + $0xe8c] ss:$16 sps:$4 sm:$0xff]  }
 0x9fd   : > { %12192 = vmatmul.mubr.bf16.gmra.mrb[172].mxu1 %v22682_v36 }
 0x9fe   : > { %12703 = vmatpush1.bf16.msra.mxu1 %v19046_v46  ;;  %12201 = vmatprep.mubr.bf16.mxu1 %v22682_v36  ;;  %v19100_v46 = vld [vmem:[#allocation15 + $0xe88] ss:$16 sps:$4 sm:$0xff]  }
 0x9ff   : > { %12704 = vmatprep.subr.bf16.mxu1 %v19051_v34  ;;  %v19108_v34 = vld [vmem:[#allocation15 + $0xeac] ss:$16 sps:$4 sm:$0xff]  }
 0xa02   : > { %12705 = vmatpush1.bf16.msra.mxu1 %v19049_v12  ;;  %v19106_v12 = vld [vmem:[#allocation15 + $0xea8] ss:$16 sps:$4 sm:$0xff]  }
 0xa03   : > { %12706 = vmatprep.subr.bf16.mxu1 %v19054_v45  ;;  %v19114_v45 = vld [vmem:[#allocation15 + $0xecc] ss:$16 sps:$4 sm:$0xff]  }
 0xa05   : > { %12202 = vmatmul.mubr.bf16.gmra.mrb[176].mxu1 %v22682_v36 }
 0xa06   : > { %12707 = vmatpush1.bf16.msra.mxu1 %v19052_v51  ;;  %12211 = vmatprep.mubr.bf16.mxu1 %v22682_v36  ;;  %v19112_v51 = vld [vmem:[#allocation15 + $0xec8] ss:$16 sps:$4 sm:$0xff]  }
 0xa07   : > { %12708 = vmatprep.subr.bf16.mxu1 %v19057_v7  ;;  %v19120_v7 = vld [vmem:[#allocation15 + $0xeec] ss:$16 sps:$4 sm:$0xff]  }
 0xa0a   : > { %12709 = vmatpush1.bf16.msra.mxu1 %v19055_v26  ;;  %v19118_v26 = vld [vmem:[#allocation15 + $0xee8] ss:$16 sps:$4 sm:$0xff]  }
 0xa0b   : > { %12710 = vmatprep.subr.bf16.mxu1 %v19060_v11  ;;  %v19126_v11 = vld [vmem:[#allocation15 + $0xf0c] ss:$16 sps:$4 sm:$0xff]  }
 0xa0d   : > { %12212 = vmatmul.mubr.bf16.gmra.mrb[180].mxu1 %v22682_v36 }
 0xa0e   : > { %12711 = vmatpush1.bf16.msra.mxu1 %v19058_v41  ;;  %12221 = vmatprep.mubr.bf16.mxu1 %v22682_v36  ;;  %v19124_v41 = vld [vmem:[#allocation15 + $0xf08] ss:$16 sps:$4 sm:$0xff]  }
 0xa0f   : > { %12712 = vmatprep.subr.bf16.mxu1 %v19063_v37  ;;  %v19132_v37 = vld [vmem:[#allocation15 + $0xf2c] ss:$16 sps:$4 sm:$0xff]  }
 0xa12   : > { %12713 = vmatpush1.bf16.msra.mxu1 %v19061_v19  ;;  %v19130_v19 = vld [vmem:[#allocation15 + $0xf28] ss:$16 sps:$4 sm:$0xff]  }
 0xa13   : > { %12714 = vmatprep.subr.bf16.mxu1 %v19066_v32  ;;  %v19138_v32 = vld [vmem:[#allocation15 + $0xf4c] ss:$16 sps:$4 sm:$0xff]  }
 0xa15   : > { %12222 = vmatmul.mubr.bf16.gmra.mrb[184].mxu1 %v22682_v36 }
 0xa16   : > { %12715 = vmatpush1.bf16.msra.mxu1 %v19064_v5  ;;  %12231 = vmatprep.mubr.bf16.mxu1 %v22682_v36  ;;  %v19136_v5 = vld [vmem:[#allocation15 + $0xf48] ss:$16 sps:$4 sm:$0xff]  }
 0xa17   : > { %12716 = vmatprep.subr.bf16.mxu1 %v19069_v43  ;;  %v19144_v43 = vld [vmem:[#allocation15 + $0xf6c] ss:$16 sps:$4 sm:$0xff]  }
 0xa1a   : > { %12717 = vmatpush1.bf16.msra.mxu1 %v19067_v29  ;;  %v19142_v29 = vld [vmem:[#allocation15 + $0xf68] ss:$16 sps:$4 sm:$0xff]  }
 0xa1b   : > { %12718 = vmatprep.subr.bf16.mxu1 %v19072_v23  ;;  %v19150_v23 = vld [vmem:[#allocation15 + $0xf8c] ss:$16 sps:$4 sm:$0xff]  }
 0xa1d   : > { %12232 = vmatmul.mubr.bf16.gmra.mrb[188].mxu1 %v22682_v36 }
 0xa1e   : > { %12719 = vmatpush1.bf16.msra.mxu1 %v19070_v27  ;;  %12722 = vmatprep.mubr.bf16.mxu1 %v22682_v36  ;;  %v19148_v27 = vld [vmem:[#allocation15 + $0xf88] ss:$16 sps:$4 sm:$0xff]  }
 0xa1f   : > { %12720 = vmatprep.subr.bf16.mxu1 %v19075_v17  ;;  %v19156_v17 = vld [vmem:[#allocation15 + $0xfac] ss:$16 sps:$4 sm:$0xff]  }
 0xa22   : > { %12721 = vmatpush1.bf16.msra.mxu1 %v19073_v63  ;;  %v19154_v63 = vld [vmem:[#allocation15 + $0xfa8] ss:$16 sps:$4 sm:$0xff]  }
 0xa23   : > { %12803 = vmatprep.subr.bf16.mxu1 %v19078_v20  ;;  %v19162_v20 = vld [vmem:[#allocation15 + $0xfcc] ss:$16 sps:$4 sm:$0xff]  }
 0xa25   : > { %12723 = vmatmul.mubr.bf16.vlgmr.msra.gmra.mrb[128].mxu1 %v22682_v36 }
 0xa26   : > { %12804 = vmatpush1.bf16.msra.mxu1 %v19076_v8  ;;  %12732 = vmatprep.mubr.bf16.mxu1 %v22682_v36  ;;  %v19160_v8 = vld [vmem:[#allocation15 + $0xfc8] ss:$16 sps:$4 sm:$0xff]  }
 0xa27   : > { %12805 = vmatprep.subr.bf16.mxu1 %v19084_v48  ;;  %v19168_v48 = vld [vmem:[#allocation15 + $0xfec] ss:$16 sps:$4 sm:$0xff]  }
 0xa2a   : > { %12806 = vmatpush1.bf16.msra.mxu1 %v19082_v61  ;;  %v19166_v61 = vld [vmem:[#allocation15 + $0xfe8] ss:$16 sps:$4 sm:$0xff]  }
 0xa2b   : > { %12807 = vmatprep.subr.bf16.mxu1 %v19090_v16  ;;  %v19174_v16 = vld [vmem:[#allocation15 + $0x1004] ss:$16 sps:$4 sm:$0xff]  }
 0xa2d   : > { %12733 = vmatmul.mubr.bf16.gmra.mrb[132].mxu1 %v22682_v36 }
 0xa2e   : > { %12808 = vmatpush1.bf16.msra.mxu1 %v19088_v49  ;;  %12742 = vmatprep.mubr.bf16.mxu1 %v22682_v36  ;;  %v19172_v49 = vld [vmem:[#allocation15 + $0x1000] ss:$16 sps:$4 sm:$0xff]  }
 0xa2f   : > { %12809 = vmatprep.subr.bf16.mxu1 %v19096_v25  ;;  %v19177_v25 = vld [vmem:[#allocation15 + $0x1024] ss:$16 sps:$4 sm:$0xff]  }
 0xa32   : > { %12810 = vmatpush1.bf16.msra.mxu1 %v19094_v22  ;;  %v19175_v22 = vld [vmem:[#allocation15 + $0x1020] ss:$16 sps:$4 sm:$0xff]  }
 0xa33   : > { %12811 = vmatprep.subr.bf16.mxu1 %v19102_v44  ;;  %v19180_v44 = vld [vmem:[#allocation15 + $0x1044] ss:$16 sps:$4 sm:$0xff]  }
 0xa35   : > { %12743 = vmatmul.mubr.bf16.gmra.mrb[136].mxu1 %v22682_v36 }
 0xa36   : > { %12812 = vmatpush1.bf16.msra.mxu1 %v19100_v46  ;;  %12752 = vmatprep.mubr.bf16.mxu1 %v22682_v36  ;;  %v19178_v46 = vld [vmem:[#allocation15 + $0x1040] ss:$16 sps:$4 sm:$0xff]  }
 0xa37   : > { %12813 = vmatprep.subr.bf16.mxu1 %v19108_v34  ;;  %v19183_v34 = vld [vmem:[#allocation15 + $0x1064] ss:$16 sps:$4 sm:$0xff]  }
 0xa3a   : > { %12814 = vmatpush1.bf16.msra.mxu1 %v19106_v12  ;;  %v19181_v12 = vld [vmem:[#allocation15 + $0x1060] ss:$16 sps:$4 sm:$0xff]  }
 0xa3b   : > { %12815 = vmatprep.subr.bf16.mxu1 %v19114_v45  ;;  %v19186_v45 = vld [vmem:[#allocation15 + $0x1084] ss:$16 sps:$4 sm:$0xff]  }
 0xa3d   : > { %12753 = vmatmul.mubr.bf16.gmra.mrb[140].mxu1 %v22682_v36 }
 0xa3e   : > { %12816 = vmatpush1.bf16.msra.mxu1 %v19112_v51  ;;  %12762 = vmatprep.mubr.bf16.mxu1 %v22682_v36  ;;  %v19184_v51 = vld [vmem:[#allocation15 + $0x1080] ss:$16 sps:$4 sm:$0xff]  }
 0xa3f   : > { %12817 = vmatprep.subr.bf16.mxu1 %v19120_v7  ;;  %v19189_v7 = vld [vmem:[#allocation15 + $0x10a4] ss:$16 sps:$4 sm:$0xff]  }
 0xa42   : > { %12818 = vmatpush1.bf16.msra.mxu1 %v19118_v26  ;;  %v19187_v26 = vld [vmem:[#allocation15 + $0x10a0] ss:$16 sps:$4 sm:$0xff]  }
 0xa43   : > { %12819 = vmatprep.subr.bf16.mxu1 %v19126_v11  ;;  %v19192_v11 = vld [vmem:[#allocation15 + $0x10c4] ss:$16 sps:$4 sm:$0xff]  }
 0xa45   : > { %12763 = vmatmul.mubr.bf16.gmra.mrb[144].mxu1 %v22682_v36 }
 0xa46   : > { %12820 = vmatpush1.bf16.msra.mxu1 %v19124_v41  ;;  %12772 = vmatprep.mubr.bf16.mxu1 %v22682_v36  ;;  %v19190_v41 = vld [vmem:[#allocation15 + $0x10c0] ss:$16 sps:$4 sm:$0xff]  }
 0xa47   : > { %12821 = vmatprep.subr.bf16.mxu1 %v19132_v37  ;;  %v19195_v37 = vld [vmem:[#allocation15 + $0x10e4] ss:$16 sps:$4 sm:$0xff]  }
 0xa4a   : > { %12822 = vmatpush1.bf16.msra.mxu1 %v19130_v19  ;;  %v19193_v19 = vld [vmem:[#allocation15 + $0x10e0] ss:$16 sps:$4 sm:$0xff]  }
 0xa4b   : > { %12823 = vmatprep.subr.bf16.mxu1 %v19138_v32  ;;  %v19198_v32 = vld [vmem:[#allocation15 + $0x1104] ss:$16 sps:$4 sm:$0xff]  }
 0xa4d   : > { %12773 = vmatmul.mubr.bf16.gmra.mrb[148].mxu1 %v22682_v36 }
 0xa4e   : > { %12824 = vmatpush1.bf16.msra.mxu1 %v19136_v5  ;;  %12782 = vmatprep.mubr.bf16.mxu1 %v22682_v36  ;;  %v19196_v5 = vld [vmem:[#allocation15 + $0x1100] ss:$16 sps:$4 sm:$0xff]  }
 0xa4f   : > { %12825 = vmatprep.subr.bf16.mxu1 %v19144_v43  ;;  %v19201_v43 = vld [vmem:[#allocation15 + $0x1124] ss:$16 sps:$4 sm:$0xff]  }
 0xa52   : > { %12826 = vmatpush1.bf16.msra.mxu1 %v19142_v29  ;;  %v19199_v29 = vld [vmem:[#allocation15 + $0x1120] ss:$16 sps:$4 sm:$0xff]  }
 0xa53   : > { %12827 = vmatprep.subr.bf16.mxu1 %v19150_v23  ;;  %v19204_v23 = vld [vmem:[#allocation15 + $0x1144] ss:$16 sps:$4 sm:$0xff]  }
 0xa55   : > { %12783 = vmatmul.mubr.bf16.gmra.mrb[152].mxu1 %v22682_v36 }
 0xa56   : > { %12828 = vmatpush1.bf16.msra.mxu1 %v19148_v27  ;;  %12792 = vmatprep.mubr.bf16.mxu1 %v22682_v36  ;;  %v19202_v27 = vld [vmem:[#allocation15 + $0x1140] ss:$16 sps:$4 sm:$0xff]  }
 0xa57   : > { %12829 = vmatprep.subr.bf16.mxu1 %v19156_v17  ;;  %v19207_v17 = vld [vmem:[#allocation15 + $0x1164] ss:$16 sps:$4 sm:$0xff]  }
 0xa5a   : > { %12830 = vmatpush1.bf16.msra.mxu1 %v19154_v63  ;;  %v19205_v63 = vld [vmem:[#allocation15 + $0x1160] ss:$16 sps:$4 sm:$0xff]  }
 0xa5b   : > { %12831 = vmatprep.subr.bf16.mxu1 %v19162_v20  ;;  %v19210_v20 = vld [vmem:[#allocation15 + $0x1184] ss:$16 sps:$4 sm:$0xff]  }
 0xa5d   : > { %12793 = vmatmul.mubr.bf16.gmra.mrb[156].mxu1 %v22682_v36 }
 0xa5e   : > { %12832 = vmatpush1.bf16.msra.mxu1 %v19160_v8  ;;  %12835 = vmatprep.mubr.bf16.mxu1 %v22682_v36  ;;  %v19208_v8 = vld [vmem:[#allocation15 + $0x1180] ss:$16 sps:$4 sm:$0xff]  }
 0xa5f   : > { %12833 = vmatprep.subr.bf16.mxu1 %v19168_v48  ;;  %v19213_v48 = vld [vmem:[#allocation15 + $0x11a4] ss:$16 sps:$4 sm:$0xff]  }
 0xa62   : > { %12834 = vmatpush1.bf16.msra.mxu1 %v19166_v61  ;;  %v19211_v61 = vld [vmem:[#allocation15 + $0x11a0] ss:$16 sps:$4 sm:$0xff]  }
 0xa63   : > { %13364 = vmatprep.subr.bf16.mxu1 %v19174_v16  ;;  %v19216_v16 = vld [vmem:[#allocation15 + $0x11c4] ss:$16 sps:$4 sm:$0xff]  }
 0xa65   : > { %12836 = vmatmul.mubr.bf16.vlgmr.msra.gmra.mrb[160].mxu1 %v22682_v36 }
 0xa66   : > { %13365 = vmatpush1.bf16.msra.mxu1 %v19172_v49  ;;  %12845 = vmatprep.mubr.bf16.mxu1 %v22682_v36  ;;  %v19214_v49 = vld [vmem:[#allocation15 + $0x11c0] ss:$16 sps:$4 sm:$0xff]  }
 0xa67   : > { %13366 = vmatprep.subr.bf16.mxu1 %v19177_v25  ;;  %v19219_v25 = vld [vmem:[#allocation15 + $0x11e4] ss:$16 sps:$4 sm:$0xff]  }
 0xa6a   : > { %13367 = vmatpush1.bf16.msra.mxu1 %v19175_v22  ;;  %v19217_v22 = vld [vmem:[#allocation15 + $0x11e0] ss:$16 sps:$4 sm:$0xff]  }
 0xa6b   : > { %13368 = vmatprep.subr.bf16.mxu1 %v19180_v44  ;;  %v19236_v44 = vld [vmem:[%s22633_s9 + $0xc0] sm:$0xff]  }
 0xa6d   : > { %12846 = vmatmul.mubr.bf16.gmra.mrb[164].mxu1 %v22682_v36 }
 0xa6e   : > { %13369 = vmatpush1.bf16.msra.mxu1 %v19178_v46  ;;  %12855 = vmatprep.mubr.bf16.mxu1 %v22682_v36  ;;  %v13666_v46 = vsub.s32 2, %v21594_v54 }
 0xa6f   : > { %13370 = vmatprep.subr.bf16.mxu1 %v19183_v34  ;;  %v22105_v34 = vld [vmem:[#allocation16] sm:$0xf] }
 0xa72   : > { %13371 = vmatpush1.bf16.msra.mxu1 %v19181_v12  ;;  %v22109_v12 = vrot.slane %v22105_v34, %v13666_v46 }
 0xa73   : > { %13372 = vmatprep.subr.bf16.mxu1 %v19186_v45 }
 0xa75   : > { %12856 = vmatmul.mubr.bf16.gmra.mrb[168].mxu1 %v22682_v36 }
 0xa76   : > { %13373 = vmatpush1.bf16.msra.mxu1 %v19184_v51  ;;  %12865 = vmatprep.mubr.bf16.mxu1 %v22682_v36 }
 0xa77   : > { %13374 = vmatprep.subr.bf16.mxu1 %v19189_v7 }
 0xa7a   : > { %13375 = vmatpush1.bf16.msra.mxu1 %v19187_v26 }
 0xa7b   : > { %13376 = vmatprep.subr.bf16.mxu1 %v19192_v11 }
 0xa7d   : > { %12866 = vmatmul.mubr.bf16.gmra.mrb[172].mxu1 %v22682_v36 }
 0xa7e   : > { %13377 = vmatpush1.bf16.msra.mxu1 %v19190_v41  ;;  %12875 = vmatprep.mubr.bf16.mxu1 %v22682_v36 }
 0xa7f   : > { %13378 = vmatprep.subr.bf16.mxu1 %v19195_v37 }
 0xa82   : > { %13379 = vmatpush1.bf16.msra.mxu1 %v19193_v19 }
 0xa83   : > { %13380 = vmatprep.subr.bf16.mxu1 %v19198_v32 }
 0xa85   : > { %12876 = vmatmul.mubr.bf16.gmra.mrb[176].mxu1 %v22682_v36 }
 0xa86   : > { %13381 = vmatpush1.bf16.msra.mxu1 %v19196_v5  ;;  %12885 = vmatprep.mubr.bf16.mxu1 %v22682_v36 }
 0xa87   : > { %13382 = vmatprep.subr.bf16.mxu1 %v19201_v43 }
 0xa8a   : > { %13383 = vmatpush1.bf16.msra.mxu1 %v19199_v29 }
 0xa8b   : > { %13384 = vmatprep.subr.bf16.mxu1 %v19204_v23 }
 0xa8d   : > { %12886 = vmatmul.mubr.bf16.gmra.mrb[180].mxu1 %v22682_v36 }
 0xa8e   : > { %13385 = vmatpush1.bf16.msra.mxu1 %v19202_v27  ;;  %12895 = vmatprep.mubr.bf16.mxu1 %v22682_v36 }
 0xa8f   : > { %13386 = vmatprep.subr.bf16.mxu1 %v19207_v17 }
 0xa92   : > { %13387 = vmatpush1.bf16.msra.mxu1 %v19205_v63 }
 0xa93   : > { %13388 = vmatprep.subr.bf16.mxu1 %v19210_v20 }
 0xa95   : > { %12896 = vmatmul.mubr.bf16.gmra.mrb[184].mxu1 %v22682_v36 }
 0xa96   : > { %13389 = vmatpush1.bf16.msra.mxu1 %v19208_v8  ;;  %12905 = vmatprep.mubr.bf16.mxu1 %v22682_v36 }
 0xa97   : > { %13390 = vmatprep.subr.bf16.mxu1 %v19213_v48 }
 0xa9a   : > { %13391 = vmatpush1.bf16.msra.mxu1 %v19211_v61 }
 0xa9b   : > { %13392 = vmatprep.subr.bf16.mxu1 %v19216_v16 }
 0xa9d   : > { %12906 = vmatmul.mubr.bf16.gmra.mrb[188].mxu1 %v22682_v36 }
 0xa9e   : > { %13393 = vmatpush1.bf16.msra.mxu1 %v19214_v49  ;;  %13396 = vmatprep.mubr.bf16.mxu1 %v22682_v36 }
 0xa9f   : > { %13394 = vmatprep.subr.bf16.mxu1 %v19219_v25 }
 0xaa2   : > { %13395 = vmatpush1.bf16.msra.mxu1 %v19217_v22 }
 0xaa3   : > { %16492 = vmatprep.subr.bf16.mxu1 %v21799_v53 }
 0xaa5   : > { %13397 = vmatmul.mubr.bf16.vlgmr.msra.gmra.mrb[128].mxu1 %v22682_v36 }
 0xaa6   : > { %16508 = vmatpush1.bf16.msra.mxu1 %v21801_v14  ;;  %13406 = vmatprep.mubr.bf16.mxu1 %v22682_v36 }
 0xaa7   : > { %16493 = vmatprep.subr.bf16.mxu1 %v21807_v35 }
 0xaaa   : > { %16509 = vmatpush1.bf16.msra.mxu1 %v21809_v9  ;;  %v21984_v53 = vpop.f32.mrb[128].mxu0 }
 0xaab   : > { %16494 = vmatprep.subr.bf16.mxu1 %v21813_v18  ;;  %v21987_v14 = vpop.f32.mrb[129].mxu0 }
 0xaac   : > { %v21989_v35 = vpop.f32.mrb[130].mxu0 }
 0xaad   : > { %13407 = vmatmul.mubr.bf16.gmra.mrb[132].mxu1 %v22682_v36  ;;  %v21992_v9 = vpop.f32.mrb[131].mxu0 }
 0xaae   : > { %16510 = vmatpush1.bf16.msra.mxu1 %v21815_v13  ;;  %13416 = vmatprep.mubr.bf16.mxu1 %v22682_v36 }
 0xaaf   : > { %16495 = vmatprep.subr.bf16.mxu1 %v21821_v55 }
 0xab2   : > { %16511 = vmatpush1.bf16.msra.mxu1 %v21823_v28  ;;  %v21998_v18 = vpop.f32.mrb[132].mxu0 }
 0xab3   : > { %16496 = vmatprep.subr.bf16.mxu1 %v21827_v62  ;;  %v22001_v13 = vpop.f32.mrb[133].mxu0 }
 0xab4   : > { %v22003_v55 = vpop.f32.mrb[134].mxu0 }
 0xab5   : > { %13417 = vmatmul.mubr.bf16.gmra.mrb[136].mxu1 %v22682_v36  ;;  %v22006_v28 = vpop.f32.mrb[135].mxu0 }
 0xab6   : > { %16512 = vmatpush1.bf16.msra.mxu1 %v21829_v47  ;;  %13426 = vmatprep.mubr.bf16.mxu1 %v22682_v36 }
 0xab7   : > { %16497 = vmatprep.subr.bf16.mxu1 %v21835_v52 }
 0xaba   : > { %16513 = vmatpush1.bf16.msra.mxu1 %v21837_v0  ;;  %v22012_v62 = vpop.f32.mrb[136].mxu0 }
 0xabb   : > { %16498 = vmatprep.subr.bf16.mxu1 %v21841_v6  ;;  %v22015_v47 = vpop.f32.mrb[137].mxu0 }
 0xabc   : > { %v22017_v52 = vpop.f32.mrb[138].mxu0 }
 0xabd   : > { %13427 = vmatmul.mubr.bf16.gmra.mrb[140].mxu1 %v22682_v36  ;;  %v22020_v0 = vpop.f32.mrb[139].mxu0 }
 0xabe   : > { %16514 = vmatpush1.bf16.msra.mxu1 %v21843_v2  ;;  %13436 = vmatprep.mubr.bf16.mxu1 %v22682_v36 }
 0xabf   : > { %16499 = vmatprep.subr.bf16.mxu1 %v21849_v3 }
 0xac2   : > { %16515 = vmatpush1.bf16.msra.mxu1 %v21851_v38  ;;  %v22026_v6 = vpop.f32.mrb[140].mxu0 }
 0xac3   : > { %16500 = vmatprep.subr.bf16.mxu1 %v21855_v31  ;;  %v22029_v2 = vpop.f32.mrb[141].mxu0  ;;  %v19220_v31 = vld [vmem:[%s22633_s9 + $0x40] sm:$0xff]  }
 0xac4   : > { %v22031_v3 = vpop.f32.mrb[142].mxu0  ;;  %16154 = vmatprep.subr.bf16.mxu0 %v19220_v31 }
 0xac5   : > { %13437 = vmatmul.mubr.bf16.gmra.mrb[144].mxu1 %v22682_v36  ;;  %v22034_v38 = vpop.f32.mrb[143].mxu0 }
 0xac6   : > { %16516 = vmatpush1.bf16.msra.mxu1 %v21857_v39  ;;  %13446 = vmatprep.mubr.bf16.mxu1 %v22682_v36  ;;  %v19221_v39 = vld [vmem:[%s22633_s9] sm:$0xff]  }
 0xac7   : > { %16501 = vmatprep.subr.bf16.mxu1 %v21863_v1  ;;  %v19222_v1 = vld [vmem:[%s22633_s9 + $0x48] sm:$0xff]   ;;  %16155 = vmatpush3.bf16.msra.mxu0 %v19221_v39 }
 0xac8   : > { %16156 = vmatprep.subr.bf16.mxu0 %v19222_v1 }
 0xaca   : > { %16517 = vmatpush1.bf16.msra.mxu1 %v21865_v24  ;;  %v19223_v24 = vld [vmem:[%s22633_s9 + $0x8] sm:$0xff]  }
 0xacb   : > { %16502 = vmatprep.subr.bf16.mxu1 %v21869_v60  ;;  %v19224_v60 = vld [vmem:[%s22633_s9 + $0x50] sm:$0xff]   ;;  %16157 = vmatpush3.bf16.msra.mxu0 %v19223_v24 }
 0xacc   : > { %16158 = vmatprep.subr.bf16.mxu0 %v19224_v60 }
 0xacd   : > { %13447 = vmatmul.mubr.bf16.gmra.mrb[148].mxu1 %v22682_v36 }
 0xace   : > { %16518 = vmatpush1.bf16.msra.mxu1 %v21871_v15  ;;  %13456 = vmatprep.mubr.bf16.mxu1 %v22682_v36  ;;  %v19225_v15 = vld [vmem:[%s22633_s9 + $0x10] sm:$0xff]  }
 0xacf   : > { %16503 = vmatprep.subr.bf16.mxu1 %v21877_v21  ;;  %v19226_v21 = vld [vmem:[%s22633_s9 + $0x58] sm:$0xff]   ;;  %16159 = vmatpush3.bf16.msra.mxu0 %v19225_v15 }
 0xad0   : > { %16160 = vmatprep.subr.bf16.mxu0 %v19226_v21 }
 0xad2   : > { %16519 = vmatpush1.bf16.msra.mxu1 %v21879_v59  ;;  %v19227_v59 = vld [vmem:[%s22633_s9 + $0x18] sm:$0xff]  }
 0xad3   : > { %16504 = vmatprep.subr.bf16.mxu1 %v21883_v57  ;;  %v19228_v57 = vld [vmem:[%s22633_s9 + $0x60] sm:$0xff]   ;;  %16161 = vmatpush3.bf16.msra.mxu0 %v19227_v59 }
 0xad4   : > { %16162 = vmatprep.subr.bf16.mxu0 %v19228_v57 }
 0xad5   : > { %13457 = vmatmul.mubr.bf16.gmra.mrb[152].mxu1 %v22682_v36 }
 0xad6   : > { %16520 = vmatpush1.bf16.msra.mxu1 %v21885_v40  ;;  %13466 = vmatprep.mubr.bf16.mxu1 %v22682_v36  ;;  %v19229_v40 = vld [vmem:[%s22633_s9 + $0x20] sm:$0xff]  }
 0xad7   : > { %16505 = vmatprep.subr.bf16.mxu1 %v21891_v50  ;;  %v19230_v50 = vld [vmem:[%s22633_s9 + $0x68] sm:$0xff]   ;;  %16163 = vmatpush3.bf16.msra.mxu0 %v19229_v40 }
 0xad8   : > { %16164 = vmatprep.subr.bf16.mxu0 %v19230_v50 }
 0xada   : > { %16521 = vmatpush1.bf16.msra.mxu1 %v21893_v33  ;;  %v19231_v33 = vld [vmem:[%s22633_s9 + $0x28] sm:$0xff]  }
 0xadb   : > { %16506 = vmatprep.subr.bf16.mxu1 %v21897_v42  ;;  %16165 = vmatpush3.bf16.msra.mxu0 %v19231_v33  ;;  %v19232_v42 = vld [vmem:[%s22633_s9 + $0x70] sm:$0xff]  }
 0xadc   : > { %16166 = vmatprep.subr.bf16.mxu0 %v19232_v42 }
 0xadd   : > { %13467 = vmatmul.mubr.bf16.gmra.mrb[156].mxu1 %v22682_v36 }
 0xade   : > { %16522 = vmatpush1.bf16.msra.mxu1 %v21899_v56  ;;  %13549 = vmatprep.mubr.bf16.mxu1 %v22682_v36  ;;  %v19233_v56 = vld [vmem:[%s22633_s9 + $0x30] sm:$0xff]  }
 0xadf   : > { %16507 = vmatprep.subr.bf16.mxu1 %v21905_v10  ;;  %16167 = vmatpush3.bf16.msra.mxu0 %v19233_v56  ;;  %v19234_v10 = vld [vmem:[%s22633_s9 + $0x78] sm:$0xff]  }
 0xae0   : > { %16168 = vmatprep.subr.bf16.mxu0 %v19234_v10 }
 0xae2   : > { %16523 = vmatpush1.bf16.msra.mxu1 %v21907_v58  ;;  %v19235_v58 = vld [vmem:[%s22633_s9 + $0x38] sm:$0xff]  }
 0xae3   : > { %16169 = vmatpush3.bf16.msra.mxu0 %v19235_v58 }
 0xae4   : > { %16218 = vmatprep.subr.bf16.mxu0 %v19236_v44 }
 0xae5   : > { %13550 = vmatmul.mubr.bf16.vlgmr.msra.gmra.mrb[176].mxu1 %v22682_v36 }
 0xae6   : > { %13559 = vmatprep.mubr.bf16.mxu1 %v22682_v36 }
 0xaed   : > { %13560 = vmatmul.mubr.bf16.gmra.mrb[180].mxu1 %v22682_v36 }
 0xaee   : > { %13569 = vmatprep.mubr.bf16.mxu1 %v22682_v36 }
 0xaf5   : > { %13570 = vmatmul.mubr.bf16.gmra.mrb[184].mxu1 %v22682_v36 }
 0xaf6   : > { %13579 = vmatprep.mubr.bf16.mxu1 %v22682_v36 }
 0xafd   : > { %13580 = vmatmul.mubr.bf16.gmra.mrb[188].mxu1 %v22682_v36  ;;  %v13670_v36 = vsub.s32 3, %v21594_v54 }
 0xaff   : > { %v22112_v51 = vrot.slane %v22105_v34, %v13670_v36 }
 0xb38   : > { %v12837_v45 = vpop.f32.mrb[160].mxu1 }
 0xb39   : > { %v16652_v7 = vadd.f32 %v21984_v53, %v12837_v45  ;;  %v12839_v26 = vpop.f32.mrb[161].mxu1 }
 0xb3a   : > { %v16653_v11 = vadd.f32 %v21987_v14, %v12839_v26  ;;  %v12841_v41 = vpop.f32.mrb[162].mxu1 }
 0xb3b   : > { %v13678_v37 = vadd.f32 %v16652_v7, %v22109_v12  ;;  %v16654_v19 = vadd.f32 %v21989_v35, %v12841_v41  ;;  %v12843_v32 = vpop.f32.mrb[163].mxu1 }
 0xb3c   : > { %v13679_v5 = vadd.f32 %v16653_v11, %v22112_v51  ;;  %v16655_v43 = vadd.f32 %v21992_v9, %v12843_v32 }
 0xb3d   : > { %v13682_v29 = vadd.f32 %v16654_v19, %v22109_v12  ;;  %v13742_v27 = vmax.f32 %v13678_v37, 0.0 }
 0xb3e   : > { %v13683_v23 = vadd.f32 %v16655_v43, %v22112_v51  ;;  %v13743_v63 = vmax.f32 %v13679_v5, 0.0 }
 0xb3f   : > { %v13746_v17 = vmax.f32 %v13682_v29, 0.0 }
 0xb40   : > { %v13747_v20 = vmax.f32 %v13683_v23, 0.0  ;;  %v12847_v8 = vpop.f32.mrb[164].mxu1 }
 0xb41   : > { %v22122_v48 = vpack.c.bf16 %v13746_v17, %v13742_v27  ;;  %v16656_v61 = vadd.f32 %v21998_v18, %v12847_v8  ;;  %v12849_v16 = vpop.f32.mrb[165].mxu1 }
 0xb42   : > { %v16657_v49 = vadd.f32 %v22001_v13, %v12849_v16  ;;  %v12851_v25 = vpop.f32.mrb[166].mxu1  ;;  %v22126_v22 = vpack.c.bf16 %v13747_v20, %v13743_v63 }
 0xb43   : > { %v13686_v53 = vadd.f32 %v16656_v61, %v22109_v12  ;;  %v16658_v14 = vadd.f32 %v22003_v55, %v12851_v25  ;;  %v12853_v35 = vpop.f32.mrb[167].mxu1 }
 0xb44   : > { %v13687_v9 = vadd.f32 %v16657_v49, %v22112_v51  ;;  %v16659_v31 = vadd.f32 %v22006_v28, %v12853_v35 }
 0xb45   : > { %v13690_v39 = vadd.f32 %v16658_v14, %v22109_v12  ;;  %v13750_v18 = vmax.f32 %v13686_v53, 0.0 }
 0xb46   : > { %v13691_v1 = vadd.f32 %v16659_v31, %v22112_v51  ;;  %v13751_v60 = vmax.f32 %v13687_v9, 0.0 }
 0xb47   : > { %v13754_v24 = vmax.f32 %v13690_v39, 0.0 }
 0xb48   : > { %v13755_v13 = vmax.f32 %v13691_v1, 0.0  ;;  %v12857_v15 = vpop.f32.mrb[168].mxu1 }
 0xb49   : > { %v22134_v21 = vpack.c.bf16 %v13754_v24, %v13750_v18  ;;  %v16660_v59 = vadd.f32 %v22012_v62, %v12857_v15  ;;  %v12859_v57 = vpop.f32.mrb[169].mxu1 }
 0xb4a   : > { %v16661_v55 = vadd.f32 %v22015_v47, %v12859_v57  ;;  %v12861_v40 = vpop.f32.mrb[170].mxu1  ;;  %v22138_v50 = vpack.c.bf16 %v13755_v13, %v13751_v60  ;;  %v19238_v60 = vld [vmem:[%s22633_s9 + $0xc8] sm:$0xff]  }
 0xb4b   : > { %v13694_v28 = vadd.f32 %v16660_v59, %v22109_v12  ;;  %v16662_v33 = vadd.f32 %v22017_v52, %v12861_v40  ;;  %v12863_v42 = vpop.f32.mrb[171].mxu1  ;;  %v19239_v40 = vld [vmem:[%s22633_s9 + $0x88] sm:$0xff]  }
 0xb4c   : > { %v13695_v56 = vadd.f32 %v16661_v55, %v22112_v51  ;;  %v16663_v10 = vadd.f32 %v22020_v0, %v12863_v42  ;;  %v19240_v42 = vld [vmem:[%s22633_s9 + $0xd0] sm:$0xff]  }
 0xb4d   : > { %v13698_v58 = vadd.f32 %v16662_v33, %v22109_v12  ;;  %v13758_v62 = vmax.f32 %v13694_v28, 0.0 }
 0xb4e   : > { %v13699_v44 = vadd.f32 %v16663_v10, %v22112_v51  ;;  %v13759_v36 = vmax.f32 %v13695_v56, 0.0 }
 0xb4f   : > { %v13762_v46 = vmax.f32 %v13698_v58, 0.0 }
 0xb50   : > { %v13763_v47 = vmax.f32 %v13699_v44, 0.0  ;;  %v12867_v45 = vpop.f32.mrb[172].mxu1 }
 0xb51   : > { %v22146_v7 = vpack.c.bf16 %v13762_v46, %v13758_v62  ;;  %v16664_v26 = vadd.f32 %v22026_v6, %v12867_v45  ;;  %v12869_v11 = vpop.f32.mrb[173].mxu1  ;;  %v19241_v46 = vld [vmem:[%s22633_s9 + $0x90] sm:$0xff]   ;;  %v19242_v45 = vld [vmem:[%s22633_s9 + $0xd8] sm:$0xff]  }
 0xb52   : > { %v16665_v52 = vadd.f32 %v22029_v2, %v12869_v11  ;;  %v12871_v41 = vpop.f32.mrb[174].mxu1  ;;  %v22150_v37 = vpack.c.bf16 %v13763_v47, %v13759_v36 }
 0xb53   : > { %v13702_v0 = vadd.f32 %v16664_v26, %v22109_v12  ;;  %v16666_v19 = vadd.f32 %v22031_v3, %v12871_v41  ;;  %v12873_v32 = vpop.f32.mrb[175].mxu1  ;;  %v22165_v3 = vrot.slane %v22105_v34, %v7242_v4 }
 0xb54   : > { %v13703_v5 = vadd.f32 %v16665_v52, %v22112_v51  ;;  %v16667_v43 = vadd.f32 %v22034_v38, %v12873_v32  ;;  %v22170_v38 = vrot.slane %v22105_v34, %v7246_v30  ;;  %v19237_v34 = vld [vmem:[%s22633_s9 + $0x80] sm:$0xff]  }
 0xb55   : > { %v13706_v29 = vadd.f32 %v16666_v19, %v22109_v12  ;;  %v13766_v6 = vmax.f32 %v13702_v0, 0.0  ;;  %v19243_v19 = vld [vmem:[%s22633_s9 + $0x98] sm:$0xff]  }
 0xb56   : > { %v13707_v23 = vadd.f32 %v16667_v43, %v22112_v51  ;;  %v13767_v17 = vmax.f32 %v13703_v5, 0.0  ;;  %v19244_v43 = vld [vmem:[%s22633_s9 + $0xe0] sm:$0xff]  }
 0xb57   : > { %v13770_v27 = vmax.f32 %v13706_v29, 0.0 }
 0xb58   : > { %v13771_v2 = vmax.f32 %v13707_v23, 0.0 }
 0xb59   : > { %v22158_v63 = vpack.c.bf16 %v13770_v27, %v13766_v6 }
 0xb5a   : > { %v22160_v20 = vpack.c.bf16 %v13771_v2, %v13767_v17  ;;  %v19245_v2 = vld [vmem:[%s22633_s9 + $0xa0] sm:$0xff]  }
 0xb78   : > { %v13398_v8 = vpop.f32.mrb[128].mxu1 }
 0xb79   : > { %v13676_v61 = vadd.f32 %v22165_v3, %v13398_v8  ;;  %v13400_v16 = vpop.f32.mrb[129].mxu1 }
 0xb7a   : > { %v13677_v49 = vadd.f32 %v22170_v38, %v13400_v16  ;;  %v13402_v25 = vpop.f32.mrb[130].mxu1  ;;  %v19246_v16 = vld [vmem:[%s22633_s9 + $0xe8] sm:$0xff]  }
 0xb7b   : > { %v13680_v53 = vadd.f32 %v22165_v3, %v13402_v25  ;;  %v13404_v14 = vpop.f32.mrb[131].mxu1  ;;  %v13740_v9 = vmax.f32 %v13676_v61, 0.0 }
 0xb7c   : > { %v13681_v35 = vadd.f32 %v22170_v38, %v13404_v14  ;;  %v13741_v31 = vmax.f32 %v13677_v49, 0.0 }
 0xb7d   : > { %v13744_v4 = vmax.f32 %v13680_v53, 0.0 }
 0xb7e   : > { %v13745_v39 = vmax.f32 %v13681_v35, 0.0 }
 0xb7f   : > { %v13868_v54 = vpack.c.bf16 %v13744_v4, %v13740_v9  ;;  %v19247_v9 = vld [vmem:[%s22633_s9 + $0xa8] sm:$0xff]  }
 0xb80   : > { %v13869_v1 = vpack.c.bf16 %v13745_v39, %v13741_v31  ;;  %v13408_v30 = vpop.f32.mrb[132].mxu1  ;;  %v19248_v39 = vld [vmem:[%s22633_s9 + $0xf0] sm:$0xff]  }
 0xb81   : > { %v13684_v18 = vadd.f32 %v22165_v3, %v13408_v30  ;;  %v13410_v24 = vpop.f32.mrb[133].mxu1 }
 0xb82   : > { %v13685_v13 = vadd.f32 %v22170_v38, %v13410_v24  ;;  %v13412_v15 = vpop.f32.mrb[134].mxu1  ;;  %14188 = vmatprep.mubr.bf16.mxu0 %v13869_v1  ;;  %v19249_v24 = vld [vmem:[%s22633_s9 + $0xb0] sm:$0xff]  }
 0xb83   : > { %v13688_v59 = vadd.f32 %v22165_v3, %v13412_v15  ;;  %v13414_v57 = vpop.f32.mrb[135].mxu1  ;;  %14189 = vmatmul.mubr.bf16.vlgmr.msra.gmra.mrb[144].mxu0 %v13868_v54  ;;  %v13748_v28 = vmax.f32 %v13684_v18, 0.0  ;;  %v19250_v15 = vld [vmem:[%s22633_s9 + $0xf8] sm:$0xff]  }
 0xb84   : > { %v13689_v55 = vadd.f32 %v22170_v38, %v13414_v57  ;;  %16219 = vmatpush3.bf16.msra.mxu0 %v19237_v34  ;;  %v13749_v56 = vmax.f32 %v13685_v13, 0.0 }
 0xb85   : > { %v13752_v33 = vmax.f32 %v13688_v59, 0.0  ;;  %16220 = vmatprep.subr.bf16.mxu0 %v19238_v60 }
 0xb86   : > { %v13753_v10 = vmax.f32 %v13689_v55, 0.0 }
 0xb87   : > { %v13872_v58 = vpack.c.bf16 %v13752_v33, %v13748_v28  ;;  %v19251_v33 = vld [vmem:[%s22633_s9 + $0xb8] sm:$0xff]  }
 0xb88   : > { %v13873_v44 = vpack.c.bf16 %v13753_v10, %v13749_v56  ;;  %v13418_v62 = vpop.f32.mrb[136].mxu1  ;;  %16221 = vmatpush3.bf16.msra.mxu0 %v19239_v40 }
 0xb89   : > { %v13692_v36 = vadd.f32 %v22165_v3, %v13418_v62  ;;  %v13420_v47 = vpop.f32.mrb[137].mxu1  ;;  %16222 = vmatprep.subr.bf16.mxu0 %v19240_v42 }
 0xb8a   : > { %v13693_v26 = vadd.f32 %v22170_v38, %v13420_v47  ;;  %v13422_v11 = vpop.f32.mrb[138].mxu1  ;;  %14196 = vmatprep.mubr.bf16.mxu0 %v13873_v44 }
 0xb8b   : > { %v13696_v52 = vadd.f32 %v22165_v3, %v13422_v11  ;;  %v13424_v41 = vpop.f32.mrb[139].mxu1  ;;  %14197 = vmatmul.mubr.bf16.gmra.mrb[148].mxu0 %v13872_v58  ;;  %v13756_v32 = vmax.f32 %v13692_v36, 0.0 }
 0xb8c   : > { %v13697_v0 = vadd.f32 %v22170_v38, %v13424_v41  ;;  %16223 = vmatpush3.bf16.msra.mxu0 %v19241_v46  ;;  %v13757_v29 = vmax.f32 %v13693_v26, 0.0 }
 0xb8d   : > { %v13760_v5 = vmax.f32 %v13696_v52, 0.0  ;;  %16224 = vmatprep.subr.bf16.mxu0 %v19242_v45 }
 0xb8e   : > { %v13761_v23 = vmax.f32 %v13697_v0, 0.0 }
 0xb8f   : > { %v13876_v6 = vpack.c.bf16 %v13760_v5, %v13756_v32 }
 0xb90   : > { %v13877_v27 = vpack.c.bf16 %v13761_v23, %v13757_v29  ;;  %v13428_v17 = vpop.f32.mrb[140].mxu1  ;;  %16225 = vmatpush3.bf16.msra.mxu0 %v19243_v19 }
 0xb91   : > { %v13700_v8 = vadd.f32 %v22165_v3, %v13428_v17  ;;  %v13430_v61 = vpop.f32.mrb[141].mxu1  ;;  %16226 = vmatprep.subr.bf16.mxu0 %v19244_v43 }
 0xb92   : > { %v13701_v49 = vadd.f32 %v22170_v38, %v13430_v61  ;;  %v13432_v25 = vpop.f32.mrb[142].mxu1  ;;  %14204 = vmatprep.mubr.bf16.mxu0 %v13877_v27 }
 0xb93   : > { %v13704_v53 = vadd.f32 %v22165_v3, %v13432_v25  ;;  %v13434_v14 = vpop.f32.mrb[143].mxu1  ;;  %14205 = vmatmul.mubr.bf16.gmra.mrb[152].mxu0 %v13876_v6  ;;  %v13764_v4 = vmax.f32 %v13700_v8, 0.0 }
 0xb94   : > { %v13705_v35 = vadd.f32 %v22170_v38, %v13434_v14  ;;  %16227 = vmatpush3.bf16.msra.mxu0 %v19245_v2  ;;  %v13765_v54 = vmax.f32 %v13701_v49, 0.0 }
 0xb95   : > { %v13768_v31 = vmax.f32 %v13704_v53, 0.0  ;;  %16228 = vmatprep.subr.bf16.mxu0 %v19246_v16 }
 0xb96   : > { %v13769_v1 = vmax.f32 %v13705_v35, 0.0 }
 0xb97   : > { %v13880_v30 = vpack.c.bf16 %v13768_v31, %v13764_v4 }
 0xb98   : > { %v13881_v34 = vpack.c.bf16 %v13769_v1, %v13765_v54  ;;  %v13438_v18 = vpop.f32.mrb[144].mxu1  ;;  %16229 = vmatpush3.bf16.msra.mxu0 %v19247_v9 }
 0xb99   : > { %v13708_v60 = vadd.f32 %v22165_v3, %v13438_v18  ;;  %v13440_v13 = vpop.f32.mrb[145].mxu1  ;;  %16230 = vmatprep.subr.bf16.mxu0 %v19248_v39 }
 0xb9a   : > { %v13709_v59 = vadd.f32 %v22170_v38, %v13440_v13  ;;  %v13442_v57 = vpop.f32.mrb[146].mxu1  ;;  %14212 = vmatprep.mubr.bf16.mxu0 %v13881_v34 }
 0xb9b   : > { %v13712_v55 = vadd.f32 %v22165_v3, %v13442_v57  ;;  %v13444_v40 = vpop.f32.mrb[147].mxu1  ;;  %14213 = vmatmul.mubr.bf16.gmra.mrb[156].mxu0 %v13880_v30  ;;  %v13772_v42 = vmax.f32 %v13708_v60, 0.0 }
 0xb9c   : > { %v13713_v28 = vadd.f32 %v22170_v38, %v13444_v40  ;;  %16231 = vmatpush3.bf16.msra.mxu0 %v19249_v24  ;;  %v13773_v10 = vmax.f32 %v13709_v59, 0.0 }
 0xb9d   : > { %v13776_v56 = vmax.f32 %v13712_v55, 0.0  ;;  %16232 = vmatprep.subr.bf16.mxu0 %v19250_v15 }
 0xb9e   : > { %v13777_v58 = vmax.f32 %v13713_v28, 0.0 }
 0xb9f   : > { %v13884_v44 = vpack.c.bf16 %v13776_v56, %v13772_v42 }
 0xba0   : > { %v13885_v62 = vpack.c.bf16 %v13777_v58, %v13773_v10  ;;  %v13448_v46 = vpop.f32.mrb[148].mxu1  ;;  %16233 = vmatpush3.bf16.msra.mxu0 %v19251_v33 }
 0xba1   : > { %v13716_v36 = vadd.f32 %v22165_v3, %v13448_v46  ;;  %v13450_v47 = vpop.f32.mrb[149].mxu1 }
 0xba2   : > { %v13717_v45 = vadd.f32 %v22170_v38, %v13450_v47  ;;  %v13452_v26 = vpop.f32.mrb[150].mxu1  ;;  %14220 = vmatprep.mubr.bf16.mxu0 %v13885_v62 }
 0xba3   : > { %v13720_v11 = vadd.f32 %v22165_v3, %v13452_v26  ;;  %v13454_v52 = vpop.f32.mrb[151].mxu1  ;;  %14221 = vmatmul.mubr.bf16.gmra.mrb[160].mxu0 %v13884_v44  ;;  %v13780_v0 = vmax.f32 %v13716_v36, 0.0 }
 0xba4   : > { %v13721_v41 = vadd.f32 %v22170_v38, %v13454_v52  ;;  %v13781_v32 = vmax.f32 %v13717_v45, 0.0 }
 0xba5   : > { %v13784_v19 = vmax.f32 %v13720_v11, 0.0 }
 0xba6   : > { %v13785_v5 = vmax.f32 %v13721_v41, 0.0 }
 0xba7   : > { %v13888_v43 = vpack.c.bf16 %v13784_v19, %v13780_v0 }
 0xba8   : > { %v13889_v29 = vpack.c.bf16 %v13785_v5, %v13781_v32  ;;  %v13458_v23 = vpop.f32.mrb[152].mxu1 }
 0xba9   : > { %v13724_v6 = vadd.f32 %v22165_v3, %v13458_v23  ;;  %v13460_v27 = vpop.f32.mrb[153].mxu1 }
 0xbaa   : > { %v13725_v17 = vadd.f32 %v22170_v38, %v13460_v27  ;;  %v13462_v2 = vpop.f32.mrb[154].mxu1  ;;  %14228 = vmatprep.mubr.bf16.mxu0 %v13889_v29 }
 0xbab   : > { %v13728_v8 = vadd.f32 %v22165_v3, %v13462_v2  ;;  %v13464_v61 = vpop.f32.mrb[155].mxu1  ;;  %14229 = vmatmul.mubr.bf16.gmra.mrb[164].mxu0 %v13888_v43  ;;  %v13788_v49 = vmax.f32 %v13724_v6, 0.0 }
 0xbac   : > { %v13729_v16 = vadd.f32 %v22170_v38, %v13464_v61  ;;  %v13789_v53 = vmax.f32 %v13725_v17, 0.0 }
 0xbad   : > { %v13792_v25 = vmax.f32 %v13728_v8, 0.0 }
 0xbae   : > { %v13793_v14 = vmax.f32 %v13729_v16, 0.0 }
 0xbaf   : > { %v13892_v35 = vpack.c.bf16 %v13792_v25, %v13788_v49 }
 0xbb0   : > { %v13893_v9 = vpack.c.bf16 %v13793_v14, %v13789_v53  ;;  %v13468_v4 = vpop.f32.mrb[156].mxu1 }
 0xbb1   : > { %v13732_v31 = vadd.f32 %v22165_v3, %v13468_v4  ;;  %v13470_v39 = vpop.f32.mrb[157].mxu1 }
 0xbb2   : > { %v13733_v54 = vadd.f32 %v22170_v38, %v13470_v39  ;;  %v13472_v1 = vpop.f32.mrb[158].mxu1  ;;  %14236 = vmatprep.mubr.bf16.mxu0 %v13893_v9 }
 0xbb3   : > { %v13736_v30 = vadd.f32 %v22165_v3, %v13472_v1  ;;  %v13474_v34 = vpop.f32.mrb[159].mxu1  ;;  %14237 = vmatmul.mubr.bf16.gmra.mrb[168].mxu0 %v13892_v35  ;;  %v13796_v24 = vmax.f32 %v13732_v31, 0.0 }
 0xbb4   : > { %v13737_v18 = vadd.f32 %v22170_v38, %v13474_v34  ;;  %v13797_v13 = vmax.f32 %v13733_v54, 0.0 }
 0xbb5   : > { %v13800_v60 = vmax.f32 %v13736_v30, 0.0 }
 0xbb6   : > { %v13801_v15 = vmax.f32 %v13737_v18, 0.0 }
 0xbb7   : > { %v13896_v59 = vpack.c.bf16 %v13800_v60, %v13796_v24 }
 0xbb8   : > { %v13897_v57 = vpack.c.bf16 %v13801_v15, %v13797_v13  ;;  %v13551_v55 = vpop.f32.mrb[176].mxu1 }
 0xbb9   : > { %v13710_v40 = vadd.f32 %v22109_v12, %v13551_v55  ;;  %v13553_v28 = vpop.f32.mrb[177].mxu1 }
 0xbba   : > { %v13711_v33 = vadd.f32 %v22112_v51, %v13553_v28  ;;  %v13555_v42 = vpop.f32.mrb[178].mxu1  ;;  %14244 = vmatprep.mubr.bf16.mxu0 %v13897_v57 }
 0xbbb   : > { %v13714_v3 = vadd.f32 %v22109_v12, %v13555_v42  ;;  %v13557_v56 = vpop.f32.mrb[179].mxu1  ;;  %14245 = vmatmul.mubr.bf16.gmra.mrb[172].mxu0 %v13896_v59  ;;  %v13774_v10 = vmax.f32 %v13710_v40, 0.0 }
 0xbbc   : > { %v13715_v38 = vadd.f32 %v22112_v51, %v13557_v56  ;;  %14285 = vmatprep.mubr.bf16.mxu0 %v22126_v22  ;;  %v13775_v44 = vmax.f32 %v13711_v33, 0.0 }
 0xbbd   : > { %v13778_v58 = vmax.f32 %v13714_v3, 0.0 }
 0xbbe   : > { %v13779_v62 = vmax.f32 %v13715_v38, 0.0 }
 0xbbf   : > { %v13886_v46 = vpack.c.bf16 %v13778_v58, %v13774_v10 }
 0xbc0   : > { %v13887_v36 = vpack.c.bf16 %v13779_v62, %v13775_v44  ;;  %v13561_v47 = vpop.f32.mrb[180].mxu1 }
 0xbc1   : > { %v13718_v45 = vadd.f32 %v22109_v12, %v13561_v47  ;;  %v13563_v26 = vpop.f32.mrb[181].mxu1 }
 0xbc2   : > { %v13719_v11 = vadd.f32 %v22112_v51, %v13563_v26  ;;  %v13565_v52 = vpop.f32.mrb[182].mxu1 }
 0xbc3   : > { %v13722_v41 = vadd.f32 %v22109_v12, %v13565_v52  ;;  %v13567_v0 = vpop.f32.mrb[183].mxu1  ;;  %14286 = vmatmul.mubr.bf16.vlgmr.msra.gmra.mrb[176].mxu0 %v22122_v48  ;;  %v13782_v19 = vmax.f32 %v13718_v45, 0.0 }
 0xbc4   : > { %v13723_v22 = vadd.f32 %v22112_v51, %v13567_v0  ;;  %14293 = vmatprep.mubr.bf16.mxu0 %v22138_v50  ;;  %v13783_v5 = vmax.f32 %v13719_v11, 0.0 }
 0xbc5   : > { %v13786_v32 = vmax.f32 %v13722_v41, 0.0 }
 0xbc6   : > { %v13787_v43 = vmax.f32 %v13723_v22, 0.0 }
 0xbc7   : > { %v13890_v29 = vpack.c.bf16 %v13786_v32, %v13782_v19 }
 0xbc8   : > { %v13891_v23 = vpack.c.bf16 %v13787_v43, %v13783_v5  ;;  %v13571_v6 = vpop.f32.mrb[184].mxu1 }
 0xbc9   : > { %v13726_v27 = vadd.f32 %v22109_v12, %v13571_v6  ;;  %v13573_v17 = vpop.f32.mrb[185].mxu1 }
 0xbca   : > { %v13727_v2 = vadd.f32 %v22112_v51, %v13573_v17  ;;  %v13575_v8 = vpop.f32.mrb[186].mxu1 }
 0xbcb   : > { %v13730_v61 = vadd.f32 %v22109_v12, %v13575_v8  ;;  %v13577_v48 = vpop.f32.mrb[187].mxu1  ;;  %14294 = vmatmul.mubr.bf16.gmra.mrb[180].mxu0 %v22134_v21  ;;  %v13790_v16 = vmax.f32 %v13726_v27, 0.0 }
 0xbcc   : > { %v13731_v50 = vadd.f32 %v22112_v51, %v13577_v48  ;;  %14301 = vmatprep.mubr.bf16.mxu0 %v22150_v37  ;;  %v13791_v25 = vmax.f32 %v13727_v2, 0.0 }
 0xbcd   : > { %v13794_v49 = vmax.f32 %v13730_v61, 0.0 }
 0xbce   : > { %v13795_v53 = vmax.f32 %v13731_v50, 0.0 }
 0xbcf   : > { %v13894_v14 = vpack.c.bf16 %v13794_v49, %v13790_v16 }
 0xbd0   : > { %v13895_v35 = vpack.c.bf16 %v13795_v53, %v13791_v25  ;;  %v13581_v9 = vpop.f32.mrb[188].mxu1 }
 0xbd1   : > { %v13734_v4 = vadd.f32 %v22109_v12, %v13581_v9  ;;  %v13583_v31 = vpop.f32.mrb[189].mxu1 }
 0xbd2   : > { %v13735_v39 = vadd.f32 %v22112_v51, %v13583_v31  ;;  %v13585_v54 = vpop.f32.mrb[190].mxu1 }
 0xbd3   : > { %v13738_v1 = vadd.f32 %v22109_v12, %v13585_v54  ;;  %v13587_v21 = vpop.f32.mrb[191].mxu1  ;;  %14302 = vmatmul.mubr.bf16.gmra.mrb[184].mxu0 %v22146_v7  ;;  %v13798_v30 = vmax.f32 %v13734_v4, 0.0 }
 0xbd4   : > { %v13739_v37 = vadd.f32 %v22112_v51, %v13587_v21  ;;  %14309 = vmatprep.mubr.bf16.mxu0 %v22160_v20  ;;  %v13799_v18 = vmax.f32 %v13735_v39, 0.0 }
 0xbd5   : > { %v13802_v34 = vmax.f32 %v13738_v1, 0.0 }
 0xbd6   : > { %v13803_v24 = vmax.f32 %v13739_v37, 0.0 }
 0xbd7   : > { %v13898_v60 = vpack.c.bf16 %v13802_v34, %v13798_v30 }
 0xbd8   : > { %v13899_v13 = vpack.c.bf16 %v13803_v24, %v13799_v18 }
 0xbdb   : > { %14310 = vmatmul.mubr.bf16.gmra.mrb[188].mxu0 %v22158_v63 }
 0xbdc   : > { %14317 = vmatprep.mubr.bf16.mxu0 %v13887_v36 }
 0xbe3   : > { %14318 = vmatmul.mubr.bf16.gmra.mrb[192].mxu0 %v13886_v46 }
 0xbe4   : > { %14325 = vmatprep.mubr.bf16.mxu0 %v13891_v23 }
 0xbeb   : > { %14326 = vmatmul.mubr.bf16.gmra.mrb[196].mxu0 %v13890_v29 }
 0xbec   : > { %14333 = vmatprep.mubr.bf16.mxu0 %v13895_v35 }
 0xbf3   : > { %14334 = vmatmul.mubr.bf16.gmra.mrb[200].mxu0 %v13894_v14 }
 0xbf4   : > { %14341 = vmatprep.mubr.bf16.mxu0 %v13899_v13 }
 0xbfb   : > { %14342 = vmatmul.mubr.bf16.gmra.mrb[204].mxu0 %v13898_v60 }
 0xc56   : > { %v16170_v12 = vpop.f32.mrb[144].mxu0 }
 0xc57   : > { %v16171_v51 = vpop.f32.mrb[145].mxu0 }
 0xc58   : > { %v16172_v7 = vadd.f32 %v16171_v51, %v16170_v12  ;;  %v16173_v20 = vpop.f32.mrb[146].mxu0 }
 0xc59   : > { %v16174_v15 = vpop.f32.mrb[147].mxu0 }
 0xc5a   : > { %v16175_v59 = vadd.f32 %v16174_v15, %v16173_v20 }
 0xc5e   : > { %v16176_v57 = vpop.f32.mrb[148].mxu0 }
 0xc5f   : > { %v16177_v55 = vpop.f32.mrb[149].mxu0 }
 0xc60   : > { %v16178_v40 = vadd.f32 %v16177_v55, %v16176_v57  ;;  %v16179_v28 = vpop.f32.mrb[150].mxu0 }
 0xc61   : > { %v16180_v33 = vpop.f32.mrb[151].mxu0 }
 0xc62   : > { %v16181_v63 = vadd.f32 %v16180_v33, %v16179_v28 }
 0xc66   : > { %v16182_v42 = vpop.f32.mrb[152].mxu0 }
 0xc67   : > { %v16183_v3 = vpop.f32.mrb[153].mxu0 }
 0xc68   : > { %v22273_v56 = vadd.f32 %v16183_v3, %v16182_v42  ;;  %v16185_v38 = vpop.f32.mrb[154].mxu0 }
 0xc69   : > { %v16186_v10 = vpop.f32.mrb[155].mxu0 }
 0xc6a   : > { %v22275_v58 = vadd.f32 %v16186_v10, %v16185_v38 }
 0xc6e   : > { %v16188_v44 = vpop.f32.mrb[156].mxu0 }
 0xc6f   : > { %v16189_v62 = vpop.f32.mrb[157].mxu0 }
 0xc70   : > { %v22277_v46 = vadd.f32 %v16189_v62, %v16188_v44  ;;  %v16191_v36 = vpop.f32.mrb[158].mxu0 }
 0xc71   : > { %v16192_v47 = vpop.f32.mrb[159].mxu0 }
 0xc72   : > { %v22279_v45 = vadd.f32 %v16192_v47, %v16191_v36 }
 0xc76   : > { %v16194_v26 = vpop.f32.mrb[160].mxu0 }
 0xc77   : > { %v16195_v11 = vpop.f32.mrb[161].mxu0 }
 0xc78   : > { %v22281_v52 = vadd.f32 %v16195_v11, %v16194_v26  ;;  %v16197_v41 = vpop.f32.mrb[162].mxu0 }
 0xc79   : > { %v16198_v0 = vpop.f32.mrb[163].mxu0 }
 0xc7a   : > { %v22283_v22 = vadd.f32 %v16198_v0, %v16197_v41 }
 0xc7e   : > { %v16200_v19 = vpop.f32.mrb[164].mxu0 }
 0xc7f   : > { %v16201_v32 = vpop.f32.mrb[165].mxu0 }
 0xc80   : > { %v22285_v5 = vadd.f32 %v16201_v32, %v16200_v19  ;;  %v16203_v43 = vpop.f32.mrb[166].mxu0 }
 0xc81   : > { %v16204_v29 = vpop.f32.mrb[167].mxu0 }
 0xc82   : > { %v22287_v23 = vadd.f32 %v16204_v29, %v16203_v43 }
 0xc86   : > { %v16206_v6 = vpop.f32.mrb[168].mxu0 }
 0xc87   : > { %v16207_v27 = vpop.f32.mrb[169].mxu0 }
 0xc88   : > { %v22289_v17 = vadd.f32 %v16207_v27, %v16206_v6  ;;  %v16209_v2 = vpop.f32.mrb[170].mxu0 }
 0xc89   : > { %v16210_v8 = vpop.f32.mrb[171].mxu0 }
 0xc8a   : > { %v22291_v61 = vadd.f32 %v16210_v8, %v16209_v2 }
 0xc8e   : > { %v16212_v48 = vpop.f32.mrb[172].mxu0 }
 0xc8f   : > { %v16213_v50 = vpop.f32.mrb[173].mxu0 }
 0xc90   : > { %v22293_v16 = vadd.f32 %v16213_v50, %v16212_v48  ;;  %v16215_v49 = vpop.f32.mrb[174].mxu0 }
 0xc91   : > { %v16216_v25 = vpop.f32.mrb[175].mxu0 }
 0xc92   : > { %v22295_v53 = vadd.f32 %v16216_v25, %v16215_v49 }
 0xc96   : > { %v16234_v14 = vpop.f32.mrb[176].mxu0 }
 0xc97   : > { %v16235_v35 = vpop.f32.mrb[177].mxu0 }
 0xc98   : > { %v16236_v9 = vadd.f32 %v16235_v35, %v16234_v14  ;;  %v16237_v4 = vpop.f32.mrb[178].mxu0 }
 0xc99   : > { %v16238_v31 = vpop.f32.mrb[179].mxu0 }
 0xc9a   : > { %v22297_v39 = vadd.f32 %v16236_v9, %v16172_v7  ;;  %v16239_v54 = vadd.f32 %v16238_v31, %v16237_v4 }
 0xc9c   : > { %v22299_v1 = vadd.f32 %v16239_v54, %v16175_v59  ;;  %v14366_v21 = vrot.slane %v22297_v39, 1  ;;  %v14406_v24 = vrot.slane %v22297_v39, 2  ;;  %v14446_v20 = vrot.slane %v22297_v39, 3 }
 0xc9d   : > { %v14486_v28 = vrot.slane %v22297_v39, 4  ;;  %v14526_v10 = vrot.slane %v22297_v39, 5  ;;  %v14566_v26 = vrot.slane %v22297_v39, 6  ;;  %v14606_v32 = vrot.slane %v22297_v39, 7 }
 0xc9e   : > { %v16240_v37 = vpop.f32.mrb[180].mxu0  ;;  %14374 = vrot.lane.b32.xlu0 %v14366_v21, %s19553_s14  ;;  %v14686_v49 = vrot.slane %v22299_v1, 1  ;;  %v14726_v9 = vrot.slane %v22299_v1, 2 }
 0xc9f   : > { %v16241_v30 = vpop.f32.mrb[181].mxu0 }
 0xca0   : > { %v16242_v34 = vadd.f32 %v16241_v30, %v16240_v37  ;;  %v16243_v18 = vpop.f32.mrb[182].mxu0  ;;  %v14766_v37 = vrot.slane %v22299_v1, 3 }
 0xca1   : > { %v16244_v60 = vpop.f32.mrb[183].mxu0 }
 0xca2   : > { %v22304_v13 = vadd.f32 %v16242_v34, %v16178_v40  ;;  %v16245_v12 = vadd.f32 %v16244_v60, %v16243_v18  ;;  %14414 = vrot.lane.b32.xlu0 %v14406_v24, %s19556_s19  ;;  %v14806_v60 = vrot.slane %v22299_v1, 4 }
 0xca4   : > { %v22307_v51 = vadd.f32 %v16245_v12, %v16181_v63  ;;  %v14367_v7 = vrot.slane %v22304_v13, 1  ;;  %v14407_v40 = vrot.slane %v22304_v13, 2  ;;  %v14447_v38 = vrot.slane %v22304_v13, 3 }
 0xca5   : > { %v14487_v47 = vrot.slane %v22304_v13, 4  ;;  %v14527_v19 = vrot.slane %v22304_v13, 5  ;;  %v14567_v27 = vrot.slane %v22304_v13, 6  ;;  %v14607_v50 = vrot.slane %v22304_v13, 7 }
 0xca6   : > { %v16246_v15 = vpop.f32.mrb[184].mxu0  ;;  %14376 = vrot.lane.b32.xlu1 %v14367_v7, %s19553_s14  ;;  %14454 = vrot.lane.b32.xlu0 %v14446_v20, %s19558_s22  ;;  %v14687_v21 = vrot.slane %v22307_v51, 1  ;;  %v14727_v24 = vrot.slane %v22307_v51, 2 }
 0xca7   : > { %v16247_v59 = vpop.f32.mrb[185].mxu0 }
 0xca8   : > { %v16248_v57 = vadd.f32 %v16247_v59, %v16246_v15  ;;  %v16249_v55 = vpop.f32.mrb[186].mxu0  ;;  %v14767_v15 = vrot.slane %v22307_v51, 3  ;;  %v14846_v59 = vrot.slane %v22299_v1, 5 }
 0xca9   : > { %v16250_v33 = vpop.f32.mrb[187].mxu0 }
 0xcaa   : > { %v22316_v63 = vadd.f32 %v16248_v57, %v22273_v56  ;;  %v16251_v42 = vadd.f32 %v16250_v33, %v16249_v55  ;;  %14416 = vrot.lane.b32.xlu1 %v14407_v40, %s19556_s19  ;;  %14494 = vrot.lane.b32.xlu0 %v14486_v28, %s19559_s21  ;;  %v14807_v28 = vrot.slane %v22307_v51, 4  ;;  %v14886_v33 = vrot.slane %v22299_v1, 6 }
 0xcac   : > { %v22321_v3 = vadd.f32 %v16251_v42, %v22275_v58 }
 0xcae   : > { %v16252_v44 = vpop.f32.mrb[188].mxu0  ;;  %14456 = vrot.lane.b32.xlu1 %v14447_v38, %s19558_s22  ;;  %14534 = vrot.lane.b32.xlu0 %v14526_v10, %s19560_s26 }
 0xcaf   : > { %v16253_v56 = vpop.f32.mrb[189].mxu0 }
 0xcb0   : > { %v16254_v62 = vadd.f32 %v16253_v56, %v16252_v44  ;;  %v16255_v36 = vpop.f32.mrb[190].mxu0  ;;  %v14847_v44 = vrot.slane %v22307_v51, 5  ;;  %v14926_v56 = vrot.slane %v22299_v1, 7 }
 0xcb1   : > { %v16256_v11 = vpop.f32.mrb[191].mxu0 }
 0xcb2   : > { %v22330_v58 = vadd.f32 %v16254_v62, %v22277_v46  ;;  %v16257_v41 = vadd.f32 %v16256_v11, %v16255_v36  ;;  %14496 = vrot.lane.b32.xlu1 %v14487_v47, %s19559_s21  ;;  %14574 = vrot.lane.b32.xlu0 %v14566_v26, %s19561_s15  ;;  %v14368_v62 = vrot.slane %v22316_v63, 1  ;;  %v14408_v36 = vrot.slane %v22316_v63, 2 }
 0xcb3   : > { %v14448_v47 = vrot.slane %v22316_v63, 3  ;;  %v14488_v11 = vrot.slane %v22316_v63, 4 }
 0xcb4   : > { %v22335_v0 = vadd.f32 %v16257_v41, %v22279_v45  ;;  %v14409_v26 = vrot.slane %v22330_v58, 2  ;;  %v14528_v41 = vrot.slane %v22316_v63, 5 }
 0xcb6   : > { %14536 = vrot.lane.b32.xlu1 %v14527_v19, %s19560_s26  ;;  %14614 = vrot.lane.b32.xlu0 %v14606_v32, %s19562_s23  ;;  %v16258_v46 = vpop.f32.mrb[192].mxu0  ;;  %v14489_v19 = vrot.slane %v22330_v58, 4  ;;  %v14568_v32 = vrot.slane %v22316_v63, 6 }
 0xcb7   : > { %v16259_v43 = vpop.f32.mrb[193].mxu0 }
 0xcb8   : > { %v16260_v29 = vadd.f32 %v16259_v43, %v16258_v46  ;;  %v16261_v6 = vpop.f32.mrb[194].mxu0  ;;  %v14529_v46 = vrot.slane %v22330_v58, 5  ;;  %v14608_v43 = vrot.slane %v22316_v63, 7 }
 0xcb9   : > { %v16262_v2 = vpop.f32.mrb[195].mxu0 }
 0xcba   : > { %v22343_v8 = vadd.f32 %v16260_v29, %v22281_v52  ;;  %v16263_v45 = vadd.f32 %v16262_v2, %v16261_v6  ;;  %14576 = vrot.lane.b32.xlu1 %v14567_v27, %s19561_s15  ;;  %14654 = vrot.lane.b32.xlu0 %v22299_v1, %s19563_s27  ;;  %v14369_v1 = vrot.slane %v22330_v58, 1  ;;  %v14569_v29 = vrot.slane %v22330_v58, 6 }
 0xcbb   : > { %v14609_v6 = vrot.slane %v22330_v58, 7  ;;  %v14688_v27 = vrot.slane %v22321_v3, 1  ;;  %v14728_v2 = vrot.slane %v22321_v3, 2 }
 0xcbc   : > { %v22349_v48 = vadd.f32 %v16263_v45, %v22283_v22  ;;  %v14689_v45 = vrot.slane %v22335_v0, 1 }
 0xcbe   : > { %14616 = vrot.lane.b32.xlu1 %v14607_v50, %s19562_s23  ;;  %14694 = vrot.lane.b32.xlu0 %v14686_v49, %s19564_s12  ;;  %v16264_v52 = vpop.f32.mrb[196].mxu0  ;;  %v14768_v50 = vrot.slane %v22321_v3, 3  ;;  %v14729_v49 = vrot.slane %v22335_v0, 2 }
 0xcbf   : > { %v16265_v25 = vpop.f32.mrb[197].mxu0 }
 0xcc0   : > { %v16266_v14 = vadd.f32 %v16265_v25, %v16264_v52  ;;  %v16267_v35 = vpop.f32.mrb[198].mxu0  ;;  %v14808_v52 = vrot.slane %v22321_v3, 4  ;;  %v14769_v25 = vrot.slane %v22335_v0, 3 }
 0xcc1   : > { %v16268_v4 = vpop.f32.mrb[199].mxu0 }
 0xcc2   : > { %v22357_v31 = vadd.f32 %v16266_v14, %v22285_v5  ;;  %v16269_v22 = vadd.f32 %v16268_v4, %v16267_v35  ;;  %14656 = vrot.lane.b32.xlu1 %v22307_v51, %s19563_s27  ;;  %14734 = vrot.lane.b32.xlu0 %v14726_v9, %s22657_s13  ;;  %v14848_v14 = vrot.slane %v22321_v3, 5  ;;  %v14809_v35 = vrot.slane %v22335_v0, 4 }
 0xcc3   : > { %v14888_v9 = vrot.slane %v22321_v3, 6 }
 0xcc4   : > { %v22363_v54 = vadd.f32 %v16269_v22, %v22287_v23  ;;  %v14849_v22 = vrot.slane %v22335_v0, 5 }
 0xcc6   : > { %14696 = vrot.lane.b32.xlu1 %v14687_v21, %s19564_s12  ;;  %14774 = vrot.lane.b32.xlu0 %v14766_v37, %s19566_s28  ;;  %v16270_v5 = vpop.f32.mrb[200].mxu0  ;;  %v14928_v21 = vrot.slane %v22321_v3, 7 }
 0xcc7   : > { %v16271_v30 = vpop.f32.mrb[201].mxu0 }
 0xcc8   : > { %v16272_v34 = vadd.f32 %v16271_v30, %v16270_v5  ;;  %v16273_v18 = vpop.f32.mrb[202].mxu0  ;;  %v14889_v5 = vrot.slane %v22335_v0, 6  ;;  %v14370_v30 = vrot.slane %v22343_v8, 1 }
 0xcc9   : > { %v16274_v12 = vpop.f32.mrb[203].mxu0 }
 0xcca   : > { %v22372_v23 = vadd.f32 %v16272_v34, %v22289_v17  ;;  %v16275_v7 = vadd.f32 %v16274_v12, %v16273_v18  ;;  %14736 = vrot.lane.b32.xlu1 %v14727_v24, %s22657_s13  ;;  %14814 = vrot.lane.b32.xlu0 %v14806_v60, %s19567_s18  ;;  %v14929_v24 = vrot.slane %v22335_v0, 7  ;;  %v14410_v60 = vrot.slane %v22343_v8, 2 }
 0xccc   : > { %v22377_v20 = vadd.f32 %v16275_v7, %v22291_v61  ;;  %v14450_v7 = vrot.slane %v22343_v8, 3 }
 0xcce   : > { %14776 = vrot.lane.b32.xlu1 %v14767_v15, %s19566_s28  ;;  %14854 = vrot.lane.b32.xlu0 %v14846_v59, %s19568_s16  ;;  %v16276_v17 = vpop.f32.mrb[204].mxu0  ;;  %v14371_v15 = vrot.slane %v22357_v31, 1 }
 0xccf   : > { %v16277_v57 = vpop.f32.mrb[205].mxu0 }
 0xcd0   : > { %v16278_v55 = vadd.f32 %v16277_v57, %v16276_v17  ;;  %v16279_v40 = vpop.f32.mrb[206].mxu0  ;;  %v14411_v57 = vrot.slane %v22357_v31, 2 }
 0xcd1   : > { %v16280_v42 = vpop.f32.mrb[207].mxu0 }
 0xcd2   : > { %v22386_v61 = vadd.f32 %v16278_v55, %v22293_v16  ;;  %v16281_v38 = vadd.f32 %v16280_v42, %v16279_v40  ;;  %14816 = vrot.lane.b32.xlu1 %v14807_v28, %s19567_s18  ;;  %14894 = vrot.lane.b32.xlu0 %v14886_v33, %s19569_s29  ;;  %v14887_v16 = vrot.slane %v22307_v51, 6  ;;  %v14530_v28 = vrot.slane %v22343_v8, 5 }
 0xcd3   : > { %v14451_v33 = vrot.slane %v22357_v31, 3 }
 0xcd4   : > { %v22391_v10 = vadd.f32 %v16281_v38, %v22295_v53  ;;  %v14927_v53 = vrot.slane %v22307_v51, 7  ;;  %v14449_v51 = vrot.slane %v22330_v58, 3 }
 0xcd6   : > { %14856 = vrot.lane.b32.xlu1 %v14847_v44, %s19568_s16  ;;  %14934 = vrot.lane.b32.xlu0 %v14926_v56, %s19570_s30  ;;  %v14570_v44 = vrot.slane %v22343_v8, 6  ;;  %v14491_v56 = vrot.slane %v22357_v31, 4 }
 0xcda   : > { %14896 = vrot.lane.b32.xlu1 %v14887_v16, %s19569_s29  ;;  %14378 = vrot.lane.b32.xlu0 %v14368_v62, %s19553_s14 }
 0xcde   : > { %14936 = vrot.lane.b32.xlu1 %v14927_v53, %s19570_s30  ;;  %14418 = vrot.lane.b32.xlu0 %v14408_v36, %s19556_s19  ;;  %v14610_v53 = vrot.slane %v22343_v8, 7  ;;  %v14531_v36 = vrot.slane %v22357_v31, 5 }
 0xce2   : > { %14380 = vrot.lane.b32.xlu1 %v14369_v1, %s19553_s14  ;;  %14458 = vrot.lane.b32.xlu0 %v14448_v47, %s19558_s22 }
 0xce6   : > { %14420 = vrot.lane.b32.xlu1 %v14409_v26, %s19556_s19  ;;  %14498 = vrot.lane.b32.xlu0 %v14488_v11, %s19559_s21 }
 0xcea   : > { %14460 = vrot.lane.b32.xlu1 %v14449_v51, %s19558_s22  ;;  %14538 = vrot.lane.b32.xlu0 %v14528_v41, %s19560_s26  ;;  %v14571_v51 = vrot.slane %v22357_v31, 6 }
 0xcee   : > { %14500 = vrot.lane.b32.xlu1 %v14489_v19, %s19559_s21  ;;  %14578 = vrot.lane.b32.xlu0 %v14568_v32, %s19561_s15 }
 0xcf2   : > { %14540 = vrot.lane.b32.xlu1 %v14529_v46, %s19560_s26  ;;  %14618 = vrot.lane.b32.xlu0 %v14608_v43, %s19562_s23  ;;  %v14611_v43 = vrot.slane %v22357_v31, 7 }
 0xcf6   : > { %14580 = vrot.lane.b32.xlu1 %v14569_v29, %s19561_s15  ;;  %14658 = vrot.lane.b32.xlu0 %v22321_v3, %s19563_s27 }
 0xcfa   : > { %14620 = vrot.lane.b32.xlu1 %v14609_v6, %s19562_s23  ;;  %14698 = vrot.lane.b32.xlu0 %v14688_v27, %s19564_s12 }
 0xcfe   : > { %14660 = vrot.lane.b32.xlu1 %v22335_v0, %s19563_s27  ;;  %14738 = vrot.lane.b32.xlu0 %v14728_v2, %s22657_s13  ;;  %v14490_v0 = vrot.slane %v22343_v8, 4 }
 0xd02   : > { %14700 = vrot.lane.b32.xlu1 %v14689_v45, %s19564_s12  ;;  %14778 = vrot.lane.b32.xlu0 %v14768_v50, %s19566_s28 }
 0xd06   : > { %14740 = vrot.lane.b32.xlu1 %v14729_v49, %s22657_s13  ;;  %14818 = vrot.lane.b32.xlu0 %v14808_v52, %s19567_s18  ;;  %v14730_v49 = vrot.slane %v22349_v48, 2 }
 0xd0a   : > { %14780 = vrot.lane.b32.xlu1 %v14769_v25, %s19566_s28  ;;  %14858 = vrot.lane.b32.xlu0 %v14848_v14, %s19568_s16 }
 0xd0e   : > { %14820 = vrot.lane.b32.xlu1 %v14809_v35, %s19567_s18  ;;  %14898 = vrot.lane.b32.xlu0 %v14888_v9, %s19569_s29 }
 0xd10   : > { %v14375_v4 = vpop.permute.xlu0 %14374 }
 0xd11   : > { %v14398_v1 = vadd.f32 %v14375_v4, %v22297_v39  ;;  %v14690_v39 = vrot.slane %v22349_v48, 1  ;;  %v14770_v4 = vrot.slane %v22349_v48, 3 }
 0xd12   : > { %14860 = vrot.lane.b32.xlu1 %v14849_v22, %s19568_s16  ;;  %14938 = vrot.lane.b32.xlu0 %v14928_v21, %s19570_s30  ;;  %v14691_v22 = vrot.slane %v22363_v54, 1 }
 0xd14   : > { %v14415_v37 = vpop.permute.xlu0 %14414 }
 0xd15   : > { %v14438_v47 = vadd.f32 %v14415_v37, %v14398_v1 }
 0xd16   : > { %14900 = vrot.lane.b32.xlu1 %v14889_v5, %s19569_s29  ;;  %14382 = vrot.lane.b32.xlu0 %v14370_v30, %s19553_s14 }
 0xd18   : > { %v14377_v34 = vpop.permute.xlu1 %14376  ;;  %v14455_v18 = vpop.permute.xlu0 %14454 }
 0xd19   : > { %v14478_v41 = vadd.f32 %v14455_v18, %v14438_v47  ;;  %v14399_v29 = vadd.f32 %v14377_v34, %v22304_v13 }
 0xd1a   : > { %14940 = vrot.lane.b32.xlu1 %v14929_v24, %s19570_s30  ;;  %14422 = vrot.lane.b32.xlu0 %v14410_v60, %s19556_s19  ;;  %v14810_v24 = vrot.slane %v22349_v48, 4  ;;  %v14731_v60 = vrot.slane %v22363_v54, 2 }
 0xd1c   : > { %v14417_v3 = vpop.permute.xlu1 %14416  ;;  %v14495_v12 = vpop.permute.xlu0 %14494 }
 0xd1d   : > { %v14518_v19 = vadd.f32 %v14495_v12, %v14478_v41  ;;  %v14439_v27 = vadd.f32 %v14417_v3, %v14399_v29 }
 0xd1e   : > { %14462 = vrot.lane.b32.xlu0 %v14450_v7, %s19558_s22  ;;  %14384 = vrot.lane.b32.xlu1 %v14371_v15, %s19553_s14 }
 0xd20   : > { %v14457_v59 = vpop.permute.xlu1 %14456  ;;  %v14535_v17 = vpop.permute.xlu0 %14534 }
 0xd21   : > { %v14558_v6 = vadd.f32 %v14535_v17, %v14518_v19  ;;  %v14479_v52 = vadd.f32 %v14457_v59, %v14439_v27 }
 0xd22   : > { %14502 = vrot.lane.b32.xlu0 %v14490_v0, %s19559_s21  ;;  %14424 = vrot.lane.b32.xlu1 %v14411_v57, %s19556_s19  ;;  %v14850_v0 = vrot.slane %v22349_v48, 5  ;;  %v14771_v57 = vrot.slane %v22363_v54, 3 }
 0xd24   : > { %v14497_v55 = vpop.permute.xlu1 %14496  ;;  %v14575_v40 = vpop.permute.xlu0 %14574 }
 0xd25   : > { %v14598_v2 = vadd.f32 %v14575_v40, %v14558_v6  ;;  %v14519_v13 = vadd.f32 %v14497_v55, %v14479_v52  ;;  %v14452_v52 = vrot.slane %v22372_v23, 3 }
 0xd26   : > { %14542 = vrot.lane.b32.xlu0 %v14530_v28, %s19560_s26  ;;  %14464 = vrot.lane.b32.xlu1 %v14451_v33, %s19558_s22 }
 0xd28   : > { %v14537_v42 = vpop.permute.xlu1 %14536  ;;  %v14615_v38 = vpop.permute.xlu0 %14614 }
 0xd29   : > { %v14638_v25 = vadd.f32 %v14615_v38, %v14598_v2  ;;  %v14559_v21 = vadd.f32 %v14537_v42, %v14519_v13  ;;  %v22512_v38 = vld [vmem:[#allocation18] sm:$0x1]  ;;  %v14931_v2 = vrot.slane %v22363_v54, 7 }
 0xd2a   : > { %14582 = vrot.lane.b32.xlu0 %v14570_v44, %s19561_s15  ;;  %14504 = vrot.lane.b32.xlu1 %v14491_v56, %s19559_s21  ;;  %v14890_v56 = vrot.slane %v22349_v48, 6 }
 0xd2c   : > { %v14577_v16 = vpop.permute.xlu1 %14576  ;;  %v14655_v62 = vpop.permute.xlu0 %14654 }
 0xd2d   : > { %v14678_v14 = vadd.f32 %v14655_v62, %v14638_v25  ;;  %v14599_v5 = vadd.f32 %v14577_v16, %v14559_v21  ;;  %v14811_v16 = vrot.slane %v22363_v54, 4  ;;  %v14373_v25 = vrot.slane %v22386_v61, 1 }
 0xd2e   : > { %14622 = vrot.lane.b32.xlu0 %v14610_v53, %s19562_s23  ;;  %14544 = vrot.lane.b32.xlu1 %v14531_v36, %s19560_s26  ;;  %v14453_v21 = vrot.slane %v22386_v61, 3 }
 0xd30   : > { %v14617_v26 = vpop.permute.xlu1 %14616  ;;  %v14695_v11 = vpop.permute.xlu0 %14694 }
 0xd31   : > { %v14718_v37 = vadd.f32 %v14695_v11, %v14678_v14  ;;  %v14639_v3 = vadd.f32 %v14617_v26, %v14599_v5  ;;  %v14930_v11 = vrot.slane %v22349_v48, 7  ;;  %v14492_v14 = vrot.slane %v22372_v23, 4 }
 0xd32   : > { %14662 = vrot.lane.b32.xlu0 %v22349_v48, %s19563_s27  ;;  %14584 = vrot.lane.b32.xlu1 %v14571_v51, %s19561_s15  ;;  %v14851_v51 = vrot.slane %v22363_v54, 5 }
 0xd34   : > { %v14657_v32 = vpop.permute.xlu1 %14656  ;;  %v14735_v46 = vpop.permute.xlu0 %14734 }
 0xd35   : > { %v14758_v30 = vadd.f32 %v14735_v46, %v14718_v37  ;;  %v14679_v7 = vadd.f32 %v14657_v32, %v14639_v3  ;;  %v14533_v3 = vrot.slane %v22386_v61, 5 }
 0xd36   : > { %14702 = vrot.lane.b32.xlu0 %v14690_v39, %s19564_s12  ;;  %14624 = vrot.lane.b32.xlu1 %v14611_v43, %s19562_s23  ;;  %v14891_v39 = vrot.slane %v22363_v54, 6  ;;  %v14372_v43 = vrot.slane %v22372_v23, 1 }
 0xd38   : > { %v14697_v45 = vpop.permute.xlu1 %14696  ;;  %v14775_v50 = vpop.permute.xlu0 %14774 }
 0xd39   : > { %v14798_v12 = vadd.f32 %v14775_v50, %v14758_v30  ;;  %v14719_v55 = vadd.f32 %v14697_v45, %v14679_v7  ;;  %v14412_v45 = vrot.slane %v22372_v23, 2  ;;  %v14572_v30 = vrot.slane %v22372_v23, 6 }
 0xd3a   : > { %14742 = vrot.lane.b32.xlu0 %v14730_v49, %s22657_s13  ;;  %14664 = vrot.lane.b32.xlu1 %v22363_v54, %s19563_s27 }
 0xd3c   : > { %v14737_v35 = vpop.permute.xlu1 %14736  ;;  %v14815_v9 = vpop.permute.xlu0 %14814 }
 0xd3d   : > { %v14838_v15 = vadd.f32 %v14815_v9, %v14798_v12  ;;  %v14759_v28 = vadd.f32 %v14737_v35, %v14719_v55  ;;  %v14413_v35 = vrot.slane %v22386_v61, 2 }
 0xd3e   : > { %14782 = vrot.lane.b32.xlu0 %v14770_v4, %s19566_s28  ;;  %14704 = vrot.lane.b32.xlu1 %v14691_v22, %s19564_s12  ;;  %v14532_v22 = vrot.slane %v22372_v23, 5 }
 0xd40   : > { %v14777_v34 = vpop.permute.xlu1 %14776  ;;  %v14855_v18 = vpop.permute.xlu0 %14854 }
 0xd41   : > { %v14878_v40 = vadd.f32 %v14855_v18, %v14838_v15  ;;  %v14799_v62 = vadd.f32 %v14777_v34, %v14759_v28  ;;  %v14493_v34 = vrot.slane %v22386_v61, 4  ;;  %v14613_v28 = vrot.slane %v22386_v61, 7 }
 0xd42   : > { %14822 = vrot.lane.b32.xlu0 %v14810_v24, %s19567_s18  ;;  %14744 = vrot.lane.b32.xlu1 %v14731_v60, %s22657_s13  ;;  %s22519_s13 = scalar_lea.vmem %s22635_s11, %s22856_s25  ;;  %v14612_v60 = vrot.slane %v22372_v23, 7 }
 0xd44   : > { %v14817_v59 = vpop.permute.xlu1 %14816  ;;  %v14895_v17 = vpop.permute.xlu0 %14894 }
 0xd45   : > { %v14918_v33 = vadd.f32 %v14895_v17, %v14878_v40  ;;  %v14839_v36 = vadd.f32 %v14817_v59, %v14799_v62  ;;  %v14573_v17 = vrot.slane %v22386_v61, 6 }
 0xd46   : > { %14862 = vrot.lane.b32.xlu0 %v14850_v0, %s19568_s16  ;;  %14784 = vrot.lane.b32.xlu1 %v14771_v57, %s19566_s28 }
 0xd48   : > { %v14857_v42 = vpop.permute.xlu1 %14856  ;;  %v14935_v44 = vpop.permute.xlu0 %14934 }
 0xd49   : > { %v14958_v53 = vadd.f32 %v14935_v44, %v14918_v33  ;;  %v14879_v41 = vadd.f32 %v14857_v42, %v14839_v36 }
 0xd4a   : > { %14902 = vrot.lane.b32.xlu0 %v14890_v56, %s19569_s29  ;;  %14824 = vrot.lane.b32.xlu1 %v14811_v16, %s19567_s18 }
 0xd4b   : > { %v14967_v1 = vadd.f32 %v22512_v38, %v14958_v53  ;;  %v14732_v53 = vrot.slane %v22377_v20, 2 }
 0xd4c   : > { %v14897_v47 = vpop.permute.xlu1 %14896  ;;  %v14379_v26 = vpop.permute.xlu0 %14378 }
 0xd4d   : > { %14976 = vst.msk [vmem:[%s22519_s13] sm:$0x1] %vm14975_vm3, %v14967_v1  ;;  %v14919_v19 = vadd.f32 %v14897_v47, %v14879_v41  ;;  %v14400_v12 = vadd.f32 %v14379_v26, %v22316_v63  ;;  %v14692_v63 = vrot.slane %v22377_v20, 1  ;;  %v14693_v41 = vrot.slane %v22391_v10, 1 }
 0xd4e   : > { %14942 = vrot.lane.b32.xlu0 %v14930_v11, %s19570_s30  ;;  %14864 = vrot.lane.b32.xlu1 %v14851_v51, %s19568_s16  ;;  %v14772_v51 = vrot.slane %v22377_v20, 3 }
 0xd50   : > { %v14937_v32 = vpop.permute.xlu1 %14936  ;;  %v14419_v46 = vpop.permute.xlu0 %14418 }
 0xd51   : > { %v14959_v29 = vadd.f32 %v14937_v32, %v14919_v19  ;;  %v14440_v7 = vadd.f32 %v14419_v46, %v14400_v12  ;;  %v14853_v12 = vrot.slane %v22391_v10, 5 }
 0xd52   : > { %14904 = vrot.lane.b32.xlu1 %v14891_v39, %s19569_s29  ;;  %14386 = vrot.lane.b32.xlu0 %v14372_v43, %s19553_s14 }
 0xd53   : > { %v14968_v48 = vadd.f32 %v22512_v38, %v14959_v29 }
 0xd54   : > { %v14381_v6 = vpop.permute.xlu1 %14380  ;;  %v14459_v27 = vpop.permute.xlu0 %14458 }
 0xd55   : > { %14977 = vst.msk [vmem:[%s22519_s13 + $0x1] sm:$0x1] %vm14975_vm3, %v14968_v48  ;;  %v14480_v0 = vadd.f32 %v14459_v27, %v14440_v7  ;;  %v14401_v33 = vadd.f32 %v14381_v6, %v22330_v58  ;;  %v14812_v48 = vrot.slane %v22377_v20, 4  ;;  %v14733_v6 = vrot.slane %v22391_v10, 2 }
 0xd56   : > { %14944 = vrot.lane.b32.xlu1 %v14931_v2, %s19570_s30  ;;  %14426 = vrot.lane.b32.xlu0 %v14412_v45, %s19556_s19 }
 0xd58   : > { %v14421_v50 = vpop.permute.xlu1 %14420  ;;  %v14499_v49 = vpop.permute.xlu0 %14498 }
 0xd59   : > { %v14520_v57 = vadd.f32 %v14499_v49, %v14480_v0  ;;  %v14441_v44 = vadd.f32 %v14421_v50, %v14401_v33  ;;  %v14893_v0 = vrot.slane %v22391_v10, 6 }
 0xd5a   : > { %14466 = vrot.lane.b32.xlu0 %v14452_v52, %s19558_s22  ;;  %14388 = vrot.lane.b32.xlu1 %v14373_v25, %s19553_s14  ;;  %s22852_s14 = smov 68   ;;  %v14852_v25 = vrot.slane %v22377_v20, 5 }
 0xd5c   : > { %v14461_v13 = vpop.permute.xlu1 %14460  ;;  %v14539_v54 = vpop.permute.xlu0 %14538 }
 0xd5d   : > { %v14560_v42 = vadd.f32 %v14539_v54, %v14520_v57  ;;  %v14481_v36 = vadd.f32 %v14461_v13, %v14441_v44  ;;  %v14773_v13 = vrot.slane %v22391_v10, 3 }
 0xd5e   : > { %14506 = vrot.lane.b32.xlu0 %v14492_v14, %s19559_s21  ;;  %14428 = vrot.lane.b32.xlu1 %v14413_v35, %s19556_s19 }
 0xd60   : > { %v14501_v9 = vpop.permute.xlu1 %14500  ;;  %v14579_v4 = vpop.permute.xlu0 %14578 }
 0xd61   : > { %v14600_v56 = vadd.f32 %v14579_v4, %v14560_v42  ;;  %v14521_v47 = vadd.f32 %v14501_v9, %v14481_v36 }
 0xd62   : > { %14546 = vrot.lane.b32.xlu0 %v14532_v22, %s19560_s26  ;;  %14468 = vrot.lane.b32.xlu1 %v14453_v21, %s19558_s22  ;;  %v14892_v21 = vrot.slane %v22377_v20, 6 }
 0xd64   : > { %v14541_v37 = vpop.permute.xlu1 %14540  ;;  %v14619_v5 = vpop.permute.xlu0 %14618 }
 0xd65   : > { %v14640_v1 = vadd.f32 %v14619_v5, %v14600_v56  ;;  %v14561_v19 = vadd.f32 %v14541_v37, %v14521_v47  ;;  %v14813_v37 = vrot.slane %v22391_v10, 4 }
 0xd66   : > { %14586 = vrot.lane.b32.xlu0 %v14572_v30, %s19561_s15  ;;  %14508 = vrot.lane.b32.xlu1 %v14493_v34, %s19559_s21 }
 0xd68   : > { %v14581_v18 = vpop.permute.xlu1 %14580  ;;  %v14659_v24 = vpop.permute.xlu0 %14658 }
 0xd69   : > { %v14680_v58 = vadd.f32 %v14659_v24, %v14640_v1  ;;  %v14601_v46 = vadd.f32 %v14581_v18, %v14561_v19 }
 0xd6a   : > { %14626 = vrot.lane.b32.xlu0 %v14612_v60, %s19562_s23  ;;  %14548 = vrot.lane.b32.xlu1 %v14533_v3, %s19560_s26  ;;  %v14932_v3 = vrot.slane %v22377_v20, 7 }
 0xd6c   : > { %v14621_v15 = vpop.permute.xlu1 %14620  ;;  %v14699_v59 = vpop.permute.xlu0 %14698 }
 0xd6d   : > { %v14720_v32 = vadd.f32 %v14699_v59, %v14680_v58  ;;  %v14641_v27 = vadd.f32 %v14621_v15, %v14601_v46 }
 0xd6e   : > { %14666 = vrot.lane.b32.xlu0 %v22377_v20, %s19563_s27  ;;  %14588 = vrot.lane.b32.xlu1 %v14573_v17, %s19561_s15 }
 0xd70   : > { %v14661_v55 = vpop.permute.xlu1 %14660  ;;  %v14739_v40 = vpop.permute.xlu0 %14738 }
 0xd71   : > { %v14760_v39 = vadd.f32 %v14739_v40, %v14720_v32  ;;  %v14681_v45 = vadd.f32 %v14661_v55, %v14641_v27 }
 0xd72   : > { %14706 = vrot.lane.b32.xlu0 %v14692_v63, %s19564_s12  ;;  %14628 = vrot.lane.b32.xlu1 %v14613_v28, %s19562_s23  ;;  %v14933_v63 = vrot.slane %v22391_v10, 7 }
 0xd74   : > { %v14701_v16 = vpop.permute.xlu1 %14700  ;;  %v14779_v62 = vpop.permute.xlu0 %14778 }
 0xd75   : > { %v14800_v2 = vadd.f32 %v14779_v62, %v14760_v39  ;;  %v14721_v54 = vadd.f32 %v14701_v16, %v14681_v45 }
 0xd76   : > { %14746 = vrot.lane.b32.xlu0 %v14732_v53, %s22852_s14  ;;  %14668 = vrot.lane.b32.xlu1 %v22391_v10, %s19563_s27 }
 0xd78   : > { %v14741_v26 = vpop.permute.xlu1 %14740  ;;  %v14819_v11 = vpop.permute.xlu0 %14818 }
 0xd79   : > { %v14840_v50 = vadd.f32 %v14819_v11, %v14800_v2  ;;  %v14761_v35 = vadd.f32 %v14741_v26, %v14721_v54 }
 0xd7a   : > { %14786 = vrot.lane.b32.xlu0 %v14772_v51, %s19566_s28  ;;  %14708 = vrot.lane.b32.xlu1 %v14693_v41, %s19564_s12 }
 0xd7c   : > { %v14781_v43 = vpop.permute.xlu1 %14780  ;;  %v14859_v29 = vpop.permute.xlu0 %14858 }
 0xd7d   : > { %v14880_v14 = vadd.f32 %v14859_v29, %v14840_v50  ;;  %v14801_v5 = vadd.f32 %v14781_v43, %v14761_v35 }
 0xd7e   : > { %14826 = vrot.lane.b32.xlu0 %v14812_v48, %s19567_s18  ;;  %14748 = vrot.lane.b32.xlu1 %v14733_v6, %s22852_s14 }
 0xd80   : > { %v14821_v49 = vpop.permute.xlu1 %14820  ;;  %v14899_v52 = vpop.permute.xlu0 %14898 }
 0xd81   : > { %v14920_v9 = vadd.f32 %v14899_v52, %v14880_v14  ;;  %v14841_v34 = vadd.f32 %v14821_v49, %v14801_v5 }
 0xd82   : > { %14866 = vrot.lane.b32.xlu0 %v14852_v25, %s19568_s16  ;;  %14788 = vrot.lane.b32.xlu1 %v14773_v13, %s19566_s28 }
 0xd84   : > { %v14861_v4 = vpop.permute.xlu1 %14860  ;;  %v14939_v22 = vpop.permute.xlu0 %14938 }
 0xd85   : > { %v14960_v30 = vadd.f32 %v14939_v22, %v14920_v9  ;;  %v14881_v7 = vadd.f32 %v14861_v4, %v14841_v34 }
 0xd86   : > { %14906 = vrot.lane.b32.xlu0 %v14892_v21, %s19569_s29  ;;  %14828 = vrot.lane.b32.xlu1 %v14813_v37, %s19567_s18 }
 0xd87   : > { %v14969_v18 = vadd.f32 %v22512_v38, %v14960_v30 }
 0xd88   : > { %v14901_v24 = vpop.permute.xlu1 %14900  ;;  %v14383_v60 = vpop.permute.xlu0 %14382 }
 0xd89   : > { %14978 = vst.msk [vmem:[%s22519_s13 + $0x2] sm:$0x1] %vm14975_vm3, %v14969_v18  ;;  %v14921_v15 = vadd.f32 %v14901_v24, %v14881_v7  ;;  %v14402_v47 = vadd.f32 %v14383_v60, %v22343_v8 }
 0xd8a   : > { %14946 = vrot.lane.b32.xlu0 %v14932_v3, %s19570_s30  ;;  %14868 = vrot.lane.b32.xlu1 %v14853_v12, %s19568_s16 }
 0xd8c   : > { %v14941_v59 = vpop.permute.xlu1 %14940  ;;  %v14423_v17 = vpop.permute.xlu0 %14422 }
 0xd8d   : > { %v14961_v57 = vadd.f32 %v14941_v59, %v14921_v15  ;;  %v14442_v58 = vadd.f32 %v14423_v17, %v14402_v47 }
 0xd8e   : > { %14908 = vrot.lane.b32.xlu1 %v14893_v0, %s19569_s29 }
 0xd8f   : > { %v14970_v20 = vadd.f32 %v22512_v38, %v14961_v57 }
 0xd90   : > { %v14463_v55 = vpop.permute.xlu0 %14462  ;;  %v14385_v40 = vpop.permute.xlu1 %14384 }
 0xd91   : > { %14979 = vst.msk [vmem:[%s22519_s13 + $0x3] sm:$0x1] %vm14975_vm3, %v14970_v20  ;;  %v14482_v10 = vadd.f32 %v14463_v55, %v14442_v58  ;;  %v14403_v32 = vadd.f32 %v14385_v40, %v22357_v31 }
 0xd92   : > { %14948 = vrot.lane.b32.xlu1 %v14933_v63, %s19570_s30 }
 0xd94   : > { %v14503_v28 = vpop.permute.xlu0 %14502  ;;  %v14425_v33 = vpop.permute.xlu1 %14424 }
 0xd95   : > { %v14522_v51 = vadd.f32 %v14503_v28, %v14482_v10  ;;  %v14443_v39 = vadd.f32 %v14425_v33, %v14403_v32 }
 0xd98   : > { %v14543_v42 = vpop.permute.xlu0 %14542  ;;  %v14465_v44 = vpop.permute.xlu1 %14464 }
 0xd99   : > { %v14562_v46 = vadd.f32 %v14543_v42, %v14522_v51  ;;  %v14483_v6 = vadd.f32 %v14465_v44, %v14443_v39 }
 0xd9c   : > { %v14583_v56 = vpop.permute.xlu0 %14582  ;;  %v14505_v16 = vpop.permute.xlu1 %14504 }
 0xd9d   : > { %v14602_v43 = vadd.f32 %v14583_v56, %v14562_v46  ;;  %v14523_v2 = vadd.f32 %v14505_v16, %v14483_v6 }
 0xda0   : > { %v14623_v62 = vpop.permute.xlu0 %14622  ;;  %v14545_v53 = vpop.permute.xlu1 %14544 }
 0xda1   : > { %v14642_v27 = vadd.f32 %v14623_v62, %v14602_v43  ;;  %v14563_v49 = vadd.f32 %v14545_v53, %v14523_v2 }
 0xda4   : > { %v14663_v36 = vpop.permute.xlu0 %14662  ;;  %v14585_v1 = vpop.permute.xlu1 %14584 }
 0xda5   : > { %v14682_v45 = vadd.f32 %v14663_v36, %v14642_v27  ;;  %v14603_v25 = vadd.f32 %v14585_v1, %v14563_v49 }
 0xda8   : > { %v14703_v26 = vpop.permute.xlu0 %14702  ;;  %v14625_v11 = vpop.permute.xlu1 %14624 }
 0xda9   : > { %v14722_v52 = vadd.f32 %v14703_v26, %v14682_v45  ;;  %v14643_v35 = vadd.f32 %v14625_v11, %v14603_v25 }
 0xdac   : > { %v14743_v41 = vpop.permute.xlu0 %14742  ;;  %v14665_v19 = vpop.permute.xlu1 %14664 }
 0xdad   : > { %v14762_v13 = vadd.f32 %v14743_v41, %v14722_v52  ;;  %v14683_v31 = vadd.f32 %v14665_v19, %v14643_v35 }
 0xdb0   : > { %v14783_v29 = vpop.permute.xlu0 %14782  ;;  %v14705_v48 = vpop.permute.xlu1 %14704 }
 0xdb1   : > { %v14802_v9 = vadd.f32 %v14783_v29, %v14762_v13  ;;  %v14723_v37 = vadd.f32 %v14705_v48, %v14683_v31 }
 0xdb4   : > { %v14823_v50 = vpop.permute.xlu0 %14822  ;;  %v14745_v8 = vpop.permute.xlu1 %14744 }
 0xdb5   : > { %v14842_v4 = vadd.f32 %v14823_v50, %v14802_v9  ;;  %v14763_v30 = vadd.f32 %v14745_v8, %v14723_v37 }
 0xdb8   : > { %v14863_v54 = vpop.permute.xlu0 %14862  ;;  %v14785_v14 = vpop.permute.xlu1 %14784 }
 0xdb9   : > { %v14882_v5 = vadd.f32 %v14863_v54, %v14842_v4  ;;  %v14803_v60 = vadd.f32 %v14785_v14, %v14763_v30 }
 0xdbc   : > { %v14903_v22 = vpop.permute.xlu0 %14902  ;;  %v14825_v21 = vpop.permute.xlu1 %14824 }
 0xdbd   : > { %v14922_v34 = vadd.f32 %v14903_v22, %v14882_v5  ;;  %v14843_v12 = vadd.f32 %v14825_v21, %v14803_v60 }
 0xdc0   : > { %v14943_v18 = vpop.permute.xlu0 %14942  ;;  %v14865_v24 = vpop.permute.xlu1 %14864 }
 0xdc1   : > { %v14962_v3 = vadd.f32 %v14943_v18, %v14922_v34  ;;  %v14883_v17 = vadd.f32 %v14865_v24, %v14843_v12 }
 0xdc3   : > { %v14971_v7 = vadd.f32 %v22512_v38, %v14962_v3 }
 0xdc4   : > { %v14905_v15 = vpop.permute.xlu1 %14904  ;;  %v14387_v59 = vpop.permute.xlu0 %14386 }
 0xdc5   : > { %14980 = vst.msk [vmem:[%s22519_s13 + $0x4] sm:$0x1] %vm14975_vm3, %v14971_v7  ;;  %v14923_v0 = vadd.f32 %v14905_v15, %v14883_v17  ;;  %v14404_v58 = vadd.f32 %v14387_v59, %v22372_v23 }
 0xdc8   : > { %v14945_v57 = vpop.permute.xlu1 %14944  ;;  %v14427_v20 = vpop.permute.xlu0 %14426 }
 0xdc9   : > { %v14963_v55 = vadd.f32 %v14945_v57, %v14923_v0  ;;  %v14444_v26 = vadd.f32 %v14427_v20, %v14404_v58 }
 0xdcb   : > { %v14972_v40 = vadd.f32 %v22512_v38, %v14963_v55 }
 0xdcc   : > { %v14467_v63 = vpop.permute.xlu0 %14466  ;;  %v14389_v28 = vpop.permute.xlu1 %14388 }
 0xdcd   : > { %14981 = vst.msk [vmem:[%s22519_s13 + $0x5] sm:$0x1] %vm14975_vm3, %v14972_v40  ;;  %v14484_v51 = vadd.f32 %v14467_v63, %v14444_v26  ;;  %v14405_v46 = vadd.f32 %v14389_v28, %v22386_v61 }
 0xdd0   : > { %v14507_v33 = vpop.permute.xlu0 %14506  ;;  %v14429_v42 = vpop.permute.xlu1 %14428 }
 0xdd1   : > { %v14524_v41 = vadd.f32 %v14507_v33, %v14484_v51  ;;  %v14445_v43 = vadd.f32 %v14429_v42, %v14405_v46 }
 0xdd4   : > { %v14547_v44 = vpop.permute.xlu0 %14546  ;;  %v14469_v56 = vpop.permute.xlu1 %14468 }
 0xdd5   : > { %v14564_v39 = vadd.f32 %v14547_v44, %v14524_v41  ;;  %v14485_v27 = vadd.f32 %v14469_v56, %v14445_v43 }
 0xdd8   : > { %v14587_v16 = vpop.permute.xlu0 %14586  ;;  %v14509_v62 = vpop.permute.xlu1 %14508 }
 0xdd9   : > { %v14604_v29 = vadd.f32 %v14587_v16, %v14564_v39  ;;  %v14525_v45 = vadd.f32 %v14509_v62, %v14485_v27 }
 0xddc   : > { %v14627_v53 = vpop.permute.xlu0 %14626  ;;  %v14549_v36 = vpop.permute.xlu1 %14548 }
 0xddd   : > { %v14644_v2 = vadd.f32 %v14627_v53, %v14604_v29  ;;  %v14565_v49 = vadd.f32 %v14549_v36, %v14525_v45 }
 0xde0   : > { %v14667_v1 = vpop.permute.xlu0 %14666  ;;  %v14589_v47 = vpop.permute.xlu1 %14588 }
 0xde1   : > { %v14684_v50 = vadd.f32 %v14667_v1, %v14644_v2  ;;  %v14605_v25 = vadd.f32 %v14589_v47, %v14565_v49 }
 0xde4   : > { %v14707_v11 = vpop.permute.xlu0 %14706  ;;  %v14629_v10 = vpop.permute.xlu1 %14628 }
 0xde5   : > { %v14724_v52 = vadd.f32 %v14707_v11, %v14684_v50  ;;  %v14645_v35 = vadd.f32 %v14629_v10, %v14605_v25 }
 0xde8   : > { %v14747_v19 = vpop.permute.xlu0 %14746  ;;  %v14669_v32 = vpop.permute.xlu1 %14668 }
 0xde9   : > { %v14764_v13 = vadd.f32 %v14747_v19, %v14724_v52  ;;  %v14685_v61 = vadd.f32 %v14669_v32, %v14645_v35 }
 0xdec   : > { %v14787_v48 = vpop.permute.xlu0 %14786  ;;  %v14709_v6 = vpop.permute.xlu1 %14708 }
 0xded   : > { %v14804_v9 = vadd.f32 %v14787_v48, %v14764_v13  ;;  %v14725_v21 = vadd.f32 %v14709_v6, %v14685_v61 }
 0xdf0   : > { %v14827_v8 = vpop.permute.xlu0 %14826  ;;  %v14749_v23 = vpop.permute.xlu1 %14748 }
 0xdf1   : > { %v14844_v31 = vadd.f32 %v14827_v8, %v14804_v9  ;;  %v14765_v5 = vadd.f32 %v14749_v23, %v14725_v21 }
 0xdf4   : > { %v14867_v54 = vpop.permute.xlu0 %14866  ;;  %v14789_v14 = vpop.permute.xlu1 %14788 }
 0xdf5   : > { %v14884_v37 = vadd.f32 %v14867_v54, %v14844_v31  ;;  %v14805_v24 = vadd.f32 %v14789_v14, %v14765_v5 }
 0xdf8   : > { %v14907_v4 = vpop.permute.xlu0 %14906  ;;  %v14829_v22 = vpop.permute.xlu1 %14828 }
 0xdf9   : > { %v14924_v30 = vadd.f32 %v14907_v4, %v14884_v37  ;;  %v14845_v3 = vadd.f32 %v14829_v22, %v14805_v24 }
 0xdfc   : > { %v14947_v34 = vpop.permute.xlu0 %14946  ;;  %v14869_v18 = vpop.permute.xlu1 %14868 }
 0xdfd   : > { %v14964_v60 = vadd.f32 %v14947_v34, %v14924_v30  ;;  %v14885_v15 = vadd.f32 %v14869_v18, %v14845_v3 }
 0xdff   : > { %v14973_v12 = vadd.f32 %v22512_v38, %v14964_v60 }
 0xe00   : > { %v14909_v7 = vpop.permute.xlu1 %14908 }
 0xe01   : > { %14982 = vst.msk [vmem:[%s22519_s13 + $0x6] sm:$0x1] %vm14975_vm3, %v14973_v12  ;;  %v14925_v59 = vadd.f32 %v14909_v7, %v14885_v15 }
 0xe04   : > { %v14949_v17 = vpop.permute.xlu1 %14948 }
 0xe05   : > { %v14965_v0 = vadd.f32 %v14949_v17, %v14925_v59 }
 0xe07   : > { %v14974_v57 = vadd.f32 %v22512_v38, %v14965_v0 }
 0xe09   : > { %14983 = vst.msk [vmem:[%s22519_s13 + $0x7] sm:$0x1] %vm14975_vm3, %v14974_v57 }
 0xe0a PF: > { %s26_s17 = sadd.s32 1, %s19532_s17  }
 0xe0b   : > { %p23_p0 = scmp.ge.s32.totalorder %s26_s17, 4  }
 0xe0d   :  { %25 = sbr.rel (!%p23_p0) target bundleno = 5 (0x5), region = 137 }
 0xe14   :  { %15004 = vsyncpa [#allocation6], 1 }
 0xe15   :  { %15006 = vsyncpa [#allocation6 + $0x1], 1 }
 0xe16   :  { %15007 = vsyncpa [#allocation8], 1 }
 0xe17   :  { %15008 = vsyncpa [#allocation11], 1 }
 0xe18   :  { %15009 = vsyncpa [#allocation14], 1 }
 0xe19   :  { %15010 = vsyncpa [#allocation17], 1 }

</bundles_post_ra>
